<compile_context>
chip_gen: v5e
topology: v5e:2x2
jax: 0.10.0
libtpu: 0.0.40
codegen_flags: <defaults>
</compile_context>

<pallas_src>
import jax
import jax.numpy as jnp
from jax import lax
from jax.experimental import pallas as pl
from jax.experimental.pallas import tpu as pltpu

NEG_SLOPE = 0.01  # F.leaky_relu default


def _leaky_relu(x):
    return jnp.where(x > 0, x, NEG_SLOPE * x)


# ---------------------------------------------------------------------------
# Fused 3x3 conv (padding=1, stride=1) + 2x2 max-pool + bias + leaky_relu.
# Grid = (batch, row-strips). One wide-K im2col matmul per strip.
# ---------------------------------------------------------------------------
def conv3x3_relu_pool_kernel(x_ref, w_ref, b_ref, o_ref):
    # x_ref: (1, H+2, W+2, Cin)  bf16  (full padded image, resident over strips)
    # w_ref: (9*Cin, Cout)       bf16  (HWIO weight flattened in (di, dj, cin) order)
    # b_ref: (1, Wh*Cout)        f32   (bias tiled along pooled width -> lane-dense)
    # o_ref: (1, THh, Wh*Cout)   bf16  (lane-dense pooled output strip)
    THh = o_ref.shape[1]
    Cout = w_ref.shape[1]
    Wh = o_ref.shape[2] // Cout
    TH, W = 2 * THh, 2 * Wh
    Cin = x_ref.shape[3]

    s = pl.program_id(1)
    r0 = pl.multiple_of(s * TH, TH)
    xs = x_ref[0, pl.ds(r0, TH + 2), :, :]            # (TH+2, W+2, Cin)

    # im2col: build (TH*W, 9*Cin) patch matrix, single wide-K matmul.
    cols = []
    for di in range(3):
        for dj in range(3):
            cols.append(xs[di:di + TH, dj:dj + W, :].reshape(TH * W, Cin))
    patches = jnp.concatenate(cols, axis=-1)          # (TH*W, 9*Cin) bf16

    acc = jnp.dot(patches, w_ref[...],
                  preferred_element_type=jnp.float32)  # (TH*W, Cout) f32

    # 2x2 max-pool (stride 2), pairwise maxima only.
    y4 = acc.reshape(THh, 2, W, Cout)
    m1 = jnp.maximum(y4[:, 0], y4[:, 1])              # pool H pairs -> (THh, W, Cout)
    y5 = m1.reshape(THh, Wh, 2, Cout)
    m2 = jnp.maximum(y5[:, :, 0], y5[:, :, 1])        # pool W pairs -> (THh, Wh, Cout)

    slab = m2.reshape(THh, Wh * Cout)                 # lane-dense (1024 lanes)
    o_ref[0] = _leaky_relu(slab + b_ref[...]).astype(o_ref.dtype)


def conv_relu_pool(x_nhwc, w_hwio, b, *, strip_rows=16):
    N, H, W, Cin = x_nhwc.shape
    Cout = w_hwio.shape[-1]
    Hh, Wh = H // 2, W // 2
    strip_rows = min(strip_rows, H)
    assert H % strip_rows == 0 and strip_rows % 2 == 0
    n_strips = H // strip_rows
    THh = strip_rows // 2

    xp = jnp.pad(x_nhwc.astype(jnp.bfloat16),
                 ((0, 0), (1, 1), (1, 1), (0, 0)))            # padding=1, bf16
    w_flat = w_hwio.astype(jnp.bfloat16).reshape(9 * Cin, Cout)
    b_tile = jnp.tile(b.astype(jnp.float32), Wh).reshape(1, Wh * Cout)

    slab = pl.pallas_call(
        conv3x3_relu_pool_kernel,
        out_shape=jax.ShapeDtypeStruct((N, Hh, Wh * Cout), jnp.bfloat16),
        grid_spec=pltpu.PrefetchScalarGridSpec(
            num_scalar_prefetch=0,
            grid=(N, n_strips),
            in_specs=[
                pl.BlockSpec((1, H + 2, W + 2, Cin), lambda n, s: (n, 0, 0, 0)),
                pl.BlockSpec((9 * Cin, Cout), lambda n, s: (0, 0)),
                pl.BlockSpec((1, Wh * Cout), lambda n, s: (0, 0)),
            ],
            out_specs=pl.BlockSpec((1, THh, Wh * Cout), lambda n, s: (n, s, 0)),
        ),
        compiler_params=pltpu.CompilerParams(
            dimension_semantics=("parallel", "parallel")),
    )(xp, w_flat, b_tile)
    return slab.reshape(N, Hh, Wh, Cout)


# ---------------------------------------------------------------------------
# MLP head: fc1 (K-streamed over the 16384 reduction dim) + leaky_relu + fc2.
# ---------------------------------------------------------------------------
def mlp_kernel(x_ref, w1_ref, b1_ref, w2_ref, b2_ref, o_ref, acc_ref):
    k = pl.program_id(0)

    @pl.when(k == 0)
    def _():
        acc_ref[...] = jnp.zeros_like(acc_ref)

    acc_ref[...] += jnp.dot(x_ref[...], w1_ref[...],
                            preferred_element_type=jnp.float32)

    @pl.when(k == pl.num_programs(0) - 1)
    def _():
        h = _leaky_relu(acc_ref[...] + b1_ref[...])
        o = jnp.dot(h, w2_ref[...],
                    preferred_element_type=jnp.float32) + b2_ref[...]
        o_ref[...] = o.astype(o_ref.dtype)


def mlp(x_flat, w1, b1, w2, b2, *, tk=4096):
    N, K = x_flat.shape
    H1 = w1.shape[1]
    CO = w2.shape[1]
    assert K % tk == 0
    nk = K // tk

    x16 = x_flat.astype(jnp.bfloat16)
    w1_16 = w1.astype(jnp.bfloat16)

    return pl.pallas_call(
        mlp_kernel,
        out_shape=jax.ShapeDtypeStruct((N, CO), jnp.float32),
        grid_spec=pltpu.PrefetchScalarGridSpec(
            num_scalar_prefetch=0,
            grid=(nk,),
            in_specs=[
                pl.BlockSpec((N, tk), lambda k: (0, k)),
                pl.BlockSpec((tk, H1), lambda k: (k, 0)),
                pl.BlockSpec((1, H1), lambda k: (0, 0)),
                pl.BlockSpec((H1, CO), lambda k: (0, 0)),
                pl.BlockSpec((1, CO), lambda k: (0, 0)),
            ],
            out_specs=pl.BlockSpec((N, CO), lambda k: (0, 0)),
            scratch_shapes=[pltpu.VMEM((N, H1), jnp.float32)],
        ),
        compiler_params=pltpu.CompilerParams(
            dimension_semantics=("arbitrary",),
            vmem_limit_bytes=32 << 20),
    )(x16, w1_16,
      b1.reshape(1, H1).astype(jnp.float32),
      w2.astype(jnp.float32),
      b2.reshape(1, CO).astype(jnp.float32))


# ---------------------------------------------------------------------------
# Full forward (wrapper glue: NCHW->NHWC transpose, (C,H,W) flatten order).
# ---------------------------------------------------------------------------
def anime_cnn_forward(x_nchw, p):
    x = jnp.transpose(x_nchw, (0, 2, 3, 1))                    # NCHW -> NHWC
    h1 = conv_relu_pool(x, p["w1"], p["b1"])                   # (N, 32, 32, 32) bf16
    h2 = conv_relu_pool(h1, p["w2"], p["b2"])                  # (N, 16, 16, 64) bf16
    h2_nchw = jnp.transpose(h2, (0, 3, 1, 2))                  # (N, 64, 16, 16)
    flat = h2_nchw.reshape(h2_nchw.shape[0], -1)               # PyTorch .view order (C,H,W)
    return mlp(flat, p["fw1"], p["fb1"], p["fw2"], p["fb2"])   # (N, 2) f32


def init_params(key):
    ks = jax.random.split(key, 8)

    def u(k, shape, fan_in):
        bound = 1.0 / jnp.sqrt(float(fan_in))
        return jax.random.uniform(k, shape, jnp.float32, -bound, bound)

    return dict(
        w1=u(ks[0], (3, 3, 3, 32), 3 * 3 * 3),            # conv1 (HWIO)
        b1=u(ks[1], (32,), 3 * 3 * 3),
        w2=u(ks[2], (3, 3, 32, 64), 32 * 3 * 3),           # conv2 (HWIO)
        b2=u(ks[3], (64,), 32 * 3 * 3),
        fw1=u(ks[4], (64 * 16 * 16, 128), 64 * 16 * 16),   # fc1 (in, out)
        fb1=u(ks[5], (128,), 64 * 16 * 16),
        fw2=u(ks[6], (128, 2), 128),                       # fc2 (in, out)
        fb2=u(ks[7], (2,), 128),
    )


# Pure-JAX f32 reference (same semantics as the PyTorch forward).
def reference_forward(x_nchw, p):
    x = jnp.transpose(x_nchw, (0, 2, 3, 1))

    def conv(x, w, b):
        y = lax.conv_general_dilated(
            x, w, (1, 1), "SAME",
            dimension_numbers=("NHWC", "HWIO", "NHWC"))
        return y + b

    def pool(x):
        return lax.reduce_window(x, -jnp.inf, lax.max,
                                 (1, 2, 2, 1), (1, 2, 2, 1), "VALID")

    h = pool(_leaky_relu(conv(x, p["w1"], p["b1"])))
    h = pool(_leaky_relu(conv(h, p["w2"], p["b2"])))
    h = jnp.transpose(h, (0, 3, 1, 2)).reshape(x.shape[0], -1)
    h = _leaky_relu(h @ p["fw1"] + p["fb1"])
    return h @ p["fw2"] + p["fb2"]


if __name__ == "__main__":
    key = jax.random.PRNGKey(0)
    pkey, xkey = jax.random.split(key)
    params = init_params(pkey)

    # fc1 expects 64*16*16 features after two 2x2 pools => input spatial 64x64.
    x = jax.random.normal(xkey, (2, 3, 64, 64), jnp.float32)   # NCHW, like PyTorch

    out = anime_cnn_forward(x, params)
    out = jax.block_until_ready(out)
    assert out.shape == (2, 2)

    ref = reference_forward(x, params)
    # bf16 activations/weights vs the f32 reference -> relaxed tolerance.
    if not bool(jnp.allclose(out, ref, atol=5e-2, rtol=5e-2)):
        raise AssertionError("Pallas output mismatch vs JAX reference")

    print("KERNEL_OK")
</pallas_src>

<mosaic_0001>
module attributes {stable_mosaic.version = 11 : i64} {
  func.func @conv3x3_relu_pool_kernel(%arg0: i32, %arg1: i32, %arg2: memref<1x66x66x3xbf16, #tpu.memory_space<vmem>>, %arg3: memref<27x32xbf16, #tpu.memory_space<vmem>>, %arg4: memref<1x1024xf32, #tpu.memory_space<vmem>>, %arg5: memref<1x8x1024xbf16, #tpu.memory_space<vmem>>) attributes {dimension_semantics = [#tpu.dimension_semantics<parallel>, #tpu.dimension_semantics<parallel>], iteration_bounds = array<i64: 2, 4>, scalar_prefetch = 0 : i64, scratch_operands = 0 : i64, tpu.core_type = #tpu.core_type<tc>, window_params = [{transform_indices = @transform_0, window_bounds = array<i64: 1, 66, 66, 3>}, {pipeline_mode = #tpu.pipeline_mode<synchronous>, transform_indices = @transform_1, window_bounds = array<i64: 27, 32>}, {pipeline_mode = #tpu.pipeline_mode<synchronous>, transform_indices = @transform_2, window_bounds = array<i64: 1, 1024>}, {transform_indices = @transform_3, window_bounds = array<i64: 1, 8, 1024>}]} {
    %c16_i32 = arith.constant 16 : i32
    %0 = arith.muli %arg1, %c16_i32 : i32
    %1 = tpu.assume_multiple %0, 16 : i32
    %c0 = arith.constant 0 : index
    %2 = arith.index_cast %1 : i32 to index
    %c0_0 = arith.constant 0 : index
    %c0_1 = arith.constant 0 : index
    %3 = vector.load %arg2[%c0, %2, %c0_0, %c0_1] : memref<1x66x66x3xbf16, #tpu.memory_space<vmem>>, vector<1x18x66x3xbf16>
    %4 = vector.shape_cast %3 : vector<1x18x66x3xbf16> to vector<18x66x3xbf16>
    %5 = vector.extract_strided_slice %4 {offsets = [0, 0, 0], sizes = [16, 64, 3], strides = [1, 1, 1]} : vector<18x66x3xbf16> to vector<16x64x3xbf16>
    %6 = vector.shape_cast %5 : vector<16x64x3xbf16> to vector<1024x3xbf16>
    %7 = vector.extract_strided_slice %4 {offsets = [0, 1, 0], sizes = [16, 64, 3], strides = [1, 1, 1]} : vector<18x66x3xbf16> to vector<16x64x3xbf16>
    %8 = vector.shape_cast %7 : vector<16x64x3xbf16> to vector<1024x3xbf16>
    %9 = vector.extract_strided_slice %4 {offsets = [0, 2, 0], sizes = [16, 64, 3], strides = [1, 1, 1]} : vector<18x66x3xbf16> to vector<16x64x3xbf16>
    %10 = vector.shape_cast %9 : vector<16x64x3xbf16> to vector<1024x3xbf16>
    %11 = vector.extract_strided_slice %4 {offsets = [1, 0, 0], sizes = [16, 64, 3], strides = [1, 1, 1]} : vector<18x66x3xbf16> to vector<16x64x3xbf16>
    %12 = vector.shape_cast %11 : vector<16x64x3xbf16> to vector<1024x3xbf16>
    %13 = vector.extract_strided_slice %4 {offsets = [1, 1, 0], sizes = [16, 64, 3], strides = [1, 1, 1]} : vector<18x66x3xbf16> to vector<16x64x3xbf16>
    %14 = vector.shape_cast %13 : vector<16x64x3xbf16> to vector<1024x3xbf16>
    %15 = vector.extract_strided_slice %4 {offsets = [1, 2, 0], sizes = [16, 64, 3], strides = [1, 1, 1]} : vector<18x66x3xbf16> to vector<16x64x3xbf16>
    %16 = vector.shape_cast %15 : vector<16x64x3xbf16> to vector<1024x3xbf16>
    %17 = vector.extract_strided_slice %4 {offsets = [2, 0, 0], sizes = [16, 64, 3], strides = [1, 1, 1]} : vector<18x66x3xbf16> to vector<16x64x3xbf16>
    %18 = vector.shape_cast %17 : vector<16x64x3xbf16> to vector<1024x3xbf16>
    %19 = vector.extract_strided_slice %4 {offsets = [2, 1, 0], sizes = [16, 64, 3], strides = [1, 1, 1]} : vector<18x66x3xbf16> to vector<16x64x3xbf16>
    %20 = vector.shape_cast %19 : vector<16x64x3xbf16> to vector<1024x3xbf16>
    %21 = vector.extract_strided_slice %4 {offsets = [2, 2, 0], sizes = [16, 64, 3], strides = [1, 1, 1]} : vector<18x66x3xbf16> to vector<16x64x3xbf16>
    %22 = vector.shape_cast %21 : vector<16x64x3xbf16> to vector<1024x3xbf16>
    %23 = tpu.concatenate %6, %8, %10, %12, %14, %16, %18, %20, %22 in 1 : vector<1024x3xbf16>, vector<1024x3xbf16>, vector<1024x3xbf16>, vector<1024x3xbf16>, vector<1024x3xbf16>, vector<1024x3xbf16>, vector<1024x3xbf16>, vector<1024x3xbf16>, vector<1024x3xbf16> -> vector<1024x27xbf16>
    %c0_2 = arith.constant 0 : index
    %c0_3 = arith.constant 0 : index
    %24 = vector.load %arg3[%c0_2, %c0_3] : memref<27x32xbf16, #tpu.memory_space<vmem>>, vector<27x32xbf16>
    %cst = arith.constant dense<0.000000e+00> : vector<1024x32xf32>
    %25 = tpu.matmul %23, %24, %cst {dimension_numbers = #tpu.dot_dimension_numbers<[1], [0], [0], [1], [0, 0, 1, 1], [], []>} : vector<1024x27xbf16>, vector<27x32xbf16>, vector<1024x32xf32> -> vector<1024x32xf32>
    %26 = vector.shape_cast %25 : vector<1024x32xf32> to vector<8x2x64x32xf32>
    %27 = vector.extract_strided_slice %26 {offsets = [0, 0, 0, 0], sizes = [8, 1, 64, 32], strides = [1, 1, 1, 1]} : vector<8x2x64x32xf32> to vector<8x1x64x32xf32>
    %28 = vector.shape_cast %27 : vector<8x1x64x32xf32> to vector<8x64x32xf32>
    %29 = vector.extract_strided_slice %26 {offsets = [0, 1, 0, 0], sizes = [8, 1, 64, 32], strides = [1, 1, 1, 1]} : vector<8x2x64x32xf32> to vector<8x1x64x32xf32>
    %30 = vector.shape_cast %29 : vector<8x1x64x32xf32> to vector<8x64x32xf32>
    %31 = arith.maximumf %28, %30 : vector<8x64x32xf32>
    %32 = vector.shape_cast %31 : vector<8x64x32xf32> to vector<8x32x2x32xf32>
    %33 = vector.extract_strided_slice %32 {offsets = [0, 0, 0, 0], sizes = [8, 32, 1, 32], strides = [1, 1, 1, 1]} : vector<8x32x2x32xf32> to vector<8x32x1x32xf32>
    %34 = vector.shape_cast %33 : vector<8x32x1x32xf32> to vector<8x32x32xf32>
    %35 = vector.extract_strided_slice %32 {offsets = [0, 0, 1, 0], sizes = [8, 32, 1, 32], strides = [1, 1, 1, 1]} : vector<8x32x2x32xf32> to vector<8x32x1x32xf32>
    %36 = vector.shape_cast %35 : vector<8x32x1x32xf32> to vector<8x32x32xf32>
    %37 = arith.maximumf %34, %36 : vector<8x32x32xf32>
    %38 = vector.shape_cast %37 : vector<8x32x32xf32> to vector<8x1024xf32>
    %c0_4 = arith.constant 0 : index
    %c0_5 = arith.constant 0 : index
    %39 = vector.load %arg4[%c0_4, %c0_5] : memref<1x1024xf32, #tpu.memory_space<vmem>>, vector<1x1024xf32>
    %40 = vector.broadcast %39 : vector<1x1024xf32> to vector<8x1024xf32>
    %41 = arith.addf %38, %40 : vector<8x1024xf32>
    %cst_6 = arith.constant 0.000000e+00 : f32
    %42 = vector.broadcast %cst_6 : f32 to vector<8x1024xf32>
    %43 = arith.cmpf ogt, %41, %42 : vector<8x1024xf32>
    %cst_7 = arith.constant 0.00999999977 : f32
    %44 = vector.broadcast %cst_7 : f32 to vector<8x1024xf32>
    %45 = arith.mulf %44, %41 : vector<8x1024xf32>
    %46 = arith.select %43, %41, %45 : vector<8x1024xi1>, vector<8x1024xf32>
    %47 = arith.truncf %46 : vector<8x1024xf32> to vector<8x1024xbf16>
    %c0_8 = arith.constant 0 : index
    %c0_9 = arith.constant 0 : index
    %c0_10 = arith.constant 0 : index
    %48 = vector.load %arg5[%c0_8, %c0_9, %c0_10] : memref<1x8x1024xbf16, #tpu.memory_space<vmem>>, vector<1x8x1024xbf16>
    %49 = vector.shape_cast %48 : vector<1x8x1024xbf16> to vector<8x1024xbf16>
    %50 = vector.shape_cast %47 : vector<8x1024xbf16> to vector<1x8x1024xbf16>
    tpu.vector_store %arg5[%c0_8, %c0_9, %c0_10], %50 {strides = array<i32>} : memref<1x8x1024xbf16, #tpu.memory_space<vmem>>, vector<1x8x1024xbf16>,
    return
  }
  func.func @transform_0(%arg0: i32, %arg1: i32) -> (i32, i32, i32, i32) {
    %c0_i32 = arith.constant 0 : i32
    %c0_i32_0 = arith.constant 0 : i32
    %c0_i32_1 = arith.constant 0 : i32
    %c0_i32_2 = arith.constant 0 : i32
    return %arg0, %c0_i32, %c0_i32_0, %c0_i32_1 : i32, i32, i32, i32
  }
  func.func @transform_1(%arg0: i32, %arg1: i32) -> (i32, i32) {
    %c0_i32 = arith.constant 0 : i32
    %c0_i32_0 = arith.constant 0 : i32
    %c0_i32_1 = arith.constant 0 : i32
    return %c0_i32, %c0_i32_0 : i32, i32
  }
  func.func @transform_2(%arg0: i32, %arg1: i32) -> (i32, i32) {
    %c0_i32 = arith.constant 0 : i32
    %c0_i32_0 = arith.constant 0 : i32
    %c0_i32_1 = arith.constant 0 : i32
    return %c0_i32, %c0_i32_0 : i32, i32
  }
  func.func @transform_3(%arg0: i32, %arg1: i32) -> (i32, i32, i32) {
    %c0_i32 = arith.constant 0 : i32
    %c0_i32_0 = arith.constant 0 : i32
    return %arg0, %arg1, %c0_i32 : i32, i32, i32
  }
}

</mosaic_0001>

<bundles_post_ra>
// kernel: tpu_custom_call.1
= control target key start
LH: loop header
LB: loop body
LE: loop exit
PB: predicated region body
PF: predicated region fallthrough
CT: control target
= control target key end

     0   :  { %8 = vsyncpa [#allocation3], 0  ;;  %s17735_s0 = inlined_call_operand.vmem [shape: bf16[2,66,66,3], index: 0, kind: input, shape index: {}]   ;;  %s17736_s1 = inlined_call_operand.vmem [shape: bf16[27,32], index: 1, kind: input, shape index: {}]   ;;  %s17737_s2 = inlined_call_operand.vmem [shape: f32[1,1024], index: 2, kind: input, shape index: {}]   ;;  %s17738_s3 = inlined_call_operand.hbm [shape: bf16[2,32,1024], index: 3, kind: output, shape index: {}]  }
   0x1   :  { %10 = vsyncpa [#allocation3 + $0x1], 0  ;;  %s10888_s12 = smov 0   ;;  %s10890_s13 = smov 0  }
   0x2   :  { %s10892_s14 = smov 0   ;;  %s10894_s15 = smov 0  }
   0x3   :  { %s10896_s16 = smov 0   ;;  %s10898_s17 = smov 0  }
   0x4   :  { %s10900_s18 = smov 0   ;;  %s10902_s19 = smov 0  }
   0x5 LB: > { %s9706_s20 = sadd.s32 4294967295, %s10853_s19   ;;  %s9707_s21 = sadd.s32 4294967294, %s10853_s19   ;;  %s10853_s19 = sphi %s10902_s19, %s16_s19   ;;  %s10849_s18 = sphi %s10900_s18, %s18937_s18   ;;  %s10845_s17 = sphi %s10898_s17, %s18936_s17   ;;  %s10841_s16 = sphi %s10896_s16, %s18935_s16   ;;  %s10837_s15 = sphi %s10894_s15, %s18934_s15   ;;  %s10833_s14 = sphi %s10892_s14, %s18933_s14   ;;  %s10829_s13 = sphi %s10890_s13, %s18932_s13   ;;  %s10825_s12 = sphi %s10888_s12, %s18931_s12  }
   0x6   : > { %s25_s22 = sadd.s32 1, %s10845_s17  ;;  %s28_s23 = sadd.s32 1, %s10849_s18 }
   0x7   : > { %p26_p0 = scmp.ge.s32.totalorder %s25_s22, 4  ;;  %p115_p1 = scmp.ne.s32.totalorder %s10833_s14, %s10829_s13 }
   0x8   : > { %p116_p2 = scmp.eq.s32.totalorder %s9706_s20, 7  ;;  %p121_p5 = scmp.ne.s32.totalorder %s10829_s13, %s10825_s12 }
   0x9   : > { %s18939_s22 = smov (%p26_p0, %s25_s22), 0  ;;  %s18941_s23 = smov (!%p26_p0, %s28_s23), %s10849_s18 }
   0xa   : > { %s101_s24 = ssub.s32 %s10845_s17, %s18939_s22  ;;  %p10939_p3 = por %p116_p2, %p115_p1 }
   0xb   : > { %p30_p4 = scmp.ge.s32.totalorder %s18941_s23, 2  ;;  %p122_p6 = scmp.eq.s32.totalorder %s9707_s21, 7 }
   0xc   : > { %p9710_p7 = scmp.ge.s32.totalorder %s10853_s19, 1  ;;  %p154_p9 = scmp.lt.s32.totalorder %s10853_s19, 9 }
   0xd   : > { %s18943_s23 = smov (%p30_p4, %s18941_s23), 0  ;;  %p10948_p8 = por %p122_p6, %p121_p5 }
   0xe   : > { %s100_s27 = ssub.s32 %s10849_s18, %s18943_s23  ;;  %s105_s28 = sadd.s32 1, %s10833_s14 }
   0xf   : > { %s102_s29 = sor.u32 %s101_s24, %s100_s27  ;;  %p155_p10 = pnand %p9710_p7, %p154_p9 }
  0x10   : > { %p103_p11 = scmp.eq.s32.totalorder %s102_s29, 0 }
  0x11   : > { %158 = sbr.rel (%p155_p10) target bundleno = 2215 (0x8a7), region = 32 }
  0x12   : > { %s10957_s30 = scalar_select %p103_p11, %s10833_s14, %s105_s28  }
  0x16   : > { %p178_p12 = scmp.lt.s32.totalorder %s10841_s16, 1  ;;  %s10356_s5 = smul.u32 576, %s10837_s15  ;;  %vm350_vm0 = vsmask.f32 3328  ;;  %vm351_vm1 = vsmask.f32 7440 }
  0x17   : > { %vm10976_vm2 = vmor %vm350_vm0, %vm351_vm1  ;;  %v17941_v25 = vmov 0  ;;  %s10855_s11 = smov 3   ;;  %vm1841_vm3 = vcmask 1042432   ;;  %vm1842_vm4 = vcmask 1046532   ;;  %s10856_s20 = smov 6   ;;  %vm5392_vm6 = vcmask 1044480  }
  0x18   : > { %s179_s4 = scalar_select %p178_p12, %s10841_s16, 1  ;;  %v17942_v25 = vsel %vm10976_vm2, 4294967295, %v17941_v25  ;;  %vm11835_vm5 = vmor %vm1841_vm3, %vm1842_vm4  ;;  %vm5393_vm7 = vcmask 1045504   ;;  %vm4152_vm8 = vcmask 23552   ;;  %vm4345_vm9 = vcmask 48128  }
  0x19   : > { %17943 = vst [vmem:[#allocation5_spill] sm:$0xff] %v17942_v25  ;;  %s10857_s21 = smov 9   ;;  %s10858_s24 = smov 12   ;;  %vm4474_vm10 = vcmask 72704   ;;  %vm4603_vm11 = vcmask 97280   ;;  %vm4732_vm12 = vcmask 121856  }
  0x1a   : > { %s10437_s6 = smul.u32 2376, %s179_s4  ;;  %s10859_s27 = smov 15   ;;  %vm4990_vm13 = vcmask 171008   ;;  %vm4861_vm14 = vcmask 146432   ;;  %vm5119_vm15 = vcmask 195584   ;;  %vm5263_vm0 = vcmask 220160  }
  0x1b   : > { %s10860_s28 = smov 18   ;;  %s10861_s29 = smov 24   ;;  %vm7525_vm1 = vcmask 1041409   ;;  %vm7529_vm3 = vcmask 1045509   ;;  %vm7531_vm4 = vcmask 1047559  }
  0x1c   : > { %s182_s9 = scalar_lea.vmem %s17735_s0, %s10437_s6  ;;  %s10862_s4 = smov 21  }
  0x1d   : > { %s10965_s10 = scalar_lea.vmem %s182_s9, %s10356_s5  ;;  %s10351_s7 = sshll.u32 %s10837_s15, 3 }
  0x1e   : > { %v197_v0 = vld [vmem:[%s10965_s10 + $0x24] sm:$0xf]  ;;  %v198_v1 = vld [vmem:[%s10965_s10 + $0x28] sm:$0xf]  ;;  %v199_v2 = vld [vmem:[%s10965_s10 + $0x2c] sm:$0xf] }
  0x1f   : > { %v438_v3 = vshrl.u32 %v197_v0, 16  ;;  %v441_v4 = vshll.u32 %v197_v0, 16  ;;  %v447_v5 = vshll.u32 %v198_v1, 16  ;;  %v451_v6 = vshrl.u32 %v198_v1, 16  ;;  %v192_v7 = vld [vmem:[%s10965_s10 + $0x10] sm:$0xf] }
  0x20   : > { %v457_v8 = vshll.u32 %v199_v2, 16  ;;  %v461_v9 = vshrl.u32 %v199_v2, 16  ;;  %v193_v10 = vld [vmem:[%s10965_s10 + $0x14] sm:$0xf]  ;;  %v194_v15 = vld [vmem:[%s10965_s10 + $0x18] sm:$0xf] }
  0x21   : > { %v440_v11 = vrot.slane %v438_v3, 4  ;;  %v443_v12 = vrot.slane %v441_v4, 5  ;;  %v449_v13 = vrot.slane %v447_v5, 5  ;;  %v453_v14 = vrot.slane %v451_v6, 4  ;;  %v188_v24 = vld [vmem:[%s10965_s10] sm:$0xf] }
  0x22   : > { %v459_v16 = vrot.slane %v457_v8, 5  ;;  %v463_v17 = vrot.slane %v461_v9, 4  ;;  %v393_v18 = vshll.u32 %v192_v7, 16  ;;  %v397_v19 = vshrl.u32 %v192_v7, 16  ;;  %v189_v37 = vld [vmem:[%s10965_s10 + $0x4] sm:$0xf] }
  0x23   : > { %v444_v20 = vor.u32 %v443_v12, %v440_v11  ;;  %v454_v21 = vor.u32 %v453_v14, %v449_v13  ;;  %v403_v22 = vshll.u32 %v193_v10, 16  ;;  %v407_v23 = vshrl.u32 %v193_v10, 16  ;;  %v190_v48 = vld [vmem:[%s10965_s10 + $0x8] sm:$0xf]  ;;  %v200_v56 = vld [vmem:[%s10965_s10 + $0x30] sm:$0xf] }
  0x24   : > { %v464_v26 = vor.u32 %v463_v17, %v459_v16  ;;  %v10980_v27 = vrot.slane %v393_v18, 5  ;;  %v399_v28 = vrot.slane %v397_v19, 4  ;;  %v413_v29 = vshll.u32 %v194_v15, 16  ;;  %v10999_v1 = vld [vmem:[%s10965_s10 + $0x34] sm:$0xf]  ;;  %s10352_s8 = sshll.u32 %s10841_s16, 5 }
  0x25   : > { %v445_v30 = vrot.slane %v444_v20, 4  ;;  %v455_v31 = vrot.slane %v454_v21, 4  ;;  %v405_v32 = vrot.slane %v403_v22, 5  ;;  %v409_v33 = vrot.slane %v407_v23, 4  ;;  %v195_v10 = vld [vmem:[%s10965_s10 + $0x1c] sm:$0xf]  ;;  %s9624_s9 = sadd.s32 %s10352_s8, %s10351_s7 }
  0x26   : > { %v400_v34 = vor.u32 %v399_v28, %v10980_v27  ;;  %v415_v35 = vrot.slane %v413_v29, 5  ;;  %v417_v36 = vshrl.u32 %v194_v15, 16  ;;  %v354_v38 = vshrl.u32 %v188_v24, 16  ;;  %v196_v15 = vld [vmem:[%s10965_s10 + $0x20] sm:$0x1]  ;;  %s10353_s15 = sshll.u32 %s9624_s9, 2 }
  0x27   : > { %v450_v39 = vsel %vm10976_vm2, %v445_v30, %v449_v13  ;;  %v460_v40 = vsel %vm10976_vm2, %v455_v31, %v459_v16  ;;  %v410_v41 = vor.u32 %v409_v33, %v405_v32  ;;  %v357_v42 = vshll.u32 %v188_v24, 16  ;;  %v191_v24 = vld [vmem:[%s10965_s10 + $0xc] sm:$0xf]  ;;  %v206_v31 = vld [vmem:[%s10965_s10 + $0x48] sm:$0xf]  ;;  %s10779_s7 = scalar_lea.hbm %s17738_s3, 256 }
  0x28   : > { %v2680_v43 = vunpack.c.l.b16 %v450_v39  ;;  %v2681_v44 = vunpack.c.l.b16 %v460_v40  ;;  %v401_v45 = vrot.slane %v400_v34, 4  ;;  %v419_v46 = vrot.slane %v417_v36, 4  ;;  %v207_v40 = vld [vmem:[%s10965_s10 + $0x4c] sm:$0xf] }
  0x29   : > { %v411_v47 = vrot.slane %v410_v41, 4  ;;  %v356_v49 = vrot.slane %v354_v38, 4  ;;  %v359_v50 = vrot.slane %v357_v42, 5  ;;  %v363_v51 = vshll.u32 %v189_v37, 16 }
  0x2a   : > { %v10989_v52 = vpack.c.b16 %v2681_v44, %v2680_v43  ;;  %v406_v53 = vsel %vm10976_vm2, %v401_v45, %v405_v32  ;;  %v420_v54 = vor.u32 %v419_v46, %v415_v35  ;;  %v367_v55 = vshrl.u32 %v189_v37, 16 }
  0x2b   : > { %v416_v57 = vsel %vm10976_vm2, %v411_v47, %v415_v35  ;;  %v2676_v58 = vunpack.c.l.b16 %v406_v53  ;;  %v360_v59 = vor.u32 %v359_v50, %v356_v49  ;;  %v365_v60 = vrot.slane %v363_v51, 5  ;;  %v11022_v49 = vld [vmem:[%s10965_s10 + $0x50] sm:$0xf] }
  0x2c   : > { %2872 = vrot.lane.b32.xlu2 %v10989_v52, %s10855_s11  ;;  %v2677_v61 = vunpack.c.l.b16 %v416_v57  ;;  %v369_v62 = vrot.slane %v367_v55, 4  ;;  %v373_v63 = vshll.u32 %v190_v48, 16  ;;  %v377_v0 = vshrl.u32 %v190_v48, 16  ;;  %v203_v55 = vld [vmem:[%s10965_s10 + $0x3c] sm:$0xf] }
  0x2d   : > { %v361_v2 = vrot.slane %v360_v59, 4  ;;  %v465_v3 = vrot.slane %v464_v26, 4  ;;  %v467_v4 = vshll.u32 %v200_v56, 16  ;;  %v471_v5 = vshrl.u32 %v200_v56, 16 }
  0x2e   : > { %v2802_v6 = vpack.c.b16 %v2677_v61, %v2676_v58  ;;  %v370_v7 = vor.u32 %v369_v62, %v365_v60  ;;  %v375_v8 = vrot.slane %v373_v63, 5  ;;  %v379_v9 = vrot.slane %v377_v0, 4  ;;  %v204_v0 = vld [vmem:[%s10965_s10 + $0x40] sm:$0xf] }
  0x2f   : > { %v366_v11 = vsel %vm10976_vm2, %v361_v2, %v365_v60  ;;  %v469_v12 = vrot.slane %v467_v4, 5  ;;  %v473_v13 = vrot.slane %v471_v5, 4  ;;  %v477_v14 = vshll.u32 %v10999_v1, 16 }
  0x30   : > { %2868 = vrot.lane.b32.xlu1 %v2802_v6, %s10855_s11  ;;  %v371_v16 = vrot.slane %v370_v7, 4  ;;  %v380_v17 = vor.u32 %v379_v9, %v375_v8  ;;  %v2672_v18 = vunpack.c.l.b16 %v366_v11  ;;  %v421_v19 = vrot.slane %v420_v54, 4 }
  0x31   : > { %v470_v20 = vsel %vm10976_vm2, %v465_v3, %v469_v12  ;;  %v474_v21 = vor.u32 %v473_v13, %v469_v12  ;;  %v11009_v22 = vrot.slane %v477_v14, 5  ;;  %v423_v23 = vshll.u32 %v195_v10, 16  ;;  %v205_v12 = vld [vmem:[%s10965_s10 + $0x44] sm:$0x1] }
  0x32   : > { %v376_v26 = vsel %vm10976_vm2, %v371_v16, %v375_v8  ;;  %v2682_v28 = vunpack.c.l.b16 %v470_v20  ;;  %v427_v29 = vshrl.u32 %v195_v10, 16  ;;  %v433_v30 = vshll.u32 %v196_v15, 16 }
  0x33   : > { %v2673_v32 = vunpack.c.l.b16 %v376_v26  ;;  %v475_v33 = vrot.slane %v474_v21, 4  ;;  %v425_v34 = vrot.slane %v423_v23, 5  ;;  %v381_v35 = vrot.slane %v380_v17, 4 }
  0x34   : > { %v429_v36 = vrot.slane %v427_v29, 4  ;;  %v435_v37 = vrot.slane %v433_v30, 5  ;;  %v383_v38 = vshll.u32 %v191_v24, 16  ;;  %v387_v39 = vshrl.u32 %v191_v24, 16  ;;  %v202_v29 = vld [vmem:[%s10965_s10 + $0x38] sm:$0xf] }
  0x35   : > { %v2800_v41 = vpack.c.b16 %v2673_v32, %v2672_v18  ;;  %v480_v42 = vsel %vm10976_vm2, %v475_v33, %v11009_v22  ;;  %v426_v43 = vsel %vm10976_vm2, %v421_v19, %v425_v34  ;;  %v522_v44 = vshrl.u32 %v206_v31, 16 }
  0x36   : > { %v2683_v45 = vunpack.c.l.b16 %v480_v42  ;;  %v430_v46 = vor.u32 %v429_v36, %v425_v34  ;;  %v2678_v47 = vunpack.c.l.b16 %v426_v43  ;;  %v385_v48 = vrot.slane %v383_v38, 5  ;;  %v213_v42 = vld [vmem:[%s10965_s10 + $0x64] sm:$0xf] }
  0x37   : > { %2864 = vrot.lane.b32.xlu0 %v2800_v41, %s10855_s11  ;;  %v389_v50 = vrot.slane %v387_v39, 4  ;;  %v524_v51 = vrot.slane %v522_v44, 4  ;;  %v525_v53 = vshll.u32 %v206_v31, 16  ;;  %v531_v54 = vshll.u32 %v207_v40, 16  ;;  %v212_v31 = vld [vmem:[%s10965_s10 + $0x60] sm:$0xf] }
  0x38   : > { %v11026_v56 = vpack.c.b16 %v2683_v45, %v2682_v28  ;;  %v431_v57 = vrot.slane %v430_v46, 4  ;;  %v386_v58 = vsel %vm10976_vm2, %v381_v35, %v385_v48  ;;  %v535_v59 = vshrl.u32 %v207_v40, 16  ;;  %v214_v46 = vld [vmem:[%s10965_s10 + $0x68] sm:$0x1] }
  0x39   : > { %v390_v60 = vor.u32 %v389_v50, %v385_v48  ;;  %v2674_v61 = vunpack.c.l.b16 %v386_v58  ;;  %v527_v62 = vrot.slane %v525_v53, 5  ;;  %v533_v63 = vrot.slane %v531_v54, 5 }
  0x3a   : > { %2874 = vrot.lane.b32.xlu2 %v11026_v56, %s10855_s11  ;;  %v436_v2 = vsel %vm10976_vm2, %v431_v57, %v435_v37  ;;  %v537_v3 = vrot.slane %v535_v59, 4  ;;  %v541_v4 = vshll.u32 %v11022_v49, 16  ;;  %v497_v5 = vshll.u32 %v203_v55, 16 }
  0x3b   : > { %v2679_v6 = vunpack.c.l.b16 %v436_v2  ;;  %v391_v7 = vrot.slane %v390_v60, 4  ;;  %v528_v8 = vor.u32 %v527_v62, %v524_v51  ;;  %v501_v9 = vshrl.u32 %v203_v55, 16  ;;  %v210_v62 = vld [vmem:[%s10965_s10 + $0x58] sm:$0xf] }
  0x3c   : > { %v538_v10 = vor.u32 %v537_v3, %v533_v63  ;;  %v11036_v11 = vrot.slane %v541_v4, 5  ;;  %v11039_v13 = vrot.slane %v497_v5, 5  ;;  %v507_v14 = vshll.u32 %v204_v0, 16  ;;  %v211_v4 = vld [vmem:[%s10965_s10 + $0x5c] sm:$0xf] }
  0x3d   : > { %v2803_v15 = vpack.c.b16 %v2679_v6, %v2678_v47  ;;  %v396_v16 = vsel %vm10976_vm2, %v391_v7, %v10980_v27  ;;  %v529_v17 = vrot.slane %v528_v8, 4  ;;  %v503_v18 = vrot.slane %v501_v9, 4 }
  0x3e   : > { %v2675_v19 = vunpack.c.l.b16 %v396_v16  ;;  %v539_v20 = vrot.slane %v538_v10, 4  ;;  %v509_v21 = vrot.slane %v507_v14, 5  ;;  %v511_v23 = vshrl.u32 %v204_v0, 16 }
  0x3f   : > { %2870 = vrot.lane.b32.xlu1 %v2803_v15, %s10855_s11  ;;  %v534_v24 = vsel %vm10976_vm2, %v529_v17, %v533_v63  ;;  %v504_v26 = vor.u32 %v503_v18, %v11039_v13  ;;  %v517_v28 = vshll.u32 %v205_v12, 16  ;;  %v481_v30 = vshrl.u32 %v10999_v1, 16 }
  0x40   : > { %v2801_v27 = vpack.c.b16 %v2675_v19, %v2674_v61  ;;  %v544_v32 = vsel %vm10976_vm2, %v539_v20, %v11036_v11  ;;  %v2688_v33 = vunpack.c.l.b16 %v534_v24  ;;  %v513_v34 = vrot.slane %v511_v23, 4  ;;  %v209_v19 = vld [vmem:[%s10965_s10 + $0x54] sm:$0xf] }
  0x41   : > { %v2689_v35 = vunpack.c.l.b16 %v544_v32  ;;  %v505_v36 = vrot.slane %v504_v26, 4  ;;  %v519_v37 = vrot.slane %v517_v28, 5  ;;  %v483_v38 = vrot.slane %v481_v30, 4  ;;  %v219_v26 = vld [vmem:[%s10965_s10 + $0x7c] sm:$0xf] }
  0x42   : > { %2866 = vrot.lane.b32.xlu0 %v2801_v27, %s10855_s11  ;;  %v514_v39 = vor.u32 %v513_v34, %v509_v21  ;;  %v487_v40 = vshll.u32 %v202_v29, 16  ;;  %v491_v41 = vshrl.u32 %v202_v29, 16  ;;  %v581_v1 = vshll.u32 %v212_v31, 16 }
  0x43   : > { %v11056_v43 = vpack.c.b16 %v2689_v35, %v2688_v33  ;;  %v510_v44 = vsel %vm10976_vm2, %v505_v36, %v509_v21  ;;  %v484_v45 = vor.u32 %v483_v38, %v11009_v22  ;;  %v585_v47 = vshrl.u32 %v212_v31, 16 }
  0x44   : > { %v515_v48 = vrot.slane %v514_v39, 4  ;;  %v2686_v50 = vunpack.c.l.b16 %v510_v44  ;;  %v489_v51 = vrot.slane %v487_v40, 5  ;;  %v493_v53 = vrot.slane %v491_v41, 4 }
  0x45   : > { %2880 = vrot.lane.b32.xlu2 %v11056_v43, %s10855_s11  ;;  %v485_v54 = vrot.slane %v484_v45, 4  ;;  %v11064_v55 = vrot.slane %v581_v1, 5  ;;  %v587_v57 = vrot.slane %v585_v47, 4  ;;  %v591_v58 = vshll.u32 %v213_v42, 16 }
  0x46   : > { %v520_v59 = vsel %vm10976_vm2, %v515_v48, %v519_v37  ;;  %v494_v22 = vor.u32 %v493_v53, %v489_v51  ;;  %v595_v60 = vshrl.u32 %v213_v42, 16  ;;  %v601_v61 = vshll.u32 %v214_v46, 16  ;;  %v220_v37 = vld [vmem:[%s10965_s10 + $0x80] sm:$0xf]  ;;  %v217_v53 = vld [vmem:[%s10965_s10 + $0x74] sm:$0xf] }
  0x47   : > { %v2687_v63 = vunpack.c.l.b16 %v520_v59  ;;  %v490_v0 = vsel %vm10976_vm2, %v485_v54, %v489_v51  ;;  %v588_v2 = vor.u32 %v587_v57, %v11064_v55  ;;  %v593_v3 = vrot.slane %v591_v58, 5 }
  0x48   : > { %v495_v5 = vrot.slane %v494_v22, 4  ;;  %v2684_v6 = vunpack.c.l.b16 %v490_v0  ;;  %v597_v7 = vrot.slane %v595_v60, 4  ;;  %v603_v8 = vrot.slane %v601_v61, 5 }
  0x49   : > { %v11073_v9 = vpack.c.b16 %v2687_v63, %v2686_v50  ;;  %v589_v10 = vrot.slane %v588_v2, 4  ;;  %v561_v12 = vshll.u32 %v210_v62, 16  ;;  %v565_v14 = vshrl.u32 %v210_v62, 16  ;;  %v11100_v50 = vld [vmem:[%s10965_s10 + $0x84] sm:$0xf] }
  0x4a   : > { %v500_v15 = vsel %vm10976_vm2, %v495_v5, %v11039_v13  ;;  %v598_v16 = vor.u32 %v597_v7, %v593_v3  ;;  %v571_v17 = vshll.u32 %v211_v4, 16  ;;  %v575_v18 = vshrl.u32 %v211_v4, 16  ;;  %v218_v5 = vld [vmem:[%s10965_s10 + $0x78] sm:$0xf]  ;;  %v215_v7 = vld [vmem:[%s10965_s10 + $0x6c] sm:$0xf] }
  0x4b   : > { %2878 = vrot.lane.b32.xlu1 %v11073_v9, %s10855_s11  ;;  %v2685_v20 = vunpack.c.l.b16 %v500_v15  ;;  %v594_v21 = vsel %vm10976_vm2, %v589_v10, %v593_v3  ;;  %v563_v23 = vrot.slane %v561_v12, 5  ;;  %v567_v24 = vrot.slane %v565_v14, 4 }
  0x4c   : > { %v599_v28 = vrot.slane %v598_v16, 4  ;;  %v2694_v29 = vunpack.c.l.b16 %v594_v21  ;;  %v573_v30 = vrot.slane %v571_v17, 5  ;;  %v577_v31 = vrot.slane %v575_v18, 4 }
  0x4d   : > { %v11084_v13 = vpack.c.b16 %v2685_v20, %v2684_v6  ;;  %v568_v27 = vor.u32 %v567_v24, %v563_v23  ;;  %v545_v32 = vshrl.u32 %v11022_v49, 16  ;;  %v551_v33 = vshll.u32 %v209_v19, 16  ;;  %v216_v24 = vld [vmem:[%s10965_s10 + $0x70] sm:$0xf] }
  0x4e   : > { %v604_v34 = vsel %vm10976_vm2, %v599_v28, %v603_v8  ;;  %v578_v35 = vor.u32 %v577_v31, %v573_v30  ;;  %v555_v36 = vshrl.u32 %v209_v19, 16  ;;  %v645_v38 = vshll.u32 %v219_v26, 16  ;;  %v226_v31 = vld [vmem:[%s10965_s10 + $0x98] sm:$0xf] }
  0x4f   : > { %2876 = vrot.lane.b32.xlu0 %v11084_v13, %s10855_s11  ;;  %v2695_v39 = vunpack.c.l.b16 %v604_v34  ;;  %v569_v40 = vrot.slane %v568_v27, 4  ;;  %v547_v41 = vrot.slane %v545_v32, 4  ;;  %v553_v42 = vrot.slane %v551_v33, 5 }
  0x50   : > { %v579_v1 = vrot.slane %v578_v35, 4  ;;  %v557_v44 = vrot.slane %v555_v36, 4  ;;  %v11092_v49 = vrot.slane %v645_v38, 5  ;;  %v649_v45 = vshrl.u32 %v219_v26, 16 }
  0x51   : > { %v11094_v46 = vpack.c.b16 %v2695_v39, %v2694_v29  ;;  %v574_v47 = vsel %vm10976_vm2, %v569_v40, %v573_v30  ;;  %v548_v48 = vor.u32 %v547_v41, %v11036_v11  ;;  %v655_v51 = vshll.u32 %v220_v37, 16 }
  0x52   : > { %v584_v54 = vsel %vm10976_vm2, %v579_v1, %v11064_v55  ;;  %v2692_v57 = vunpack.c.l.b16 %v574_v47  ;;  %v558_v58 = vor.u32 %v557_v44, %v553_v42  ;;  %v651_v59 = vrot.slane %v649_v45, 4 }
  0x53   : > { %2886 = vrot.lane.b32.xlu2 %v11094_v46, %s10855_s11  ;;  %v2693_v22 = vunpack.c.l.b16 %v584_v54  ;;  %v549_v60 = vrot.slane %v548_v48, 4  ;;  %v657_v61 = vrot.slane %v655_v51, 5  ;;  %v659_v11 = vshrl.u32 %v220_v37, 16  ;;  %v11137_v48 = vld [vmem:[%s10965_s10 + $0xa0] sm:$0xf] }
  0x54   : > { %v559_v62 = vrot.slane %v558_v58, 4  ;;  %v652_v63 = vor.u32 %v651_v59, %v11092_v49  ;;  %v665_v0 = vshll.u32 %v11100_v50, 16  ;;  %v625_v2 = vshll.u32 %v217_v53, 16 }
  0x55   : > { %v11110_v3 = vpack.c.b16 %v2693_v22, %v2692_v57  ;;  %v554_v55 = vsel %vm10976_vm2, %v549_v60, %v553_v42  ;;  %v661_v4 = vrot.slane %v659_v11, 4  ;;  %v629_v6 = vshrl.u32 %v217_v53, 16  ;;  %v227_v42 = vld [vmem:[%s10965_s10 + $0x9c] sm:$0xf]  ;;  %v224_v11 = vld [vmem:[%s10965_s10 + $0x90] sm:$0xf] }
  0x56   : > { %v564_v8 = vsel %vm10976_vm2, %v559_v62, %v563_v23  ;;  %v2690_v10 = vunpack.c.l.b16 %v554_v55  ;;  %v653_v12 = vrot.slane %v652_v63, 4  ;;  %v11118_v14 = vrot.slane %v665_v0, 5 }
  0x57   : > { %2884 = vrot.lane.b32.xlu1 %v11110_v3, %s10855_s11  ;;  %v2691_v15 = vunpack.c.l.b16 %v564_v8  ;;  %v662_v16 = vor.u32 %v661_v4, %v657_v61  ;;  %v627_v17 = vrot.slane %v625_v2, 5  ;;  %v631_v18 = vrot.slane %v629_v6, 4 }
  0x58   : > { %v658_v19 = vsel %vm10976_vm2, %v653_v12, %v657_v61  ;;  %v635_v20 = vshll.u32 %v218_v5, 16  ;;  %v639_v21 = vshrl.u32 %v218_v5, 16  ;;  %v606_v26 = vshrl.u32 %v215_v7, 16  ;;  %v225_v12 = vld [vmem:[%s10965_s10 + $0x94] sm:$0xf] }
  0x59   : > { %v11125_v23 = vpack.c.b16 %v2691_v15, %v2690_v10  ;;  %v663_v28 = vrot.slane %v662_v16, 4  ;;  %v2700_v29 = vunpack.c.l.b16 %v658_v19  ;;  %v632_v30 = vor.u32 %v631_v18, %v627_v17 }
  0x5a   : > { %v637_v27 = vrot.slane %v635_v20, 5  ;;  %v641_v32 = vrot.slane %v639_v21, 4  ;;  %v608_v33 = vrot.slane %v606_v26, 4  ;;  %v609_v34 = vshll.u32 %v215_v7, 16 }
  0x5b   : > { %2882 = vrot.lane.b32.xlu0 %v11125_v23, %s10855_s11  ;;  %v668_v35 = vsel %vm10976_vm2, %v663_v28, %v11118_v14  ;;  %v633_v36 = vrot.slane %v632_v30, 4  ;;  %v615_v37 = vshll.u32 %v216_v24, 16  ;;  %v619_v38 = vshrl.u32 %v216_v24, 16  ;;  %v222_v28 = vld [vmem:[%s10965_s10 + $0x88] sm:$0xf] }
  0x5c   : > { %v2701_v39 = vunpack.c.l.b16 %v668_v35  ;;  %v642_v40 = vor.u32 %v641_v32, %v637_v27  ;;  %v611_v41 = vrot.slane %v609_v34, 5  ;;  %v709_v1 = vshll.u32 %v226_v31, 16 }
  0x5d   : > { %v638_v44 = vsel %vm10976_vm2, %v633_v36, %v637_v27  ;;  %v617_v45 = vrot.slane %v615_v37, 5  ;;  %v621_v47 = vrot.slane %v619_v38, 4  ;;  %v713_v51 = vshrl.u32 %v226_v31, 16  ;;  %v223_v27 = vld [vmem:[%s10965_s10 + $0x8c] sm:$0x1] }
  0x5e   : > { %v11139_v53 = vpack.c.b16 %v2701_v39, %v2700_v29  ;;  %v643_v54 = vrot.slane %v642_v40, 4  ;;  %v2698_v57 = vunpack.c.l.b16 %v638_v44  ;;  %v612_v58 = vor.u32 %v611_v41, %v608_v33  ;;  %v233_v40 = vld [vmem:[%s10965_s10 + $0xb4] sm:$0xf] }
  0x5f   : > { %v622_v59 = vor.u32 %v621_v47, %v617_v45  ;;  %v11141_v22 = vrot.slane %v709_v1, 5  ;;  %v715_v60 = vrot.slane %v713_v51, 4  ;;  %v719_v61 = vshll.u32 %v227_v42, 16 }
  0x60   : > { %17944 = vst [vmem:[#allocation6_spill] sm:$0xff] %v11139_v53  ;;  %2892 = vrot.lane.b32.xlu2 %v11139_v53, %s10855_s11  ;;  %v648_v62 = vsel %vm10976_vm2, %v643_v54, %v11092_v49  ;;  %v613_v63 = vrot.slane %v612_v58, 4  ;;  %v723_v0 = vshrl.u32 %v227_v42, 16  ;;  %v729_v2 = vshll.u32 %v11137_v48, 16  ;;  %v234_v54 = vld [vmem:[%s10965_s10 + $0xb8] sm:$0xf] }
  0x61   : > { %v2699_v55 = vunpack.c.l.b16 %v648_v62  ;;  %v623_v4 = vrot.slane %v622_v59, 4  ;;  %v716_v5 = vor.u32 %v715_v60, %v11141_v22  ;;  %v721_v6 = vrot.slane %v719_v61, 5 }
  0x62   : > { %v618_v7 = vsel %vm10976_vm2, %v613_v63, %v617_v45  ;;  %v725_v8 = vrot.slane %v723_v0, 4  ;;  %v11153_v10 = vrot.slane %v729_v2, 5  ;;  %v690_v15 = vshrl.u32 %v224_v11, 16 }
  0x63   : > { %v11156_v49 = vpack.c.b16 %v2699_v55, %v2698_v57  ;;  %v628_v16 = vsel %vm10976_vm2, %v623_v4, %v627_v17  ;;  %v2696_v18 = vunpack.c.l.b16 %v618_v7  ;;  %v717_v19 = vrot.slane %v716_v5, 4  ;;  %v11182_v55 = vld [vmem:[%s10965_s10 + $0xbc] sm:$0xf]  ;;  %v230_v5 = vld [vmem:[%s10965_s10 + $0xa8] sm:$0xf] }
  0x64   : > { %v2697_v20 = vunpack.c.l.b16 %v628_v16  ;;  %v726_v21 = vor.u32 %v725_v8, %v721_v6  ;;  %v692_v24 = vrot.slane %v690_v15, 4  ;;  %v693_v26 = vshll.u32 %v224_v11, 16  ;;  %v231_v15 = vld [vmem:[%s10965_s10 + $0xac] sm:$0xf] }
  0x65   : > { %17945 = vst [vmem:[#allocation7_spill] sm:$0xff] %v11156_v49  ;;  %2890 = vrot.lane.b32.xlu1 %v11156_v49, %s10855_s11  ;;  %v722_v29 = vsel %vm10976_vm2, %v717_v19, %v721_v6  ;;  %v699_v30 = vshll.u32 %v225_v12, 16  ;;  %v703_v31 = vshrl.u32 %v225_v12, 16  ;;  %v669_v32 = vshrl.u32 %v11100_v50, 16 }
  0x66   : > { %v11167_v17 = vpack.c.b16 %v2697_v20, %v2696_v18  ;;  %v727_v33 = vrot.slane %v726_v21, 4  ;;  %v2706_v34 = vunpack.c.l.b16 %v722_v29  ;;  %v695_v35 = vrot.slane %v693_v26, 5 }
  0x67   : > { %v701_v36 = vrot.slane %v699_v30, 5  ;;  %v705_v37 = vrot.slane %v703_v31, 4  ;;  %v671_v38 = vrot.slane %v669_v32, 4  ;;  %v675_v39 = vshll.u32 %v222_v28, 16  ;;  %v232_v30 = vld [vmem:[%s10965_s10 + $0xb0] sm:$0x1] }
  0x68   : > { %17946 = vst [vmem:[#allocation8_spill] sm:$0xff] %v11167_v17  ;;  %2888 = vrot.lane.b32.xlu0 %v11167_v17, %s10855_s11  ;;  %v732_v41 = vsel %vm10976_vm2, %v727_v33, %v11153_v10  ;;  %v696_v42 = vor.u32 %v695_v35, %v692_v24  ;;  %v679_v50 = vshrl.u32 %v222_v28, 16  ;;  %v685_v1 = vshll.u32 %v223_v27, 16 }
  0x69   : > { %v2707_v44 = vunpack.c.l.b16 %v732_v41  ;;  %v706_v45 = vor.u32 %v705_v37, %v701_v36  ;;  %v672_v47 = vor.u32 %v671_v38, %v11118_v14  ;;  %v677_v51 = vrot.slane %v675_v39, 5 }
  0x6a   : > { %v697_v57 = vrot.slane %v696_v42, 4  ;;  %v681_v58 = vrot.slane %v679_v50, 4  ;;  %v687_v59 = vrot.slane %v685_v1, 5  ;;  %v774_v60 = vshrl.u32 %v233_v40, 16 }
  0x6b   : > { %v11177_v61 = vpack.c.b16 %v2707_v44, %v2706_v34  ;;  %v707_v11 = vrot.slane %v706_v45, 4  ;;  %v673_v62 = vrot.slane %v672_v47, 4  ;;  %v777_v63 = vshll.u32 %v233_v40, 16  ;;  %v229_v40 = vld [vmem:[%s10965_s10 + $0xa4] sm:$0xf] }
  0x6c   : > { %v702_v0 = vsel %vm10976_vm2, %v697_v57, %v701_v36  ;;  %v682_v2 = vor.u32 %v681_v58, %v677_v51  ;;  %v776_v14 = vrot.slane %v774_v60, 4  ;;  %v783_v4 = vshll.u32 %v234_v54, 16  ;;  %v239_v44 = vld [vmem:[%s10965_s10 + $0xcc] sm:$0xf] }
  0x6d   : > { %17947 = vst [vmem:[#allocation9_spill] sm:$0xff] %v11177_v61  ;;  %2898 = vrot.lane.b32.xlu2 %v11177_v61, %s10855_s11  ;;  %v712_v6 = vsel %vm10976_vm2, %v707_v11, %v11141_v22  ;;  %v2704_v7 = vunpack.c.l.b16 %v702_v0  ;;  %v678_v8 = vsel %vm10976_vm2, %v673_v62, %v677_v51  ;;  %v779_v12 = vrot.slane %v777_v63, 5 }
  0x6e   : > { %v2705_v16 = vunpack.c.l.b16 %v712_v6  ;;  %v683_v18 = vrot.slane %v682_v2, 4  ;;  %v2702_v19 = vunpack.c.l.b16 %v678_v8  ;;  %v785_v20 = vrot.slane %v783_v4, 5 }
  0x6f   : > { %v780_v21 = vor.u32 %v779_v12, %v776_v14  ;;  %v787_v24 = vshrl.u32 %v234_v54, 16  ;;  %v793_v26 = vshll.u32 %v11182_v55, 16  ;;  %v749_v28 = vshll.u32 %v230_v5, 16 }
  0x70   : > { %v11194_v29 = vpack.c.b16 %v2705_v16, %v2704_v7  ;;  %v688_v22 = vsel %vm10976_vm2, %v683_v18, %v687_v59  ;;  %v753_v31 = vshrl.u32 %v230_v5, 16  ;;  %v759_v27 = vshll.u32 %v231_v15, 16  ;;  %v241_v18 = vld [vmem:[%s10965_s10 + $0xd4] sm:$0x1] }
  0x71   : > { %v2703_v32 = vunpack.c.l.b16 %v688_v22  ;;  %v781_v33 = vrot.slane %v780_v21, 4  ;;  %v789_v34 = vrot.slane %v787_v24, 4  ;;  %v11199_v35 = vrot.slane %v793_v26, 5  ;;  %v237_v21 = vld [vmem:[%s10965_s10 + $0xc4] sm:$0xf] }
  0x72   : > { %17948 = vst [vmem:[#allocation10_spill] sm:$0xff] %v11194_v29  ;;  %2896 = vrot.lane.b32.xlu1 %v11194_v29, %s10855_s11  ;;  %v751_v36 = vrot.slane %v749_v28, 5  ;;  %v755_v37 = vrot.slane %v753_v31, 4  ;;  %v761_v38 = vrot.slane %v759_v27, 5  ;;  %v763_v39 = vshrl.u32 %v231_v15, 16 }
  0x73   : > { %v11204_v41 = vpack.c.b16 %v2703_v32, %v2702_v19  ;;  %v786_v42 = vsel %vm10976_vm2, %v781_v33, %v785_v20  ;;  %v790_v50 = vor.u32 %v789_v34, %v785_v20  ;;  %v769_v1 = vshll.u32 %v232_v30, 16 }
  0x74   : > { %v2712_v45 = vunpack.c.l.b16 %v786_v42  ;;  %v756_v47 = vor.u32 %v755_v37, %v751_v36  ;;  %v765_v51 = vrot.slane %v763_v39, 4  ;;  %v733_v54 = vshrl.u32 %v11137_v48, 16  ;;  %v240_v48 = vld [vmem:[%s10965_s10 + $0xd0] sm:$0xf]  ;;  %v238_v37 = vld [vmem:[%s10965_s10 + $0xc8] sm:$0xf] }
  0x75   : > { %17949 = vst [vmem:[#allocation11_spill] sm:$0xff] %v11204_v41  ;;  %2894 = vrot.lane.b32.xlu0 %v11204_v41, %s10855_s11  ;;  %v791_v57 = vrot.slane %v790_v50, 4  ;;  %v771_v58 = vrot.slane %v769_v1, 5  ;;  %v739_v59 = vshll.u32 %v229_v40, 16  ;;  %v743_v60 = vshrl.u32 %v229_v40, 16 }
  0x76   : > { %v757_v11 = vrot.slane %v756_v47, 4  ;;  %v766_v62 = vor.u32 %v765_v51, %v761_v38  ;;  %v735_v63 = vrot.slane %v733_v54, 4  ;;  %v833_v0 = vshll.u32 %v239_v44, 16  ;;  %v236_v51 = vld [vmem:[%s10965_s10 + $0xc0] sm:$0xf] }
  0x77   : > { %v796_v2 = vsel %vm10976_vm2, %v791_v57, %v11199_v35  ;;  %v741_v14 = vrot.slane %v739_v59, 5  ;;  %v745_v4 = vrot.slane %v743_v60, 4  ;;  %v837_v5 = vshrl.u32 %v239_v44, 16  ;;  %v246_v60 = vld [vmem:[%s10965_s10 + $0xe8] sm:$0xf] }
  0x78   : > { %v2713_v6 = vunpack.c.l.b16 %v796_v2  ;;  %v762_v7 = vsel %vm10976_vm2, %v757_v11, %v761_v38  ;;  %v767_v8 = vrot.slane %v766_v62, 4  ;;  %v736_v12 = vor.u32 %v735_v63, %v11153_v10 }
  0x79   : > { %v2710_v15 = vunpack.c.l.b16 %v762_v7  ;;  %v746_v16 = vor.u32 %v745_v4, %v741_v14  ;;  %v11220_v19 = vrot.slane %v833_v0, 5  ;;  %v839_v20 = vrot.slane %v837_v5, 4 }
  0x7a   : > { %v11223_v24 = vpack.c.b16 %v2713_v6, %v2712_v45  ;;  %v772_v26 = vsel %vm10976_vm2, %v767_v8, %v771_v58  ;;  %v737_v28 = vrot.slane %v736_v12, 4  ;;  %v843_v22 = vshll.u32 %v240_v48, 16 }
  0x7b   : > { %v2711_v30 = vunpack.c.l.b16 %v772_v26  ;;  %v747_v31 = vrot.slane %v746_v16, 4  ;;  %v840_v27 = vor.u32 %v839_v20, %v11220_v19  ;;  %v847_v10 = vshrl.u32 %v240_v48, 16  ;;  %v247_v16 = vld [vmem:[%s10965_s10 + $0xec] sm:$0xf] }
  0x7c   : > { %17950 = vst [vmem:[#allocation12_spill] sm:$0xff] %v11223_v24  ;;  %2904 = vrot.lane.b32.xlu2 %v11223_v24, %s10855_s11  ;;  %v742_v32 = vsel %vm10976_vm2, %v737_v28, %v741_v14  ;;  %v845_v33 = vrot.slane %v843_v22, 5  ;;  %v853_v34 = vshll.u32 %v241_v18, 16  ;;  %v813_v38 = vshll.u32 %v237_v21, 16 }
  0x7d   : > { %v11233_v39 = vpack.c.b16 %v2711_v30, %v2710_v15  ;;  %v752_v40 = vsel %vm10976_vm2, %v747_v31, %v751_v36  ;;  %v2708_v42 = vunpack.c.l.b16 %v742_v32  ;;  %v841_v50 = vrot.slane %v840_v27, 4 }
  0x7e   : > { %v2709_v1 = vunpack.c.l.b16 %v752_v40  ;;  %v849_v44 = vrot.slane %v847_v10, 4  ;;  %v855_v45 = vrot.slane %v853_v34, 5  ;;  %v815_v47 = vrot.slane %v813_v38, 5  ;;  %v11262_v38 = vld [vmem:[%s10965_s10 + $0xf0] sm:$0xf] }
  0x7f   : > { %17951 = vst [vmem:[#allocation13_spill] sm:$0xff] %v11233_v39  ;;  %2902 = vrot.lane.b32.xlu1 %v11233_v39, %s10855_s11  ;;  %v846_v54 = vsel %vm10976_vm2, %v841_v50, %v845_v33  ;;  %v817_v57 = vshrl.u32 %v237_v21, 16  ;;  %v823_v58 = vshll.u32 %v238_v37, 16  ;;  %v827_v59 = vshrl.u32 %v238_v37, 16 }
  0x80   : > { %v11243_v11 = vpack.c.b16 %v2709_v1, %v2708_v42  ;;  %v850_v36 = vor.u32 %v849_v44, %v845_v33  ;;  %v2718_v62 = vunpack.c.l.b16 %v846_v54  ;;  %v797_v63 = vshrl.u32 %v11182_v55, 16  ;;  %v244_v42 = vld [vmem:[%s10965_s10 + $0xe0] sm:$0xf] }
  0x81   : > { %v819_v0 = vrot.slane %v817_v57, 4  ;;  %v825_v2 = vrot.slane %v823_v58, 5  ;;  %v829_v14 = vrot.slane %v827_v59, 4  ;;  %v803_v4 = vshll.u32 %v236_v51, 16  ;;  %v245_v58 = vld [vmem:[%s10965_s10 + $0xe4] sm:$0xf] }
  0x82   : > { %17952 = vst [vmem:[#allocation14_spill] sm:$0xff] %v11243_v11  ;;  %2900 = vrot.lane.b32.xlu0 %v11243_v11, %s10855_s11  ;;  %v851_v48 = vrot.slane %v850_v36, 4  ;;  %v799_v5 = vrot.slane %v797_v63, 4  ;;  %v807_v6 = vshrl.u32 %v236_v51, 16  ;;  %v897_v7 = vshll.u32 %v246_v60, 16 }
  0x83   : > { %v820_v8 = vor.u32 %v819_v0, %v815_v47  ;;  %v830_v12 = vor.u32 %v829_v14, %v825_v2  ;;  %v805_v15 = vrot.slane %v803_v4, 5  ;;  %v901_v18 = vshrl.u32 %v246_v60, 16  ;;  %v242_v4 = vld [vmem:[%s10965_s10 + $0xd8] sm:$0xf] }
  0x84   : > { %v856_v55 = vsel %vm10976_vm2, %v851_v48, %v855_v45  ;;  %v800_v20 = vor.u32 %v799_v5, %v11199_v35  ;;  %v809_v21 = vrot.slane %v807_v6, 4  ;;  %v11252_v26 = vrot.slane %v897_v7, 5  ;;  %v243_v48 = vld [vmem:[%s10965_s10 + $0xdc] sm:$0xf] }
  0x85   : > { %v2719_v28 = vunpack.c.l.b16 %v856_v55  ;;  %v821_v22 = vrot.slane %v820_v8, 4  ;;  %v831_v30 = vrot.slane %v830_v12, 4  ;;  %v903_v31 = vrot.slane %v901_v18, 4 }
  0x86   : > { %v801_v27 = vrot.slane %v800_v20, 4  ;;  %v810_v10 = vor.u32 %v809_v21, %v805_v15  ;;  %v907_v32 = vshll.u32 %v247_v16, 16  ;;  %v911_v33 = vshrl.u32 %v247_v16, 16 }
  0x87   : > { %v11254_v34 = vpack.c.b16 %v2719_v28, %v2718_v62  ;;  %v826_v37 = vsel %vm10976_vm2, %v821_v22, %v825_v2  ;;  %v836_v35 = vsel %vm10976_vm2, %v831_v30, %v11220_v19  ;;  %v904_v40 = vor.u32 %v903_v31, %v11252_v26  ;;  %v253_v28 = vld [vmem:[%s10965_s10 + $0x104] sm:$0xf] }
  0x88   : > { %v2716_v50 = vunpack.c.l.b16 %v826_v37  ;;  %v2717_v1 = vunpack.c.l.b16 %v836_v35  ;;  %v806_v44 = vsel %vm10976_vm2, %v801_v27, %v805_v15  ;;  %v811_v45 = vrot.slane %v810_v10, 4  ;;  %v254_v10 = vld [vmem:[%s10965_s10 + $0x108] sm:$0xf] }
  0x89   : > { %17953 = vst [vmem:[#allocation15_spill] sm:$0xff] %v11254_v34  ;;  %2910 = vrot.lane.b32.xlu2 %v11254_v34, %s10855_s11  ;;  %v2714_v51 = vunpack.c.l.b16 %v806_v44  ;;  %v905_v54 = vrot.slane %v904_v40, 4  ;;  %v909_v57 = vrot.slane %v907_v32, 5  ;;  %v913_v19 = vrot.slane %v911_v33, 4 }
  0x8a   : > { %v11271_v59 = vpack.c.b16 %v2717_v1, %v2716_v50  ;;  %v816_v60 = vsel %vm10976_vm2, %v811_v45, %v815_v47  ;;  %v917_v36 = vshll.u32 %v11262_v38, 16  ;;  %v877_v62 = vshll.u32 %v244_v42, 16 }
  0x8b   : > { %v2715_v63 = vunpack.c.l.b16 %v816_v60  ;;  %v910_v0 = vsel %vm10976_vm2, %v905_v54, %v909_v57  ;;  %v914_v2 = vor.u32 %v913_v19, %v909_v57  ;;  %v881_v14 = vshrl.u32 %v244_v42, 16 }
  0x8c   : > { %17954 = vst [vmem:[#allocation16_spill] sm:$0xff] %v11271_v59  ;;  %2908 = vrot.lane.b32.xlu1 %v11271_v59, %s10855_s11  ;;  %v11282_v5 = vrot.slane %v917_v36, 5  ;;  %v2724_v6 = vunpack.c.l.b16 %v910_v0  ;;  %v879_v7 = vrot.slane %v877_v62, 5  ;;  %v887_v47 = vshll.u32 %v245_v58, 16  ;;  %v251_v62 = vld [vmem:[%s10965_s10 + $0xfc] sm:$0xf] }
  0x8d   : > { %v11284_v8 = vpack.c.b16 %v2715_v63, %v2714_v51  ;;  %v915_v12 = vrot.slane %v914_v2, 4  ;;  %v883_v15 = vrot.slane %v881_v14, 4  ;;  %v891_v16 = vshrl.u32 %v245_v58, 16  ;;  %v11296_v51 = vld [vmem:[%s10965_s10 + $0x10c] sm:$0xf] }
  0x8e   : > { %v889_v18 = vrot.slane %v887_v47, 5  ;;  %v858_v55 = vshrl.u32 %v242_v4, 16  ;;  %v861_v20 = vshll.u32 %v242_v4, 16  ;;  %v867_v21 = vshll.u32 %v243_v48, 16 }
  0x8f   : > { %17955 = vst [vmem:[#allocation17_spill] sm:$0xff] %v11284_v8  ;;  %2906 = vrot.lane.b32.xlu0 %v11284_v8, %s10855_s11  ;;  %v920_v22 = vsel %vm10976_vm2, %v915_v12, %v11282_v5  ;;  %v884_v30 = vor.u32 %v883_v15, %v879_v7  ;;  %v893_v31 = vrot.slane %v891_v16, 4  ;;  %v871_v27 = vshrl.u32 %v243_v48, 16 }
  0x90   : > { %v2725_v32 = vunpack.c.l.b16 %v920_v22  ;;  %v860_v33 = vrot.slane %v858_v55, 4  ;;  %v863_v37 = vrot.slane %v861_v20, 5  ;;  %v869_v35 = vrot.slane %v867_v21, 5 }
  0x91   : > { %v885_v40 = vrot.slane %v884_v30, 4  ;;  %v894_v42 = vor.u32 %v893_v31, %v889_v18  ;;  %v873_v50 = vrot.slane %v871_v27, 4  ;;  %v961_v1 = vshll.u32 %v253_v28, 16 }
  0x92   : > { %v11293_v44 = vpack.c.b16 %v2725_v32, %v2724_v6  ;;  %v864_v45 = vor.u32 %v863_v37, %v860_v33  ;;  %v965_v54 = vshrl.u32 %v253_v28, 16  ;;  %v971_v57 = vshll.u32 %v254_v10, 16 }
  0x93   : > { %v890_v19 = vsel %vm10976_vm2, %v885_v40, %v889_v18  ;;  %v895_v58 = vrot.slane %v894_v42, 4  ;;  %v874_v60 = vor.u32 %v873_v50, %v869_v35  ;;  %v11300_v36 = vrot.slane %v961_v1, 5  ;;  %v252_v18 = vld [vmem:[%s10965_s10 + $0x100] sm:$0xf]  ;;  %v250_v42 = vld [vmem:[%s10965_s10 + $0xf8] sm:$0x1] }
  0x94   : > { %2916 = vrot.lane.b32.xlu2 %v11293_v44, %s10855_s11  ;;  %v2722_v63 = vunpack.c.l.b16 %v890_v19  ;;  %v865_v0 = vrot.slane %v864_v45, 4  ;;  %v967_v2 = vrot.slane %v965_v54, 4  ;;  %v973_v14 = vrot.slane %v971_v57, 5  ;;  %v260_v45 = vld [vmem:[%s10965_s10 + $0x120] sm:$0xf] }
  0x95   : > { %v900_v4 = vsel %vm10976_vm2, %v895_v58, %v11252_v26  ;;  %v875_v48 = vrot.slane %v874_v60, 4  ;;  %v975_v6 = vshrl.u32 %v254_v10, 16  ;;  %v981_v47 = vshll.u32 %v11296_v51, 16  ;;  %v249_v26 = vld [vmem:[%s10965_s10 + $0xf4] sm:$0xf] }
  0x96   : > { %v2723_v12 = vunpack.c.l.b16 %v900_v4  ;;  %v870_v15 = vsel %vm10976_vm2, %v865_v0, %v869_v35  ;;  %v968_v16 = vor.u32 %v967_v2, %v11300_v36  ;;  %v942_v55 = vshrl.u32 %v251_v62, 16 }
  0x97   : > { %v880_v20 = vsel %vm10976_vm2, %v875_v48, %v879_v7  ;;  %v2720_v21 = vunpack.c.l.b16 %v870_v15  ;;  %v977_v28 = vrot.slane %v975_v6, 4  ;;  %v11315_v22 = vrot.slane %v981_v47, 5  ;;  %v261_v15 = vld [vmem:[%s10965_s10 + $0x124] sm:$0xf] }
  0x98   : > { %v11318_v30 = vpack.c.b16 %v2723_v12, %v2722_v63  ;;  %v2721_v31 = vunpack.c.l.b16 %v880_v20  ;;  %v969_v27 = vrot.slane %v968_v16, 4  ;;  %v944_v10 = vrot.slane %v942_v55, 4 }
  0x99   : > { %v978_v32 = vor.u32 %v977_v28, %v973_v14  ;;  %v945_v33 = vshll.u32 %v251_v62, 16  ;;  %v951_v37 = vshll.u32 %v252_v18, 16  ;;  %v955_v35 = vshrl.u32 %v252_v18, 16 }
  0x9a   : > { %2914 = vrot.lane.b32.xlu1 %v11318_v30, %s10855_s11  ;;  %v11322_v7 = vpack.c.b16 %v2721_v31, %v2720_v21  ;;  %v974_v40 = vsel %vm10976_vm2, %v969_v27, %v973_v14  ;;  %v921_v50 = vshrl.u32 %v11262_v38, 16  ;;  %v927_v1 = vshll.u32 %v249_v26, 16  ;;  %v257_v27 = vld [vmem:[%s10965_s10 + $0x114] sm:$0xf] }
  0x9b   : > { %v979_v54 = vrot.slane %v978_v32, 4  ;;  %v2730_v57 = vunpack.c.l.b16 %v974_v40  ;;  %v947_v19 = vrot.slane %v945_v33, 5  ;;  %v953_v58 = vrot.slane %v951_v37, 5  ;;  %v11342_v32 = vld [vmem:[%s10965_s10 + $0x128] sm:$0xf] }
  0x9c   : > { %2912 = vrot.lane.b32.xlu0 %v11322_v7, %s10855_s11  ;;  %v957_v60 = vrot.slane %v955_v35, 4  ;;  %v923_v62 = vrot.slane %v921_v50, 4  ;;  %v929_v63 = vrot.slane %v927_v1, 5  ;;  %v931_v0 = vshrl.u32 %v249_v26, 16 }
  0x9d   : > { %v984_v2 = vsel %vm10976_vm2, %v979_v54, %v11315_v22  ;;  %v948_v14 = vor.u32 %v947_v19, %v944_v10  ;;  %v937_v38 = vshll.u32 %v250_v42, 16  ;;  %v1026_v4 = vshrl.u32 %v260_v45, 16  ;;  %v258_v19 = vld [vmem:[%s10965_s10 + $0x118] sm:$0xf] }
  0x9e   : > { %v2731_v48 = vunpack.c.l.b16 %v984_v2  ;;  %v958_v6 = vor.u32 %v957_v60, %v953_v58  ;;  %v924_v47 = vor.u32 %v923_v62, %v11282_v5  ;;  %v933_v12 = vrot.slane %v931_v0, 4 }
  0x9f   : > { %v949_v16 = vrot.slane %v948_v14, 4  ;;  %v939_v18 = vrot.slane %v937_v38, 5  ;;  %v1028_v55 = vrot.slane %v1026_v4, 4  ;;  %v1029_v20 = vshll.u32 %v260_v45, 16 }
  0xa0   : > { %v11336_v21 = vpack.c.b16 %v2731_v48, %v2730_v57  ;;  %v959_v28 = vrot.slane %v958_v6, 4  ;;  %v925_v26 = vrot.slane %v924_v47, 4  ;;  %v934_v31 = vor.u32 %v933_v12, %v929_v63  ;;  %v256_v12 = vld [vmem:[%s10965_s10 + $0x110] sm:$0xf] }
  0xa1   : > { %v954_v10 = vsel %vm10976_vm2, %v949_v16, %v953_v58  ;;  %v1031_v33 = vrot.slane %v1029_v20, 5  ;;  %v1035_v5 = vshll.u32 %v261_v15, 16  ;;  %v1039_v37 = vshrl.u32 %v261_v15, 16  ;;  %v266_v20 = vld [vmem:[%s10965_s10 + $0x138] sm:$0xf] }
  0xa2   : > { %17956 = vst [vmem:[#allocation18_spill] sm:$0xff] %v11336_v21  ;;  %2922 = vrot.lane.b32.xlu2 %v11336_v21, %s10855_s11  ;;  %v964_v35 = vsel %vm10976_vm2, %v959_v28, %v11300_v36  ;;  %v2728_v40 = vunpack.c.l.b16 %v954_v10  ;;  %v930_v42 = vsel %vm10976_vm2, %v925_v26, %v929_v63  ;;  %v935_v50 = vrot.slane %v934_v31, 4  ;;  %v259_v63 = vld [vmem:[%s10965_s10 + $0x11c] sm:$0x1] }
  0xa3   : > { %v2729_v1 = vunpack.c.l.b16 %v964_v35  ;;  %v2726_v45 = vunpack.c.l.b16 %v930_v42  ;;  %v1032_v54 = vor.u32 %v1031_v33, %v1028_v55  ;;  %v1037_v57 = vrot.slane %v1035_v5, 5 }
  0xa4   : > { %v940_v58 = vsel %vm10976_vm2, %v935_v50, %v939_v18  ;;  %v1041_v60 = vrot.slane %v1039_v37, 4  ;;  %v1045_v62 = vshll.u32 %v11342_v32, 16  ;;  %v1001_v0 = vshll.u32 %v257_v27, 16 }
  0xa5   : > { %v11355_v36 = vpack.c.b16 %v2729_v1, %v2728_v40  ;;  %v2727_v2 = vunpack.c.l.b16 %v940_v58  ;;  %v1033_v14 = vrot.slane %v1032_v54, 4  ;;  %v1005_v38 = vshrl.u32 %v257_v27, 16 }
  0xa6   : > { %v1042_v4 = vor.u32 %v1041_v60, %v1037_v57  ;;  %v11358_v48 = vrot.slane %v1045_v62, 5  ;;  %v1003_v6 = vrot.slane %v1001_v0, 5  ;;  %v1011_v47 = vshll.u32 %v258_v19, 16  ;;  %v268_v62 = vld [vmem:[%s10965_s10 + $0x140] sm:$0x1] }
  0xa7   : > { %17957 = vst [vmem:[#allocation19_spill] sm:$0xff] %v11355_v36  ;;  %2920 = vrot.lane.b32.xlu1 %v11355_v36, %s10855_s11  ;;  %v11363_v15 = vpack.c.b16 %v2727_v2, %v2726_v45  ;;  %v1038_v16 = vsel %vm10976_vm2, %v1033_v14, %v1037_v57  ;;  %v1007_v18 = vrot.slane %v1005_v38, 4  ;;  %v1015_v55 = vshrl.u32 %v258_v19, 16  ;;  %v267_v19 = vld [vmem:[%s10965_s10 + $0x13c] sm:$0xf] }
  0xa8   : > { %v1043_v28 = vrot.slane %v1042_v4, 4  ;;  %v2736_v26 = vunpack.c.l.b16 %v1038_v16  ;;  %v1013_v31 = vrot.slane %v1011_v47, 5  ;;  %v1021_v27 = vshll.u32 %v259_v63, 16 }
  0xa9   : > { %2918 = vrot.lane.b32.xlu0 %v11363_v15, %s10855_s11  ;;  %v1008_v10 = vor.u32 %v1007_v18, %v1003_v6  ;;  %v1017_v33 = vrot.slane %v1015_v55, 4  ;;  %v985_v5 = vshrl.u32 %v11296_v51, 16  ;;  %v991_v37 = vshll.u32 %v256_v12, 16  ;;  %v264_v18 = vld [vmem:[%s10965_s10 + $0x130] sm:$0xf] }
  0xaa   : > { %v1048_v35 = vsel %vm10976_vm2, %v1043_v28, %v11358_v48  ;;  %v1023_v40 = vrot.slane %v1021_v27, 5  ;;  %v995_v42 = vshrl.u32 %v256_v12, 16  ;;  %v1085_v50 = vshll.u32 %v266_v20, 16 }
  0xab   : > { %v2737_v1 = vunpack.c.l.b16 %v1048_v35  ;;  %v1009_v45 = vrot.slane %v1008_v10, 4  ;;  %v1018_v54 = vor.u32 %v1017_v33, %v1013_v31  ;;  %v987_v57 = vrot.slane %v985_v5, 4  ;;  %v265_v35 = vld [vmem:[%s10965_s10 + $0x134] sm:$0xf] }
  0xac   : > { %v993_v58 = vrot.slane %v991_v37, 5  ;;  %v997_v60 = vrot.slane %v995_v42, 4  ;;  %v11376_v0 = vrot.slane %v1085_v50, 5  ;;  %v1089_v51 = vshrl.u32 %v266_v20, 16 }
  0xad   : > { %v11378_v2 = vpack.c.b16 %v2737_v1, %v2736_v26  ;;  %v1014_v14 = vsel %vm10976_vm2, %v1009_v45, %v1013_v31  ;;  %v1019_v63 = vrot.slane %v1018_v54, 4  ;;  %v988_v38 = vor.u32 %v987_v57, %v11315_v22 }
  0xae   : > { %v2734_v4 = vunpack.c.l.b16 %v1014_v14  ;;  %v998_v47 = vor.u32 %v997_v60, %v993_v58  ;;  %v1091_v12 = vrot.slane %v1089_v51, 4  ;;  %v1095_v16 = vshll.u32 %v267_v19, 16 }
  0xaf   : > { %17958 = vst [vmem:[#allocation20_spill] sm:$0xff] %v11378_v2  ;;  %2928 = vrot.lane.b32.xlu2 %v11378_v2, %s10855_s11  ;;  %v1024_v55 = vsel %vm10976_vm2, %v1019_v63, %v1023_v40  ;;  %v989_v20 = vrot.slane %v988_v38, 4  ;;  %v1099_v28 = vshrl.u32 %v267_v19, 16  ;;  %v1105_v26 = vshll.u32 %v268_v62, 16  ;;  %v263_v62 = vld [vmem:[%s10965_s10 + $0x12c] sm:$0xf] }
  0xb0   : > { %v2735_v27 = vunpack.c.l.b16 %v1024_v55  ;;  %v999_v31 = vrot.slane %v998_v47, 4  ;;  %v1092_v22 = vor.u32 %v1091_v12, %v11376_v0  ;;  %v1097_v10 = vrot.slane %v1095_v16, 5 }
  0xb1   : > { %v994_v33 = vsel %vm10976_vm2, %v989_v20, %v993_v58  ;;  %v1101_v5 = vrot.slane %v1099_v28, 4  ;;  %v1107_v37 = vrot.slane %v1105_v26, 5  ;;  %v1065_v42 = vshll.u32 %v264_v18, 16  ;;  %v273_v20 = vld [vmem:[%s10965_s10 + $0x154] sm:$0xf] }
  0xb2   : > { %v11392_v50 = vpack.c.b16 %v2735_v27, %v2734_v4  ;;  %v1004_v40 = vsel %vm10976_vm2, %v999_v31, %v1003_v6  ;;  %v2732_v1 = vunpack.c.l.b16 %v994_v33  ;;  %v1093_v45 = vrot.slane %v1092_v22, 4  ;;  %v274_v33 = vld [vmem:[%s10965_s10 + $0x158] sm:$0xf] }
  0xb3   : > { %v2733_v54 = vunpack.c.l.b16 %v1004_v40  ;;  %v1102_v57 = vor.u32 %v1101_v5, %v1097_v10  ;;  %v1067_v19 = vrot.slane %v1065_v42, 5  ;;  %v1069_v60 = vshrl.u32 %v264_v18, 16 }
  0xb4   : > { %17959 = vst [vmem:[#allocation21_spill] sm:$0xff] %v11392_v50  ;;  %2926 = vrot.lane.b32.xlu1 %v11392_v50, %s10855_s11  ;;  %v1098_v58 = vsel %vm10976_vm2, %v1093_v45, %v1097_v10  ;;  %v1075_v51 = vshll.u32 %v265_v35, 16  ;;  %v1079_v14 = vshrl.u32 %v265_v35, 16  ;;  %v1049_v63 = vshrl.u32 %v11342_v32, 16 }
  0xb5   : > { %v11402_v38 = vpack.c.b16 %v2733_v54, %v2732_v1  ;;  %v1103_v6 = vrot.slane %v1102_v57, 4  ;;  %v2742_v4 = vunpack.c.l.b16 %v1098_v58  ;;  %v1071_v47 = vrot.slane %v1069_v60, 4  ;;  %v11416_v60 = vld [vmem:[%s10965_s10 + $0x15c] sm:$0xf]  ;;  %v271_v58 = vld [vmem:[%s10965_s10 + $0x14c] sm:$0xf] }
  0xb6   : > { %v1077_v12 = vrot.slane %v1075_v51, 5  ;;  %v1081_v16 = vrot.slane %v1079_v14, 4  ;;  %v1051_v18 = vrot.slane %v1049_v63, 4  ;;  %v1055_v55 = vshll.u32 %v263_v62, 16 }
  0xb7   : > { %17960 = vst [vmem:[#allocation22_spill] sm:$0xff] %v11402_v38  ;;  %2924 = vrot.lane.b32.xlu0 %v11402_v38, %s10855_s11  ;;  %v1108_v28 = vsel %vm10976_vm2, %v1103_v6, %v1107_v37  ;;  %v1072_v26 = vor.u32 %v1071_v47, %v1067_v19  ;;  %v1059_v32 = vshrl.u32 %v263_v62, 16  ;;  %v1149_v42 = vshll.u32 %v273_v20, 16 }
  0xb8   : > { %v2743_v27 = vunpack.c.l.b16 %v1108_v28  ;;  %v1082_v31 = vor.u32 %v1081_v16, %v1077_v12  ;;  %v1052_v22 = vor.u32 %v1051_v18, %v11358_v48  ;;  %v1057_v10 = vrot.slane %v1055_v55, 5 }
  0xb9   : > { %v1073_v5 = vrot.slane %v1072_v26, 4  ;;  %v1061_v35 = vrot.slane %v1059_v32, 4  ;;  %v1153_v54 = vshrl.u32 %v273_v20, 16  ;;  %v11418_v62 = vrot.slane %v1149_v42, 5 }
  0xba   : > { %v11411_v40 = vpack.c.b16 %v2743_v27, %v2742_v4  ;;  %v1083_v1 = vrot.slane %v1082_v31, 4  ;;  %v1053_v45 = vrot.slane %v1052_v22, 4  ;;  %v1159_v48 = vshll.u32 %v274_v33, 16  ;;  %v272_v4 = vld [vmem:[%s10965_s10 + $0x150] sm:$0xf] }
  0xbb   : > { %v1078_v37 = vsel %vm10976_vm2, %v1073_v5, %v1077_v12  ;;  %v1062_v57 = vor.u32 %v1061_v35, %v1057_v10  ;;  %v1155_v6 = vrot.slane %v1153_v54, 4  ;;  %v1163_v20 = vshrl.u32 %v274_v33, 16  ;;  %v269_v22 = vld [vmem:[%s10965_s10 + $0x144] sm:$0xf] }
  0xbc   : > { %17961 = vst [vmem:[#allocation23_spill] sm:$0xff] %v11411_v40  ;;  %2934 = vrot.lane.b32.xlu2 %v11411_v40, %s10855_s11  ;;  %v1088_v51 = vsel %vm10976_vm2, %v1083_v1, %v11376_v0  ;;  %v2740_v14 = vunpack.c.l.b16 %v1078_v37  ;;  %v1058_v63 = vsel %vm10976_vm2, %v1053_v45, %v1057_v10  ;;  %v1161_v18 = vrot.slane %v1159_v48, 5  ;;  %v270_v37 = vld [vmem:[%s10965_s10 + $0x148] sm:$0xf] }
  0xbd   : > { %v2741_v47 = vunpack.c.l.b16 %v1088_v51  ;;  %v1063_v12 = vrot.slane %v1062_v57, 4  ;;  %v2738_v16 = vunpack.c.l.b16 %v1058_v63  ;;  %v1156_v55 = vor.u32 %v1155_v6, %v11418_v62  ;;  %v280_v6 = vld [vmem:[%s10965_s10 + $0x170] sm:$0xf] }
  0xbe   : > { %v1169_v28 = vshll.u32 %v11416_v60, 16  ;;  %v1129_v26 = vshll.u32 %v271_v58, 16  ;;  %v1133_v27 = vshrl.u32 %v271_v58, 16  ;;  %v1139_v31 = vshll.u32 %v272_v4, 16 }
  0xbf   : > { %v11431_v32 = vpack.c.b16 %v2741_v47, %v2740_v14  ;;  %v1068_v0 = vsel %vm10976_vm2, %v1063_v12, %v1067_v19  ;;  %v1157_v5 = vrot.slane %v1156_v55, 4  ;;  %v1165_v35 = vrot.slane %v1163_v20, 4 }
  0xc0   : > { %v2739_v10 = vunpack.c.l.b16 %v1068_v0  ;;  %v11436_v42 = vrot.slane %v1169_v28, 5  ;;  %v1131_v33 = vrot.slane %v1129_v26, 5  ;;  %v1135_v1 = vrot.slane %v1133_v27, 4 }
  0xc1   : > { %17962 = vst [vmem:[#allocation24_spill] sm:$0xff] %v11431_v32  ;;  %2932 = vrot.lane.b32.xlu1 %v11431_v32, %s10855_s11  ;;  %v1141_v45 = vrot.slane %v1139_v31, 5  ;;  %v1143_v54 = vshrl.u32 %v272_v4, 16  ;;  %v1162_v19 = vsel %vm10976_vm2, %v1157_v5, %v1161_v18  ;;  %v1166_v48 = vor.u32 %v1165_v35, %v1161_v18  ;;  %v281_v31 = vld [vmem:[%s10965_s10 + $0x174] sm:$0xf] }
  0xc2   : > { %v11441_v57 = vpack.c.b16 %v2739_v10, %v2738_v16  ;;  %v1110_v58 = vshrl.u32 %v269_v22, 16  ;;  %v1136_v51 = vor.u32 %v1135_v1, %v1131_v33  ;;  %v1113_v63 = vshll.u32 %v269_v22, 16 }
  0xc3   : > { %v1145_v14 = vrot.slane %v1143_v54, 4  ;;  %v1167_v47 = vrot.slane %v1166_v48, 4  ;;  %v1119_v55 = vshll.u32 %v270_v37, 16  ;;  %v1123_v4 = vshrl.u32 %v270_v37, 16 }
  0xc4   : > { %17963 = vst [vmem:[#allocation25_spill] sm:$0xff] %v11441_v57  ;;  %2930 = vrot.lane.b32.xlu0 %v11441_v57, %s10855_s11  ;;  %v1112_v12 = vrot.slane %v1110_v58, 4  ;;  %v2748_v16 = vunpack.c.l.b16 %v1162_v19  ;;  %v1137_v20 = vrot.slane %v1136_v51, 4  ;;  %v1115_v26 = vrot.slane %v1113_v63, 5  ;;  %v11455_v19 = vld [vmem:[%s10965_s10 + $0x178] sm:$0xf] }
  0xc5   : > { %v1146_v28 = vor.u32 %v1145_v14, %v1141_v45  ;;  %v1172_v18 = vsel %vm10976_vm2, %v1167_v47, %v11436_v42  ;;  %v1121_v0 = vrot.slane %v1119_v55, 5  ;;  %v1125_v27 = vrot.slane %v1123_v4, 4  ;;  %v278_v51 = vld [vmem:[%s10965_s10 + $0x168] sm:$0xf] }
  0xc6   : > { %v1213_v22 = vshll.u32 %v280_v6, 16  ;;  %v2749_v10 = vunpack.c.l.b16 %v1172_v18  ;;  %v1142_v5 = vsel %vm10976_vm2, %v1137_v20, %v1141_v45  ;;  %v1116_v1 = vor.u32 %v1115_v26, %v1112_v12  ;;  %v11465_v45 = vpop.permute.xlu2 %2872  ;;  %v279_v18 = vld [vmem:[%s10965_s10 + $0x16c] sm:$0xf] }
  0xc7   : > { %v1147_v35 = vrot.slane %v1146_v28, 4  ;;  %v2746_v54 = vunpack.c.l.b16 %v1142_v5  ;;  %v1126_v37 = vor.u32 %v1125_v27, %v1121_v0  ;;  %v1217_v58 = vshrl.u32 %v280_v6, 16  ;;  %17965 = vst [vmem:[#allocation27_spill] sm:$0xff] %v11465_v45  ;;  %v276_v5 = vld [vmem:[%s10965_s10 + $0x160] sm:$0xf] }
  0xc8   : > { %v11457_v48 = vrot.slane %v1213_v22, 5  ;;  %v11460_v14 = vpack.c.b16 %v2749_v10, %v2748_v16  ;;  %v1117_v47 = vrot.slane %v1116_v1, 4  ;;  %v1223_v55 = vshll.u32 %v281_v31, 16 }
  0xc9   : > { %v1152_v63 = vsel %vm10976_vm2, %v1147_v35, %v11418_v62  ;;  %v1127_v4 = vrot.slane %v1126_v37, 4  ;;  %v1219_v20 = vrot.slane %v1217_v58, 4  ;;  %v1227_v28 = vshrl.u32 %v281_v31, 16 }
  0xca   : > { %17964 = vst [vmem:[#allocation26_spill] sm:$0xff] %v11460_v14  ;;  %v2747_v12 = vunpack.c.l.b16 %v1152_v63  ;;  %2940 = vrot.lane.b32.xlu2 %v11460_v14, %s10855_s11  ;;  %v1122_v6 = vsel %vm10976_vm2, %v1117_v47, %v1121_v0  ;;  %v1225_v16 = vrot.slane %v1223_v55, 5  ;;  %v1233_v26 = vshll.u32 %v11455_v19, 16 }
  0xcb   : > { %v1194_v62 = vshrl.u32 %v278_v51, 16  ;;  %v1132_v22 = vsel %vm10976_vm2, %v1127_v4, %v1131_v33  ;;  %v2744_v10 = vunpack.c.l.b16 %v1122_v6  ;;  %v1220_v31 = vor.u32 %v1219_v20, %v11457_v48 }
  0xcc   : > { %v11473_v27 = vpack.c.b16 %v2747_v12, %v2746_v54  ;;  %v2745_v35 = vunpack.c.l.b16 %v1132_v22  ;;  %v1229_v1 = vrot.slane %v1227_v28, 4  ;;  %v11479_v37 = vrot.slane %v1233_v26, 5  ;;  %v277_v12 = vld [vmem:[%s10965_s10 + $0x164] sm:$0x1]  ;;  %v287_v22 = vld [vmem:[%s10965_s10 + $0x18c] sm:$0xf] }
  0xcd   : > { %v1196_v0 = vrot.slane %v1194_v62, 4  ;;  %v1221_v58 = vrot.slane %v1220_v31, 4  ;;  %v1197_v54 = vshll.u32 %v278_v51, 16  ;;  %v1203_v63 = vshll.u32 %v279_v18, 16 }
  0xce   : > { %17966 = vst [vmem:[#allocation28_spill] sm:$0xff] %v11473_v27  ;;  %2938 = vrot.lane.b32.xlu1 %v11473_v27, %s10855_s11  ;;  %v1207_v47 = vshrl.u32 %v279_v18, 16  ;;  %v11483_v55 = vpack.c.b16 %v2745_v35, %v2744_v10  ;;  %v1230_v33 = vor.u32 %v1229_v1, %v1225_v16  ;;  %v1173_v4 = vshrl.u32 %v11416_v60, 16 }
  0xcf   : > { %v1179_v20 = vshll.u32 %v276_v5, 16  ;;  %v1226_v28 = vsel %vm10976_vm2, %v1221_v58, %v1225_v16  ;;  %v1199_v6 = vrot.slane %v1197_v54, 5  ;;  %v1205_v26 = vrot.slane %v1203_v63, 5  ;;  %v11496_v63 = vpop.permute.xlu2 %2874 }
  0xd0   : > { %17967 = vst [vmem:[#allocation29_spill] sm:$0xff] %v11483_v55  ;;  %v1209_v62 = vrot.slane %v1207_v47, 4  ;;  %2936 = vrot.lane.b32.xlu0 %v11483_v55, %s10855_s11  ;;  %v1231_v51 = vrot.slane %v1230_v33, 4  ;;  %v2754_v31 = vunpack.c.l.b16 %v1226_v28  ;;  %v1175_v18 = vrot.slane %v1173_v4, 4 }
  0xd1   : > { %v1181_v10 = vrot.slane %v1179_v20, 5  ;;  %v1200_v35 = vor.u32 %v1199_v6, %v1196_v0  ;;  %v1183_v45 = vshrl.u32 %v276_v5, 16  ;;  %v1189_v60 = vshll.u32 %v277_v12, 16  ;;  %17968 = vst [vmem:[#allocation30_spill] sm:$0xff] %v11496_v63  ;;  %v288_v6 = vld [vmem:[%s10965_s10 + $0x190] sm:$0xf] }
  0xd2   : > { %v1210_v1 = vor.u32 %v1209_v62, %v1205_v26  ;;  %v1236_v16 = vsel %vm10976_vm2, %v1231_v51, %v11479_v37  ;;  %v1176_v58 = vor.u32 %v1175_v18, %v11436_v42  ;;  %v1278_v54 = vshrl.u32 %v287_v22, 16 }
  0xd3   : > { %v2755_v47 = vunpack.c.l.b16 %v1236_v16  ;;  %v1201_v33 = vrot.slane %v1200_v35, 4  ;;  %v1185_v28 = vrot.slane %v1183_v45, 4  ;;  %v1191_v0 = vrot.slane %v1189_v60, 5  ;;  %v11507_v16 = vld [vmem:[%s10965_s10 + $0x194] sm:$0xf] }
  0xd4   : > { %v1211_v4 = vrot.slane %v1210_v1, 4  ;;  %v1177_v20 = vrot.slane %v1176_v58, 4  ;;  %v1280_v5 = vrot.slane %v1278_v54, 4  ;;  %v1281_v12 = vshll.u32 %v287_v22, 16  ;;  %v284_v35 = vld [vmem:[%s10965_s10 + $0x180] sm:$0xf] }
  0xd5   : > { %v11499_v62 = vpack.c.b16 %v2755_v47, %v2754_v31  ;;  %v1206_v51 = vsel %vm10976_vm2, %v1201_v33, %v1205_v26  ;;  %v1186_v18 = vor.u32 %v1185_v28, %v1181_v10  ;;  %v1287_v58 = vshll.u32 %v288_v6, 16 }
  0xd6   : > { %v1216_v42 = vsel %vm10976_vm2, %v1211_v4, %v11457_v48  ;;  %v2752_v45 = vunpack.c.l.b16 %v1206_v51  ;;  %v1182_v22 = vsel %vm10976_vm2, %v1177_v20, %v1181_v10  ;;  %v1283_v31 = vrot.slane %v1281_v12, 5  ;;  %v285_v4 = vld [vmem:[%s10965_s10 + $0x184] sm:$0xf]  ;;  %v286_v12 = vld [vmem:[%s10965_s10 + $0x188] sm:$0x1] }
  0xd7   : > { %17969 = vst [vmem:[#allocation31_spill] sm:$0xff] %v11499_v62  ;;  %v2753_v1 = vunpack.c.l.b16 %v1216_v42  ;;  %2946 = vrot.lane.b32.xlu2 %v11499_v62, %s10855_s11  ;;  %v1187_v26 = vrot.slane %v1186_v18, 4  ;;  %v2750_v60 = vunpack.c.l.b16 %v1182_v22  ;;  %v1291_v54 = vshrl.u32 %v288_v6, 16  ;;  %v283_v62 = vld [vmem:[%s10965_s10 + $0x17c] sm:$0xf] }
  0xd8   : > { %v1284_v47 = vor.u32 %v1283_v31, %v1280_v5  ;;  %v1297_v33 = vshll.u32 %v11507_v16, 16  ;;  %v1253_v28 = vshll.u32 %v284_v35, 16  ;;  %v1289_v10 = vrot.slane %v1287_v58, 5  ;;  %v11531_v58 = vpop.permute.xlu2 %2880 }
  0xd9   : > { %v11514_v48 = vpack.c.b16 %v2753_v1, %v2752_v45  ;;  %v1192_v51 = vsel %vm10976_vm2, %v1187_v26, %v1191_v0  ;;  %v1293_v20 = vrot.slane %v1291_v54, 4  ;;  %v1257_v42 = vshrl.u32 %v284_v35, 16  ;;  %17972 = vst [vmem:[#allocation34_spill] sm:$0xff] %v11531_v58 }
  0xda   : > { %v2751_v18 = vunpack.c.l.b16 %v1192_v51  ;;  %v1285_v6 = vrot.slane %v1284_v47, 4  ;;  %v11523_v45 = vrot.slane %v1297_v33, 5  ;;  %v1255_v5 = vrot.slane %v1253_v28, 5 }
  0xdb   : > { %17970 = vst [vmem:[#allocation32_spill] sm:$0xff] %v11514_v48  ;;  %2944 = vrot.lane.b32.xlu1 %v11514_v48, %s10855_s11  ;;  %v1294_v1 = vor.u32 %v1293_v20, %v1289_v10  ;;  %v1259_v22 = vrot.slane %v1257_v42, 4  ;;  %v1263_v31 = vshll.u32 %v285_v4, 16  ;;  %v1267_v63 = vshrl.u32 %v285_v4, 16 }
  0xdc   : > { %v11526_v27 = vpack.c.b16 %v2751_v18, %v2750_v60  ;;  %v1290_v0 = vsel %vm10976_vm2, %v1285_v6, %v1289_v10  ;;  %v1273_v26 = vshll.u32 %v286_v12, 16  ;;  %v1237_v35 = vshrl.u32 %v11455_v19, 16 }
  0xdd   : > { %v1295_v54 = vrot.slane %v1294_v1, 4  ;;  %v1260_v47 = vor.u32 %v1259_v22, %v1255_v5  ;;  %v1265_v33 = vrot.slane %v1263_v31, 5  ;;  %v2760_v4 = vunpack.c.l.b16 %v1290_v0  ;;  %v293_v22 = vld [vmem:[%s10965_s10 + $0x1a4] sm:$0xf]  ;;  %v294_v31 = vld [vmem:[%s10965_s10 + $0x1a8] sm:$0xf] }
  0xde   : > { %17971 = vst [vmem:[#allocation33_spill] sm:$0xff] %v11526_v27  ;;  %2942 = vrot.lane.b32.xlu0 %v11526_v27, %s10855_s11  ;;  %v1269_v60 = vrot.slane %v1267_v63, 4  ;;  %v1239_v28 = vrot.slane %v1237_v35, 4  ;;  %v1243_v51 = vshll.u32 %v283_v62, 16  ;;  %v1275_v20 = vrot.slane %v1273_v26, 5 }
  0xdf   : > { %v1300_v10 = vsel %vm10976_vm2, %v1295_v54, %v11523_v45  ;;  %v1261_v19 = vrot.slane %v1260_v47, 4  ;;  %v1247_v12 = vshrl.u32 %v283_v62, 16  ;;  %v295_v35 = vld [vmem:[%s10965_s10 + $0x1ac] sm:$0x1]  ;;  %v1337_v26 = vshll.u32 %v293_v22, 16 }
  0xe0   : > { %v2761_v42 = vunpack.c.l.b16 %v1300_v10  ;;  %v1270_v18 = vor.u32 %v1269_v60, %v1265_v33  ;;  %v1240_v6 = vor.u32 %v1239_v28, %v11479_v37  ;;  %v1245_v1 = vrot.slane %v1243_v51, 5  ;;  %v11552_v28 = vpop.permute.xlu1 %2868 }
  0xe1   : > { %v1266_v0 = vsel %vm10976_vm2, %v1261_v19, %v1265_v33  ;;  %v1249_v63 = vrot.slane %v1247_v12, 4  ;;  %v1341_v60 = vshrl.u32 %v293_v22, 16  ;;  %v1347_v10 = vshll.u32 %v294_v31, 16  ;;  %17974 = vst [vmem:[#allocation36_spill] sm:$0xff] %v11552_v28  ;;  %v291_v19 = vld [vmem:[%s10965_s10 + $0x19c] sm:$0xf] }
  0xe2   : > { %v11544_v58 = vpack.c.b16 %v2761_v42, %v2760_v4  ;;  %v1271_v48 = vrot.slane %v1270_v18, 4  ;;  %v2758_v54 = vunpack.c.l.b16 %v1266_v0  ;;  %v1241_v47 = vrot.slane %v1240_v6, 4  ;;  %v292_v22 = vld [vmem:[%s10965_s10 + $0x1a0] sm:$0xf] }
  0xe3   : > { %v1250_v62 = vor.u32 %v1249_v63, %v1245_v1  ;;  %v1351_v4 = vshrl.u32 %v294_v31, 16  ;;  %v1357_v51 = vshll.u32 %v295_v35, 16  ;;  %v1339_v6 = vrot.slane %v1337_v26, 5  ;;  %v11565_v26 = vpop.permute.xlu0 %2864 }
  0xe4   : > { %17973 = vst [vmem:[#allocation35_spill] sm:$0xff] %v11544_v58  ;;  %2952 = vrot.lane.b32.xlu2 %v11544_v58, %s10855_s11  ;;  %v1276_v37 = vsel %vm10976_vm2, %v1271_v48, %v1275_v20  ;;  %v1246_v33 = vsel %vm10976_vm2, %v1241_v47, %v1245_v1  ;;  %v1343_v0 = vrot.slane %v1341_v60, 4  ;;  %v1349_v63 = vrot.slane %v1347_v10, 5  ;;  %v11560_v20 = vpop.permute.xlu2 %2886 }
  0xe5   : > { %v2759_v12 = vunpack.c.l.b16 %v1276_v37  ;;  %v1251_v42 = vrot.slane %v1250_v62, 4  ;;  %v2756_v18 = vunpack.c.l.b16 %v1246_v33  ;;  %v1353_v58 = vrot.slane %v1351_v4, 4  ;;  %17976 = vst [vmem:[#allocation38_spill] sm:$0xff] %v11560_v20  ;;  %v290_v33 = vld [vmem:[%s10965_s10 + $0x198] sm:$0xf] }
  0xe6   : > { %v1359_v14 = vrot.slane %v1357_v51, 5  ;;  %v1317_v1 = vshll.u32 %v291_v19, 16  ;;  %v1321_v31 = vshrl.u32 %v291_v19, 16  ;;  %v1344_v47 = vor.u32 %v1343_v0, %v1339_v6  ;;  %17977 = vst [vmem:[#allocation39_spill] sm:$0xff] %v11565_v26  ;;  %v301_v20 = vld [vmem:[%s10965_s10 + $0x1c4] sm:$0xf] }
  0xe7   : > { %v11556_v27 = vpack.c.b16 %v2759_v12, %v2758_v54  ;;  %v1256_v48 = vsel %vm10976_vm2, %v1251_v42, %v1255_v5  ;;  %v1354_v62 = vor.u32 %v1353_v58, %v1349_v63  ;;  %v1327_v37 = vshll.u32 %v292_v22, 16 }
  0xe8   : > { %v2757_v35 = vunpack.c.l.b16 %v1256_v48  ;;  %v1319_v60 = vrot.slane %v1317_v1, 5  ;;  %v1323_v54 = vrot.slane %v1321_v31, 4  ;;  %v1331_v10 = vshrl.u32 %v292_v22, 16 }
  0xe9   : > { %17975 = vst [vmem:[#allocation37_spill] sm:$0xff] %v11556_v27  ;;  %2950 = vrot.lane.b32.xlu1 %v11556_v27, %s10855_s11  ;;  %v1301_v4 = vshrl.u32 %v11507_v16, 16  ;;  %v1345_v51 = vrot.slane %v1344_v47, 4  ;;  %v1355_v19 = vrot.slane %v1354_v62, 4  ;;  %v1329_v12 = vrot.slane %v1327_v37, 5 }
  0xea   : > { %v11568_v5 = vpack.c.b16 %v2757_v35, %v2756_v18  ;;  %v1324_v42 = vor.u32 %v1323_v54, %v1319_v60  ;;  %v1333_v58 = vrot.slane %v1331_v10, 4  ;;  %v1307_v48 = vshll.u32 %v290_v33, 16  ;;  %v300_v62 = vld [vmem:[%s10965_s10 + $0x1c0] sm:$0xf] }
  0xeb   : > { %v1303_v0 = vrot.slane %v1301_v4, 4  ;;  %v1350_v1 = vsel %vm10976_vm2, %v1345_v51, %v1349_v63  ;;  %v1360_v16 = vsel %vm10976_vm2, %v1355_v19, %v1359_v14  ;;  %v1311_v18 = vshrl.u32 %v290_v33, 16  ;;  %v11578_v4 = vpop.permute.xlu1 %2870 }
  0xec   : > { %17978 = vst [vmem:[#allocation40_spill] sm:$0xff] %v11568_v5  ;;  %2948 = vrot.lane.b32.xlu0 %v11568_v5, %s10855_s11  ;;  %v2766_v22 = vunpack.c.l.b16 %v1350_v1  ;;  %v2767_v31 = vunpack.c.l.b16 %v1360_v16  ;;  %v1325_v35 = vrot.slane %v1324_v42, 4  ;;  %v1334_v47 = vor.u32 %v1333_v58, %v1329_v12  ;;  %v298_v58 = vld [vmem:[%s10965_s10 + $0x1b8] sm:$0xf] }
  0xed   : > { %v1304_v37 = vor.u32 %v1303_v0, %v11523_v45  ;;  %v1309_v54 = vrot.slane %v1307_v48, 5  ;;  %v1313_v10 = vrot.slane %v1311_v18, 4  ;;  %17979 = vst [vmem:[#allocation41_spill] sm:$0xff] %v11578_v4  ;;  %v1401_v42 = vshll.u32 %v300_v62, 16  ;;  %v11590_v0 = vpop.permute.xlu2 %2892  ;;  %v11593_v48 = vld [vmem:[%s10965_s10 + $0x1c8] sm:$0xf] }
  0xee   : > { %v11581_v28 = vpack.c.b16 %v2767_v31, %v2766_v22  ;;  %v1330_v14 = vsel %vm10976_vm2, %v1325_v35, %v1329_v12  ;;  %v1335_v63 = vrot.slane %v1334_v47, 4  ;;  %17981 = vst [vmem:[#allocation43_spill] sm:$0xff] %v11590_v0  ;;  %v1405_v1 = vshrl.u32 %v300_v62, 16 }
  0xef   : > { %v2764_v33 = vunpack.c.l.b16 %v1330_v14  ;;  %v1305_v51 = vrot.slane %v1304_v37, 4  ;;  %v1314_v19 = vor.u32 %v1313_v10, %v1309_v54  ;;  %v1411_v16 = vshll.u32 %v301_v20, 16  ;;  %v11597_v37 = vpop.permute.xlu0 %2866 }
  0xf0   : > { %17980 = vst [vmem:[#allocation42_spill] sm:$0xff] %v11581_v28  ;;  %2958 = vrot.lane.b32.xlu2 %v11581_v28, %s10855_s11  ;;  %v1340_v45 = vsel %vm10976_vm2, %v1335_v63, %v1339_v6  ;;  %v1415_v12 = vshrl.u32 %v301_v20, 16  ;;  %v1403_v35 = vrot.slane %v1401_v42, 5  ;;  %v1407_v10 = vrot.slane %v1405_v1, 4  ;;  %v299_v63 = vld [vmem:[%s10965_s10 + $0x1bc] sm:$0xf] }
  0xf1   : > { %v2765_v18 = vunpack.c.l.b16 %v1340_v45  ;;  %v1310_v22 = vsel %vm10976_vm2, %v1305_v51, %v1309_v54  ;;  %v1315_v31 = vrot.slane %v1314_v19, 4  ;;  %17982 = vst [vmem:[#allocation44_spill] sm:$0xff] %v11597_v37  ;;  %v1413_v14 = vrot.slane %v1411_v16, 5 }
  0xf2   : > { %v2762_v47 = vunpack.c.l.b16 %v1310_v22  ;;  %v1417_v6 = vrot.slane %v1415_v12, 4  ;;  %v1421_v62 = vshll.u32 %v11593_v48, 16  ;;  %v1381_v45 = vshll.u32 %v298_v58, 16  ;;  %v296_v22 = vld [vmem:[%s10965_s10 + $0x1b0] sm:$0xf] }
  0xf3   : > { %v11600_v0 = vpack.c.b16 %v2765_v18, %v2764_v33  ;;  %v1320_v20 = vsel %vm10976_vm2, %v1315_v31, %v1319_v60  ;;  %v1408_v51 = vor.u32 %v1407_v10, %v1403_v35  ;;  %v1385_v42 = vshrl.u32 %v298_v58, 16  ;;  %v297_v18 = vld [vmem:[%s10965_s10 + $0x1b4] sm:$0xf]  ;;  %v11615_v26 = vpop.permute.xlu1 %2878 }
  0xf4   : > { %v2763_v54 = vunpack.c.l.b16 %v1320_v20  ;;  %v1418_v19 = vor.u32 %v1417_v6, %v1413_v14  ;;  %v11608_v1 = vrot.slane %v1421_v62, 5  ;;  %v11610_v16 = vrot.slane %v1381_v45, 5  ;;  %17985 = vst [vmem:[#allocation47_spill] sm:$0xff] %v11615_v26 }
  0xf5   : > { %17983 = vst [vmem:[#allocation45_spill] sm:$0xff] %v11600_v0  ;;  %2956 = vrot.lane.b32.xlu1 %v11600_v0, %s10855_s11  ;;  %v1391_v33 = vshll.u32 %v299_v63, 16  ;;  %v1395_v12 = vshrl.u32 %v299_v63, 16  ;;  %v1409_v60 = vrot.slane %v1408_v51, 4  ;;  %v1387_v37 = vrot.slane %v1385_v42, 4  ;;  %v11625_v0 = vpop.permute.xlu2 %2898 }
  0xf6   : > { %v11613_v4 = vpack.c.b16 %v2763_v54, %v2762_v47  ;;  %v1419_v31 = vrot.slane %v1418_v19, 4  ;;  %v1362_v6 = vshrl.u32 %v296_v22, 16  ;;  %v1365_v58 = vshll.u32 %v296_v22, 16  ;;  %17986 = vst [vmem:[#allocation48_spill] sm:$0xff] %v11625_v0 }
  0xf7   : > { %v1393_v20 = vrot.slane %v1391_v33, 5  ;;  %v1397_v10 = vrot.slane %v1395_v12, 4  ;;  %v1414_v62 = vsel %vm10976_vm2, %v1409_v60, %v1413_v14  ;;  %v1388_v63 = vor.u32 %v1387_v37, %v11610_v16  ;;  %v307_v14 = vld [vmem:[%s10965_s10 + $0x1dc] sm:$0xf]  ;;  %v11633_v27 = vpop.permute.xlu0 %2876 }
  0xf8   : > { %17984 = vst [vmem:[#allocation46_spill] sm:$0xff] %v11613_v4  ;;  %2954 = vrot.lane.b32.xlu0 %v11613_v4, %s10855_s11  ;;  %v1424_v47 = vsel %vm10976_vm2, %v1419_v31, %v11608_v1  ;;  %v1371_v45 = vshll.u32 %v297_v18, 16  ;;  %v2772_v54 = vunpack.c.l.b16 %v1414_v62  ;;  %v1364_v42 = vrot.slane %v1362_v6, 4  ;;  %v308_v31 = vld [vmem:[%s10965_s10 + $0x1e0] sm:$0xf] }
  0xf9   : > { %v2773_v51 = vunpack.c.l.b16 %v1424_v47  ;;  %v1398_v19 = vor.u32 %v1397_v10, %v1393_v20  ;;  %v1389_v22 = vrot.slane %v1388_v63, 4  ;;  %v1367_v33 = vrot.slane %v1365_v58, 5  ;;  %17988 = vst [vmem:[#allocation50_spill] sm:$0xff] %v11633_v27  ;;  %v11636_v10 = vld [vmem:[%s10965_s10 + $0x1e4] sm:$0xf] }
  0xfa   : > { %v1373_v12 = vrot.slane %v1371_v45, 5  ;;  %v1375_v26 = vshrl.u32 %v297_v18, 16  ;;  %v1465_v58 = vshll.u32 %v307_v14, 16  ;;  %v1469_v63 = vshrl.u32 %v307_v14, 16  ;;  %v306_v27 = vld [vmem:[%s10965_s10 + $0x1d8] sm:$0xf] }
  0xfb   : > { %v11628_v60 = vpack.c.b16 %v2773_v51, %v2772_v54  ;;  %v1399_v28 = vrot.slane %v1398_v19, 4  ;;  %v1394_v37 = vsel %vm10976_vm2, %v1389_v22, %v1393_v20  ;;  %v1368_v62 = vor.u32 %v1367_v33, %v1364_v42  ;;  %v305_v19 = vld [vmem:[%s10965_s10 + $0x1d4] sm:$0xf] }
  0xfc   : > { %v1377_v47 = vrot.slane %v1375_v26, 4  ;;  %v2770_v6 = vunpack.c.l.b16 %v1394_v37  ;;  %v1475_v20 = vshll.u32 %v308_v31, 16  ;;  %v1467_v26 = vrot.slane %v1465_v58, 5 }
  0xfd   : > { %17987 = vst [vmem:[#allocation49_spill] sm:$0xff] %v11628_v60  ;;  %2964 = vrot.lane.b32.xlu2 %v11628_v60, %s10855_s11  ;;  %v1404_v18 = vsel %vm10976_vm2, %v1399_v28, %v1403_v35  ;;  %v1369_v54 = vrot.slane %v1368_v62, 4  ;;  %v1471_v42 = vrot.slane %v1469_v63, 4  ;;  %v1479_v22 = vshrl.u32 %v308_v31, 16  ;;  %v11661_v4 = vpop.permute.xlu2 %2904 }
  0xfe   : > { %v2771_v45 = vunpack.c.l.b16 %v1404_v18  ;;  %v1378_v51 = vor.u32 %v1377_v47, %v1373_v12  ;;  %v1485_v33 = vshll.u32 %v11636_v10, 16  ;;  %v1477_v35 = vrot.slane %v1475_v20, 5  ;;  %v11651_v18 = vpop.permute.xlu1 %2884  ;;  %17991 = vst [vmem:[#allocation53_spill] sm:$0xff] %v11661_v4 }
  0xff   : > { %v1374_v60 = vsel %vm10976_vm2, %v1369_v54, %v1373_v12  ;;  %v1472_v37 = vor.u32 %v1471_v42, %v1467_v26  ;;  %v1481_v62 = vrot.slane %v1479_v22, 4  ;;  %17990 = vst [vmem:[#allocation52_spill] sm:$0xff] %v11651_v18  ;;  %v1449_v12 = vshll.u32 %v305_v19, 16 }
 0x100   : > { %v11645_v0 = vpack.c.b16 %v2771_v45, %v2770_v6  ;;  %v1379_v28 = vrot.slane %v1378_v51, 4  ;;  %v2768_v14 = vunpack.c.l.b16 %v1374_v60  ;;  %v11649_v47 = vrot.slane %v1485_v33, 5  ;;  %v303_v51 = vld [vmem:[%s10965_s10 + $0x1cc] sm:$0xf]  ;;  %v304_v33 = vld [vmem:[%s10965_s10 + $0x1d0] sm:$0x1] }
 0x101   : > { %v1446_v6 = vshrl.u32 %v305_v19, 16  ;;  %v1455_v58 = vshll.u32 %v306_v27, 16  ;;  %v1473_v45 = vrot.slane %v1472_v37, 4  ;;  %v1482_v60 = vor.u32 %v1481_v62, %v1477_v35 }
 0x102   : > { %17989 = vst [vmem:[#allocation51_spill] sm:$0xff] %v11645_v0  ;;  %2962 = vrot.lane.b32.xlu1 %v11645_v0, %s10855_s11  ;;  %v1384_v31 = vsel %vm10976_vm2, %v1379_v28, %v11610_v16  ;;  %v1459_v54 = vshrl.u32 %v306_v27, 16  ;;  %v1451_v42 = vrot.slane %v1449_v12, 5  ;;  %v1425_v18 = vshrl.u32 %v11593_v48, 16 }
 0x103   : > { %v2769_v63 = vunpack.c.l.b16 %v1384_v31  ;;  %v1448_v20 = vrot.slane %v1446_v6, 4  ;;  %v1457_v22 = vrot.slane %v1455_v58, 5  ;;  %v1478_v16 = vsel %vm10976_vm2, %v1473_v45, %v1477_v35  ;;  %v11667_v6 = vpop.permute.xlu0 %2882 }
 0x104   : > { %v1483_v19 = vrot.slane %v1482_v60, 4  ;;  %v1461_v28 = vrot.slane %v1459_v54, 4  ;;  %v2778_v31 = vunpack.c.l.b16 %v1478_v16  ;;  %v1427_v27 = vrot.slane %v1425_v18, 4  ;;  %17993 = vst [vmem:[#allocation55_spill] sm:$0xff] %v11667_v6 }
 0x105   : > { %v11663_v0 = vpack.c.b16 %v2769_v63, %v2768_v14  ;;  %v1452_v37 = vor.u32 %v1451_v42, %v1448_v20  ;;  %v1431_v62 = vshll.u32 %v303_v51, 16  ;;  %v1435_v12 = vshrl.u32 %v303_v51, 16  ;;  %v314_v20 = vld [vmem:[%s10965_s10 + $0x1f8] sm:$0xf] }
 0x106   : > { %v1488_v48 = vsel %vm10976_vm2, %v1483_v19, %v11649_v47  ;;  %v1462_v14 = vor.u32 %v1461_v28, %v1457_v22  ;;  %v1441_v35 = vshll.u32 %v304_v33, 16  ;;  %v1428_v45 = vor.u32 %v1427_v27, %v11608_v1  ;;  %v315_v19 = vld [vmem:[%s10965_s10 + $0x1fc] sm:$0xf]  ;;  %v11686_v1 = vpop.permute.xlu1 %2890 }
 0x107   : > { %17992 = vst [vmem:[#allocation54_spill] sm:$0xff] %v11663_v0  ;;  %2960 = vrot.lane.b32.xlu0 %v11663_v0, %s10855_s11  ;;  %v2779_v58 = vunpack.c.l.b16 %v1488_v48  ;;  %v1453_v63 = vrot.slane %v1452_v37, 4  ;;  %v1433_v18 = vrot.slane %v1431_v62, 5  ;;  %v1437_v54 = vrot.slane %v1435_v12, 4  ;;  %v11684_v48 = vld [vmem:[%s10965_s10 + $0x200] sm:$0xf] }
 0x108   : > { %v1463_v60 = vrot.slane %v1462_v14, 4  ;;  %v1429_v6 = vrot.slane %v1428_v45, 4  ;;  %v1443_v37 = vrot.slane %v1441_v35, 5  ;;  %17995 = vst [vmem:[#allocation57_spill] sm:$0xff] %v11686_v1  ;;  %v1530_v27 = vshrl.u32 %v314_v20, 16  ;;  %v11697_v1 = vpop.permute.xlu2 %2910 }
 0x109   : > { %v11676_v42 = vpack.c.b16 %v2779_v58, %v2778_v31  ;;  %v1458_v16 = vsel %vm10976_vm2, %v1453_v63, %v1457_v22  ;;  %v1438_v28 = vor.u32 %v1437_v54, %v1433_v18  ;;  %v1533_v62 = vshll.u32 %v314_v20, 16  ;;  %v311_v14 = vld [vmem:[%s10965_s10 + $0x1ec] sm:$0xf]  ;;  %17997 = vst [vmem:[#allocation59_spill] sm:$0xff] %v11697_v1 }
 0x10a   : > { %v1468_v51 = vsel %vm10976_vm2, %v1463_v60, %v1467_v26  ;;  %v2776_v33 = vunpack.c.l.b16 %v1458_v16  ;;  %v1434_v22 = vsel %vm10976_vm2, %v1429_v6, %v1433_v18  ;;  %v1539_v58 = vshll.u32 %v315_v19, 16  ;;  %v312_v16 = vld [vmem:[%s10965_s10 + $0x1f0] sm:$0xf] }
 0x10b   : > { %17994 = vst [vmem:[#allocation56_spill] sm:$0xff] %v11676_v42  ;;  %2970 = vrot.lane.b32.xlu2 %v11676_v42, %s10855_s11  ;;  %v2777_v31 = vunpack.c.l.b16 %v1468_v51  ;;  %v1439_v26 = vrot.slane %v1438_v28, 4  ;;  %v2774_v12 = vunpack.c.l.b16 %v1434_v22  ;;  %v1543_v35 = vshrl.u32 %v315_v19, 16  ;;  %v313_v51 = vld [vmem:[%s10965_s10 + $0x1f4] sm:$0x1] }
 0x10c   : > { %v1532_v45 = vrot.slane %v1530_v27, 4  ;;  %v1535_v60 = vrot.slane %v1533_v62, 5  ;;  %v1549_v54 = vshll.u32 %v11684_v48, 16  ;;  %v1541_v18 = vrot.slane %v1539_v58, 5  ;;  %v11706_v27 = vpop.permute.xlu0 %2888 }
 0x10d   : > { %v11693_v63 = vpack.c.b16 %v2777_v31, %v2776_v33  ;;  %v1444_v6 = vsel %vm10976_vm2, %v1439_v26, %v1443_v37  ;;  %v1545_v20 = vrot.slane %v1543_v35, 4  ;;  %v1505_v28 = vshll.u32 %v311_v14, 16  ;;  %17998 = vst [vmem:[#allocation60_spill] sm:$0xff] %v11706_v27  ;;  %v310_v37 = vld [vmem:[%s10965_s10 + $0x1e8] sm:$0xf] }
 0x10e   : > { %v2775_v19 = vunpack.c.l.b16 %v1444_v6  ;;  %v1536_v33 = vor.u32 %v1535_v60, %v1532_v45  ;;  %v11704_v31 = vrot.slane %v1549_v54, 5  ;;  %v1509_v22 = vshrl.u32 %v311_v14, 16 }
 0x10f   : > { %17996 = vst [vmem:[#allocation58_spill] sm:$0xff] %v11693_v63  ;;  %2968 = vrot.lane.b32.xlu1 %v11693_v63, %s10855_s11  ;;  %v1546_v62 = vor.u32 %v1545_v20, %v1541_v18  ;;  %v11708_v1 = vrot.slane %v1505_v28, 5  ;;  %v1515_v4 = vshll.u32 %v312_v16, 16  ;;  %v1519_v42 = vshrl.u32 %v312_v16, 16 }
 0x110   : > { %v11711_v26 = vpack.c.b16 %v2775_v19, %v2774_v12  ;;  %v1537_v58 = vrot.slane %v1536_v33, 4  ;;  %v1511_v35 = vrot.slane %v1509_v22, 4  ;;  %v1525_v0 = vshll.u32 %v313_v51, 16 }
 0x111   : > { %v1547_v5 = vrot.slane %v1546_v62, 4  ;;  %v1517_v63 = vrot.slane %v1515_v4, 5  ;;  %v1521_v6 = vrot.slane %v1519_v42, 4  ;;  %v1489_v45 = vshrl.u32 %v11636_v10, 16  ;;  %v11722_v10 = vpop.permute.xlu1 %2896 }
 0x112   : > { %17999 = vst [vmem:[#allocation61_spill] sm:$0xff] %v11711_v26  ;;  %2966 = vrot.lane.b32.xlu0 %v11711_v26, %s10855_s11  ;;  %v1542_v14 = vsel %vm10976_vm2, %v1537_v58, %v1541_v18  ;;  %v1512_v60 = vor.u32 %v1511_v35, %v11708_v1  ;;  %v1527_v12 = vrot.slane %v1525_v0, 5  ;;  %v1495_v54 = vshll.u32 %v310_v37, 16  ;;  %v320_v18 = vld [vmem:[%s10965_s10 + $0x210] sm:$0xf] }
 0x113   : > { %v1552_v16 = vsel %vm10976_vm2, %v1547_v5, %v11704_v31  ;;  %v2784_v4 = vunpack.c.l.b16 %v1542_v14  ;;  %v1522_v42 = vor.u32 %v1521_v6, %v1517_v63  ;;  %v1491_v20 = vrot.slane %v1489_v45, 4  ;;  %18000 = vst [vmem:[#allocation62_spill] sm:$0xff] %v11722_v10  ;;  %v321_v0 = vld [vmem:[%s10965_s10 + $0x214] sm:$0xf]  ;;  %v322_v6 = vld [vmem:[%s10965_s10 + $0x218] sm:$0x1]  ;;  %v11732_v45 = vpop.permute.xlu2 %2916 }
 0x114   : > { %v2785_v51 = vunpack.c.l.b16 %v1552_v16  ;;  %v1513_v28 = vrot.slane %v1512_v60, 4  ;;  %v1497_v19 = vrot.slane %v1495_v54, 5  ;;  %v1499_v33 = vshrl.u32 %v310_v37, 16  ;;  %18002 = vst [vmem:[#allocation64_spill] sm:$0xff] %v11732_v45 }
 0x115   : > { %v1523_v22 = vrot.slane %v1522_v42, 4  ;;  %v1492_v62 = vor.u32 %v1491_v20, %v11649_v47  ;;  %v1589_v54 = vshll.u32 %v320_v18, 16  ;;  %v1599_v42 = vshll.u32 %v321_v0, 16  ;;  %v318_v20 = vld [vmem:[%s10965_s10 + $0x208] sm:$0xf] }
 0x116   : > { %v11727_v58 = vpack.c.b16 %v2785_v51, %v2784_v4  ;;  %v1518_v5 = vsel %vm10976_vm2, %v1513_v28, %v1517_v63  ;;  %v1501_v35 = vrot.slane %v1499_v33, 4  ;;  %v1593_v4 = vshrl.u32 %v320_v18, 16  ;;  %v11739_v63 = vpop.permute.xlu0 %2894 }
 0x117   : > { %v1528_v14 = vsel %vm10976_vm2, %v1523_v22, %v1527_v12  ;;  %v2782_v37 = vunpack.c.l.b16 %v1518_v5  ;;  %v1493_v60 = vrot.slane %v1492_v62, 4  ;;  %18003 = vst [vmem:[#allocation65_spill] sm:$0xff] %v11739_v63  ;;  %v1591_v28 = vrot.slane %v1589_v54, 5  ;;  %v319_v22 = vld [vmem:[%s10965_s10 + $0x20c] sm:$0xf] }
 0x118   : > { %18001 = vst [vmem:[#allocation63_spill] sm:$0xff] %v11727_v58  ;;  %2976 = vrot.lane.b32.xlu2 %v11727_v58, %s10855_s11  ;;  %v2783_v47 = vunpack.c.l.b16 %v1528_v14  ;;  %v1502_v16 = vor.u32 %v1501_v35, %v1497_v19  ;;  %v1603_v33 = vshrl.u32 %v321_v0, 16  ;;  %v1609_v12 = vshll.u32 %v322_v6, 16  ;;  %v317_v54 = vld [vmem:[%s10965_s10 + $0x204] sm:$0xf] }
 0x119   : > { %v1498_v51 = vsel %vm10976_vm2, %v1493_v60, %v1497_v19  ;;  %v1595_v45 = vrot.slane %v1593_v4, 4  ;;  %v1601_v14 = vrot.slane %v1599_v42, 5  ;;  %v1569_v10 = vshll.u32 %v318_v20, 16  ;;  %v11752_v4 = vpop.permute.xlu1 %2902 }
 0x11a   : > { %v11744_v62 = vpack.c.b16 %v2783_v47, %v2782_v37  ;;  %v1503_v5 = vrot.slane %v1502_v16, 4  ;;  %v2780_v27 = vunpack.c.l.b16 %v1498_v51  ;;  %v1605_v35 = vrot.slane %v1603_v33, 4  ;;  %18005 = vst [vmem:[#allocation67_spill] sm:$0xff] %v11752_v4 }
 0x11b   : > { %v1611_v18 = vrot.slane %v1609_v12, 5  ;;  %v1596_v0 = vor.u32 %v1595_v45, %v1591_v28  ;;  %v1573_v60 = vshrl.u32 %v318_v20, 16  ;;  %v1579_v6 = vshll.u32 %v319_v22, 16 }
 0x11c   : > { %18004 = vst [vmem:[#allocation66_spill] sm:$0xff] %v11744_v62  ;;  %2974 = vrot.lane.b32.xlu1 %v11744_v62, %s10855_s11  ;;  %v1508_v19 = vsel %vm10976_vm2, %v1503_v5, %v11708_v1  ;;  %v1606_v47 = vor.u32 %v1605_v35, %v1601_v14  ;;  %v1571_v16 = vrot.slane %v1569_v10, 5  ;;  %v1583_v51 = vshrl.u32 %v319_v22, 16  ;;  %v11759_v5 = vpop.permute.xlu2 %2922 }
 0x11d   : > { %v2781_v37 = vunpack.c.l.b16 %v1508_v19  ;;  %v1597_v42 = vrot.slane %v1596_v0, 4  ;;  %v1575_v33 = vrot.slane %v1573_v60, 4  ;;  %v1581_v12 = vrot.slane %v1579_v6, 5  ;;  %18007 = vst [vmem:[#allocation69_spill] sm:$0xff] %v11759_v5 }
 0x11e   : > { %v1553_v63 = vshrl.u32 %v11684_v48, 16  ;;  %v1607_v58 = vrot.slane %v1606_v47, 4  ;;  %v1585_v26 = vrot.slane %v1583_v51, 4  ;;  %v1559_v1 = vshll.u32 %v317_v54, 16  ;;  %v328_v47 = vld [vmem:[%s10965_s10 + $0x230] sm:$0xf] }
 0x11f   : > { %v11755_v62 = vpack.c.b16 %v2781_v37, %v2780_v27  ;;  %v1602_v45 = vsel %vm10976_vm2, %v1597_v42, %v1601_v14  ;;  %v1576_v20 = vor.u32 %v1575_v33, %v1571_v16  ;;  %v1563_v22 = vshrl.u32 %v317_v54, 16  ;;  %v327_v37 = vld [vmem:[%s10965_s10 + $0x22c] sm:$0xf] }
 0x120   : > { %v1555_v10 = vrot.slane %v1553_v63, 4  ;;  %v1612_v48 = vsel %vm10976_vm2, %v1607_v58, %v1611_v18  ;;  %v2790_v27 = vunpack.c.l.b16 %v1602_v45  ;;  %v1586_v35 = vor.u32 %v1585_v26, %v1581_v12  ;;  %v11767_v63 = vpop.permute.xlu0 %2900 }
 0x121   : > { %18006 = vst [vmem:[#allocation68_spill] sm:$0xff] %v11755_v62  ;;  %2972 = vrot.lane.b32.xlu0 %v11755_v62, %s10855_s11  ;;  %v1561_v19 = vrot.slane %v1559_v1, 5  ;;  %v2791_v0 = vunpack.c.l.b16 %v1612_v48  ;;  %v1577_v60 = vrot.slane %v1576_v20, 4  ;;  %v1565_v6 = vrot.slane %v1563_v22, 4  ;;  %v325_v48 = vld [vmem:[%s10965_s10 + $0x224] sm:$0xf] }
 0x122   : > { %v1556_v14 = vor.u32 %v1555_v10, %v11704_v31  ;;  %18008 = vst [vmem:[#allocation70_spill] sm:$0xff] %v11767_v63  ;;  %v1587_v54 = vrot.slane %v1586_v35, 4  ;;  %v11777_v31 = vld [vmem:[%s10965_s10 + $0x234] sm:$0xf]  ;;  %v1653_v1 = vshll.u32 %v327_v37, 16  ;;  %v1657_v45 = vshrl.u32 %v327_v37, 16 }
 0x123   : > { %v11770_v51 = vpack.c.b16 %v2791_v0, %v2790_v27  ;;  %v1582_v58 = vsel %vm10976_vm2, %v1577_v60, %v1581_v12  ;;  %v1566_v26 = vor.u32 %v1565_v6, %v1561_v19  ;;  %v1663_v12 = vshll.u32 %v328_v47, 16  ;;  %v326_v60 = vld [vmem:[%s10965_s10 + $0x228] sm:$0xf] }
 0x124   : > { %v1557_v18 = vrot.slane %v1556_v14, 4  ;;  %v1592_v42 = vsel %vm10976_vm2, %v1587_v54, %v1591_v28  ;;  %v2788_v33 = vunpack.c.l.b16 %v1582_v58  ;;  %v1655_v35 = vrot.slane %v1653_v1, 5  ;;  %v11785_v14 = vpop.permute.xlu1 %2908  ;;  %v11798_v5 = vpop.permute.xlu2 %2928 }
 0x125   : > { %18009 = vst [vmem:[#allocation71_spill] sm:$0xff] %v11770_v51  ;;  %2982 = vrot.lane.b32.xlu2 %v11770_v51, %s10855_s11  ;;  %v2789_v20 = vunpack.c.l.b16 %v1592_v42  ;;  %v1567_v22 = vrot.slane %v1566_v26, 4  ;;  %v1659_v0 = vrot.slane %v1657_v45, 4  ;;  %v1667_v28 = vshrl.u32 %v328_v47, 16 }
 0x126   : > { %v1562_v10 = vsel %vm10976_vm2, %v1557_v18, %v1561_v19  ;;  %18010 = vst [vmem:[#allocation72_spill] sm:$0xff] %v11785_v14  ;;  %v1665_v54 = vrot.slane %v1663_v12, 5  ;;  %v1673_v19 = vshll.u32 %v11777_v31, 16  ;;  %v1633_v42 = vshll.u32 %v325_v48, 16 }
 0x127   : > { %v2786_v27 = vunpack.c.l.b16 %v1562_v10  ;;  %v11787_v6 = vpack.c.b16 %v2789_v20, %v2788_v33  ;;  %v1572_v37 = vsel %vm10976_vm2, %v1567_v22, %v1571_v16  ;;  %v1660_v18 = vor.u32 %v1659_v0, %v1655_v35  ;;  %v323_v10 = vld [vmem:[%s10965_s10 + $0x21c] sm:$0xf]  ;;  %v324_v20 = vld [vmem:[%s10965_s10 + $0x220] sm:$0xf]  ;;  %18012 = vst [vmem:[#allocation74_spill] sm:$0xff] %v11798_v5 }
 0x128   : > { %v2787_v58 = vunpack.c.l.b16 %v1572_v37  ;;  %v1669_v26 = vrot.slane %v1667_v28, 4  ;;  %v11795_v47 = vrot.slane %v1673_v19, 5  ;;  %v1637_v1 = vshrl.u32 %v325_v48, 16  ;;  %v11802_v63 = vpop.permute.xlu0 %2906 }
 0x129   : > { %18011 = vst [vmem:[#allocation73_spill] sm:$0xff] %v11787_v6  ;;  %2980 = vrot.lane.b32.xlu1 %v11787_v6, %s10855_s11  ;;  %v1643_v45 = vshll.u32 %v326_v60, 16  ;;  %v1647_v33 = vshrl.u32 %v326_v60, 16  ;;  %v1661_v22 = vrot.slane %v1660_v18, 4  ;;  %v1635_v37 = vrot.slane %v1633_v42, 5 }
 0x12a   : > { %v11800_v16 = vpack.c.b16 %v2787_v58, %v2786_v27  ;;  %v1670_v12 = vor.u32 %v1669_v26, %v1665_v54  ;;  %v1639_v0 = vrot.slane %v1637_v1, 4  ;;  %v1614_v4 = vshrl.u32 %v323_v10, 16  ;;  %18014 = vst [vmem:[#allocation76_spill] sm:$0xff] %v11802_v63 }
 0x12b   : > { %v1645_v28 = vrot.slane %v1643_v45, 5  ;;  %v1649_v14 = vrot.slane %v1647_v33, 4  ;;  %v1666_v48 = vsel %vm10976_vm2, %v1661_v22, %v1665_v54  ;;  %v1617_v19 = vshll.u32 %v323_v10, 16 }
 0x12c   : > { %18013 = vst [vmem:[#allocation75_spill] sm:$0xff] %v11800_v16  ;;  %2978 = vrot.lane.b32.xlu0 %v11800_v16, %s10855_s11  ;;  %v1671_v60 = vrot.slane %v1670_v12, 4  ;;  %v1623_v5 = vshll.u32 %v324_v20, 16  ;;  %v2796_v27 = vunpack.c.l.b16 %v1666_v48  ;;  %v1640_v58 = vor.u32 %v1639_v0, %v1635_v37  ;;  %v11811_v10 = vpop.permute.xlu1 %2914 }
 0x12d   : > { %v1650_v18 = vor.u32 %v1649_v14, %v1645_v28  ;;  %v1616_v26 = vrot.slane %v1614_v4, 4  ;;  %v1619_v1 = vrot.slane %v1617_v19, 5  ;;  %v1627_v33 = vshrl.u32 %v324_v20, 16  ;;  %18015 = vst [vmem:[#allocation77_spill] sm:$0xff] %v11811_v10  ;;  %v10523_v19 = vld [vmem:[%s10965_s10 + $0xc] sm:$0xf] }
 0x12e   : > { %v1676_v42 = vsel %vm10976_vm2, %v1671_v60, %v11795_v47  ;;  %v1625_v45 = vrot.slane %v1623_v5, 5  ;;  %v1641_v6 = vrot.slane %v1640_v58, 4  ;;  %v10522_v60 = vld [vmem:[%s10965_s10 + $0x8] sm:$0xf]  ;;  %v11824_v58 = vld [vmem:[%s10965_s10 + $0x10] sm:$0xf] }
 0x12f   : > { %v2797_v63 = vunpack.c.l.b16 %v1676_v42  ;;  %v1651_v51 = vrot.slane %v1650_v18, 4  ;;  %v1620_v54 = vor.u32 %v1619_v1, %v1616_v26  ;;  %v1629_v22 = vrot.slane %v1627_v33, 4  ;;  %v10525_v1 = vld [vmem:[%s10965_s10] sm:$0xf]  ;;  %v331_v10 = vld [vmem:[%s10965_s10 + $0x23c] sm:$0x1] }
 0x130   : > { %v1646_v4 = vsel %vm10976_vm2, %v1641_v6, %v1645_v28  ;;  %v17783_v6 = vrot.slane %v11824_v58, 5  ;;  %v18019_v42 = vmov 0  ;;  %v9716_v33 = vrot.slane %v10525_v1, 9 }
 0x131   : > { %v11813_v12 = vpack.c.b16 %v2797_v63, %v2796_v27  ;;  %v1656_v5 = vsel %vm10976_vm2, %v1651_v51, %v1655_v35  ;;  %v2794_v14 = vunpack.c.l.b16 %v1646_v4  ;;  %v1621_v0 = vrot.slane %v1620_v54, 4  ;;  %v330_v51 = vld [vmem:[%s10965_s10 + $0x238] sm:$0xf]  ;;  %v11828_v35 = vpop.permute.xlu2 %2934 }
 0x132   : > { %v2795_v20 = vunpack.c.l.b16 %v1656_v5  ;;  %v1630_v48 = vor.u32 %v1629_v22, %v1625_v45  ;;  %v1849_v63 = vrot.slane %v10522_v60, 5  ;;  %v1852_v27 = vrot.slane %v10523_v19, 5  ;;  %18017 = vst [vmem:[#allocation79_spill] sm:$0xff] %v11828_v35  ;;  %v10526_v5 = vld [vmem:[%s10965_s10 + $0x4] sm:$0xf]  ;;  %v11841_v19 = vpop.permute.xlu0 %2912 }
 0x133   : > { %18016 = vst [vmem:[#allocation78_spill] sm:$0xff] %v11813_v12  ;;  %2988 = vrot.lane.b32.xlu2 %v11813_v12, %s10855_s11  ;;  %v1626_v18 = vsel %vm10976_vm2, %v1621_v0, %v1625_v45  ;;  %v18020_v42 = vsel %vm11835_vm5, 4294967295, %v18019_v42  ;;  %v1846_v60 = vrot.slane %v10526_v5, 5  ;;  %v1687_v0 = vshrl.u32 %v330_v51, 16 }
 0x134   : > { %v11830_v28 = vpack.c.b16 %v2795_v20, %v2794_v14  ;;  %v1631_v26 = vrot.slane %v1630_v48, 4  ;;  %18021 = vst [vmem:[#allocation81_spill] sm:$0xff] %v18020_v42  ;;  %v2792_v54 = vunpack.c.l.b16 %v1626_v18  ;;  %v1851_v22 = vrot.slane %v1849_v63, 4  ;;  %v12747_v42 = vld [vmem:[%s10965_s10 + $0xe8] sm:$0xff] }
 0x135   : > { %v1854_v4 = vrot.slane %v1852_v27, 4  ;;  %18022 = vst [vmem:[#allocation82_spill] sm:$0xff] %v11841_v19  ;;  %v1677_v14 = vshrl.u32 %v11777_v31, 16  ;;  %v1683_v20 = vshll.u32 %v330_v51, 16  ;;  %v1847_v5 = vsel %vm11835_vm5, %v9716_v33, %v1846_v60 }
 0x136   : > { %18018 = vst [vmem:[#allocation80_spill] sm:$0xff] %v11830_v28  ;;  %2986 = vrot.lane.b32.xlu1 %v11830_v28, %s10855_s11  ;;  %v1636_v45 = vsel %vm10976_vm2, %v1631_v26, %v1635_v37  ;;  %v1853_v18 = vsel %vm11835_vm5, %v1851_v22, %v1852_v27  ;;  %v1848_v37 = vrot.slane %v1846_v60, 4  ;;  %v2992_v26 = vunpack.c.l.b16 %v1847_v5 }
 0x137   : > { %v2793_v48 = vunpack.c.l.b16 %v1636_v45  ;;  %v1856_v1 = vsel %vm11835_vm5, %v1854_v4, %v17783_v6  ;;  %v2994_v19 = vunpack.c.l.b16 %v1853_v18  ;;  %v1679_v51 = vrot.slane %v1677_v14, 4  ;;  %v11861_v6 = vpop.permute.xlu1 %2920  ;;  %v10529_v18 = vld [vmem:[%s10965_s10 + $0x2c] sm:$0xf] }
 0x138   : > { %v2995_v35 = vunpack.c.l.b16 %v1856_v1  ;;  %v1685_v45 = vrot.slane %v1683_v20, 5  ;;  %v1689_v27 = vrot.slane %v1687_v0, 4  ;;  %v1850_v28 = vsel %vm11835_vm5, %v1848_v37, %v1849_v63  ;;  %18024 = vst [vmem:[#allocation84_spill] sm:$0xff] %v11861_v6  ;;  %v10528_v63 = vld [vmem:[%s10965_s10 + $0x28] sm:$0xf] }
 0x139   : > { %v11857_v31 = vpack.c.b16 %v2793_v48, %v2792_v54  ;;  %v1693_v4 = vshll.u32 %v331_v10, 16  ;;  %v2993_v33 = vunpack.c.l.b16 %v1850_v28  ;;  %v1680_v60 = vor.u32 %v1679_v51, %v11795_v47  ;;  %v11870_v28 = vpop.permute.xlu2 %2940  ;;  %v10530_v37 = vld [vmem:[%s10965_s10 + $0x18] sm:$0xf] }
 0x13a   : > { %v3121_v22 = vpack.c.b16 %v2995_v35, %v2994_v19  ;;  %v1690_v54 = vor.u32 %v1689_v27, %v1685_v45  ;;  %v10527_v19 = vld [vmem:[%s10965_s10 + $0x24] sm:$0xf]  ;;  %v1871_v10 = vrot.slane %v10528_v63, 5  ;;  %v1874_v1 = vrot.slane %v10529_v18, 5  ;;  %18025 = vst [vmem:[#allocation85_spill] sm:$0xff] %v11870_v28 }
 0x13b   : > { %18023 = vst [vmem:[#allocation83_spill] sm:$0xff] %v11857_v31  ;;  %2984 = vrot.lane.b32.xlu0 %v11857_v31, %s10855_s11  ;;  %v1695_v35 = vrot.slane %v1693_v4, 5  ;;  %v9717_v14 = vrot.slane %v10527_v19, 9  ;;  %v3120_v20 = vpack.c.b16 %v2993_v33, %v2992_v26  ;;  %v1681_v0 = vrot.slane %v1680_v60, 4  ;;  %v10531_v27 = vld [vmem:[%s10965_s10 + $0x1c] sm:$0xf]  ;;  %v11882_v19 = vpop.permute.xlu0 %2918 }
 0x13c   : > { %3186 = vrot.lane.b32.xlu2 %v3121_v22, %s10856_s20  ;;  %v1691_v48 = vrot.slane %v1690_v54, 4  ;;  %v1873_v5 = vrot.slane %v1871_v10, 4  ;;  %v1861_v51 = vrot.slane %v10530_v37, 5  ;;  %v1864_v22 = vrot.slane %v10531_v27, 5  ;;  %v10532_v60 = vld [vmem:[%s10965_s10 + $0x20] sm:$0x1] }
 0x13d   : > { %v1872_v47 = vsel %vm11835_vm5, %v9717_v14, %v1871_v10  ;;  %v1686_v26 = vsel %vm10976_vm2, %v1681_v0, %v1685_v45  ;;  %v1867_v54 = vrot.slane %v10532_v60, 5  ;;  %18026 = vst [vmem:[#allocation86_spill] sm:$0xff] %v11882_v19  ;;  %v10533_v0 = vld [vmem:[%s10965_s10 + $0x14] sm:$0xf]  ;;  %v10615_v31 = vld [vmem:[%s10965_s10 + $0x180] sm:$0xf] }
 0x13e   : > { %3184 = vrot.lane.b32.xlu1 %v3120_v20, %s10856_s20  ;;  %v1696_v4 = vsel %vm10976_vm2, %v1691_v48, %v1695_v35  ;;  %v3000_v33 = vunpack.c.l.b16 %v1872_v47  ;;  %v2798_v14 = vunpack.c.l.b16 %v1686_v26  ;;  %v1875_v10 = vsel %vm11835_vm5, %v1873_v5, %v1874_v1 }
 0x13f   : > { %v2799_v63 = vunpack.c.l.b16 %v1696_v4  ;;  %v1863_v18 = vrot.slane %v1861_v51, 4  ;;  %v3001_v37 = vunpack.c.l.b16 %v1875_v10  ;;  %v1866_v27 = vrot.slane %v1864_v22, 4  ;;  %v11901_v10 = vpop.permute.xlu1 %2926 }
 0x140   : > { %v18027_v20 = vrot.slane %v11824_v58, 5  ;;  %v1858_v35 = vrot.slane %v10533_v0, 5  ;;  %18030 = vst [vmem:[#allocation89_spill] sm:$0xff] %v11901_v10 }
 0x141   : > { %v11889_v48 = vpack.c.b16 %v2799_v63, %v2798_v14  ;;  %v1865_v47 = vsel %vm11835_vm5, %v1863_v18, %v1864_v22  ;;  %v11893_v26 = vpack.c.b16 %v3001_v37, %v3000_v33  ;;  %v1868_v5 = vsel %vm11835_vm5, %v1866_v27, %v1867_v54  ;;  %v10534_v22 = vld [vmem:[%s10965_s10 + $0x3c] sm:$0xf]  ;;  %v10535_v18 = vld [vmem:[%s10965_s10 + $0x40] sm:$0xf]  ;;  %v10536_v37 = vld [vmem:[%s10965_s10 + $0x44] sm:$0x1] }
 0x142   : > { %v1857_v45 = vrot.slane %v18027_v20, 4  ;;  %v2998_v4 = vunpack.c.l.b16 %v1865_v47  ;;  %v2999_v60 = vunpack.c.l.b16 %v1868_v5  ;;  %v1860_v14 = vrot.slane %v1858_v35, 4  ;;  %v10537_v20 = vld [vmem:[%s10965_s10 + $0x34] sm:$0xf] }
 0x143   : > { %18028 = vst [vmem:[#allocation87_spill] sm:$0xff] %v11889_v48  ;;  %2990 = vrot.lane.b32.xlu0 %v11889_v48, %s10855_s11  ;;  %v1886_v33 = vrot.slane %v10534_v22, 5  ;;  %v1889_v54 = vrot.slane %v10535_v18, 5  ;;  %v1892_v27 = vrot.slane %v10536_v37, 5  ;;  %v10539_v18 = vld [vmem:[%s10965_s10 + $0x30] sm:$0xf] }
 0x144   : > { %18029 = vst [vmem:[#allocation88_spill] sm:$0xff] %v11893_v26  ;;  %v1859_v58 = vsel %vm11835_vm5, %v1857_v45, %v1858_v35  ;;  %3192 = vrot.lane.b32.xlu2 %v11893_v26, %s10856_s20  ;;  %v1880_v45 = vrot.slane %v10537_v20, 5  ;;  %v3123_v0 = vpack.c.b16 %v2999_v60, %v2998_v4  ;;  %v1862_v47 = vsel %vm11835_vm5, %v1860_v14, %v1861_v51  ;;  %v10538_v35 = vld [vmem:[%s10965_s10 + $0x38] sm:$0xf]  ;;  %v11912_v26 = vpop.permute.xlu2 %2946  ;;  %v11922_v60 = vpop.permute.xlu0 %2924  ;;  %v10600_v48 = vld [vmem:[%s10965_s10 + $0x124] sm:$0xf] }
 0x145   : > { %v2996_v63 = vunpack.c.l.b16 %v1859_v58  ;;  %v1883_v5 = vrot.slane %v10538_v35, 5  ;;  %v1876_v58 = vrot.slane %v1874_v1, 4  ;;  %v2997_v10 = vunpack.c.l.b16 %v1862_v47  ;;  %18031 = vst [vmem:[#allocation90_spill] sm:$0xff] %v11912_v26 }
 0x146   : > { %v1888_v6 = vrot.slane %v1886_v33, 4  ;;  %v1891_v19 = vrot.slane %v1889_v54, 4  ;;  %v1882_v28 = vrot.slane %v1880_v45, 4  ;;  %3190 = vrot.lane.b32.xlu1 %v3123_v0, %s10856_s20  ;;  %v1877_v37 = vrot.slane %v10539_v18, 5  ;;  %18032 = vst [vmem:[#allocation91_spill] sm:$0xff] %v11922_v60 }
 0x147   : > { %v1885_v22 = vrot.slane %v1883_v5, 4  ;;  %v3122_v20 = vpack.c.b16 %v2997_v10, %v2996_v63  ;;  %v2046_v25 = vrot.slane %v10600_v48, 5 }
 0x148   : > { %v1890_v4 = vsel %vm11835_vm5, %v1888_v6, %v1889_v54  ;;  %v1893_v1 = vsel %vm11835_vm5, %v1891_v19, %v1892_v27  ;;  %v1884_v51 = vsel %vm11835_vm5, %v1882_v28, %v1883_v5  ;;  %v1878_v6 = vsel %vm11835_vm5, %v1876_v58, %v1877_v37  ;;  %v10540_v27 = vld [vmem:[%s10965_s10 + $0x58] sm:$0xf]  ;;  %v10541_v5 = vld [vmem:[%s10965_s10 + $0x5c] sm:$0xf] }
 0x149   : > { %v3006_v14 = vunpack.c.l.b16 %v1890_v4  ;;  %v3007_v0 = vunpack.c.l.b16 %v1893_v1  ;;  %v1887_v47 = vsel %vm11835_vm5, %v1885_v22, %v1886_v33  ;;  %v3004_v63 = vunpack.c.l.b16 %v1884_v51  ;;  %v10542_v22 = vld [vmem:[%s10965_s10 + $0x60] sm:$0xf] }
 0x14a   : > { %v3005_v10 = vunpack.c.l.b16 %v1887_v47  ;;  %v1879_v54 = vrot.slane %v1877_v37, 4  ;;  %v3002_v28 = vunpack.c.l.b16 %v1878_v6  ;;  %v1905_v35 = vrot.slane %v10540_v27, 5  ;;  %v10543_v37 = vld [vmem:[%s10965_s10 + $0x50] sm:$0xf]  ;;  %v11942_v6 = vpop.permute.xlu1 %2932 }
 0x14b   : > { %3188 = vrot.lane.b32.xlu0 %v3122_v20, %s10856_s20  ;;  %v11929_v19 = vpack.c.b16 %v3007_v0, %v3006_v14  ;;  %v1908_v18 = vrot.slane %v10541_v5, 5  ;;  %v1911_v58 = vrot.slane %v10542_v22, 5  ;;  %v1899_v1 = vrot.slane %v10543_v37, 5  ;;  %v10544_v0 = vld [vmem:[%s10965_s10 + $0x54] sm:$0xf]  ;;  %18035 = vst [vmem:[#allocation94_spill] sm:$0xff] %v11942_v6 }
 0x14c   : > { %v11933_v4 = vpack.c.b16 %v3005_v10, %v3004_v63  ;;  %v1881_v33 = vsel %vm11835_vm5, %v1879_v54, %v1880_v45  ;;  %v1907_v51 = vrot.slane %v1905_v35, 4  ;;  %v1902_v47 = vrot.slane %v10544_v0, 5  ;;  %v10545_v10 = vld [vmem:[%s10965_s10 + $0x48] sm:$0xf]  ;;  %v10546_v5 = vld [vmem:[%s10965_s10 + $0x4c] sm:$0xf]  ;;  %v11964_v26 = vpop.permute.xlu0 %2930 }
 0x14d   : > { %18033 = vst [vmem:[#allocation92_spill] sm:$0xff] %v11929_v19  ;;  %3198 = vrot.lane.b32.xlu2 %v11929_v19, %s10856_s20  ;;  %v3003_v20 = vunpack.c.l.b16 %v1881_v33  ;;  %v1910_v14 = vrot.slane %v1908_v18, 4  ;;  %v1901_v63 = vrot.slane %v1899_v1, 4  ;;  %v9718_v27 = vrot.slane %v10545_v10, 9 }
 0x14e   : > { %18034 = vst [vmem:[#allocation93_spill] sm:$0xff] %v11933_v4  ;;  %v1896_v60 = vrot.slane %v10546_v5, 5  ;;  %3196 = vrot.lane.b32.xlu1 %v11933_v4, %s10856_s20  ;;  %v1909_v54 = vsel %vm11835_vm5, %v1907_v51, %v1908_v18  ;;  %v1904_v22 = vrot.slane %v1902_v47, 4  ;;  %v10552_v4 = vld [vmem:[%s10965_s10 + $0x64] sm:$0xf] }
 0x14f   : > { %v11948_v45 = vpack.c.b16 %v3003_v20, %v3002_v28  ;;  %v1912_v33 = vsel %vm11835_vm5, %v1910_v14, %v1911_v58  ;;  %v3012_v37 = vunpack.c.l.b16 %v1909_v54  ;;  %v1903_v10 = vsel %vm11835_vm5, %v1901_v63, %v1902_v47  ;;  %v11958_v28 = vpop.permute.xlu2 %2952  ;;  %18039 = vst [vmem:[#allocation98_spill] sm:$0xff] %v11964_v26  ;;  %v10547_v63 = vld [vmem:[%s10965_s10 + $0x74] sm:$0xf] }
 0x150   : > { %v3013_v0 = vunpack.c.l.b16 %v1912_v33  ;;  %v1897_v5 = vsel %vm11835_vm5, %v9718_v27, %v1896_v60  ;;  %18037 = vst [vmem:[#allocation96_spill] sm:$0xff] %v11958_v28  ;;  %v1906_v18 = vsel %vm11835_vm5, %v1904_v22, %v1905_v35  ;;  %v3010_v20 = vunpack.c.l.b16 %v1903_v10  ;;  %v10548_v35 = vld [vmem:[%s10965_s10 + $0x78] sm:$0xf]  ;;  %v10549_v10 = vld [vmem:[%s10965_s10 + $0x7c] sm:$0xf] }
 0x151   : > { %18036 = vst [vmem:[#allocation95_spill] sm:$0xff] %v11948_v45  ;;  %v1898_v51 = vrot.slane %v1896_v60, 4  ;;  %v3011_v54 = vunpack.c.l.b16 %v1906_v18  ;;  %v3008_v33 = vunpack.c.l.b16 %v1897_v5  ;;  %v1924_v27 = vrot.slane %v10547_v63, 5  ;;  %v10550_v5 = vld [vmem:[%s10965_s10 + $0x6c] sm:$0xf] }
 0x152   : > { %v11962_v14 = vpack.c.b16 %v3013_v0, %v3012_v37  ;;  %v1927_v22 = vrot.slane %v10548_v35, 5  ;;  %v1930_v60 = vrot.slane %v10549_v10, 5  ;;  %v9719_v18 = vrot.slane %v10550_v5, 9  ;;  %v10551_v28 = vld [vmem:[%s10965_s10 + $0x70] sm:$0xf] }
 0x153   : > { %3194 = vrot.lane.b32.xlu0 %v11948_v45, %s10856_s20  ;;  %v1900_v47 = vsel %vm11835_vm5, %v1898_v51, %v1899_v1  ;;  %v11973_v37 = vpack.c.b16 %v3011_v54, %v3010_v20  ;;  %v1921_v6 = vrot.slane %v10551_v28, 5  ;;  %v1926_v26 = vrot.slane %v1924_v27, 4  ;;  %v10553_v54 = vld [vmem:[%s10965_s10 + $0x68] sm:$0x1] }
 0x154   : > { %18038 = vst [vmem:[#allocation97_spill] sm:$0xff] %v11962_v14  ;;  %v3009_v0 = vunpack.c.l.b16 %v1900_v47  ;;  %v1929_v1 = vrot.slane %v1927_v22, 4  ;;  %v1913_v51 = vrot.slane %v1911_v58, 4  ;;  %v1914_v63 = vrot.slane %v10552_v4, 5 }
 0x155   : > { %18040 = vst [vmem:[#allocation99_spill] sm:$0xff] %v11973_v37  ;;  %3204 = vrot.lane.b32.xlu2 %v11962_v14, %s10856_s20  ;;  %v1922_v35 = vsel %vm11835_vm5, %v9719_v18, %v1921_v6  ;;  %v1923_v20 = vrot.slane %v1921_v6, 4  ;;  %v1917_v47 = vrot.slane %v10553_v54, 5  ;;  %v1928_v28 = vsel %vm11835_vm5, %v1926_v26, %v1927_v22  ;;  %v12013_v14 = vpop.permute.xlu0 %2936 }
 0x156   : > { %v11980_v19 = vpack.c.b16 %v3009_v0, %v3008_v33  ;;  %3202 = vrot.lane.b32.xlu1 %v11973_v37, %s10856_s20  ;;  %v1931_v58 = vsel %vm11835_vm5, %v1929_v1, %v1930_v60  ;;  %v3016_v10 = vunpack.c.l.b16 %v1922_v35  ;;  %v1915_v4 = vsel %vm11835_vm5, %v1913_v51, %v1914_v63  ;;  %v11993_v33 = vpop.permute.xlu1 %2938  ;;  %v10554_v51 = vld [vmem:[%s10965_s10 + $0x90] sm:$0xf]  ;;  %18046 = vst [vmem:[#allocation105_spill] sm:$0xff] %v12013_v14 }
 0x157   : > { %18042 = vst [vmem:[#allocation101_spill] sm:$0xff] %v11993_v33  ;;  %v3018_v6 = vunpack.c.l.b16 %v1928_v28  ;;  %v3019_v0 = vunpack.c.l.b16 %v1931_v58  ;;  %v1925_v5 = vsel %vm11835_vm5, %v1923_v20, %v1924_v27  ;;  %v1916_v18 = vrot.slane %v1914_v63, 4  ;;  %v12002_v33 = vpop.permute.xlu2 %2958  ;;  %v10555_v63 = vld [vmem:[%s10965_s10 + $0x94] sm:$0xf]  ;;  %v10556_v58 = vld [vmem:[%s10965_s10 + $0x98] sm:$0xf] }
 0x158   : > { %18041 = vst [vmem:[#allocation100_spill] sm:$0xff] %v11980_v19  ;;  %v3017_v54 = vunpack.c.l.b16 %v1925_v5  ;;  %v3014_v1 = vunpack.c.l.b16 %v1915_v4  ;;  %v9720_v35 = vrot.slane %v10554_v51, 9  ;;  %v1946_v20 = vrot.slane %v10555_v63, 5  ;;  %v10559_v4 = vld [vmem:[%s10965_s10 + $0x8c] sm:$0x1] }
 0x159   : > { %v11997_v26 = vpack.c.b16 %v3019_v0, %v3018_v6  ;;  %v1918_v22 = vsel %vm11835_vm5, %v1916_v18, %v1917_v47  ;;  %18044 = vst [vmem:[#allocation103_spill] sm:$0xff] %v12002_v33  ;;  %v1949_v6 = vrot.slane %v10556_v58, 5  ;;  %v10557_v0 = vld [vmem:[%s10965_s10 + $0x84] sm:$0xf]  ;;  %v10558_v47 = vld [vmem:[%s10965_s10 + $0x88] sm:$0xf] }
 0x15a   : > { %v12006_v28 = vpack.c.b16 %v3017_v54, %v3016_v10  ;;  %v3015_v27 = vunpack.c.l.b16 %v1918_v22  ;;  %v1936_v5 = vrot.slane %v10557_v0, 5  ;;  %v1939_v18 = vrot.slane %v10558_v47, 5  ;;  %v10560_v22 = vld [vmem:[%s10965_s10 + $0x80] sm:$0xf] }
 0x15b   : > { %18043 = vst [vmem:[#allocation102_spill] sm:$0xff] %v11997_v26  ;;  %3200 = vrot.lane.b32.xlu0 %v11980_v19, %s10856_s20  ;;  %v1942_v37 = vrot.slane %v10559_v4, 5  ;;  %v1932_v51 = vrot.slane %v1930_v60, 4  ;;  %v1947_v10 = vsel %vm11835_vm5, %v9720_v35, %v1946_v20  ;;  %v1948_v54 = vrot.slane %v1946_v20, 4 }
 0x15c   : > { %18045 = vst [vmem:[#allocation104_spill] sm:$0xff] %v12006_v28  ;;  %v1933_v63 = vrot.slane %v10560_v22, 5  ;;  %v3024_v33 = vunpack.c.l.b16 %v1947_v10  ;;  %v1938_v58 = vrot.slane %v1936_v5, 4  ;;  %v1941_v19 = vrot.slane %v1939_v18, 4 }
 0x15d   : > { %3210 = vrot.lane.b32.xlu2 %v11997_v26, %s10856_s20  ;;  %v12022_v0 = vpack.c.b16 %v3015_v27, %v3014_v1  ;;  %v1950_v60 = vsel %vm11835_vm5, %v1948_v54, %v1949_v6  ;;  %v10562_v26 = vld [vmem:[%s10965_s10 + $0xac] sm:$0xf] }
 0x15e   : > { %3208 = vrot.lane.b32.xlu1 %v12006_v28, %s10856_s20  ;;  %v1934_v47 = vsel %vm11835_vm5, %v1932_v51, %v1933_v63  ;;  %v1935_v35 = vrot.slane %v1933_v63, 4  ;;  %v3025_v20 = vunpack.c.l.b16 %v1950_v60  ;;  %v1940_v4 = vsel %vm11835_vm5, %v1938_v58, %v1939_v18  ;;  %v12034_v14 = vpop.permute.xlu1 %2944  ;;  %v10561_v60 = vld [vmem:[%s10965_s10 + $0xa8] sm:$0xf] }
 0x15f   : > { %18047 = vst [vmem:[#allocation106_spill] sm:$0xff] %v12022_v0  ;;  %v1943_v10 = vsel %vm11835_vm5, %v1941_v19, %v1942_v37  ;;  %v3022_v22 = vunpack.c.l.b16 %v1940_v4  ;;  %v3020_v54 = vunpack.c.l.b16 %v1934_v47  ;;  %v1961_v28 = vrot.slane %v10561_v60, 5  ;;  %v10563_v37 = vld [vmem:[%s10965_s10 + $0xb0] sm:$0x1]  ;;  %v10564_v4 = vld [vmem:[%s10965_s10 + $0xa0] sm:$0xf] }
 0x160   : > { %v3023_v1 = vunpack.c.l.b16 %v1943_v10  ;;  %v1937_v27 = vsel %vm11835_vm5, %v1935_v35, %v1936_v5  ;;  %18048 = vst [vmem:[#allocation107_spill] sm:$0xff] %v12034_v14  ;;  %v12036_v51 = vpack.c.b16 %v3025_v20, %v3024_v33  ;;  %v1964_v18 = vrot.slane %v10562_v26, 5  ;;  %v10565_v47 = vld [vmem:[%s10965_s10 + $0xa4] sm:$0xf]  ;;  %v10566_v14 = vld [vmem:[%s10965_s10 + $0x9c] sm:$0xf] }
 0x161   : > { %v3021_v63 = vunpack.c.l.b16 %v1937_v27  ;;  %v1967_v58 = vrot.slane %v10563_v37, 5  ;;  %v1955_v5 = vrot.slane %v10564_v4, 5  ;;  %v1958_v35 = vrot.slane %v10565_v47, 5  ;;  %v12047_v27 = vpop.permute.xlu2 %2964 }
 0x162   : > { %18049 = vst [vmem:[#allocation108_spill] sm:$0xff] %v12036_v51  ;;  %v12042_v19 = vpack.c.b16 %v3023_v1, %v3022_v22  ;;  %v1963_v10 = vrot.slane %v1961_v28, 4  ;;  %v1966_v33 = vrot.slane %v1964_v18, 4  ;;  %v1951_v20 = vrot.slane %v1949_v6, 4  ;;  %v12058_v6 = vpop.permute.xlu0 %2942 }
 0x163   : > { %3206 = vrot.lane.b32.xlu0 %v12022_v0, %s10856_s20  ;;  %18051 = vst [vmem:[#allocation110_spill] sm:$0xff] %v12047_v27  ;;  %v1957_v26 = vrot.slane %v1955_v5, 4  ;;  %v1960_v60 = vrot.slane %v1958_v35, 4  ;;  %v1952_v0 = vrot.slane %v10566_v14, 5  ;;  %v12052_v22 = vpack.c.b16 %v3021_v63, %v3020_v54 }
 0x164   : > { %18050 = vst [vmem:[#allocation109_spill] sm:$0xff] %v12042_v19  ;;  %v1965_v1 = vsel %vm11835_vm5, %v1963_v10, %v1964_v18  ;;  %v1968_v37 = vsel %vm11835_vm5, %v1966_v33, %v1967_v58 }
 0x165   : > { %3216 = vrot.lane.b32.xlu2 %v12036_v51, %s10856_s20  ;;  %18052 = vst [vmem:[#allocation111_spill] sm:$0xff] %v12052_v22  ;;  %v3030_v4 = vunpack.c.l.b16 %v1965_v1  ;;  %v3031_v47 = vunpack.c.l.b16 %v1968_v37  ;;  %v1959_v14 = vsel %vm11835_vm5, %v1957_v26, %v1958_v35  ;;  %v1962_v54 = vsel %vm11835_vm5, %v1960_v60, %v1961_v28  ;;  %v10567_v1 = vld [vmem:[%s10965_s10 + $0xc4] sm:$0xf]  ;;  %v10568_v37 = vld [vmem:[%s10965_s10 + $0xc8] sm:$0xf] }
 0x166   : > { %18053 = vst [vmem:[#allocation112_spill] sm:$0xff] %v12058_v6  ;;  %3214 = vrot.lane.b32.xlu1 %v12042_v19, %s10856_s20  ;;  %v3028_v63 = vunpack.c.l.b16 %v1959_v14  ;;  %v3029_v18 = vunpack.c.l.b16 %v1962_v54  ;;  %v1953_v58 = vsel %vm11835_vm5, %v1951_v20, %v1952_v0  ;;  %v1954_v10 = vrot.slane %v1952_v0, 4  ;;  %v10569_v26 = vld [vmem:[%s10965_s10 + $0xcc] sm:$0xf]  ;;  %v10570_v14 = vld [vmem:[%s10965_s10 + $0xbc] sm:$0xf] }
 0x167   : > { %v12068_v33 = vpack.c.b16 %v3031_v47, %v3030_v4  ;;  %v3026_v6 = vunpack.c.l.b16 %v1953_v58  ;;  %v1980_v27 = vrot.slane %v10567_v1, 5  ;;  %v1983_v19 = vrot.slane %v10568_v37, 5  ;;  %v10571_v54 = vld [vmem:[%s10965_s10 + $0xc0] sm:$0xf]  ;;  %v12081_v1 = vpop.permute.xlu1 %2950  ;;  %v10573_v51 = vld [vmem:[%s10965_s10 + $0xb8] sm:$0xf] }
 0x168   : > { %v12072_v35 = vpack.c.b16 %v3029_v18, %v3028_v63  ;;  %v1956_v28 = vsel %vm11835_vm5, %v1954_v10, %v1955_v5  ;;  %v1986_v60 = vrot.slane %v10569_v26, 5  ;;  %v1974_v20 = vrot.slane %v10570_v14, 5  ;;  %18056 = vst [vmem:[#allocation115_spill] sm:$0xff] %v12081_v1  ;;  %v10572_v18 = vld [vmem:[%s10965_s10 + $0xb4] sm:$0xf] }
 0x169   : > { %18054 = vst [vmem:[#allocation113_spill] sm:$0xff] %v12068_v33  ;;  %v3027_v0 = vunpack.c.l.b16 %v1956_v28  ;;  %v1982_v4 = vrot.slane %v1980_v27, 4  ;;  %v1985_v47 = vrot.slane %v1983_v19, 4  ;;  %v1977_v58 = vrot.slane %v10571_v54, 5 }
 0x16a   : > { %18055 = vst [vmem:[#allocation114_spill] sm:$0xff] %v12072_v35  ;;  %v1976_v63 = vrot.slane %v1974_v20, 4  ;;  %v9721_v37 = vrot.slane %v10572_v18, 9  ;;  %v1971_v45 = vrot.slane %v10573_v51, 5  ;;  %v12095_v18 = vpop.permute.xlu2 %2970 }
 0x16b   : > { %3212 = vrot.lane.b32.xlu0 %v12052_v22, %s10856_s20  ;;  %v1984_v5 = vsel %vm11835_vm5, %v1982_v4, %v1983_v19  ;;  %v1987_v10 = vsel %vm11835_vm5, %v1985_v47, %v1986_v60  ;;  %v1979_v28 = vrot.slane %v1977_v58, 4  ;;  %18057 = vst [vmem:[#allocation116_spill] sm:$0xff] %v12095_v18  ;;  %v12099_v19 = vpack.c.b16 %v3027_v0, %v3026_v6  ;;  %v10574_v18 = vld [vmem:[%s10965_s10 + $0xe0] sm:$0xf]  ;;  %v10575_v0 = vld [vmem:[%s10965_s10 + $0xe4] sm:$0xf] }
 0x16c   : > { %v3036_v26 = vunpack.c.l.b16 %v1984_v5  ;;  %v3037_v14 = vunpack.c.l.b16 %v1987_v10  ;;  %v1978_v54 = vsel %vm11835_vm5, %v1976_v63, %v1977_v58  ;;  %v1972_v51 = vsel %vm11835_vm5, %v9721_v37, %v1971_v45  ;;  %v12105_v37 = vpop.permute.xlu0 %2948 }
 0x16d   : > { %3222 = vrot.lane.b32.xlu2 %v12068_v33, %s10856_s20  ;;  %18058 = vst [vmem:[#allocation117_spill] sm:$0xff] %v12099_v19  ;;  %v1981_v4 = vsel %vm11835_vm5, %v1979_v28, %v1980_v27  ;;  %v3034_v47 = vunpack.c.l.b16 %v1978_v54  ;;  %v1973_v5 = vrot.slane %v1971_v45, 4  ;;  %v3032_v63 = vunpack.c.l.b16 %v1972_v51  ;;  %v10576_v33 = vld [vmem:[%s10965_s10 + $0xe8] sm:$0xf]  ;;  %v10578_v54 = vld [vmem:[%s10965_s10 + $0xdc] sm:$0xf] }
 0x16e   : > { %3220 = vrot.lane.b32.xlu1 %v12072_v35, %s10856_s20  ;;  %v12103_v10 = vpack.c.b16 %v3037_v14, %v3036_v26  ;;  %v3035_v58 = vunpack.c.l.b16 %v1981_v4  ;;  %18060 = vst [vmem:[#allocation119_spill] sm:$0xff] %v12105_v37  ;;  %v1999_v6 = vrot.slane %v10574_v18, 5  ;;  %v2002_v35 = vrot.slane %v10575_v0, 5  ;;  %v10577_v26 = vld [vmem:[%s10965_s10 + $0xd8] sm:$0xf] }
 0x16f   : > { %v1975_v1 = vsel %vm11835_vm5, %v1973_v5, %v1974_v20  ;;  %v2005_v27 = vrot.slane %v10576_v33, 5  ;;  %v9722_v14 = vrot.slane %v10577_v26, 9  ;;  %v1996_v51 = vrot.slane %v10578_v54, 5  ;;  %v10579_v37 = vld [vmem:[%s10965_s10 + $0xd0] sm:$0xf] }
 0x170   : > { %18059 = vst [vmem:[#allocation118_spill] sm:$0xff] %v12103_v10  ;;  %v12112_v28 = vpack.c.b16 %v3035_v58, %v3034_v47  ;;  %v3033_v45 = vunpack.c.l.b16 %v1975_v1  ;;  %v2001_v4 = vrot.slane %v1999_v6, 4  ;;  %v2004_v20 = vrot.slane %v2002_v35, 4  ;;  %v10580_v33 = vld [vmem:[%s10965_s10 + $0xd4] sm:$0x1] }
 0x171   : > { %v1988_v5 = vrot.slane %v1986_v60, 4  ;;  %v1989_v18 = vrot.slane %v10579_v37, 5  ;;  %v1997_v0 = vsel %vm11835_vm5, %v9722_v14, %v1996_v51  ;;  %v1998_v22 = vrot.slane %v1996_v51, 4  ;;  %v12130_v37 = vpop.permute.xlu1 %2956 }
 0x172   : > { %18061 = vst [vmem:[#allocation120_spill] sm:$0xff] %v12112_v28  ;;  %v1992_v47 = vrot.slane %v10580_v33, 5  ;;  %v2003_v1 = vsel %vm11835_vm5, %v2001_v4, %v2002_v35  ;;  %v2006_v58 = vsel %vm11835_vm5, %v2004_v20, %v2005_v27  ;;  %v3040_v26 = vunpack.c.l.b16 %v1997_v0  ;;  %v12140_v0 = vpop.permute.xlu2 %2976 }
 0x173   : > { %3218 = vrot.lane.b32.xlu0 %v12099_v19, %s10856_s20  ;;  %v1990_v60 = vsel %vm11835_vm5, %v1988_v5, %v1989_v18  ;;  %18062 = vst [vmem:[#allocation121_spill] sm:$0xff] %v12130_v37  ;;  %v3042_v14 = vunpack.c.l.b16 %v2003_v1  ;;  %v3043_v54 = vunpack.c.l.b16 %v2006_v58  ;;  %v2000_v51 = vsel %vm11835_vm5, %v1998_v22, %v1999_v6  ;;  %v10581_v1 = vld [vmem:[%s10965_s10 + $0xfc] sm:$0xf]  ;;  %v10582_v6 = vld [vmem:[%s10965_s10 + $0x100] sm:$0xf] }
 0x174   : > { %v1991_v33 = vrot.slane %v1989_v18, 4  ;;  %v12136_v35 = vpack.c.b16 %v3033_v45, %v3032_v63  ;;  %v3041_v4 = vunpack.c.l.b16 %v2000_v51  ;;  %v3038_v5 = vunpack.c.l.b16 %v1990_v60  ;;  %18064 = vst [vmem:[#allocation123_spill] sm:$0xff] %v12140_v0  ;;  %v10583_v63 = vld [vmem:[%s10965_s10 + $0x104] sm:$0xf]  ;;  %v10584_v51 = vld [vmem:[%s10965_s10 + $0xf0] sm:$0xf] }
 0x175   : > { %3228 = vrot.lane.b32.xlu2 %v12103_v10, %s10856_s20  ;;  %v9723_v58 = vrot.slane %v10581_v1, 9  ;;  %v12143_v37 = vpack.c.b16 %v3043_v54, %v3042_v14  ;;  %v2021_v18 = vrot.slane %v10582_v6, 5  ;;  %v2024_v45 = vrot.slane %v10583_v63, 5  ;;  %v10586_v60 = vld [vmem:[%s10965_s10 + $0xf8] sm:$0x1] }
 0x176   : > { %3226 = vrot.lane.b32.xlu1 %v12112_v28, %s10856_s20  ;;  %18063 = vst [vmem:[#allocation122_spill] sm:$0xff] %v12136_v35  ;;  %v1993_v20 = vsel %vm11835_vm5, %v1991_v33, %v1992_v47  ;;  %v12145_v22 = vpack.c.b16 %v3041_v4, %v3040_v26  ;;  %v12149_v28 = vpop.permute.xlu0 %2954  ;;  %v2011_v10 = vrot.slane %v10584_v51, 5  ;;  %v10585_v47 = vld [vmem:[%s10965_s10 + $0xf4] sm:$0xf]  ;;  %v2017_v19 = vrot.slane %v10586_v60, 5 }
 0x177   : > { %18065 = vst [vmem:[#allocation124_spill] sm:$0xff] %v12143_v37  ;;  %v2014_v33 = vrot.slane %v10585_v47, 5  ;;  %v2007_v0 = vrot.slane %v2005_v27, 4  ;;  %v3039_v14 = vunpack.c.l.b16 %v1993_v20  ;;  %v2022_v26 = vsel %vm11835_vm5, %v9723_v58, %v2021_v18  ;;  %v10587_v4 = vld [vmem:[%s10965_s10 + $0xec] sm:$0xf] }
 0x178   : > { %18066 = vst [vmem:[#allocation125_spill] sm:$0xff] %v12145_v22  ;;  %v2023_v54 = vrot.slane %v2021_v18, 4  ;;  %v2008_v1 = vrot.slane %v10587_v4, 5  ;;  %v2013_v6 = vrot.slane %v2011_v10, 4  ;;  %v3048_v27 = vunpack.c.l.b16 %v2022_v26 }
 0x179   : > { %18067 = vst [vmem:[#allocation126_spill] sm:$0xff] %v12149_v28  ;;  %v2016_v63 = vrot.slane %v2014_v33, 4  ;;  %v10588_v28 = vld [vmem:[%s10965_s10 + $0x114] sm:$0xf] }
 0x17a   : > { %v2025_v51 = vsel %vm11835_vm5, %v2023_v54, %v2024_v45  ;;  %v2009_v20 = vsel %vm11835_vm5, %v2007_v0, %v2008_v1  ;;  %v2010_v47 = vrot.slane %v2008_v1, 4  ;;  %v2015_v18 = vsel %vm11835_vm5, %v2013_v6, %v2014_v33  ;;  %v12175_v1 = vpop.permute.xlu1 %2962  ;;  %v10589_v6 = vld [vmem:[%s10965_s10 + $0x118] sm:$0xf] }
 0x17b   : > { %3224 = vrot.lane.b32.xlu0 %v12136_v35, %s10856_s20  ;;  %v3049_v58 = vunpack.c.l.b16 %v2025_v51  ;;  %v2018_v60 = vsel %vm11835_vm5, %v2016_v63, %v2017_v19  ;;  %v12171_v54 = vpack.c.b16 %v3039_v14, %v3038_v5  ;;  %v3046_v26 = vunpack.c.l.b16 %v2015_v18  ;;  %18069 = vst [vmem:[#allocation128_spill] sm:$0xff] %v12175_v1  ;;  %v10590_v19 = vld [vmem:[%s10965_s10 + $0x11c] sm:$0x1]  ;;  %v10592_v14 = vld [vmem:[%s10965_s10 + $0x110] sm:$0xf] }
 0x17c   : > { %v3047_v4 = vunpack.c.l.b16 %v2018_v60  ;;  %v2012_v0 = vsel %vm11835_vm5, %v2010_v47, %v2011_v10  ;;  %v3044_v51 = vunpack.c.l.b16 %v2009_v20  ;;  %v2036_v33 = vrot.slane %v10588_v28, 5 }
 0x17d   : > { %3234 = vrot.lane.b32.xlu2 %v12143_v37, %s10856_s20  ;;  %18068 = vst [vmem:[#allocation127_spill] sm:$0xff] %v12171_v54  ;;  %v2039_v37 = vrot.slane %v10589_v6, 5  ;;  %v12179_v35 = vpack.c.b16 %v3049_v58, %v3048_v27  ;;  %v2042_v63 = vrot.slane %v10590_v19, 5  ;;  %v2033_v18 = vrot.slane %v10592_v14, 5  ;;  %v10593_v6 = vld [vmem:[%s10965_s10 + $0x108] sm:$0xf] }
 0x17e   : > { %3232 = vrot.lane.b32.xlu1 %v12145_v22, %s10856_s20  ;;  %v10591_v22 = vld [vmem:[%s10965_s10 + $0x10c] sm:$0xf]  ;;  %v3045_v60 = vunpack.c.l.b16 %v2012_v0  ;;  %v2038_v10 = vrot.slane %v2036_v33, 4  ;;  %v2026_v20 = vrot.slane %v2024_v45, 4  ;;  %v12188_v28 = vpack.c.b16 %v3047_v4, %v3046_v26  ;;  %v12191_v1 = vpop.permute.xlu0 %2960  ;;  %v10594_v14 = vld [vmem:[%s10965_s10 + $0x130] sm:$0xf] }
 0x17f   : > { %18070 = vst [vmem:[#allocation129_spill] sm:$0xff] %v12179_v35  ;;  %v2030_v5 = vrot.slane %v10591_v22, 5  ;;  %v12184_v12 = vpop.permute.xlu2 %2982  ;;  %v2041_v47 = vrot.slane %v2039_v37, 4  ;;  %v2035_v58 = vrot.slane %v2033_v18, 4  ;;  %v2027_v19 = vrot.slane %v10593_v6, 5 }
 0x180   : > { %18071 = vst [vmem:[#allocation130_spill] sm:$0xff] %v12184_v12  ;;  %v2040_v22 = vsel %vm11835_vm5, %v2038_v10, %v2039_v37  ;;  %v2055_v45 = vrot.slane %v10594_v14, 5  ;;  %v12204_v37 = vpack.c.b16 %v3045_v60, %v3044_v51  ;;  %v10595_v14 = vld [vmem:[%s10965_s10 + $0x134] sm:$0xf] }
 0x181   : > { %18072 = vst [vmem:[#allocation131_spill] sm:$0xff] %v12188_v28  ;;  %v2032_v27 = vrot.slane %v2030_v5, 4  ;;  %v2043_v0 = vsel %vm11835_vm5, %v2041_v47, %v2042_v63  ;;  %v3054_v26 = vunpack.c.l.b16 %v2040_v22  ;;  %v2037_v12 = vsel %vm11835_vm5, %v2035_v58, %v2036_v33  ;;  %v10596_v33 = vld [vmem:[%s10965_s10 + $0x138] sm:$0xf] }
 0x182   : > { %18073 = vst [vmem:[#allocation132_spill] sm:$0xff] %v12191_v1  ;;  %v3055_v4 = vunpack.c.l.b16 %v2043_v0  ;;  %v2028_v63 = vsel %vm11835_vm5, %v2026_v20, %v2027_v19  ;;  %v2029_v10 = vrot.slane %v2027_v19, 4  ;;  %v3053_v22 = vunpack.c.l.b16 %v2037_v12  ;;  %v10597_v20 = vld [vmem:[%s10965_s10 + $0x128] sm:$0xf]  ;;  %v10598_v12 = vld [vmem:[%s10965_s10 + $0x12c] sm:$0xf] }
 0x183   : > { %3230 = vrot.lane.b32.xlu0 %v12171_v54, %s10856_s20  ;;  %v2034_v6 = vsel %vm11835_vm5, %v2032_v27, %v2033_v18  ;;  %18074 = vst [vmem:[#allocation133_spill] sm:$0xff] %v12204_v37  ;;  %v2057_v0 = vrot.slane %v2055_v45, 4  ;;  %v2058_v1 = vrot.slane %v10595_v14, 5  ;;  %v2061_v60 = vrot.slane %v10596_v33, 5 }
 0x184   : > { %v3052_v47 = vunpack.c.l.b16 %v2034_v6  ;;  %v12211_v18 = vpack.c.b16 %v3055_v4, %v3054_v26  ;;  %v2031_v51 = vsel %vm11835_vm5, %v2029_v10, %v2030_v5  ;;  %v2049_v27 = vrot.slane %v10597_v20, 5  ;;  %v10599_v4 = vld [vmem:[%s10965_s10 + $0x120] sm:$0xf] }
 0x185   : > { %3240 = vrot.lane.b32.xlu2 %v12179_v35, %s10856_s20  ;;  %v3050_v58 = vunpack.c.l.b16 %v2028_v63  ;;  %v3051_v19 = vunpack.c.l.b16 %v2031_v51  ;;  %v2060_v6 = vrot.slane %v2058_v1, 4  ;;  %v2052_v35 = vrot.slane %v10598_v12, 5 }
 0x186   : > { %3238 = vrot.lane.b32.xlu1 %v12188_v28, %s10856_s20  ;;  %18075 = vst [vmem:[#allocation134_spill] sm:$0xff] %v12211_v18  ;;  %v12217_v28 = vpop.permute.xlu1 %2968  ;;  %v2059_v14 = vsel %vm11835_vm5, %v2057_v0, %v2058_v1  ;;  %v2051_v26 = vrot.slane %v2049_v27, 4  ;;  %v9724_v54 = vrot.slane %v10599_v4, 9  ;;  %v12226_v5 = vpack.c.b16 %v3053_v22, %v3052_v47  ;;  %v12240_v20 = vpop.permute.xlu0 %2966 }
 0x187   : > { %18076 = vst [vmem:[#allocation135_spill] sm:$0xff] %v12217_v28  ;;  %v2062_v63 = vsel %vm11835_vm5, %v2060_v6, %v2061_v60  ;;  %v2054_v10 = vrot.slane %v2052_v35, 4  ;;  %v2048_v0 = vrot.slane %v2046_v25, 4  ;;  %v3060_v48 = vunpack.c.l.b16 %v2059_v14 }
 0x188   : > { %18077 = vst [vmem:[#allocation136_spill] sm:$0xff] %v12226_v5  ;;  %v2053_v1 = vsel %vm11835_vm5, %v2051_v26, %v2052_v35  ;;  %v3061_v47 = vunpack.c.l.b16 %v2062_v63  ;;  %v12238_v33 = vpack.c.b16 %v3051_v19, %v3050_v58  ;;  %v2047_v35 = vsel %vm11835_vm5, %v9724_v54, %v2046_v25  ;;  %v10601_v26 = vld [vmem:[%s10965_s10 + $0x14c] sm:$0xf]  ;;  %v12251_v58 = vld [vmem:[%s10965_s10 + $0x154] sm:$0xf] }
 0x189   : > { %v2056_v22 = vsel %vm11835_vm5, %v2054_v10, %v2055_v45  ;;  %18080 = vst [vmem:[#allocation139_spill] sm:$0xff] %v12240_v20  ;;  %v3058_v6 = vunpack.c.l.b16 %v2053_v1  ;;  %v2050_v14 = vsel %vm11835_vm5, %v2048_v0, %v2049_v27  ;;  %v2074_v4 = vrot.slane %v10601_v26, 5  ;;  %v10602_v45 = vld [vmem:[%s10965_s10 + $0x150] sm:$0xf]  ;;  %v10604_v10 = vld [vmem:[%s10965_s10 + $0x144] sm:$0xf] }
 0x18a   : > { %18079 = vst [vmem:[#allocation138_spill] sm:$0xff] %v12238_v33  ;;  %v3059_v12 = vunpack.c.l.b16 %v2056_v22  ;;  %v2077_v63 = vrot.slane %v10602_v45, 5  ;;  %v2080_v19 = vrot.slane %v12251_v58, 5  ;;  %v9725_v1 = vrot.slane %v10604_v10, 9  ;;  %v10605_v22 = vld [vmem:[%s10965_s10 + $0x148] sm:$0xf] }
 0x18b   : > { %3236 = vrot.lane.b32.xlu0 %v12204_v37, %s10856_s20  ;;  %v2071_v25 = vrot.slane %v10605_v22, 5  ;;  %v12256_v54 = vpack.c.b16 %v3061_v47, %v3060_v48  ;;  %v10606_v20 = vld [vmem:[%s10965_s10 + $0x13c] sm:$0xf]  ;;  %v3056_v27 = vunpack.c.l.b16 %v2047_v35  ;;  %v3057_v0 = vunpack.c.l.b16 %v2050_v14 }
 0x18c   : > { %v2079_v28 = vrot.slane %v2077_v63, 4  ;;  %v2063_v45 = vrot.slane %v2061_v60, 4  ;;  %v12261_v58 = vpack.c.b16 %v3059_v12, %v3058_v6 }
 0x18d   : > { %v12230_v51 = vpop.permute.xlu2 %2988  ;;  %3246 = vrot.lane.b32.xlu2 %v12211_v18, %s10856_s20  ;;  %18081 = vst [vmem:[#allocation140_spill] sm:$0xff] %v12256_v54  ;;  %v2073_v26 = vrot.slane %v2071_v25, 4  ;;  %v2072_v60 = vsel %vm11835_vm5, %v9725_v1, %v2071_v25  ;;  %v12280_v18 = vpack.c.b16 %v3057_v0, %v3056_v27  ;;  %v10610_v1 = vld [vmem:[%s10965_s10 + $0x170] sm:$0xf]  ;;  %v10611_v0 = vld [vmem:[%s10965_s10 + $0x15c] sm:$0xf] }
 0x18e   : > { %18078 = vst [vmem:[#allocation137_spill] sm:$0xff] %v12230_v51  ;;  %3244 = vrot.lane.b32.xlu1 %v12226_v5, %s10856_s20  ;;  %v2076_v51 = vrot.slane %v2074_v4, 4  ;;  %v2064_v5 = vrot.slane %v10606_v20, 5  ;;  %v12263_v10 = vpop.permute.xlu1 %2974  ;;  %v2081_v47 = vsel %vm11835_vm5, %v2079_v28, %v2080_v19  ;;  %v10607_v20 = vld [vmem:[%s10965_s10 + $0x140] sm:$0x1]  ;;  %v2099_v25 = vrot.slane %v10610_v1, 5 }
 0x18f   : > { %18082 = vst [vmem:[#allocation141_spill] sm:$0xff] %v12261_v58  ;;  %v2067_v35 = vrot.slane %v10607_v20, 5  ;;  %v2075_v14 = vsel %vm11835_vm5, %v2073_v26, %v2074_v4  ;;  %v3064_v26 = vunpack.c.l.b16 %v2072_v60  ;;  %v10613_v1 = vld [vmem:[%s10965_s10 + $0x164] sm:$0x1] }
 0x190   : > { %18083 = vst [vmem:[#allocation142_spill] sm:$0xff] %v12263_v10  ;;  %v2078_v48 = vsel %vm11835_vm5, %v2076_v51, %v2077_v63  ;;  %v2066_v22 = vrot.slane %v2064_v5, 4  ;;  %v3067_v51 = vunpack.c.l.b16 %v2081_v47  ;;  %v10608_v63 = vld [vmem:[%s10965_s10 + $0x168] sm:$0xf]  ;;  %v10609_v10 = vld [vmem:[%s10965_s10 + $0x16c] sm:$0xf]  ;;  %v2065_v4 = vsel %vm11835_vm5, %v2063_v45, %v2064_v5 }
 0x191   : > { %v3066_v12 = vunpack.c.l.b16 %v2078_v48  ;;  %v9726_v28 = vrot.slane %v10608_v63, 9  ;;  %v2096_v20 = vrot.slane %v10609_v10, 5  ;;  %18085 = vst [vmem:[#allocation144_spill] sm:$0xff] %v12280_v18  ;;  %v3065_v48 = vunpack.c.l.b16 %v2075_v14  ;;  %v10612_v45 = vld [vmem:[%s10965_s10 + $0x160] sm:$0xf] }
 0x192   : > { %v2068_v47 = vsel %vm11835_vm5, %v2066_v22, %v2067_v35  ;;  %v2086_v5 = vrot.slane %v10611_v0, 5  ;;  %v2089_v10 = vrot.slane %v10612_v45, 5  ;;  %v3062_v60 = vunpack.c.l.b16 %v2065_v4  ;;  %v10614_v14 = vld [vmem:[%s10965_s10 + $0x158] sm:$0xf] }
 0x193   : > { %3242 = vrot.lane.b32.xlu0 %v12238_v33, %s10856_s20  ;;  %v2098_v63 = vrot.slane %v2096_v20, 4  ;;  %v2097_v27 = vsel %vm11835_vm5, %v9726_v28, %v2096_v20  ;;  %v2083_v22 = vrot.slane %v10614_v14, 5  ;;  %v2111_v28 = vrot.slane %v10615_v31, 5 }
 0x194   : > { %v2088_v33 = vrot.slane %v2086_v5, 4  ;;  %v2091_v37 = vrot.slane %v2089_v10, 4  ;;  %v12304_v20 = vpack.c.b16 %v3065_v48, %v3064_v26  ;;  %v3072_v0 = vunpack.c.l.b16 %v2097_v27 }
 0x195   : > { %3252 = vrot.lane.b32.xlu2 %v12256_v54, %s10856_s20  ;;  %v12296_v54 = vpack.c.b16 %v3067_v51, %v3066_v12  ;;  %v2100_v35 = vsel %vm11835_vm5, %v2098_v63, %v2099_v25  ;;  %v2082_v12 = vrot.slane %v2080_v19, 4  ;;  %v10616_v51 = vld [vmem:[%s10965_s10 + $0x184] sm:$0xf]  ;;  %v2113_v26 = vrot.slane %v2111_v28, 4 }
 0x196   : > { %v12276_v6 = vpop.permute.xlu2 %3186  ;;  %3250 = vrot.lane.b32.xlu1 %v12261_v58, %s10856_s20  ;;  %v2092_v58 = vrot.slane %v10613_v1, 5  ;;  %18088 = vst [vmem:[#allocation147_spill] sm:$0xff] %v12304_v20  ;;  %v2114_v4 = vrot.slane %v10616_v51, 5  ;;  %v3073_v45 = vunpack.c.l.b16 %v2100_v35  ;;  %v2090_v63 = vsel %vm11835_vm5, %v2088_v33, %v2089_v10  ;;  %v10617_v35 = vld [vmem:[%s10965_s10 + $0x188] sm:$0x1] }
 0x197   : > { %18084 = vst [vmem:[#allocation143_spill] sm:$0xff] %v12276_v6  ;;  %v12289_v6 = vpop.permute.xlu0 %2972  ;;  %v2085_v1 = vrot.slane %v2083_v22, 4  ;;  %v2117_v14 = vrot.slane %v10617_v35, 5  ;;  %v10618_v10 = vld [vmem:[%s10965_s10 + $0x178] sm:$0xf] }
 0x198   : > { %18086 = vst [vmem:[#allocation145_spill] sm:$0xff] %v12289_v6  ;;  %v3063_v6 = vunpack.c.l.b16 %v2068_v47  ;;  %v2093_v47 = vsel %vm11835_vm5, %v2091_v37, %v2092_v58  ;;  %v2116_v27 = vrot.slane %v2114_v4, 4  ;;  %v3070_v37 = vunpack.c.l.b16 %v2090_v63 }
 0x199   : > { %18087 = vst [vmem:[#allocation146_spill] sm:$0xff] %v12296_v54  ;;  %v3071_v33 = vunpack.c.l.b16 %v2093_v47  ;;  %v2084_v58 = vsel %vm11835_vm5, %v2082_v12, %v2083_v22  ;;  %v2105_v51 = vrot.slane %v10618_v10, 5  ;;  %v2115_v35 = vsel %vm11835_vm5, %v2113_v26, %v2114_v4 }
 0x19a   : > { %v12315_v48 = vpack.c.b16 %v3063_v6, %v3062_v60  ;;  %v12325_v6 = vpack.c.b16 %v3073_v45, %v3072_v0  ;;  %v2087_v60 = vsel %vm11835_vm5, %v2085_v1, %v2086_v5  ;;  %v2118_v63 = vsel %vm11835_vm5, %v2116_v27, %v2117_v14  ;;  %v10621_v0 = vld [vmem:[%s10965_s10 + $0x19c] sm:$0xf] }
 0x19b   : > { %3248 = vrot.lane.b32.xlu0 %v12280_v18, %s10856_s20  ;;  %v12313_v31 = vpop.permute.xlu1 %2980  ;;  %v2107_v47 = vrot.slane %v2105_v51, 4  ;;  %v2130_v45 = vrot.slane %v10621_v0, 5  ;;  %v10622_v18 = vld [vmem:[%s10965_s10 + $0x1a0] sm:$0xf]  ;;  %v12341_v4 = vpack.c.b16 %v3071_v33, %v3070_v37  ;;  %v3068_v1 = vunpack.c.l.b16 %v2084_v58  ;;  %v10623_v33 = vld [vmem:[%s10965_s10 + $0x194] sm:$0xf] }
 0x19c   : > { %18089 = vst [vmem:[#allocation148_spill] sm:$0xff] %v12313_v31  ;;  %v10619_v31 = vld [vmem:[%s10965_s10 + $0x17c] sm:$0xf]  ;;  %v2133_v5 = vrot.slane %v10622_v18, 5  ;;  %v3079_v26 = vunpack.c.l.b16 %v2118_v63  ;;  %v2124_v0 = vrot.slane %v10623_v33, 5 }
 0x19d   : > { %3258 = vrot.lane.b32.xlu2 %v12296_v54, %s10856_s20  ;;  %18090 = vst [vmem:[#allocation149_spill] sm:$0xff] %v12315_v48  ;;  %v10620_v54 = vld [vmem:[%s10965_s10 + $0x174] sm:$0xf]  ;;  %v2132_v37 = vrot.slane %v2130_v45, 4 }
 0x19e   : > { %v12317_v19 = vpop.permute.xlu2 %3192  ;;  %3256 = vrot.lane.b32.xlu1 %v12304_v20, %s10856_s20  ;;  %18092 = vst [vmem:[#allocation151_spill] sm:$0xff] %v12325_v6  ;;  %v2101_v20 = vrot.slane %v2099_v25, 4  ;;  %v2102_v22 = vrot.slane %v10620_v54, 5  ;;  %v3078_v25 = vunpack.c.l.b16 %v2115_v35  ;;  %v2135_v58 = vrot.slane %v2133_v5, 4 }
 0x19f   : > { %18091 = vst [vmem:[#allocation150_spill] sm:$0xff] %v12317_v19  ;;  %v2108_v19 = vrot.slane %v10619_v31, 5  ;;  %v12335_v12 = vpop.permute.xlu0 %2978  ;;  %v3069_v31 = vunpack.c.l.b16 %v2087_v60  ;;  %v12353_v60 = vld [vmem:[%s10965_s10 + $0x1a4] sm:$0xf]  ;;  %v2126_v33 = vrot.slane %v2124_v0, 4 }
 0x1a0   : > { %18093 = vst [vmem:[#allocation152_spill] sm:$0xff] %v12335_v12  ;;  %v2104_v14 = vrot.slane %v2102_v22, 4  ;;  %v2103_v18 = vsel %vm11835_vm5, %v2101_v20, %v2102_v22  ;;  %v2136_v35 = vrot.slane %v12353_v60, 5  ;;  %v12365_v12 = vpack.c.b16 %v3079_v26, %v3078_v25  ;;  %v10628_v26 = vld [vmem:[%s10965_s10 + $0x1b8] sm:$0xf] }
 0x1a1   : > { %v2110_v10 = vrot.slane %v2108_v19, 4  ;;  %18094 = vst [vmem:[#allocation153_spill] sm:$0xff] %v12341_v4  ;;  %v2109_v54 = vsel %vm11835_vm5, %v2107_v47, %v2108_v19  ;;  %v10625_v19 = vld [vmem:[%s10965_s10 + $0x198] sm:$0xf] }
 0x1a2   : > { %v2127_v63 = vrot.slane %v10625_v19, 5  ;;  %v3076_v22 = vunpack.c.l.b16 %v2109_v54  ;;  %18098 = vst [vmem:[#allocation157_spill] sm:$0xff] %v12365_v12  ;;  %v2106_v60 = vsel %vm11835_vm5, %v2104_v14, %v2105_v51  ;;  %v3074_v19 = vunpack.c.l.b16 %v2103_v18  ;;  %v10629_v51 = vld [vmem:[%s10965_s10 + $0x1bc] sm:$0xf] }
 0x1a3   : > { %3254 = vrot.lane.b32.xlu0 %v12315_v48, %s10856_s20  ;;  %v2112_v27 = vsel %vm11835_vm5, %v2110_v10, %v2111_v28  ;;  %v12359_v28 = vpack.c.b16 %v3069_v31, %v3068_v1  ;;  %v10626_v31 = vld [vmem:[%s10965_s10 + $0x18c] sm:$0xf]  ;;  %v2137_v54 = vsel %vm11835_vm5, %v2135_v58, %v2136_v35  ;;  %v2152_v14 = vrot.slane %v10629_v51, 5 }
 0x1a4   : > { %v3077_v10 = vunpack.c.l.b16 %v2112_v27  ;;  %v2129_v1 = vrot.slane %v2127_v63, 4  ;;  %v2128_v25 = vsel %vm11835_vm5, %v2126_v33, %v2127_v63  ;;  %v2149_v27 = vrot.slane %v10628_v26, 5  ;;  %v12390_v26 = vld [vmem:[%s10965_s10 + $0x1c0] sm:$0xf] }
 0x1a5   : > { %3264 = vrot.lane.b32.xlu2 %v12325_v6, %s10856_s20  ;;  %18095 = vst [vmem:[#allocation154_spill] sm:$0xff] %v12359_v28  ;;  %v9727_v6 = vrot.slane %v10626_v31, 9  ;;  %v3075_v18 = vunpack.c.l.b16 %v2106_v60  ;;  %v3085_v63 = vunpack.c.l.b16 %v2137_v54  ;;  %v3082_v33 = vunpack.c.l.b16 %v2128_v25 }
 0x1a6   : > { %3262 = vrot.lane.b32.xlu1 %v12341_v4, %s10856_s20  ;;  %v2134_v4 = vsel %vm11835_vm5, %v2132_v37, %v2133_v5  ;;  %v12381_v5 = vpack.c.b16 %v3077_v10, %v3076_v22  ;;  %v2131_v37 = vsel %vm11835_vm5, %v2129_v1, %v2130_v45  ;;  %v10631_v10 = vld [vmem:[%s10965_s10 + $0x1b4] sm:$0xf]  ;;  %v2151_v1 = vrot.slane %v2149_v27, 4  ;;  %v10632_v22 = vld [vmem:[%s10965_s10 + $0x1b0] sm:$0xf] }
 0x1a7   : > { %v12363_v20 = vpop.permute.xlu2 %3198  ;;  %v3084_v31 = vunpack.c.l.b16 %v2134_v4  ;;  %v2146_v60 = vrot.slane %v10631_v10, 5  ;;  %v3083_v51 = vunpack.c.l.b16 %v2131_v37  ;;  %v12398_v4 = vpack.c.b16 %v3075_v18, %v3074_v19 }
 0x1a8   : > { %v12361_v47 = vpop.permute.xlu1 %2986  ;;  %18097 = vst [vmem:[#allocation156_spill] sm:$0xff] %v12363_v20  ;;  %v9728_v20 = vrot.slane %v10632_v22, 9 }
 0x1a9   : > { %18096 = vst [vmem:[#allocation155_spill] sm:$0xff] %v12361_v47  ;;  %v10627_v47 = vld [vmem:[%s10965_s10 + $0x190] sm:$0xf]  ;;  %v2148_v10 = vrot.slane %v2146_v60, 4  ;;  %v12410_v19 = vpack.c.b16 %v3083_v51, %v3082_v33  ;;  %v12424_v51 = vld [vmem:[%s10965_s10 + $0x1c8] sm:$0xf] }
 0x1aa   : > { %v2121_v48 = vrot.slane %v10627_v47, 5  ;;  %18099 = vst [vmem:[#allocation158_spill] sm:$0xff] %v12381_v5 }
 0x1ab   : > { %3260 = vrot.lane.b32.xlu0 %v12359_v28, %s10856_s20  ;;  %18101 = vst [vmem:[#allocation160_spill] sm:$0xff] %v12398_v4  ;;  %v10641_v28 = vld [vmem:[%s10965_s10 + $0x1c4] sm:$0xf] }
 0x1ac   : > { %v2123_v47 = vrot.slane %v2121_v48, 4  ;;  %v2122_v45 = vsel %vm11835_vm5, %v9727_v6, %v2121_v48  ;;  %v10633_v48 = vld [vmem:[%s10965_s10 + $0x1a8] sm:$0xf]  ;;  %18105 = vst [vmem:[#allocation164_spill] sm:$0xff] %v12410_v19  ;;  %v2158_v16 = vrot.slane %v10641_v28, 5 }
 0x1ad   : > { %v12385_v58 = vpop.permute.xlu0 %2984  ;;  %3270 = vrot.lane.b32.xlu2 %v12365_v12, %s10856_s20  ;;  %v2139_v6 = vrot.slane %v10633_v48, 5  ;;  %v12408_v12 = vpack.c.b16 %v3085_v63, %v3084_v31  ;;  %v2147_v31 = vsel %vm11835_vm5, %v9728_v20, %v2146_v60  ;;  %v2138_v63 = vrot.slane %v2136_v35, 4 }
 0x1ae   : > { %18100 = vst [vmem:[#allocation159_spill] sm:$0xff] %v12385_v58  ;;  %v2154_v58 = vrot.slane %v2152_v14, 4  ;;  %3268 = vrot.lane.b32.xlu1 %v12381_v5, %s10856_s20  ;;  %v2125_v25 = vsel %vm11835_vm5, %v2123_v47, %v2124_v0  ;;  %v3080_v5 = vunpack.c.l.b16 %v2122_v45  ;;  %v2153_v0 = vsel %vm11835_vm5, %v2151_v1, %v2152_v14  ;;  %v10634_v45 = vld [vmem:[%s10965_s10 + $0x1d8] sm:$0xf] }
 0x1af   : > { %v12400_v54 = vpop.permute.xlu2 %3204  ;;  %18104 = vst [vmem:[#allocation163_spill] sm:$0xff] %v12408_v12  ;;  %v3081_v18 = vunpack.c.l.b16 %v2125_v25  ;;  %v18106_v47 = vrot.slane %v12390_v26, 5  ;;  %v2171_v33 = vrot.slane %v10634_v45, 5  ;;  %v2150_v1 = vsel %vm11835_vm5, %v2148_v10, %v2149_v27  ;;  %v10638_v45 = vld [vmem:[%s10965_s10 + $0x1d4] sm:$0xf] }
 0x1b0   : > { %18102 = vst [vmem:[#allocation161_spill] sm:$0xff] %v12400_v54  ;;  %v12405_v37 = vpop.permute.xlu1 %3184  ;;  %v2141_v25 = vrot.slane %v2139_v6, 4  ;;  %v3090_v35 = vunpack.c.l.b16 %v2153_v0  ;;  %v9729_v14 = vrot.slane %v10638_v45, 9  ;;  %v10639_v27 = vld [vmem:[%s10965_s10 + $0x1dc] sm:$0xf]  ;;  %v2140_v0 = vsel %vm11835_vm5, %v2138_v63, %v2139_v6 }
 0x1b1   : > { %18103 = vst [vmem:[#allocation162_spill] sm:$0xff] %v12405_v37  ;;  %v2156_v22 = vsel %vm11835_vm5, %v2154_v58, %v18106_v47  ;;  %v10636_v58 = vld [vmem:[%s10965_s10 + $0x1ac] sm:$0x1]  ;;  %v12435_v60 = vpack.c.b16 %v3081_v18, %v3080_v5  ;;  %v2174_v10 = vrot.slane %v10639_v27, 5  ;;  %v18110_v5 = vrot.slane %v12424_v51, 5 }
 0x1b2   : > { %v2142_v48 = vrot.slane %v10636_v58, 5  ;;  %v10637_v47 = vld [vmem:[%s10965_s10 + $0x1cc] sm:$0xf]  ;;  %v3091_v20 = vunpack.c.l.b16 %v2156_v22  ;;  %v3086_v6 = vunpack.c.l.b16 %v2140_v0  ;;  %v2172_v63 = vsel %vm11835_vm5, %v9729_v14, %v2171_v33  ;;  %v10644_v14 = vld [vmem:[%s10965_s10 + $0x1e4] sm:$0xf] }
 0x1b3   : > { %3266 = vrot.lane.b32.xlu0 %v12398_v4, %s10856_s20  ;;  %v2164_v54 = vrot.slane %v10637_v47, 5  ;;  %18108 = vst [vmem:[#allocation166_spill] sm:$0xff] %v12435_v60  ;;  %v2173_v4 = vrot.slane %v2171_v33, 4  ;;  %v3088_v47 = vunpack.c.l.b16 %v2147_v31  ;;  %v2163_v18 = vrot.slane %v18110_v5, 4 }
 0x1b4   : > { %v2143_v22 = vsel %vm11835_vm5, %v2141_v25, %v2142_v48  ;;  %v12453_v31 = vpack.c.b16 %v3091_v20, %v3090_v35  ;;  %v10643_v48 = vld [vmem:[%s10965_s10 + $0x1f0] sm:$0xf]  ;;  %v18114_v20 = vrot.slane %v12390_v26, 5  ;;  %v10646_v26 = vld [vmem:[%s10965_s10 + $0x1f4] sm:$0x1] }
 0x1b5   : > { %v12431_v37 = vpop.permute.xlu0 %2990  ;;  %3276 = vrot.lane.b32.xlu2 %v12408_v12, %s10856_s20  ;;  %v2166_v45 = vrot.slane %v2164_v54, 4  ;;  %v10640_v12 = vld [vmem:[%s10965_s10 + $0x1d0] sm:$0x1]  ;;  %v2175_v25 = vsel %vm11835_vm5, %v2173_v4, %v2174_v10  ;;  %v2189_v5 = vrot.slane %v10643_v48, 5  ;;  %v3087_v28 = vunpack.c.l.b16 %v2143_v22  ;;  %v10645_v48 = vld [vmem:[%s10965_s10 + $0x1e8] sm:$0xf] }
 0x1b6   : > { %18107 = vst [vmem:[#allocation165_spill] sm:$0xff] %v12431_v37  ;;  %3274 = vrot.lane.b32.xlu1 %v12410_v19, %s10856_s20  ;;  %v3089_v37 = vunpack.c.l.b16 %v2150_v1  ;;  %v2167_v27 = vrot.slane %v10640_v12, 5  ;;  %v10642_v1 = vld [vmem:[%s10965_s10 + $0x1ec] sm:$0xf]  ;;  %v2165_v35 = vsel %vm11835_vm5, %v2163_v18, %v2164_v54  ;;  %v2157_v0 = vrot.slane %v18114_v20, 4 }
 0x1b7   : > { %v12441_v58 = vpop.permute.xlu2 %3210  ;;  %18112 = vst [vmem:[#allocation169_spill] sm:$0xff] %v12453_v31  ;;  %v2160_v4 = vrot.slane %v2158_v16, 4  ;;  %v2191_v18 = vrot.slane %v2189_v5, 4  ;;  %v2192_v22 = vrot.slane %v10646_v26, 5  ;;  %v10647_v20 = vld [vmem:[%s10965_s10 + $0x1e0] sm:$0xf] }
 0x1b8   : > { %18109 = vst [vmem:[#allocation167_spill] sm:$0xff] %v12441_v58  ;;  %v12451_v19 = vpop.permute.xlu1 %3190  ;;  %v2186_v58 = vrot.slane %v10642_v1, 5  ;;  %v12463_v12 = vpack.c.b16 %v3089_v37, %v3088_v47  ;;  %v2168_v33 = vsel %vm11835_vm5, %v2166_v45, %v2167_v27  ;;  %v2180_v1 = vrot.slane %v10644_v14, 5 }
 0x1b9   : > { %18111 = vst [vmem:[#allocation168_spill] sm:$0xff] %v12451_v19  ;;  %v2183_v19 = vrot.slane %v10645_v48, 5  ;;  %v3096_v37 = vunpack.c.l.b16 %v2172_v63  ;;  %v3097_v47 = vunpack.c.l.b16 %v2175_v25  ;;  %v2177_v62 = vrot.slane %v10647_v20, 5 }
 0x1ba   : > { %18113 = vst [vmem:[#allocation170_spill] sm:$0xff] %v12463_v12  ;;  %v2188_v54 = vrot.slane %v2186_v58, 4  ;;  %v12481_v45 = vpack.c.b16 %v3087_v28, %v3086_v6  ;;  %v3094_v14 = vunpack.c.l.b16 %v2165_v35  ;;  %v3095_v48 = vunpack.c.l.b16 %v2168_v33  ;;  %v10648_v35 = vld [vmem:[%s10965_s10 + $0x208] sm:$0xf] }
 0x1bb   : > { %3272 = vrot.lane.b32.xlu0 %v12435_v60, %s10856_s20  ;;  %v2159_v63 = vsel %vm11835_vm5, %v2157_v0, %v2158_v16  ;;  %v18118_v25 = vrot.slane %v12424_v51, 5  ;;  %v2185_v20 = vrot.slane %v2183_v19, 4  ;;  %v12493_v6 = vpack.c.b16 %v3097_v47, %v3096_v37 }
 0x1bc   : > { %18116 = vst [vmem:[#allocation172_spill] sm:$0xff] %v12481_v45  ;;  %v2190_v28 = vsel %vm11835_vm5, %v2188_v54, %v2189_v5  ;;  %v2205_v33 = vrot.slane %v10648_v35, 5  ;;  %v2193_v16 = vsel %vm11835_vm5, %v2191_v18, %v2192_v22  ;;  %v2176_v51 = vrot.slane %v2174_v10, 4  ;;  %v10650_v35 = vld [vmem:[%s10965_s10 + $0x200] sm:$0xf] }
 0x1bd   : > { %v12473_v60 = vpop.permute.xlu0 %3188  ;;  %3282 = vrot.lane.b32.xlu2 %v12453_v31, %s10856_s20  ;;  %v2162_v26 = vsel %vm11835_vm5, %v2160_v4, %v18118_v25  ;;  %18120 = vst [vmem:[#allocation175_spill] sm:$0xff] %v12493_v6  ;;  %v2179_v0 = vrot.slane %v2177_v62, 4  ;;  %v12503_v25 = vpack.c.b16 %v3095_v48, %v3094_v14  ;;  %v3092_v37 = vunpack.c.l.b16 %v2159_v63  ;;  %v10651_v10 = vld [vmem:[%s10965_s10 + $0x204] sm:$0xf] }
 0x1be   : > { %18115 = vst [vmem:[#allocation171_spill] sm:$0xff] %v12473_v60  ;;  %3280 = vrot.lane.b32.xlu1 %v12463_v12, %s10856_s20  ;;  %v2182_v60 = vrot.slane %v2180_v1, 4  ;;  %v3093_v47 = vunpack.c.l.b16 %v2162_v26  ;;  %v2187_v54 = vsel %vm11835_vm5, %v2185_v20, %v2186_v58  ;;  %v2199_v18 = vrot.slane %v10650_v35, 5  ;;  %v10652_v58 = vld [vmem:[%s10965_s10 + $0x210] sm:$0xf] }
 0x1bf   : > { %v12483_v27 = vpop.permute.xlu2 %3216  ;;  %18121 = vst [vmem:[#allocation176_spill] sm:$0xff] %v12503_v25  ;;  %v2202_v22 = vrot.slane %v10651_v10, 5  ;;  %v3102_v14 = vunpack.c.l.b16 %v2190_v28  ;;  %v3103_v48 = vunpack.c.l.b16 %v2193_v16  ;;  %v2207_v63 = vrot.slane %v2205_v33, 4 }
 0x1c0   : > { %18117 = vst [vmem:[#allocation173_spill] sm:$0xff] %v12483_v27  ;;  %v12491_v31 = vpop.permute.xlu1 %3196  ;;  %v10649_v27 = vld [vmem:[%s10965_s10 + $0x20c] sm:$0xf]  ;;  %v2184_v5 = vsel %vm11835_vm5, %v2182_v60, %v2183_v19  ;;  %v2178_v26 = vsel %vm11835_vm5, %v2176_v51, %v2177_v62  ;;  %v2181_v19 = vsel %vm11835_vm5, %v2179_v0, %v2180_v1  ;;  %v2211_v20 = vrot.slane %v10652_v58, 5 }
 0x1c1   : > { %18119 = vst [vmem:[#allocation174_spill] sm:$0xff] %v12491_v31  ;;  %v2208_v4 = vrot.slane %v10649_v27, 5  ;;  %v12522_v35 = vpack.c.b16 %v3093_v47, %v3092_v37  ;;  %v3100_v28 = vunpack.c.l.b16 %v2184_v5  ;;  %v3101_v16 = vunpack.c.l.b16 %v2187_v54  ;;  %v10653_v31 = vld [vmem:[%s10965_s10 + $0x1fc] sm:$0xf]  ;;  %v10654_v5 = vld [vmem:[%s10965_s10 + $0x1f8] sm:$0xf] }
 0x1c2   : > { %v2196_v62 = vrot.slane %v10653_v31, 5  ;;  %v2201_v51 = vrot.slane %v2199_v18, 4  ;;  %v12529_v0 = vpack.c.b16 %v3103_v48, %v3102_v14  ;;  %v3098_v58 = vunpack.c.l.b16 %v2178_v26  ;;  %v10655_v54 = vld [vmem:[%s10965_s10 + $0x224] sm:$0xf]  ;;  %v10656_v31 = vld [vmem:[%s10965_s10 + $0x228] sm:$0xf] }
 0x1c3   : > { %3278 = vrot.lane.b32.xlu0 %v12481_v45, %s10856_s20  ;;  %v2210_v60 = vrot.slane %v2208_v4, 4  ;;  %18123 = vst [vmem:[#allocation178_spill] sm:$0xff] %v12522_v35  ;;  %v2209_v37 = vsel %vm11835_vm5, %v2207_v63, %v2208_v4  ;;  %v2227_v12 = vrot.slane %v10656_v31, 5  ;;  %v12540_v14 = vpack.c.b16 %v3101_v16, %v3100_v28  ;;  %v10657_v63 = vld [vmem:[%s10965_s10 + $0x220] sm:$0xf] }
 0x1c4   : > { %18126 = vst [vmem:[#allocation181_spill] sm:$0xff] %v12529_v0  ;;  %v2198_v48 = vrot.slane %v2196_v62, 4  ;;  %v2203_v26 = vsel %vm11835_vm5, %v2201_v51, %v2202_v22  ;;  %v3108_v28 = vunpack.c.l.b16 %v2209_v37  ;;  %v10658_v31 = vld [vmem:[%s10965_s10 + $0x22c] sm:$0xf] }
 0x1c5   : > { %v12511_v27 = vpop.permute.xlu0 %3194  ;;  %3288 = vrot.lane.b32.xlu2 %v12493_v6, %s10856_s20  ;;  %v3099_v6 = vunpack.c.l.b16 %v2181_v19  ;;  %v2212_v47 = vsel %vm11835_vm5, %v2210_v60, %v2211_v20  ;;  %18127 = vst [vmem:[#allocation182_spill] sm:$0xff] %v12540_v14  ;;  %v2221_v19 = vrot.slane %v10657_v63, 5  ;;  %v2229_v51 = vrot.slane %v2227_v12, 4 }
 0x1c6   : > { %18122 = vst [vmem:[#allocation177_spill] sm:$0xff] %v12511_v27  ;;  %3286 = vrot.lane.b32.xlu1 %v12503_v25, %s10856_s20  ;;  %v2204_v27 = vrot.slane %v2202_v22, 4  ;;  %v2224_v25 = vrot.slane %v10655_v54, 5  ;;  %v3109_v16 = vunpack.c.l.b16 %v2212_v47  ;;  %v3106_v63 = vunpack.c.l.b16 %v2203_v26  ;;  %v10660_v47 = vld [vmem:[%s10965_s10 + $0x21c] sm:$0xf] }
 0x1c7   : > { %v12524_v10 = vpop.permute.xlu2 %3222 }
 0x1c8   : > { %18124 = vst [vmem:[#allocation179_spill] sm:$0xff] %v12524_v10  ;;  %v12527_v1 = vpop.permute.xlu1 %3202  ;;  %v9730_v10 = vrot.slane %v10654_v5, 9  ;;  %v2206_v4 = vsel %vm11835_vm5, %v2204_v27, %v2205_v33  ;;  %v12551_v5 = vpack.c.b16 %v3099_v6, %v3098_v58  ;;  %v2226_v22 = vrot.slane %v2224_v25, 4  ;;  %v10659_v58 = vld [vmem:[%s10965_s10 + $0x214] sm:$0xf] }
 0x1c9   : > { %18125 = vst [vmem:[#allocation180_spill] sm:$0xff] %v12527_v1  ;;  %v2230_v33 = vrot.slane %v10658_v31, 5  ;;  %v3107_v1 = vunpack.c.l.b16 %v2206_v4  ;;  %v2200_v6 = vsel %vm11835_vm5, %v2198_v48, %v2199_v18  ;;  %v2214_v37 = vrot.slane %v10659_v58, 5 }
 0x1ca   : > { %18129 = vst [vmem:[#allocation184_spill] sm:$0xff] %v12551_v5  ;;  %v2197_v54 = vsel %vm11835_vm5, %v9730_v10, %v2196_v62  ;;  %v2223_v10 = vrot.slane %v2221_v19, 4  ;;  %v12566_v31 = vpack.c.b16 %v3109_v16, %v3108_v28  ;;  %v2228_v26 = vsel %vm11835_vm5, %v2226_v22, %v2227_v12  ;;  %v10663_v22 = vld [vmem:[%s10965_s10 + $0x238] sm:$0xf] }
 0x1cb   : > { %3284 = vrot.lane.b32.xlu0 %v12522_v35, %s10856_s20  ;;  %v2231_v18 = vsel %vm11835_vm5, %v2229_v51, %v2230_v33  ;;  %v12574_v48 = vpack.c.b16 %v3107_v1, %v3106_v63  ;;  %v2213_v4 = vrot.slane %v2211_v20, 4  ;;  %v2216_v58 = vrot.slane %v2214_v37, 4 }
 0x1cc   : > { %v2225_v16 = vsel %vm11835_vm5, %v2223_v10, %v2224_v25  ;;  %v2239_v51 = vrot.slane %v10663_v22, 5  ;;  %v3114_v20 = vunpack.c.l.b16 %v2228_v26  ;;  %v3115_v1 = vunpack.c.l.b16 %v2231_v18  ;;  %v10665_v18 = vld [vmem:[%s10965_s10 + $0x230] sm:$0xf] }
 0x1cd   : > { %v12547_v60 = vpop.permute.xlu0 %3200  ;;  %3294 = vrot.lane.b32.xlu2 %v12529_v0, %s10856_s20  ;;  %v3104_v0 = vunpack.c.l.b16 %v2197_v54  ;;  %v10662_v54 = vld [vmem:[%s10965_s10 + $0x234] sm:$0xf]  ;;  %v2215_v10 = vsel %vm11835_vm5, %v2213_v4, %v2214_v37 }
 0x1ce   : > { %18128 = vst [vmem:[#allocation183_spill] sm:$0xff] %v12547_v60  ;;  %3292 = vrot.lane.b32.xlu1 %v12540_v14, %s10856_s20  ;;  %v9731_v60 = vrot.slane %v10660_v47, 9  ;;  %v3105_v14 = vunpack.c.l.b16 %v2200_v6  ;;  %v10661_v47 = vld [vmem:[%s10965_s10 + $0x218] sm:$0x1]  ;;  %v2236_v12 = vrot.slane %v10662_v54, 5  ;;  %v2241_v22 = vrot.slane %v2239_v51, 4 }
 0x1cf   : > { %v12558_v27 = vpop.permute.xlu2 %3228 }
 0x1d0   : > { %18130 = vst [vmem:[#allocation185_spill] sm:$0xff] %v12558_v27  ;;  %v12564_v62 = vpop.permute.xlu1 %3208  ;;  %v2222_v28 = vsel %vm11835_vm5, %v9731_v60, %v2221_v19  ;;  %v12587_v63 = vpack.c.b16 %v3105_v14, %v3104_v0  ;;  %v3113_v60 = vunpack.c.l.b16 %v2225_v16  ;;  %v2238_v54 = vrot.slane %v2236_v12, 4 }
 0x1d1   : > { %18131 = vst [vmem:[#allocation186_spill] sm:$0xff] %v12564_v62  ;;  %v2217_v62 = vrot.slane %v10661_v47, 5  ;;  %v3112_v25 = vunpack.c.l.b16 %v2222_v28  ;;  %v2233_v0 = vrot.slane %v10665_v18, 5  ;;  %v12601_v27 = vpack.c.b16 %v3115_v1, %v3114_v20 }
 0x1d2   : > { %v3110_v16 = vunpack.c.l.b16 %v2215_v10 }
 0x1d3   : > { %3290 = vrot.lane.b32.xlu0 %v12551_v5, %s10856_s20  ;;  %v2218_v47 = vsel %vm11835_vm5, %v2216_v58, %v2217_v62  ;;  %18135 = vst [vmem:[#allocation190_spill] sm:$0xff] %v12601_v27  ;;  %v12605_v28 = vpack.c.b16 %v3113_v60, %v3112_v25  ;;  %v2240_v62 = vsel %vm11835_vm5, %v2238_v54, %v2239_v51  ;;  %v2232_v58 = vrot.slane %v2230_v33, 4 }
 0x1d4   : > { %v3111_v37 = vunpack.c.l.b16 %v2218_v47  ;;  %v3118_v25 = vunpack.c.l.b16 %v2240_v62  ;;  %v10361_v47 = vld [vmem:[%s10965_s10 + $0x24] sm:$0xff]  ;;  %v10364_v62 = vld [vmem:[%s10965_s10 + $0x3c] sm:$0xff] }
 0x1d5   : > { %v12583_v6 = vpop.permute.xlu0 %3206  ;;  %3300 = vrot.lane.b32.xlu2 %v12566_v31, %s10856_s20  ;;  %18136 = vst [vmem:[#allocation191_spill] sm:$0xff] %v12605_v28  ;;  %v2234_v51 = vsel %vm11835_vm5, %v2232_v58, %v2233_v0 }
 0x1d6   : > { %18132 = vst [vmem:[#allocation187_spill] sm:$0xff] %v12583_v6  ;;  %3298 = vrot.lane.b32.xlu1 %v12574_v48, %s10856_s20  ;;  %v10664_v6 = vld [vmem:[%s10965_s10 + $0x23c] sm:$0x1]  ;;  %v12617_v20 = vpack.c.b16 %v3111_v37, %v3110_v16 }
 0x1d7   : > { %v12591_v19 = vpop.permute.xlu2 %3234  ;;  %v2242_v26 = vrot.slane %v10664_v6, 5  ;;  %v2235_v6 = vrot.slane %v2233_v0, 4 }
 0x1d8   : > { %18133 = vst [vmem:[#allocation188_spill] sm:$0xff] %v12591_v19  ;;  %v12599_v14 = vpop.permute.xlu1 %3214  ;;  %v10376_v19 = vld [vmem:[%s10965_s10 + $0xa8] sm:$0xff] }
 0x1d9   : > { %18134 = vst [vmem:[#allocation189_spill] sm:$0xff] %v12599_v14  ;;  %v2243_v4 = vsel %vm11835_vm5, %v2241_v22, %v2242_v26  ;;  %v2237_v33 = vsel %vm11835_vm5, %v2235_v6, %v2236_v12  ;;  %v3116_v22 = vunpack.c.l.b16 %v2234_v51  ;;  %v10367_v51 = vld [vmem:[%s10965_s10 + $0x58] sm:$0xff]  ;;  %v10373_v14 = vld [vmem:[%s10965_s10 + $0x90] sm:$0xff] }
 0x1da   : > { %v3119_v60 = vunpack.c.l.b16 %v2243_v4  ;;  %v3117_v26 = vunpack.c.l.b16 %v2237_v33  ;;  %v10363_v4 = vld [vmem:[%s10965_s10 + $0x34] sm:$0xff] }
 0x1db   : > { %3296 = vrot.lane.b32.xlu0 %v12587_v63, %s10856_s20  ;;  %v10366_v33 = vld [vmem:[%s10965_s10 + $0x50] sm:$0xff] }
 0x1dc   : > { %v12630_v54 = vpack.c.b16 %v3119_v60, %v3118_v25  ;;  %v12637_v12 = vpack.c.b16 %v3117_v26, %v3116_v22  ;;  %v10362_v25 = vld [vmem:[%s10965_s10 + $0x2c] sm:$0xff] }
 0x1dd   : > { %v12611_v18 = vpop.permute.xlu0 %3212  ;;  %3306 = vrot.lane.b32.xlu2 %v12601_v27, %s10856_s20  ;;  %v12666_v26 = vld [vmem:[%s10965_s10 + $0x48] sm:$0xff]  ;;  %v12839_v27 = vld [vmem:[%s10965_s10 + $0x1b0] sm:$0xff] }
 0x1de   : > { %18137 = vst [vmem:[#allocation192_spill] sm:$0xff] %v12611_v18  ;;  %3304 = vrot.lane.b32.xlu1 %v12605_v28, %s10856_s20 }
 0x1df   : > { %v12619_v1 = vpop.permute.xlu2 %3240  ;;  %18140 = vst [vmem:[#allocation195_spill] sm:$0xff] %v12630_v54 }
 0x1e0   : > { %18138 = vst [vmem:[#allocation193_spill] sm:$0xff] %v12619_v1  ;;  %v12625_v10 = vpop.permute.xlu1 %3220  ;;  %v10372_v1 = vld [vmem:[%s10965_s10 + $0x84] sm:$0xff] }
 0x1e1   : > { %18139 = vst [vmem:[#allocation194_spill] sm:$0xff] %v12625_v10 }
 0x1e2   : > { %18142 = vst [vmem:[#allocation197_spill] sm:$0xff] %v12637_v12 }
 0x1e3   : > { %3302 = vrot.lane.b32.xlu0 %v12617_v20, %s10856_s20  ;;  %18186 = vst [vmem:[#allocation241_spill] sm:$0xff] %v12839_v27 }
 0x1e5   : > { %v12632_v16 = vpop.permute.xlu0 %3218  ;;  %3324 = vrot.lane.b32.xlu2 %v10361_v47, %s10857_s21 }
 0x1e6   : > { %18141 = vst [vmem:[#allocation196_spill] sm:$0xff] %v12632_v16  ;;  %3310 = vrot.lane.b32.xlu1 %v12630_v54, %s10856_s20  ;;  %v10393_v54 = vld [vmem:[%s10965_s10 + $0x144] sm:$0xff]  ;;  %v10412_v16 = vld [vmem:[%s10965_s10 + $0x1ec] sm:$0xff] }
 0x1e7   : > { %v12639_v0 = vpop.permute.xlu2 %3246 }
 0x1e8   : > { %18143 = vst [vmem:[#allocation198_spill] sm:$0xff] %v12639_v0  ;;  %v12641_v37 = vpop.permute.xlu1 %3226 }
 0x1e9   : > { %18144 = vst [vmem:[#allocation199_spill] sm:$0xff] %v12641_v37  ;;  %v10385_v37 = vld [vmem:[%s10965_s10 + $0xfc] sm:$0xff] }
 0x1eb   : > { %3308 = vrot.lane.b32.xlu0 %v12637_v12, %s10856_s20  ;;  %v10403_v12 = vld [vmem:[%s10965_s10 + $0x19c] sm:$0xff]  ;;  %s10866_s20 = smov 64  }
 0x1ed   : > { %v12647_v58 = vpop.permute.xlu0 %3224  ;;  %3330 = vrot.lane.b32.xlu2 %v10364_v62, %s10857_s21 }
 0x1ee   : > { %18145 = vst [vmem:[#allocation200_spill] sm:$0xff] %v12647_v58  ;;  %3328 = vrot.lane.b32.xlu1 %v10363_v4, %s10857_s21  ;;  %v10370_v4 = vld [vmem:[%s10965_s10 + $0x74] sm:$0xff] }
 0x1ef   : > { %v12651_v6 = vpop.permute.xlu2 %3252 }
 0x1f0   : > { %18146 = vst [vmem:[#allocation201_spill] sm:$0xff] %v12651_v6  ;;  %v12654_v60 = vpop.permute.xlu1 %3232 }
 0x1f1   : > { %18147 = vst [vmem:[#allocation202_spill] sm:$0xff] %v12654_v60  ;;  %v10378_v60 = vld [vmem:[%s10965_s10 + $0xbc] sm:$0xff] }
 0x1f3   : > { %3326 = vrot.lane.b32.xlu0 %v10362_v25, %s10857_s21  ;;  %v10369_v25 = vld [vmem:[%s10965_s10 + $0x6c] sm:$0xff] }
 0x1f5   : > { %v12659_v47 = vpop.permute.xlu0 %3230  ;;  %3336 = vrot.lane.b32.xlu2 %v10367_v51, %s10857_s21 }
 0x1f6   : > { %18148 = vst [vmem:[#allocation203_spill] sm:$0xff] %v12659_v47  ;;  %3334 = vrot.lane.b32.xlu1 %v10366_v33, %s10857_s21  ;;  %v10368_v33 = vld [vmem:[%s10965_s10 + $0x60] sm:$0xff] }
 0x1f7   : > { %v12663_v22 = vpop.permute.xlu2 %3258 }
 0x1f8   : > { %18149 = vst [vmem:[#allocation204_spill] sm:$0xff] %v12663_v22  ;;  %v12668_v62 = vpop.permute.xlu1 %3238 }
 0x1f9   : > { %18150 = vst [vmem:[#allocation205_spill] sm:$0xff] %v12668_v62 }
 0x1fb   : > { %3332 = vrot.lane.b32.xlu0 %v12666_v26, %s10857_s21 }
 0x1fd   : > { %v12674_v0 = vpop.permute.xlu0 %3236  ;;  %3342 = vrot.lane.b32.xlu2 %v10370_v4, %s10857_s21 }
 0x1fe   : > { %18151 = vst [vmem:[#allocation206_spill] sm:$0xff] %v12674_v0  ;;  %3340 = vrot.lane.b32.xlu1 %v10369_v25, %s10857_s21  ;;  %v10371_v25 = vld [vmem:[%s10965_s10 + $0x7c] sm:$0xff] }
 0x1ff   : > { %v12678_v51 = vpop.permute.xlu2 %3264 }
 0x200   : > { %18152 = vst [vmem:[#allocation207_spill] sm:$0xff] %v12678_v51  ;;  %v12681_v18 = vpop.permute.xlu1 %3244  ;;  %v12720_v51 = vld [vmem:[%s10965_s10 + $0xe0] sm:$0xff] }
 0x201   : > { %18153 = vst [vmem:[#allocation208_spill] sm:$0xff] %v12681_v18  ;;  %v10375_v18 = vld [vmem:[%s10965_s10 + $0xa0] sm:$0xff] }
 0x203   : > { %3338 = vrot.lane.b32.xlu0 %v10368_v33, %s10857_s21 }
 0x205   : > { %v12686_v62 = vpop.permute.xlu0 %3242  ;;  %3348 = vrot.lane.b32.xlu2 %v10373_v14, %s10857_s21 }
 0x206   : > { %18154 = vst [vmem:[#allocation209_spill] sm:$0xff] %v12686_v62  ;;  %3346 = vrot.lane.b32.xlu1 %v10372_v1, %s10857_s21  ;;  %v10374_v1 = vld [vmem:[%s10965_s10 + $0x98] sm:$0xff] }
 0x207   : > { %v12690_v4 = vpop.permute.xlu2 %3270 }
 0x208   : > { %18155 = vst [vmem:[#allocation210_spill] sm:$0xff] %v12690_v4  ;;  %v12693_v0 = vpop.permute.xlu1 %3250  ;;  %v10379_v4 = vld [vmem:[%s10965_s10 + $0xc4] sm:$0xff] }
 0x209   : > { %18156 = vst [vmem:[#allocation211_spill] sm:$0xff] %v12693_v0  ;;  %v10420_v0 = vld [vmem:[%s10965_s10 + $0x234] sm:$0xff] }
 0x20b   : > { %3344 = vrot.lane.b32.xlu0 %v10371_v25, %s10857_s21 }
 0x20d   : > { %v12698_v33 = vpop.permute.xlu0 %3248  ;;  %3354 = vrot.lane.b32.xlu2 %v10376_v19, %s10857_s21 }
 0x20e   : > { %3352 = vrot.lane.b32.xlu1 %v10375_v18, %s10857_s21  ;;  %v10377_v18 = vld [vmem:[%s10965_s10 + $0xb4] sm:$0xff] }
 0x20f   : > { %v12702_v14 = vpop.permute.xlu2 %3276 }
 0x210   : > { %18157 = vst [vmem:[#allocation212_spill] sm:$0xff] %v12702_v14  ;;  %v12705_v62 = vpop.permute.xlu1 %3256 }
 0x211   : > { %18158 = vst [vmem:[#allocation213_spill] sm:$0xff] %v12705_v62 }
 0x213   : > { %3350 = vrot.lane.b32.xlu0 %v10374_v1, %s10857_s21  ;;  %v12724_v1 = vld [vmem:[%s10965_s10 + $0xd8] sm:$0xff] }
 0x215   : > { %v12710_v25 = vpop.permute.xlu0 %3254  ;;  %3360 = vrot.lane.b32.xlu2 %v10379_v4, %s10857_s21  ;;  %v10380_v4 = vld [vmem:[%s10965_s10 + $0xcc] sm:$0xff] }
 0x216   : > { %18159 = vst [vmem:[#allocation214_spill] sm:$0xff] %v12710_v25  ;;  %3358 = vrot.lane.b32.xlu1 %v10378_v60, %s10857_s21 }
 0x217   : > { %v12714_v19 = vpop.permute.xlu2 %3282 }
 0x218   : > { %18160 = vst [vmem:[#allocation215_spill] sm:$0xff] %v12714_v19  ;;  %v12717_v14 = vpop.permute.xlu1 %3262  ;;  %v10421_v19 = vld [vmem:[%s10965_s10 + $0x240] sm:$0xff] }
 0x219   : > { %18161 = vst [vmem:[#allocation216_spill] sm:$0xff] %v12717_v14 }
 0x21b   : > { %3356 = vrot.lane.b32.xlu0 %v10377_v18, %s10857_s21  ;;  %v10384_v18 = vld [vmem:[%s10965_s10 + $0xf0] sm:$0xff] }
 0x21d   : > { %v12726_v47 = vpop.permute.xlu0 %3260  ;;  %3366 = vrot.lane.b32.xlu2 %v12720_v51, %s10857_s21 }
 0x21e   : > { %18162 = vst [vmem:[#allocation217_spill] sm:$0xff] %v12726_v47  ;;  %3364 = vrot.lane.b32.xlu1 %v12724_v1, %s10857_s21 }
 0x21f   : > { %v12732_v60 = vpop.permute.xlu2 %3288 }
 0x220   : > { %18163 = vst [vmem:[#allocation218_spill] sm:$0xff] %v12732_v60  ;;  %v12735_v14 = vpop.permute.xlu1 %3268 }
 0x221   : > { %18164 = vst [vmem:[#allocation219_spill] sm:$0xff] %v12735_v14  ;;  %v10388_v14 = vld [vmem:[%s10965_s10 + $0x114] sm:$0xff] }
 0x223   : > { %3362 = vrot.lane.b32.xlu0 %v10380_v4, %s10857_s21  ;;  %v10387_v4 = vld [vmem:[%s10965_s10 + $0x10c] sm:$0xff] }
 0x225   : > { %v12740_v22 = vpop.permute.xlu0 %3266  ;;  %3372 = vrot.lane.b32.xlu2 %v10385_v37, %s10857_s21 }
 0x226   : > { %18165 = vst [vmem:[#allocation220_spill] sm:$0xff] %v12740_v22  ;;  %3370 = vrot.lane.b32.xlu1 %v10384_v18, %s10857_s21  ;;  %v10386_v18 = vld [vmem:[%s10965_s10 + $0x104] sm:$0xff] }
 0x227   : > { %v12744_v47 = vpop.permute.xlu2 %3294 }
 0x228   : > { %18166 = vst [vmem:[#allocation221_spill] sm:$0xff] %v12744_v47  ;;  %v12749_v58 = vpop.permute.xlu1 %3274  ;;  %v10390_v47 = vld [vmem:[%s10965_s10 + $0x128] sm:$0xff] }
 0x229   : > { %18167 = vst [vmem:[#allocation222_spill] sm:$0xff] %v12749_v58  ;;  %v10391_v58 = vld [vmem:[%s10965_s10 + $0x130] sm:$0xff] }
 0x22b   : > { %3368 = vrot.lane.b32.xlu0 %v12747_v42, %s10857_s21 }
 0x22d   : > { %v12755_v60 = vpop.permute.xlu0 %3272  ;;  %3378 = vrot.lane.b32.xlu2 %v10388_v14, %s10857_s21 }
 0x22e   : > { %18168 = vst [vmem:[#allocation223_spill] sm:$0xff] %v12755_v60  ;;  %3376 = vrot.lane.b32.xlu1 %v10387_v4, %s10857_s21  ;;  %v10389_v4 = vld [vmem:[%s10965_s10 + $0x120] sm:$0xff] }
 0x22f   : > { %v12759_v37 = vpop.permute.xlu2 %3300 }
 0x230   : > { %18169 = vst [vmem:[#allocation224_spill] sm:$0xff] %v12759_v37  ;;  %v12762_v22 = vpop.permute.xlu1 %3280  ;;  %v10394_v37 = vld [vmem:[%s10965_s10 + $0x14c] sm:$0xff] }
 0x231   : > { %18170 = vst [vmem:[#allocation225_spill] sm:$0xff] %v12762_v22 }
 0x233   : > { %3374 = vrot.lane.b32.xlu0 %v10386_v18, %s10857_s21 }
 0x235   : > { %v12767_v62 = vpop.permute.xlu0 %3278  ;;  %3384 = vrot.lane.b32.xlu2 %v10391_v58, %s10857_s21 }
 0x236   : > { %18171 = vst [vmem:[#allocation226_spill] sm:$0xff] %v12767_v62  ;;  %3382 = vrot.lane.b32.xlu1 %v10390_v47, %s10857_s21  ;;  %v10392_v47 = vld [vmem:[%s10965_s10 + $0x138] sm:$0xff] }
 0x237   : > { %v12771_v14 = vpop.permute.xlu2 %3306 }
 0x238   : > { %18172 = vst [vmem:[#allocation227_spill] sm:$0xff] %v12771_v14  ;;  %v12774_v60 = vpop.permute.xlu1 %3286  ;;  %v12789_v14 = vld [vmem:[%s10965_s10 + $0x168] sm:$0xff] }
 0x239   : > { %18173 = vst [vmem:[#allocation228_spill] sm:$0xff] %v12774_v60 }
 0x23b   : > { %3380 = vrot.lane.b32.xlu0 %v10389_v4, %s10857_s21  ;;  %v10396_v4 = vld [vmem:[%s10965_s10 + $0x15c] sm:$0xff] }
 0x23d   : > { %v12779_v18 = vpop.permute.xlu0 %3284  ;;  %3390 = vrot.lane.b32.xlu2 %v10394_v37, %s10857_s21  ;;  %v10395_v37 = vld [vmem:[%s10965_s10 + $0x154] sm:$0xff] }
 0x23e   : > { %18174 = vst [vmem:[#allocation229_spill] sm:$0xff] %v12779_v18  ;;  %3388 = vrot.lane.b32.xlu1 %v10393_v54, %s10857_s21 }
 0x23f   : > { %v12783_v58 = vpop.permute.xlu2 %3324 }
 0x240   : > { %18175 = vst [vmem:[#allocation230_spill] sm:$0xff] %v12783_v58  ;;  %v12786_v62 = vpop.permute.xlu1 %3292  ;;  %v10424_v58 = vld [vmem:[%s10965_s10 + $0x258] sm:$0xff] }
 0x241   : > { %18176 = vst [vmem:[#allocation231_spill] sm:$0xff] %v12786_v62  ;;  %v12804_v62 = vld [vmem:[%s10965_s10 + $0x180] sm:$0xff] }
 0x243   : > { %3386 = vrot.lane.b32.xlu0 %v10392_v47, %s10857_s21  ;;  %v12808_v47 = vld [vmem:[%s10965_s10 + $0x178] sm:$0xff] }
 0x245   : > { %v12793_v25 = vpop.permute.xlu0 %3290  ;;  %3396 = vrot.lane.b32.xlu2 %v12789_v14, %s10857_s21 }
 0x246   : > { %18177 = vst [vmem:[#allocation232_spill] sm:$0xff] %v12793_v25  ;;  %3394 = vrot.lane.b32.xlu1 %v10396_v4, %s10857_s21 }
 0x247   : > { %v12798_v54 = vpop.permute.xlu2 %3330 }
 0x248   : > { %18178 = vst [vmem:[#allocation233_spill] sm:$0xff] %v12798_v54  ;;  %v12801_v60 = vpop.permute.xlu1 %3298 }
 0x249   : > { %18179 = vst [vmem:[#allocation234_spill] sm:$0xff] %v12801_v60  ;;  %v12819_v60 = vld [vmem:[%s10965_s10 + $0x170] sm:$0xff] }
 0x24b   : > { %3392 = vrot.lane.b32.xlu0 %v10395_v37, %s10857_s21  ;;  %v10402_v37 = vld [vmem:[%s10965_s10 + $0x194] sm:$0xff] }
 0x24d   : > { %v12810_v25 = vpop.permute.xlu0 %3296  ;;  %3402 = vrot.lane.b32.xlu2 %v12804_v62, %s10857_s21 }
 0x24e   : > { %18180 = vst [vmem:[#allocation235_spill] sm:$0xff] %v12810_v25  ;;  %3400 = vrot.lane.b32.xlu1 %v12808_v47, %s10857_s21 }
 0x24f   : > { %v12816_v4 = vpop.permute.xlu2 %3336 }
 0x250   : > { %18181 = vst [vmem:[#allocation236_spill] sm:$0xff] %v12816_v4  ;;  %v12821_v54 = vpop.permute.xlu1 %3304  ;;  %v10401_v4 = vld [vmem:[%s10965_s10 + $0x18c] sm:$0xff] }
 0x251   : > { %18182 = vst [vmem:[#allocation237_spill] sm:$0xff] %v12821_v54  ;;  %v10406_v54 = vld [vmem:[%s10965_s10 + $0x1b8] sm:$0xff] }
 0x253   : > { %3398 = vrot.lane.b32.xlu0 %v12819_v60, %s10857_s21 }
 0x255   : > { %v12827_v25 = vpop.permute.xlu0 %3302  ;;  %3408 = vrot.lane.b32.xlu2 %v10403_v12, %s10857_s21 }
 0x256   : > { %18183 = vst [vmem:[#allocation238_spill] sm:$0xff] %v12827_v25  ;;  %3406 = vrot.lane.b32.xlu1 %v10402_v37, %s10857_s21  ;;  %v10404_v37 = vld [vmem:[%s10965_s10 + $0x1a4] sm:$0xff] }
 0x257   : > { %v12831_v10 = vpop.permute.xlu2 %3342 }
 0x258   : > { %18184 = vst [vmem:[#allocation239_spill] sm:$0xff] %v12831_v10  ;;  %v12834_v18 = vpop.permute.xlu1 %3310 }
 0x259   : > { %18185 = vst [vmem:[#allocation240_spill] sm:$0xff] %v12834_v18  ;;  %v10409_v18 = vld [vmem:[%s10965_s10 + $0x1d4] sm:$0xff] }
 0x25b   : > { %3404 = vrot.lane.b32.xlu0 %v10401_v4, %s10857_s21  ;;  %v10408_v4 = vld [vmem:[%s10965_s10 + $0x1c8] sm:$0xff] }
 0x25d   : > { %v12841_v6 = vpop.permute.xlu0 %3308  ;;  %3414 = vrot.lane.b32.xlu2 %v10406_v54, %s10857_s21 }
 0x25e   : > { %18187 = vst [vmem:[#allocation242_spill] sm:$0xff] %v12841_v6  ;;  %3412 = vrot.lane.b32.xlu1 %v12839_v27, %s10857_s21  ;;  %v10407_v6 = vld [vmem:[%s10965_s10 + $0x1c0] sm:$0xff] }
 0x25f   : > { %v12846_v12 = vpop.permute.xlu2 %3348 }
 0x260   : > { %18188 = vst [vmem:[#allocation243_spill] sm:$0xff] %v12846_v12  ;;  %v12849_v25 = vpop.permute.xlu1 %3328 }
 0x261   : > { %18189 = vst [vmem:[#allocation244_spill] sm:$0xff] %v12849_v25  ;;  %v10411_v25 = vld [vmem:[%s10965_s10 + $0x1e4] sm:$0xff] }
 0x263   : > { %3410 = vrot.lane.b32.xlu0 %v10404_v37, %s10857_s21 }
 0x265   : > { %v12854_v10 = vpop.permute.xlu0 %3326  ;;  %3420 = vrot.lane.b32.xlu2 %v10409_v18, %s10857_s21 }
 0x266   : > { %18190 = vst [vmem:[#allocation245_spill] sm:$0xff] %v12854_v10  ;;  %3418 = vrot.lane.b32.xlu1 %v10408_v4, %s10857_s21  ;;  %v10410_v4 = vld [vmem:[%s10965_s10 + $0x1dc] sm:$0xff]  ;;  %v12876_v10 = vld [vmem:[%s10965_s10 + $0x208] sm:$0xff] }
 0x267   : > { %v12858_v54 = vpop.permute.xlu2 %3354 }
 0x268   : > { %18191 = vst [vmem:[#allocation246_spill] sm:$0xff] %v12858_v54  ;;  %v12861_v12 = vpop.permute.xlu1 %3334 }
 0x269   : > { %18192 = vst [vmem:[#allocation247_spill] sm:$0xff] %v12861_v12 }
 0x26b   : > { %3416 = vrot.lane.b32.xlu0 %v10407_v6, %s10857_s21  ;;  %v12880_v6 = vld [vmem:[%s10965_s10 + $0x200] sm:$0xff] }
 0x26d   : > { %v12866_v37 = vpop.permute.xlu0 %3332  ;;  %3426 = vrot.lane.b32.xlu2 %v10412_v16, %s10857_s21 }
 0x26e   : > { %18193 = vst [vmem:[#allocation248_spill] sm:$0xff] %v12866_v37  ;;  %3424 = vrot.lane.b32.xlu1 %v10411_v25, %s10857_s21  ;;  %v12891_v25 = vld [vmem:[%s10965_s10 + $0x1f8] sm:$0xff]  ;;  %v10418_v37 = vld [vmem:[%s10965_s10 + $0x224] sm:$0xff] }
 0x26f   : > { %v12870_v18 = vpop.permute.xlu2 %3360 }
 0x270   : > { %18194 = vst [vmem:[#allocation249_spill] sm:$0xff] %v12870_v18  ;;  %v12873_v54 = vpop.permute.xlu1 %3340  ;;  %v12909_v18 = vld [vmem:[%s10965_s10 + $0x210] sm:$0xff] }
 0x271   : > { %18195 = vst [vmem:[#allocation250_spill] sm:$0xff] %v12873_v54 }
 0x273   : > { %3422 = vrot.lane.b32.xlu0 %v10410_v4, %s10857_s21  ;;  %v12899_v4 = vld [vmem:[%s10965_s10 + $0x21c] sm:$0xff] }
 0x274   : > { %18199 = vst [vmem:[#allocation254_spill] sm:$0xff] %v12899_v4 }
 0x275   : > { %v12882_v12 = vpop.permute.xlu0 %3338  ;;  %3432 = vrot.lane.b32.xlu2 %v12876_v10, %s10857_s21 }
 0x276   : > { %18196 = vst [vmem:[#allocation251_spill] sm:$0xff] %v12882_v12  ;;  %3430 = vrot.lane.b32.xlu1 %v12880_v6, %s10857_s21 }
 0x277   : > { %v12888_v16 = vpop.permute.xlu2 %3366 }
 0x278   : > { %18197 = vst [vmem:[#allocation252_spill] sm:$0xff] %v12888_v16  ;;  %v12893_v54 = vpop.permute.xlu1 %3346 }
 0x279   : > { %18198 = vst [vmem:[#allocation253_spill] sm:$0xff] %v12893_v54 }
 0x27b   : > { %3428 = vrot.lane.b32.xlu0 %v12891_v25, %s10857_s21 }
 0x27d   : > { %v12901_v12 = vpop.permute.xlu0 %3344  ;;  %3438 = vrot.lane.b32.xlu2 %v10418_v37, %s10857_s21 }
 0x27e   : > { %18200 = vst [vmem:[#allocation255_spill] sm:$0xff] %v12901_v12  ;;  %3436 = vrot.lane.b32.xlu1 %v12899_v4, %s10857_s21  ;;  %v10419_v12 = vld [vmem:[%s10965_s10 + $0x22c] sm:$0xff] }
 0x27f   : > { %v12906_v16 = vpop.permute.xlu2 %3372 }
 0x280   : > { %18201 = vst [vmem:[#allocation256_spill] sm:$0xff] %v12906_v16  ;;  %v12911_v54 = vpop.permute.xlu1 %3352 }
 0x281   : > { %18202 = vst [vmem:[#allocation257_spill] sm:$0xff] %v12911_v54  ;;  %v10423_v54 = vld [vmem:[%s10965_s10 + $0x250] sm:$0xff] }
 0x283   : > { %3434 = vrot.lane.b32.xlu0 %v12909_v18, %s10857_s21 }
 0x285   : > { %v12917_v28 = vpop.permute.xlu0 %3350  ;;  %3444 = vrot.lane.b32.xlu2 %v10421_v19, %s10857_s21 }
 0x286   : > { %18203 = vst [vmem:[#allocation258_spill] sm:$0xff] %v12917_v28  ;;  %3442 = vrot.lane.b32.xlu1 %v10420_v0, %s10857_s21  ;;  %v10422_v28 = vld [vmem:[%s10965_s10 + $0x248] sm:$0xff] }
 0x287   : > { %v12921_v37 = vpop.permute.xlu2 %3378 }
 0x288   : > { %18204 = vst [vmem:[#allocation259_spill] sm:$0xff] %v12921_v37  ;;  %v12924_v16 = vpop.permute.xlu1 %3358 }
 0x289   : > { %18205 = vst [vmem:[#allocation260_spill] sm:$0xff] %v12924_v16  ;;  %v18280_v16 = vld [vmem:[#allocation63_spill] sm:$0xff] }
 0x28b   : > { %3440 = vrot.lane.b32.xlu0 %v10419_v12, %s10857_s21 }
 0x28d   : > { %v12929_v4 = vpop.permute.xlu0 %3356  ;;  %3450 = vrot.lane.b32.xlu2 %v10424_v58, %s10857_s21 }
 0x28e   : > { %18206 = vst [vmem:[#allocation261_spill] sm:$0xff] %v12929_v4  ;;  %3448 = vrot.lane.b32.xlu1 %v10423_v54, %s10857_s21 }
 0x28f   : > { %v12934_v22 = vpop.permute.xlu2 %3384 }
 0x290   : > { %18207 = vst [vmem:[#allocation262_spill] sm:$0xff] %v12934_v22  ;;  %v12936_v19 = vpop.permute.xlu1 %3364 }
 0x291   : > { %18208 = vst [vmem:[#allocation263_spill] sm:$0xff] %v12936_v19 }
 0x293   : > { %3446 = vrot.lane.b32.xlu0 %v10422_v28, %s10857_s21  ;;  %s10867_s21 = smov 96  }
 0x295   : > { %v12939_v0 = vpop.permute.xlu0 %3362  ;;  %3468 = vrot.lane.b32.xlu2 %v11084_v13, %s10858_s24 }
 0x296   : > { %18209 = vst [vmem:[#allocation264_spill] sm:$0xff] %v12939_v0  ;;  %3466 = vrot.lane.b32.xlu1 %v11026_v56, %s10858_s24  ;;  %v18274_v0 = vld [vmem:[#allocation56_spill] sm:$0xff] }
 0x297   : > { %v12945_v12 = vpop.permute.xlu2 %3390 }
 0x298   : > { %18210 = vst [vmem:[#allocation265_spill] sm:$0xff] %v12945_v12  ;;  %v12947_v58 = vpop.permute.xlu1 %3370 }
 0x299   : > { %18211 = vst [vmem:[#allocation266_spill] sm:$0xff] %v12947_v58 }
 0x29b   : > { %3464 = vrot.lane.b32.xlu0 %v10989_v52, %s10858_s24 }
 0x29d   : > { %v12951_v54 = vpop.permute.xlu0 %3368  ;;  %3474 = vrot.lane.b32.xlu2 %v11125_v23, %s10858_s24 }
 0x29e   : > { %18212 = vst [vmem:[#allocation267_spill] sm:$0xff] %v12951_v54  ;;  %3472 = vrot.lane.b32.xlu1 %v11056_v43, %s10858_s24  ;;  %v18243_v54 = vld [vmem:[#allocation33_spill] sm:$0xff] }
 0x29f   : > { %v12957_v28 = vpop.permute.xlu2 %3396 }
 0x2a0   : > { %18213 = vst [vmem:[#allocation268_spill] sm:$0xff] %v12957_v28  ;;  %v12959_v13 = vpop.permute.xlu1 %3376  ;;  %v18273_v28 = vld [vmem:[#allocation68_spill] sm:$0xff] }
 0x2a1   : > { %18214 = vst [vmem:[#allocation269_spill] sm:$0xff] %v12959_v13 }
 0x2a3   : > { %3470 = vrot.lane.b32.xlu0 %v11073_v9, %s10858_s24 }
 0x2a5   : > { %v12963_v56 = vpop.permute.xlu0 %3374  ;;  %3480 = vrot.lane.b32.xlu2 %v11167_v17, %s10858_s24 }
 0x2a6   : > { %18215 = vst [vmem:[#allocation270_spill] sm:$0xff] %v12963_v56  ;;  %3478 = vrot.lane.b32.xlu1 %v11094_v46, %s10858_s24 }
 0x2a7   : > { %v12969_v52 = vpop.permute.xlu2 %3402 }
 0x2a8   : > { %18216 = vst [vmem:[#allocation271_spill] sm:$0xff] %v12969_v52  ;;  %v12971_v22 = vpop.permute.xlu1 %3382 }
 0x2a9   : > { %18217 = vst [vmem:[#allocation272_spill] sm:$0xff] %v12971_v22 }
 0x2ab   : > { %3476 = vrot.lane.b32.xlu0 %v11110_v3, %s10858_s24 }
 0x2ad   : > { %v12975_v37 = vpop.permute.xlu0 %3380  ;;  %3486 = vrot.lane.b32.xlu2 %v11204_v41, %s10858_s24 }
 0x2ae   : > { %18218 = vst [vmem:[#allocation273_spill] sm:$0xff] %v12975_v37  ;;  %3484 = vrot.lane.b32.xlu1 %v11139_v53, %s10858_s24 }
 0x2af   : > { %v12981_v9 = vpop.permute.xlu2 %3408 }
 0x2b0   : > { %18219 = vst [vmem:[#allocation274_spill] sm:$0xff] %v12981_v9  ;;  %v12983_v13 = vpop.permute.xlu1 %3388 }
 0x2b1   : > { %18220 = vst [vmem:[#allocation275_spill] sm:$0xff] %v12983_v13  ;;  %v18293_v13 = vld [vmem:[#allocation78_spill] sm:$0xff] }
 0x2b3   : > { %3482 = vrot.lane.b32.xlu0 %v11156_v49, %s10858_s24  ;;  %v332_v49 = vld [vmem:[%s10965_s10 + $0x240] sm:$0xf] }
 0x2b5   : > { %v12987_v56 = vpop.permute.xlu0 %3386  ;;  %3492 = vrot.lane.b32.xlu2 %v11243_v11, %s10858_s24 }
 0x2b6   : > { %18221 = vst [vmem:[#allocation276_spill] sm:$0xff] %v12987_v56  ;;  %3490 = vrot.lane.b32.xlu1 %v11177_v61, %s10858_s24 }
 0x2b7   : > { %v12993_v22 = vpop.permute.xlu2 %3414 }
 0x2b8   : > { %18222 = vst [vmem:[#allocation277_spill] sm:$0xff] %v12993_v22  ;;  %v12995_v37 = vpop.permute.xlu1 %3394 }
 0x2b9   : > { %18223 = vst [vmem:[#allocation278_spill] sm:$0xff] %v12995_v37  ;;  %v334_v37 = vld [vmem:[%s10965_s10 + $0x248] sm:$0xf] }
 0x2bb   : > { %3488 = vrot.lane.b32.xlu0 %v11194_v29, %s10858_s24 }
 0x2bd   : > { %v12999_v9 = vpop.permute.xlu0 %3392  ;;  %3498 = vrot.lane.b32.xlu2 %v11284_v8, %s10858_s24 }
 0x2be   : > { %18224 = vst [vmem:[#allocation279_spill] sm:$0xff] %v12999_v9  ;;  %3496 = vrot.lane.b32.xlu1 %v11223_v24, %s10858_s24 }
 0x2bf   : > { %v13005_v56 = vpop.permute.xlu2 %3420 }
 0x2c0   : > { %18225 = vst [vmem:[#allocation280_spill] sm:$0xff] %v13005_v56  ;;  %v13007_v58 = vpop.permute.xlu1 %3400  ;;  %v18286_v56 = vld [vmem:[#allocation71_spill] sm:$0xff] }
 0x2c1   : > { %18226 = vst [vmem:[#allocation281_spill] sm:$0xff] %v13007_v58  ;;  %v18244_v58 = vld [vmem:[#allocation26_spill] sm:$0xff] }
 0x2c3   : > { %3494 = vrot.lane.b32.xlu0 %v11233_v39, %s10858_s24 }
 0x2c5   : > { %v13011_v22 = vpop.permute.xlu0 %3398  ;;  %3504 = vrot.lane.b32.xlu2 %v11322_v7, %s10858_s24 }
 0x2c6   : > { %18227 = vst [vmem:[#allocation282_spill] sm:$0xff] %v13011_v22  ;;  %3502 = vrot.lane.b32.xlu1 %v11254_v34, %s10858_s24 }
 0x2c7   : > { %v13017_v11 = vpop.permute.xlu2 %3426 }
 0x2c8   : > { %18228 = vst [vmem:[#allocation283_spill] sm:$0xff] %v13017_v11  ;;  %v13019_v8 = vpop.permute.xlu1 %3406  ;;  %v2264_v11 = vshll.u32 %v334_v37, 16 }
 0x2c9   : > { %18229 = vst [vmem:[#allocation284_spill] sm:$0xff] %v13019_v8 }
 0x2cb   : > { %3500 = vrot.lane.b32.xlu0 %v11271_v59, %s10858_s24 }
 0x2cd   : > { %v13023_v24 = vpop.permute.xlu0 %3404  ;;  %3510 = vrot.lane.b32.xlu2 %v11363_v15, %s10858_s24 }
 0x2ce   : > { %18230 = vst [vmem:[#allocation285_spill] sm:$0xff] %v13023_v24  ;;  %3508 = vrot.lane.b32.xlu1 %v11293_v44, %s10858_s24 }
 0x2cf   : > { %v13029_v39 = vpop.permute.xlu2 %3432 }
 0x2d0   : > { %18231 = vst [vmem:[#allocation286_spill] sm:$0xff] %v13029_v39  ;;  %v13031_v52 = vpop.permute.xlu1 %3412 }
 0x2d1   : > { %18232 = vst [vmem:[#allocation287_spill] sm:$0xff] %v13031_v52 }
 0x2d3   : > { %3506 = vrot.lane.b32.xlu0 %v11318_v30, %s10858_s24 }
 0x2d5   : > { %v13035_v34 = vpop.permute.xlu0 %3410  ;;  %3516 = vrot.lane.b32.xlu2 %v11402_v38, %s10858_s24 }
 0x2d6   : > { %18233 = vst [vmem:[#allocation288_spill] sm:$0xff] %v13035_v34  ;;  %3514 = vrot.lane.b32.xlu1 %v11336_v21, %s10858_s24  ;;  %v18279_v21 = vld [vmem:[#allocation75_spill] sm:$0xff] }
 0x2d7   : > { %v13041_v59 = vpop.permute.xlu2 %3438 }
 0x2d8   : > { %18234 = vst [vmem:[#allocation289_spill] sm:$0xff] %v13041_v59  ;;  %v13043_v8 = vpop.permute.xlu1 %3418 }
 0x2d9   : > { %18235 = vst [vmem:[#allocation290_spill] sm:$0xff] %v13043_v8 }
 0x2db   : > { %3512 = vrot.lane.b32.xlu0 %v11355_v36, %s10858_s24 }
 0x2dd   : > { %v13047_v24 = vpop.permute.xlu0 %3416  ;;  %3522 = vrot.lane.b32.xlu2 %v11441_v57, %s10858_s24  ;;  %v18249_v57 = vld [vmem:[#allocation40_spill] sm:$0xff] }
 0x2de   : > { %18236 = vst [vmem:[#allocation291_spill] sm:$0xff] %v13047_v24  ;;  %3520 = vrot.lane.b32.xlu1 %v11378_v2, %s10858_s24 }
 0x2df   : > { %v13053_v52 = vpop.permute.xlu2 %3444 }
 0x2e0   : > { %18237 = vst [vmem:[#allocation292_spill] sm:$0xff] %v13053_v52  ;;  %v13055_v34 = vpop.permute.xlu1 %3424 }
 0x2e1   : > { %18238 = vst [vmem:[#allocation293_spill] sm:$0xff] %v13055_v34 }
 0x2e3   : > { %3518 = vrot.lane.b32.xlu0 %v11392_v50, %s10858_s24 }
 0x2e5   : > { %v13059_v59 = vpop.permute.xlu0 %3422  ;;  %3528 = vrot.lane.b32.xlu2 %v11483_v55, %s10858_s24 }
 0x2e6   : > { %18239 = vst [vmem:[#allocation294_spill] sm:$0xff] %v13059_v59  ;;  %3526 = vrot.lane.b32.xlu1 %v11411_v40, %s10858_s24  ;;  %v18247_v40 = vld [vmem:[#allocation28_spill] sm:$0xff]  ;;  %v2248_v59 = vshll.u32 %v332_v49, 16 }
 0x2e7   : > { %v13065_v8 = vpop.permute.xlu2 %3450 }
 0x2e8   : > { %18240 = vst [vmem:[#allocation295_spill] sm:$0xff] %v13065_v8  ;;  %v13067_v24 = vpop.permute.xlu1 %3430 }
 0x2e9   : > { %18241 = vst [vmem:[#allocation296_spill] sm:$0xff] %v13067_v24  ;;  %v18259_v24 = vld [vmem:[#allocation37_spill] sm:$0xff] }
 0x2eb   : > { %3524 = vrot.lane.b32.xlu0 %v11431_v32, %s10858_s24  ;;  %v18250_v32 = vld [vmem:[#allocation31_spill] sm:$0xff] }
 0x2ed   : > { %v13071_v52 = vpop.permute.xlu0 %3428  ;;  %3534 = vrot.lane.b32.xlu2 %v18243_v54, %s10858_s24 }
 0x2ee   : > { %18242 = vst [vmem:[#allocation297_spill] sm:$0xff] %v13071_v52  ;;  %3532 = vrot.lane.b32.xlu1 %v18244_v58, %s10858_s24  ;;  %v18253_v58 = vld [vmem:[#allocation32_spill] sm:$0xff] }
 0x2ef   : > { %v13077_v61 = vpop.permute.xlu2 %3468 }
 0x2f0   : > { %18245 = vst [vmem:[#allocation298_spill] sm:$0xff] %v13077_v61  ;;  %v13079_v55 = vpop.permute.xlu1 %3436 }
 0x2f1   : > { %18246 = vst [vmem:[#allocation299_spill] sm:$0xff] %v13079_v55  ;;  %v18255_v55 = vld [vmem:[#allocation46_spill] sm:$0xff] }
 0x2f3   : > { %3530 = vrot.lane.b32.xlu0 %v18247_v40, %s10858_s24  ;;  %v18256_v40 = vld [vmem:[#allocation35_spill] sm:$0xff] }
 0x2f5   : > { %v13083_v8 = vpop.permute.xlu0 %3434  ;;  %3540 = vrot.lane.b32.xlu2 %v18249_v57, %s10858_s24 }
 0x2f6   : > { %18248 = vst [vmem:[#allocation300_spill] sm:$0xff] %v13083_v8  ;;  %3538 = vrot.lane.b32.xlu1 %v18250_v32, %s10858_s24 }
 0x2f7   : > { %v13089_v39 = vpop.permute.xlu2 %3474 }
 0x2f8   : > { %18251 = vst [vmem:[#allocation40_spill] sm:$0xff] %v13089_v39  ;;  %v13091_v54 = vpop.permute.xlu1 %3442  ;;  %v18261_v39 = vld [vmem:[#allocation54_spill] sm:$0xff] }
 0x2f9   : > { %18252 = vst [vmem:[#allocation31_spill] sm:$0xff] %v13091_v54 }
 0x2fb   : > { %3536 = vrot.lane.b32.xlu0 %v18253_v58, %s10858_s24 }
 0x2fd   : > { %v13095_v29 = vpop.permute.xlu0 %3440  ;;  %3546 = vrot.lane.b32.xlu2 %v18255_v55, %s10858_s24  ;;  %v333_v55 = vld [vmem:[%s10965_s10 + $0x244] sm:$0xf] }
 0x2fe   : > { %18254 = vst [vmem:[#allocation32_spill] sm:$0xff] %v13095_v29  ;;  %3544 = vrot.lane.b32.xlu1 %v18256_v40, %s10858_s24  ;;  %v18262_v29 = vld [vmem:[#allocation42_spill] sm:$0xff]  ;;  %v2254_v12 = vshll.u32 %v333_v55, 16 }
 0x2ff   : > { %v13101_v8 = vpop.permute.xlu2 %3480 }
 0x300   : > { %18257 = vst [vmem:[#allocation301_spill] sm:$0xff] %v13101_v8  ;;  %v13103_v2 = vpop.permute.xlu1 %3448 }
 0x301   : > { %18258 = vst [vmem:[#allocation302_spill] sm:$0xff] %v13103_v2  ;;  %v18265_v2 = vld [vmem:[#allocation45_spill] sm:$0xff] }
 0x303   : > { %3542 = vrot.lane.b32.xlu0 %v18259_v24, %s10858_s24 }
 0x305   : > { %v13107_v54 = vpop.permute.xlu0 %3446  ;;  %3552 = vrot.lane.b32.xlu2 %v18261_v39, %s10858_s24  ;;  %v18268_v39 = vld [vmem:[#allocation49_spill] sm:$0xff] }
 0x306   : > { %18260 = vst [vmem:[#allocation37_spill] sm:$0xff] %v13107_v54  ;;  %3550 = vrot.lane.b32.xlu1 %v18262_v29, %s10858_s24  ;;  %v18267_v54 = vld [vmem:[#allocation61_spill] sm:$0xff]  ;;  %v336_v29 = vld [vmem:[%s10965_s10 + $0x250] sm:$0xf] }
 0x307   : > { %v13113_v22 = vpop.permute.xlu2 %3486  ;;  %v2284_v53 = vshll.u32 %v336_v29, 16 }
 0x308   : > { %18263 = vst [vmem:[#allocation303_spill] sm:$0xff] %v13113_v22  ;;  %v13115_v8 = vpop.permute.xlu1 %3466  ;;  %v18271_v22 = vld [vmem:[#allocation51_spill] sm:$0xff] }
 0x309   : > { %18264 = vst [vmem:[#allocation304_spill] sm:$0xff] %v13115_v8  ;;  %v2286_v9 = vrot.slane %v2284_v53, 5  ;;  %v2258_v53 = vshrl.u32 %v333_v55, 16  ;;  %v339_v55 = vld [vmem:[%s10965_s10 + $0x25c] sm:$0xf] }
 0x30a   : > { %v2318_v27 = vshrl.u32 %v339_v55, 16 }
 0x30b   : > { %3548 = vrot.lane.b32.xlu0 %v18265_v2, %s10858_s24  ;;  %v2268_v2 = vshrl.u32 %v334_v37, 16 }
 0x30d   : > { %v13119_v19 = vpop.permute.xlu0 %3464  ;;  %3558 = vrot.lane.b32.xlu2 %v18267_v54, %s10858_s24  ;;  %v2270_v37 = vrot.slane %v2268_v2, 4  ;;  %v18283_v2 = vld [vmem:[#allocation66_spill] sm:$0xff] }
 0x30e   : > { %18266 = vst [vmem:[#allocation305_spill] sm:$0xff] %v13119_v19  ;;  %3556 = vrot.lane.b32.xlu1 %v18268_v39, %s10858_s24  ;;  %v337_v39 = vld [vmem:[%s10965_s10 + $0x254] sm:$0xf]  ;;  %v2250_v19 = vrot.slane %v2248_v59, 5 }
 0x30f   : > { %v13125_v50 = vpop.permute.xlu2 %3492  ;;  %v2294_v38 = vshll.u32 %v337_v39, 16 }
 0x310   : > { %18269 = vst [vmem:[#allocation306_spill] sm:$0xff] %v13125_v50  ;;  %v13127_v52 = vpop.permute.xlu1 %3472  ;;  %v335_v50 = vld [vmem:[%s10965_s10 + $0x24c] sm:$0xf] }
 0x311   : > { %18270 = vst [vmem:[#allocation307_spill] sm:$0xff] %v13127_v52  ;;  %v2274_v61 = vshll.u32 %v335_v50, 16 }
 0x313   : > { %3554 = vrot.lane.b32.xlu0 %v18271_v22, %s10858_s24  ;;  %v2288_v22 = vshrl.u32 %v336_v29, 16  ;;  %v2296_v29 = vrot.slane %v2294_v38, 5  ;;  %v2276_v8 = vrot.slane %v2274_v61, 5  ;;  %v2256_v61 = vrot.slane %v2254_v12, 5 }
 0x315   : > { %v13131_v41 = vpop.permute.xlu0 %3470  ;;  %3564 = vrot.lane.b32.xlu2 %v18273_v28, %s10858_s24  ;;  %v18277_v28 = vld [vmem:[#allocation58_spill] sm:$0xff] }
 0x316   : > { %18272 = vst [vmem:[#allocation308_spill] sm:$0xff] %v13131_v41  ;;  %3562 = vrot.lane.b32.xlu1 %v18274_v0, %s10858_s24  ;;  %v2298_v41 = vshrl.u32 %v337_v39, 16  ;;  %v2278_v0 = vshrl.u32 %v335_v50, 16  ;;  %v13153_v39 = vrot.slane %v2264_v11, 5  ;;  %v338_v50 = vld [vmem:[%s10965_s10 + $0x258] sm:$0xf] }
 0x317   : > { %v13138_v54 = vpop.permute.xlu2 %3498  ;;  %v2304_v11 = vshll.u32 %v338_v50, 16  ;;  %v2308_v12 = vshrl.u32 %v338_v50, 16 }
 0x318   : > { %18275 = vst [vmem:[#allocation309_spill] sm:$0xff] %v13138_v54  ;;  %v13143_v52 = vpop.permute.xlu1 %3478  ;;  %v2300_v54 = vrot.slane %v2298_v41, 4  ;;  %v2280_v36 = vrot.slane %v2278_v0, 4  ;;  %v2271_v17 = vor.u32 %v2270_v37, %v13153_v39  ;;  %v2260_v0 = vrot.slane %v2258_v53, 4 }
 0x319   : > { %18276 = vst [vmem:[#allocation310_spill] sm:$0xff] %v13143_v52  ;;  %v2290_v52 = vrot.slane %v2288_v22, 4  ;;  %v2314_v53 = vshll.u32 %v339_v55, 16  ;;  %v2310_v50 = vrot.slane %v2308_v12, 4  ;;  %v2320_v55 = vrot.slane %v2318_v27, 4 }
 0x31a   : > { %v2301_v41 = vor.u32 %v2300_v54, %v2296_v29  ;;  %v2281_v4 = vor.u32 %v2280_v36, %v2276_v8  ;;  %v2306_v54 = vrot.slane %v2304_v11, 5  ;;  %v2272_v37 = vrot.slane %v2271_v17, 4  ;;  %v18290_v11 = vld [vmem:[#allocation73_spill] sm:$0xff] }
 0x31b   : > { %3560 = vrot.lane.b32.xlu0 %v18277_v28, %s10858_s24  ;;  %v2291_v38 = vor.u32 %v2290_v52, %v2286_v9  ;;  %v2261_v59 = vor.u32 %v2260_v0, %v2256_v61  ;;  %v2316_v0 = vrot.slane %v2314_v53, 5 }
 0x31c   : > { %v2302_v52 = vrot.slane %v2301_v41, 4  ;;  %v2282_v36 = vrot.slane %v2281_v4, 4  ;;  %v2277_v17 = vsel %vm10976_vm2, %v2272_v37, %v2276_v8 }
 0x31d   : > { %v13148_v34 = vpop.permute.xlu0 %3476  ;;  %3570 = vrot.lane.b32.xlu2 %v18279_v21, %s10858_s24  ;;  %v3454_v37 = vunpack.c.l.b16 %v2277_v17 }
 0x31e   : > { %18278 = vst [vmem:[#allocation311_spill] sm:$0xff] %v13148_v34  ;;  %3568 = vrot.lane.b32.xlu1 %v18280_v16, %s10858_s24  ;;  %v2245_v34 = vshrl.u32 %v332_v49, 16  ;;  %v18285_v49 = vld [vmem:[#allocation83_spill] sm:$0xff]  ;;  %v2307_v41 = vsel %vm10976_vm2, %v2302_v52, %v2306_v54  ;;  %v2287_v4 = vsel %vm10976_vm2, %v2282_v36, %v2286_v9 }
 0x31f   : > { %v13157_v28 = vpop.permute.xlu2 %3504  ;;  %v3457_v52 = vunpack.c.l.b16 %v2307_v41  ;;  %v3455_v9 = vunpack.c.l.b16 %v2287_v4  ;;  %v18296_v41 = vld [vmem:[#allocation80_spill] sm:$0xff] }
 0x320   : > { %18281 = vst [vmem:[#allocation75_spill] sm:$0xff] %v13157_v28  ;;  %v13160_v22 = vpop.permute.xlu1 %3484  ;;  %v2247_v28 = vrot.slane %v2245_v34, 4 }
 0x321   : > { %18282 = vst [vmem:[#allocation63_spill] sm:$0xff] %v13160_v22  ;;  %v2292_v22 = vrot.slane %v2291_v38, 4 }
 0x322   : > { %v2251_v34 = vor.u32 %v2250_v19, %v2247_v28  ;;  %v2262_v28 = vrot.slane %v2261_v59, 4  ;;  %v2321_v59 = vor.u32 %v2320_v55, %v2316_v0 }
 0x323   : > { %3566 = vrot.lane.b32.xlu0 %v18283_v2, %s10858_s24  ;;  %v2297_v38 = vsel %vm10976_vm2, %v2292_v22, %v2296_v29  ;;  %v18292_v29 = vld [vmem:[#allocation87_spill] sm:$0xff] }
 0x324   : > { %v2252_v19 = vrot.slane %v2251_v34, 4  ;;  %v3456_v22 = vunpack.c.l.b16 %v2297_v38  ;;  %v2267_v27 = vsel %vm10976_vm2, %v2262_v28, %v13153_v39  ;;  %v2311_v34 = vor.u32 %v2310_v50, %v2306_v54 }
 0x325   : > { %v13165_v40 = vpop.permute.xlu0 %3482  ;;  %3576 = vrot.lane.b32.xlu2 %v18285_v49, %s10858_s24  ;;  %v3453_v4 = vunpack.c.l.b16 %v2267_v27 }
 0x326   : > { %18284 = vst [vmem:[#allocation312_spill] sm:$0xff] %v13165_v40  ;;  %3574 = vrot.lane.b32.xlu1 %v18286_v56, %s10858_s24  ;;  %v2257_v36 = vsel %vm10976_vm2, %v2252_v19, %v2256_v61  ;;  %v13202_v38 = vpack.c.b16 %v3457_v52, %v3456_v22  ;;  %v2322_v61 = vrot.slane %v2321_v59, 4  ;;  %v18309_v59 = vld [vmem:[#allocation92_spill] sm:$0xff] }
 0x327   : > { %v13172_v2 = vpop.permute.xlu2 %3510  ;;  %v3452_v17 = vunpack.c.l.b16 %v2257_v36 }
 0x328   : > { %18287 = vst [vmem:[#allocation71_spill] sm:$0xff] %v13172_v2  ;;  %v13174_v40 = vpop.permute.xlu1 %3490  ;;  %v340_v2 = vld [vmem:[%s10965_s10 + $0x260] sm:$0x1] }
 0x329   : > { %18288 = vst [vmem:[#allocation313_spill] sm:$0xff] %v13174_v40  ;;  %v2324_v12 = vshll.u32 %v340_v2, 16  ;;  %v13214_v39 = vpack.c.b16 %v3453_v4, %v3452_v17  ;;  %v18312_v4 = vld [vmem:[#allocation93_spill] sm:$0xff] }
 0x32a   : > { %18295 = vst [vmem:[#allocation315_spill] sm:$0xff] %v13202_v38 }
 0x32b   : > { %3572 = vrot.lane.b32.xlu0 %v18290_v11, %s10858_s24  ;;  %v2326_v19 = vrot.slane %v2324_v12, 5  ;;  %18299 = vst [vmem:[#allocation318_spill] sm:$0xff] %v13214_v39 }
 0x32d   : > { %v13186_v40 = vpop.permute.xlu0 %3488  ;;  %3582 = vrot.lane.b32.xlu2 %v18292_v29, %s10858_s24  ;;  %v2327_v28 = vsel %vm10976_vm2, %v2322_v61, %v2326_v19  ;;  %v18314_v19 = vld [vmem:[#allocation106_spill] sm:$0xff] }
 0x32e   : > { %18291 = vst [vmem:[#allocation73_spill] sm:$0xff] %v13186_v40  ;;  %3580 = vrot.lane.b32.xlu1 %v18293_v13, %s10858_s24  ;;  %v13206_v40 = vpack.c.b16 %v3455_v9, %v3454_v37  ;;  %v3459_v22 = vunpack.c.l.b16 %v2327_v28  ;;  %v18303_v37 = vld [vmem:[#allocation95_spill] sm:$0xff]  ;;  %v18304_v9 = vld [vmem:[#allocation88_spill] sm:$0xff]  ;;  %v18365_v13 = vld [vmem:[#allocation154_spill] sm:$0xff] }
 0x32f   : > { %v13193_v8 = vpop.permute.xlu2 %3516 }
 0x330   : > { %18294 = vst [vmem:[#allocation314_spill] sm:$0xff] %v13193_v8  ;;  %v13200_v53 = vpop.permute.xlu1 %3496  ;;  %v2312_v8 = vrot.slane %v2311_v34, 4  ;;  %v18308_v34 = vld [vmem:[#allocation100_spill] sm:$0xff] }
 0x331   : > { %18297 = vst [vmem:[#allocation316_spill] sm:$0xff] %v13206_v40 }
 0x332   : > { %v2317_v54 = vsel %vm10976_vm2, %v2312_v8, %v2316_v0 }
 0x333   : > { %3578 = vrot.lane.b32.xlu0 %v18296_v41, %s10858_s24  ;;  %v3458_v55 = vunpack.c.l.b16 %v2317_v54  ;;  %v18315_v54 = vld [vmem:[#allocation97_spill] sm:$0xff]  ;;  %v18384_v41 = vld [vmem:[#allocation164_spill] sm:$0xff] }
 0x335   : > { %v13208_v29 = vpop.permute.xlu0 %3494  ;;  %3588 = vrot.lane.b32.xlu2 %v13202_v38, %s10858_s24  ;;  %v13232_v0 = vpack.c.b16 %v3459_v22, %v3458_v55  ;;  %v18318_v22 = vld [vmem:[#allocation99_spill] sm:$0xff] }
 0x336   : > { %18298 = vst [vmem:[#allocation317_spill] sm:$0xff] %v13208_v29  ;;  %3586 = vrot.lane.b32.xlu1 %v13206_v40, %s10858_s24 }
 0x337   : > { %v13216_v2 = vpop.permute.xlu2 %3522  ;;  %18305 = vst [vmem:[#allocation95_spill] sm:$0xff] %v13232_v0 }
 0x338   : > { %18300 = vst [vmem:[#allocation319_spill] sm:$0xff] %v13216_v2  ;;  %v13222_v50 = vpop.permute.xlu1 %3502  ;;  %v18324_v2 = vld [vmem:[#allocation104_spill] sm:$0xff] }
 0x339   : > { %18301 = vst [vmem:[#allocation320_spill] sm:$0xff] %v13222_v50 }
 0x33b   : > { %3584 = vrot.lane.b32.xlu0 %v13214_v39, %s10858_s24 }
 0x33d   : > { %v13226_v52 = vpop.permute.xlu0 %3500  ;;  %3606 = vrot.lane.b32.xlu2 %v18303_v37, %s10859_s27 }
 0x33e   : > { %18302 = vst [vmem:[#allocation321_spill] sm:$0xff] %v13226_v52  ;;  %3604 = vrot.lane.b32.xlu1 %v18304_v9, %s10859_s27  ;;  %v18320_v9 = vld [vmem:[#allocation111_spill] sm:$0xff] }
 0x33f   : > { %v13234_v8 = vpop.permute.xlu2 %3528 }
 0x340   : > { %v13236_v36 = vpop.permute.xlu1 %3508 }
 0x341   : > { %18306 = vst [vmem:[#allocation88_spill] sm:$0xff] %v13236_v36 }
 0x343   : > { %3590 = vrot.lane.b32.xlu0 %v13232_v0, %s10858_s24  ;;  %v18330_v0 = vld [vmem:[#allocation109_spill] sm:$0xff] }
 0x345   : > { %v13240_v27 = vpop.permute.xlu0 %3506  ;;  %3612 = vrot.lane.b32.xlu2 %v18308_v34, %s10859_s27 }
 0x346   : > { %18307 = vst [vmem:[#allocation322_spill] sm:$0xff] %v13240_v27  ;;  %3610 = vrot.lane.b32.xlu1 %v18309_v59, %s10859_s27  ;;  %v18321_v59 = vld [vmem:[#allocation102_spill] sm:$0xff] }
 0x347   : > { %v13246_v12 = vpop.permute.xlu2 %3534  ;;  %v18338_v27 = vld [vmem:[#allocation118_spill] sm:$0xff] }
 0x348   : > { %18310 = vst [vmem:[#allocation100_spill] sm:$0xff] %v13246_v12  ;;  %v13248_v17 = vpop.permute.xlu1 %3514  ;;  %v18358_v12 = vld [vmem:[#allocation136_spill] sm:$0xff] }
 0x349   : > { %18311 = vst [vmem:[#allocation92_spill] sm:$0xff] %v13248_v17 }
 0x34b   : > { %3608 = vrot.lane.b32.xlu0 %v18312_v4, %s10859_s27 }
 0x34d   : > { %v13252_v61 = vpop.permute.xlu0 %3512  ;;  %3618 = vrot.lane.b32.xlu2 %v18314_v19, %s10859_s27 }
 0x34e   : > { %18313 = vst [vmem:[#allocation93_spill] sm:$0xff] %v13252_v61  ;;  %3616 = vrot.lane.b32.xlu1 %v18315_v54, %s10859_s27 }
 0x34f   : > { %v13258_v28 = vpop.permute.xlu2 %3540 }
 0x350   : > { %18316 = vst [vmem:[#allocation106_spill] sm:$0xff] %v13258_v28  ;;  %v13260_v55 = vpop.permute.xlu1 %3520  ;;  %v18337_v28 = vld [vmem:[#allocation127_spill] sm:$0xff] }
 0x351   : > { %18317 = vst [vmem:[#allocation97_spill] sm:$0xff] %v13260_v55  ;;  %v18326_v55 = vld [vmem:[#allocation117_spill] sm:$0xff] }
 0x353   : > { %3614 = vrot.lane.b32.xlu0 %v18318_v22, %s10859_s27 }
 0x355   : > { %v13264_v37 = vpop.permute.xlu0 %3518  ;;  %3624 = vrot.lane.b32.xlu2 %v18320_v9, %s10859_s27 }
 0x356   : > { %18319 = vst [vmem:[#allocation99_spill] sm:$0xff] %v13264_v37  ;;  %3622 = vrot.lane.b32.xlu1 %v18321_v59, %s10859_s27  ;;  %v18327_v37 = vld [vmem:[#allocation108_spill] sm:$0xff] }
 0x357   : > { %v13270_v4 = vpop.permute.xlu2 %3546 }
 0x358   : > { %18322 = vst [vmem:[#allocation323_spill] sm:$0xff] %v13270_v4  ;;  %v13272_v29 = vpop.permute.xlu1 %3526 }
 0x359   : > { %18323 = vst [vmem:[#allocation324_spill] sm:$0xff] %v13272_v29  ;;  %v18331_v29 = vld [vmem:[#allocation122_spill] sm:$0xff] }
 0x35b   : > { %3620 = vrot.lane.b32.xlu0 %v18324_v2, %s10859_s27 }
 0x35d   : > { %v13276_v17 = vpop.permute.xlu0 %3524  ;;  %3630 = vrot.lane.b32.xlu2 %v18326_v55, %s10859_s27  ;;  %v18335_v55 = vld [vmem:[#allocation114_spill] sm:$0xff] }
 0x35e   : > { %18325 = vst [vmem:[#allocation104_spill] sm:$0xff] %v13276_v17  ;;  %3628 = vrot.lane.b32.xlu1 %v18327_v37, %s10859_s27  ;;  %v18332_v17 = vld [vmem:[#allocation113_spill] sm:$0xff] }
 0x35f   : > { %v13282_v49 = vpop.permute.xlu2 %3552  ;;  %v18343_v37 = vld [vmem:[#allocation133_spill] sm:$0xff] }
 0x360   : > { %18328 = vst [vmem:[#allocation325_spill] sm:$0xff] %v13282_v49  ;;  %v13284_v61 = vpop.permute.xlu1 %3532 }
 0x361   : > { %18329 = vst [vmem:[#allocation326_spill] sm:$0xff] %v13284_v61  ;;  %v18380_v61 = vld [vmem:[#allocation158_spill] sm:$0xff] }
 0x363   : > { %3626 = vrot.lane.b32.xlu0 %v18330_v0, %s10859_s27 }
 0x365   : > { %v13288_v4 = vpop.permute.xlu0 %3530  ;;  %3636 = vrot.lane.b32.xlu2 %v18331_v29, %s10859_s27 }
 0x366   : > { %3634 = vrot.lane.b32.xlu1 %v18332_v17, %s10859_s27  ;;  %v18341_v17 = vld [vmem:[#allocation120_spill] sm:$0xff] }
 0x367   : > { %v13294_v38 = vpop.permute.xlu2 %3558 }
 0x368   : > { %18333 = vst [vmem:[#allocation327_spill] sm:$0xff] %v13294_v38  ;;  %v13296_v36 = vpop.permute.xlu1 %3538 }
 0x369   : > { %18334 = vst [vmem:[#allocation328_spill] sm:$0xff] %v13296_v36 }
 0x36b   : > { %3632 = vrot.lane.b32.xlu0 %v18335_v55, %s10859_s27  ;;  %v18344_v55 = vld [vmem:[#allocation124_spill] sm:$0xff] }
 0x36d   : > { %v13300_v49 = vpop.permute.xlu0 %3536  ;;  %3642 = vrot.lane.b32.xlu2 %v18337_v28, %s10859_s27 }
 0x36e   : > { %18336 = vst [vmem:[#allocation329_spill] sm:$0xff] %v13300_v49  ;;  %3640 = vrot.lane.b32.xlu1 %v18338_v27, %s10859_s27  ;;  %v18347_v27 = vld [vmem:[#allocation125_spill] sm:$0xff]  ;;  %v18353_v49 = vld [vmem:[#allocation131_spill] sm:$0xff] }
 0x36f   : > { %v13306_v40 = vpop.permute.xlu2 %3564 }
 0x370   : > { %18339 = vst [vmem:[#allocation330_spill] sm:$0xff] %v13306_v40  ;;  %v13308_v29 = vpop.permute.xlu1 %3544 }
 0x371   : > { %18340 = vst [vmem:[#allocation331_spill] sm:$0xff] %v13308_v29  ;;  %v18349_v29 = vld [vmem:[#allocation138_spill] sm:$0xff] }
 0x373   : > { %3638 = vrot.lane.b32.xlu0 %v18341_v17, %s10859_s27  ;;  %v18350_v17 = vld [vmem:[#allocation129_spill] sm:$0xff] }
 0x375   : > { %v13312_v38 = vpop.permute.xlu0 %3542  ;;  %3648 = vrot.lane.b32.xlu2 %v18343_v37, %s10859_s27 }
 0x376   : > { %18342 = vst [vmem:[#allocation332_spill] sm:$0xff] %v13312_v38  ;;  %3646 = vrot.lane.b32.xlu1 %v18344_v55, %s10859_s27 }
 0x377   : > { %v13318_v36 = vpop.permute.xlu2 %3570 }
 0x378   : > { %18345 = vst [vmem:[#allocation133_spill] sm:$0xff] %v13318_v36  ;;  %v13320_v28 = vpop.permute.xlu1 %3550 }
 0x379   : > { %18346 = vst [vmem:[#allocation124_spill] sm:$0xff] %v13320_v28  ;;  %v18355_v28 = vld [vmem:[#allocation144_spill] sm:$0xff] }
 0x37b   : > { %3644 = vrot.lane.b32.xlu0 %v18347_v27, %s10859_s27 }
 0x37d   : > { %v13324_v39 = vpop.permute.xlu0 %3548  ;;  %3654 = vrot.lane.b32.xlu2 %v18349_v29, %s10859_s27 }
 0x37e   : > { %18348 = vst [vmem:[#allocation125_spill] sm:$0xff] %v13324_v39  ;;  %3652 = vrot.lane.b32.xlu1 %v18350_v17, %s10859_s27  ;;  %v18356_v39 = vld [vmem:[#allocation134_spill] sm:$0xff] }
 0x37f   : > { %v13330_v38 = vpop.permute.xlu2 %3576 }
 0x380   : > { %18351 = vst [vmem:[#allocation129_spill] sm:$0xff] %v13330_v38  ;;  %v13332_v0 = vpop.permute.xlu1 %3556 }
 0x381   : > { %18352 = vst [vmem:[#allocation333_spill] sm:$0xff] %v13332_v0  ;;  %v18359_v0 = vld [vmem:[#allocation149_spill] sm:$0xff] }
 0x383   : > { %3650 = vrot.lane.b32.xlu0 %v18353_v49, %s10859_s27 }
 0x385   : > { %v13336_v36 = vpop.permute.xlu0 %3554  ;;  %3660 = vrot.lane.b32.xlu2 %v18355_v28, %s10859_s27 }
 0x386   : > { %18354 = vst [vmem:[#allocation131_spill] sm:$0xff] %v13336_v36  ;;  %3658 = vrot.lane.b32.xlu1 %v18356_v39, %s10859_s27  ;;  %v18360_v36 = vld [vmem:[#allocation140_spill] sm:$0xff]  ;;  %v18363_v39 = vld [vmem:[#allocation141_spill] sm:$0xff] }
 0x387   : > { %v13342_v50 = vpop.permute.xlu2 %3582 }
 0x388   : > { %18357 = vst [vmem:[#allocation334_spill] sm:$0xff] %v13342_v50  ;;  %v13344_v9 = vpop.permute.xlu1 %3562 }
 0x38b   : > { %3656 = vrot.lane.b32.xlu0 %v18358_v12, %s10859_s27  ;;  %v18366_v12 = vld [vmem:[#allocation146_spill] sm:$0xff] }
 0x38d   : > { %v13348_v38 = vpop.permute.xlu0 %3560  ;;  %3666 = vrot.lane.b32.xlu2 %v18359_v0, %s10859_s27 }
 0x38e   : > { %3664 = vrot.lane.b32.xlu1 %v18360_v36, %s10859_s27  ;;  %v18368_v36 = vld [vmem:[#allocation147_spill] sm:$0xff] }
 0x38f   : > { %v13354_v52 = vpop.permute.xlu2 %3588 }
 0x390   : > { %18361 = vst [vmem:[#allocation335_spill] sm:$0xff] %v13354_v52  ;;  %v13356_v28 = vpop.permute.xlu1 %3568 }
 0x391   : > { %18362 = vst [vmem:[#allocation336_spill] sm:$0xff] %v13356_v28  ;;  %v18370_v28 = vld [vmem:[#allocation160_spill] sm:$0xff] }
 0x393   : > { %3662 = vrot.lane.b32.xlu0 %v18363_v39, %s10859_s27  ;;  %v18371_v39 = vld [vmem:[#allocation151_spill] sm:$0xff] }
 0x395   : > { %v13360_v50 = vpop.permute.xlu0 %3566  ;;  %3672 = vrot.lane.b32.xlu2 %v18365_v13, %s10859_s27 }
 0x396   : > { %18364 = vst [vmem:[#allocation337_spill] sm:$0xff] %v13360_v50  ;;  %3670 = vrot.lane.b32.xlu1 %v18366_v12, %s10859_s27  ;;  %v18374_v12 = vld [vmem:[#allocation153_spill] sm:$0xff] }
 0x397   : > { %v13366_v29 = vpop.permute.xlu2 %3606 }
 0x398   : > { %v13368_v0 = vpop.permute.xlu1 %3574 }
 0x399   : > { %18367 = vst [vmem:[#allocation338_spill] sm:$0xff] %v13368_v0  ;;  %v18376_v0 = vld [vmem:[#allocation166_spill] sm:$0xff] }
 0x39b   : > { %3668 = vrot.lane.b32.xlu0 %v18368_v36, %s10859_s27  ;;  %v18377_v36 = vld [vmem:[#allocation157_spill] sm:$0xff] }
 0x39d   : > { %v13372_v52 = vpop.permute.xlu0 %3572  ;;  %3678 = vrot.lane.b32.xlu2 %v18370_v28, %s10859_s27 }
 0x39e   : > { %18369 = vst [vmem:[#allocation339_spill] sm:$0xff] %v13372_v52  ;;  %3676 = vrot.lane.b32.xlu1 %v18371_v39, %s10859_s27 }
 0x39f   : > { %v13378_v50 = vpop.permute.xlu2 %3612 }
 0x3a0   : > { %18372 = vst [vmem:[#allocation160_spill] sm:$0xff] %v13378_v50  ;;  %v13380_v13 = vpop.permute.xlu1 %3580 }
 0x3a1   : > { %18373 = vst [vmem:[#allocation151_spill] sm:$0xff] %v13380_v13 }
 0x3a3   : > { %3674 = vrot.lane.b32.xlu0 %v18374_v12, %s10859_s27  ;;  %v18382_v12 = vld [vmem:[#allocation163_spill] sm:$0xff] }
 0x3a5   : > { %v13384_v40 = vpop.permute.xlu0 %3578  ;;  %3684 = vrot.lane.b32.xlu2 %v18376_v0, %s10859_s27 }
 0x3a6   : > { %18375 = vst [vmem:[#allocation340_spill] sm:$0xff] %v13384_v40  ;;  %3682 = vrot.lane.b32.xlu1 %v18377_v36, %s10859_s27 }
 0x3a7   : > { %v13390_v52 = vpop.permute.xlu2 %3618 }
 0x3a8   : > { %18378 = vst [vmem:[#allocation166_spill] sm:$0xff] %v13390_v52  ;;  %v13392_v59 = vpop.permute.xlu1 %3586 }
 0x3a9   : > { %18379 = vst [vmem:[#allocation157_spill] sm:$0xff] %v13392_v59  ;;  %v18386_v59 = vld [vmem:[#allocation169_spill] sm:$0xff] }
 0x3ab   : > { %3680 = vrot.lane.b32.xlu0 %v18380_v61, %s10859_s27 }
 0x3ad   : > { %v13396_v50 = vpop.permute.xlu0 %3584  ;;  %3690 = vrot.lane.b32.xlu2 %v12481_v45, %s10859_s27 }
 0x3ae   : > { %18381 = vst [vmem:[#allocation158_spill] sm:$0xff] %v13396_v50  ;;  %3688 = vrot.lane.b32.xlu1 %v18382_v12, %s10859_s27  ;;  %v18388_v12 = vld [vmem:[#allocation170_spill] sm:$0xff] }
 0x3af   : > { %v13402_v13 = vpop.permute.xlu2 %3624 }
 0x3b0   : > { %18383 = vst [vmem:[#allocation341_spill] sm:$0xff] %v13402_v13  ;;  %v13404_v40 = vpop.permute.xlu1 %3604 }
 0x3b3   : > { %3686 = vrot.lane.b32.xlu0 %v18384_v41, %s10859_s27 }
 0x3b5   : > { %v13408_v52 = vpop.permute.xlu0 %3590  ;;  %3696 = vrot.lane.b32.xlu2 %v12522_v35, %s10859_s27 }
 0x3b6   : > { %18385 = vst [vmem:[#allocation342_spill] sm:$0xff] %v13408_v52  ;;  %3694 = vrot.lane.b32.xlu1 %v18386_v59, %s10859_s27  ;;  %v18389_v52 = vld [vmem:[#allocation175_spill] sm:$0xff]  ;;  %v18391_v59 = vld [vmem:[#allocation176_spill] sm:$0xff] }
 0x3b7   : > { %v13414_v50 = vpop.permute.xlu2 %3630 }
 0x3b8   : > { %18387 = vst [vmem:[#allocation343_spill] sm:$0xff] %v13414_v50  ;;  %v13416_v45 = vpop.permute.xlu1 %3610 }
 0x3bb   : > { %3692 = vrot.lane.b32.xlu0 %v18388_v12, %s10859_s27 }
 0x3bd   : > { %v13420_v13 = vpop.permute.xlu0 %3608  ;;  %3702 = vrot.lane.b32.xlu2 %v12551_v5, %s10859_s27 }
 0x3be   : > { %3700 = vrot.lane.b32.xlu1 %v18389_v52, %s10859_s27  ;;  %v18393_v52 = vld [vmem:[#allocation182_spill] sm:$0xff] }
 0x3bf   : > { %v13426_v41 = vpop.permute.xlu2 %3636 }
 0x3c0   : > { %v13428_v35 = vpop.permute.xlu1 %3616 }
 0x3c1   : > { %18390 = vst [vmem:[#allocation344_spill] sm:$0xff] %v13428_v35 }
 0x3c3   : > { %3698 = vrot.lane.b32.xlu0 %v18391_v59, %s10859_s27 }
 0x3c5   : > { %v13432_v50 = vpop.permute.xlu0 %3614  ;;  %3840 = vrot.lane.b32.xlu2 %v12891_v25, %s10860_s28 }
 0x3c6   : > { %3808 = vrot.lane.b32.xlu1 %v12789_v14, %s10860_s28 }
 0x3c7   : > { %v13438_v5 = vpop.permute.xlu2 %3642 }
 0x3c8   : > { %v13440_v12 = vpop.permute.xlu1 %3622 }
 0x3c9   : > { %18392 = vst [vmem:[#allocation176_spill] sm:$0xff] %v13440_v12 }
 0x3cb   : > { %3704 = vrot.lane.b32.xlu0 %v18393_v52, %s10859_s27 }
 0x3cd   : > { %v13444_v35 = vpop.permute.xlu0 %3620  ;;  %4088 = vrot.lane.b32.xlu2 %v18371_v39, %s10861_s29 }
 0x3ce   : > { %3980 = vrot.lane.b32.xlu1 %v18280_v16, %s10862_s4 }
 0x3cf   : > { %v13450_v25 = vpop.permute.xlu2 %3648 }
 0x3d0   : > { %v13452_v14 = vpop.permute.xlu1 %3628 }
 0x3d1   : > { %18394 = vst [vmem:[#allocation345_spill] sm:$0xff] %v13452_v14 }
 0x3d3   : > { %3948 = vrot.lane.b32.xlu0 %v18253_v58, %s10862_s4 }
 0x3d5   : > { %v13456_v12 = vpop.permute.xlu0 %3626  ;;  %3776 = vrot.lane.b32.xlu2 %v12724_v1, %s10860_s28 }
 0x3d6   : > { %18395 = vst [vmem:[#allocation346_spill] sm:$0xff] %v13456_v12  ;;  %3744 = vrot.lane.b32.xlu1 %v12666_v26, %s10860_s28 }
 0x3d7   : > { %v13462_v39 = vpop.permute.xlu2 %3654 }
 0x3d8   : > { %v13464_v52 = vpop.permute.xlu1 %3634 }
 0x3d9   : > { %18396 = vst [vmem:[#allocation347_spill] sm:$0xff] %v13464_v52 }
 0x3db   : > { %4120 = vrot.lane.b32.xlu0 %v12587_v63, %s10861_s29 }
 0x3dd   : > { %v13468_v16 = vpop.permute.xlu0 %3632  ;;  %4024 = vrot.lane.b32.xlu2 %v18308_v34, %s10861_s29 }
 0x3de   : > { %18397 = vst [vmem:[#allocation348_spill] sm:$0xff] %v13468_v16  ;;  %3916 = vrot.lane.b32.xlu1 %v11322_v7, %s10862_s4 }
 0x3df   : > { %v13474_v58 = vpop.permute.xlu2 %3660 }
 0x3e0   : > { %18398 = vst [vmem:[#allocation349_spill] sm:$0xff] %v13474_v58  ;;  %v13476_v1 = vpop.permute.xlu1 %3640 }
 0x3e3   : > { %3884 = vrot.lane.b32.xlu0 %v11056_v43, %s10862_s4 }
 0x3e5   : > { %v13480_v26 = vpop.permute.xlu0 %3638  ;;  %3842 = vrot.lane.b32.xlu2 %v12880_v6, %s10860_s28 }
 0x3e6   : > { %3810 = vrot.lane.b32.xlu1 %v12819_v60, %s10860_s28 }
 0x3e7   : > { %v13486_v34 = vpop.permute.xlu2 %3666 }
 0x3e8   : > { %18399 = vst [vmem:[#allocation350_spill] sm:$0xff] %v13486_v34  ;;  %v13488_v16 = vpop.permute.xlu1 %3646 }
 0x3eb   : > { %4056 = vrot.lane.b32.xlu0 %v18347_v27, %s10861_s29  ;;  %v10666_v27 = vld [vmem:[%s10965_s10 + $0x50] sm:$0xff] }
 0x3ed   : > { %v13492_v7 = vpop.permute.xlu0 %3644  ;;  %4090 = vrot.lane.b32.xlu2 %v18370_v28, %s10861_s29 }
 0x3ee   : > { %3982 = vrot.lane.b32.xlu1 %v18279_v21, %s10862_s4 }
 0x3ef   : > { %v13498_v43 = vpop.permute.xlu2 %3672 }
 0x3f0   : > { %v13500_v6 = vpop.permute.xlu1 %3652 }
 0x3f3   : > { %3950 = vrot.lane.b32.xlu0 %v18250_v32, %s10862_s4 }
 0x3f5   : > { %v13504_v60 = vpop.permute.xlu0 %3650  ;;  %3778 = vrot.lane.b32.xlu2 %v12720_v51, %s10860_s28 }
 0x3f6   : > { %3746 = vrot.lane.b32.xlu1 %v10666_v27, %s10860_s28 }
 0x3f7   : > { %v13510_v34 = vpop.permute.xlu2 %3678 }
 0x3f8   : > { %v13512_v28 = vpop.permute.xlu1 %3658 }
 0x3f9   : > { %18400 = vst [vmem:[#allocation351_spill] sm:$0xff] %v13512_v28 }
 0x3fb   : > { %4122 = vrot.lane.b32.xlu0 %v12574_v48, %s10861_s29 }
 0x3fd   : > { %v13516_v21 = vpop.permute.xlu0 %3656  ;;  %4026 = vrot.lane.b32.xlu2 %v18318_v22, %s10861_s29 }
 0x3fe   : > { %3918 = vrot.lane.b32.xlu1 %v11318_v30, %s10862_s4 }
 0x3ff   : > { %v13522_v32 = vpop.permute.xlu2 %3684 }
 0x400   : > { %v13524_v51 = vpop.permute.xlu1 %3664 }
 0x401   : > { %18401 = vst [vmem:[#allocation352_spill] sm:$0xff] %v13524_v51 }
 0x403   : > { %3886 = vrot.lane.b32.xlu0 %v11125_v23, %s10862_s4 }
 0x405   : > { %v13528_v27 = vpop.permute.xlu0 %3662  ;;  %3844 = vrot.lane.b32.xlu2 %v12876_v10, %s10860_s28 }
 0x406   : > { %18402 = vst [vmem:[#allocation353_spill] sm:$0xff] %v13528_v27  ;;  %3812 = vrot.lane.b32.xlu1 %v12808_v47, %s10860_s28 }
 0x407   : > { %v13534_v22 = vpop.permute.xlu2 %3690 }
 0x408   : > { %18403 = vst [vmem:[#allocation354_spill] sm:$0xff] %v13534_v22  ;;  %v13536_v52 = vpop.permute.xlu1 %3670 }
 0x40b   : > { %4058 = vrot.lane.b32.xlu0 %v18344_v55, %s10861_s29  ;;  %v10667_v55 = vld [vmem:[%s10965_s10 + $0x58] sm:$0xff] }
 0x40d   : > { %v13540_v30 = vpop.permute.xlu0 %3668  ;;  %4092 = vrot.lane.b32.xlu2 %v18380_v61, %s10861_s29 }
 0x40e   : > { %3984 = vrot.lane.b32.xlu1 %v18290_v11, %s10862_s4  ;;  %v10028_v11 = vld [vmem:[%s17736_s1 + $0x8] sm:$0xf] }
 0x40f   : > { %v13546_v23 = vpop.permute.xlu2 %3696 }
 0x410   : > { %18404 = vst [vmem:[#allocation355_spill] sm:$0xff] %v13546_v23  ;;  %v13548_v10 = vpop.permute.xlu1 %3676  ;;  %v10863_v23 = vmov 65535  }
 0x411   : > { %v5394_v27 = vsel %vm5392_vm6, 4294967295, %v10863_v23  ;;  %vm9527_vm6 = vcmask 261120  }
 0x412   : > { %v5395_v14 = vsel %vm5393_vm7, %v5394_v27, 0  ;;  %vm9529_vm7 = vcmask 523264  }
 0x413   : > { %3952 = vrot.lane.b32.xlu0 %v18249_v57, %s10862_s4  ;;  %v10430_v57 = vld [vmem:[%s17736_s1 + $0x8] sm:$0x30] }
 0x415   : > { %v13552_v47 = vpop.permute.xlu0 %3674  ;;  %3780 = vrot.lane.b32.xlu2 %v12747_v42, %s10860_s28 }
 0x416   : > { %3748 = vrot.lane.b32.xlu1 %v10667_v55, %s10860_s28  ;;  %v10029_v55 = vor.u32 %v10430_v57, %v10028_v11  ;;  %v10668_v57 = vld [vmem:[%s10965_s10 + $0x60] sm:$0xff] }
 0x417   : > { %v13558_v51 = vpop.permute.xlu2 %3702 }
 0x418   : > { %v13560_v61 = vpop.permute.xlu1 %3682  ;;  %v5397_v28 = vand.u32 %v10029_v55, %v5395_v14  ;;  %v13624_v55 = vld [vmem:[%s10965_s10 + $0x120] sm:$0xff] }
 0x41a   : > { %10432 = vmatpush.bf16.msra.mxu2 %v5397_v28  ;;  %10433 = vmatpush.bf16.msra.mxu3 %v5397_v28 }
 0x41b   : > { %4124 = vrot.lane.b32.xlu0 %v12566_v31, %s10861_s29  ;;  %5405 = vmatpush.bf16.msra.mxu0 %v5397_v28 }
 0x41c   : > { %10431 = vmatpush.bf16.msra.mxu1 %v5397_v28 }
 0x41d   : > { %v13570_v42 = vpop.permute.xlu0 %3680  ;;  %4028 = vrot.lane.b32.xlu2 %v18315_v54, %s10861_s29  ;;  %v10429_v54 = vld [vmem:[%s17736_s1] sm:$0xff] }
 0x41e   : > { %3920 = vrot.lane.b32.xlu1 %v11293_v44, %s10862_s4  ;;  %10435 = vmatpush.bf16.msra.mxu2 %v10429_v54  ;;  %v18405_v44 = vld [vmem:[#allocation181_spill] sm:$0xff] }
 0x41f   : > { %v13576_v58 = vpop.permute.xlu2 %3840  ;;  %10436 = vmatpush.bf16.msra.mxu3 %v10429_v54  ;;  %5406 = vmatpush.bf16.msra.mxu0 %v10429_v54 }
 0x420   : > { %v13578_v12 = vpop.permute.xlu1 %3688  ;;  %10434 = vmatpush.bf16.msra.mxu1 %v10429_v54  ;;  %v18409_v54 = vld [vmem:[#allocation74_spill] sm:$0xff] }
 0x423   : > { %3888 = vrot.lane.b32.xlu0 %v11110_v3, %s10862_s4 }
 0x425   : > { %v13585_v27 = vpop.permute.xlu0 %3686  ;;  %3814 = vrot.lane.b32.xlu2 %v12804_v62, %s10860_s28 }
 0x426   : > { %3706 = vrot.lane.b32.xlu1 %v18405_v44, %s10859_s27 }
 0x427   : > { %v4089_v14 = vpop.permute.xlu2 %4088 }
 0x428   : > { %v13591_v28 = vpop.permute.xlu1 %3694 }
 0x429   : > { %18406 = vst [vmem:[#allocation356_spill] sm:$0xff] %v13591_v28  ;;  %v18410_v28 = vld [vmem:[#allocation275_spill] sm:$0xff] }
 0x42b   : > { %4060 = vrot.lane.b32.xlu0 %v18343_v37, %s10861_s29 }
 0x42d   : > { %v13595_v3 = vpop.permute.xlu0 %3692  ;;  %3986 = vrot.lane.b32.xlu2 %v18286_v56, %s10862_s4 }
 0x42e   : > { %18407 = vst [vmem:[#allocation357_spill] sm:$0xff] %v13595_v3  ;;  %3954 = vrot.lane.b32.xlu1 %v18259_v24, %s10862_s4  ;;  %v10670_v3 = vld [vmem:[%s10965_s10 + $0xf0] sm:$0xff] }
 0x42f   : > { %v13601_v62 = vpop.permute.xlu2 %3776 }
 0x430   : > { %v3701_v23 = vpop.permute.xlu1 %3700 }
 0x433   : > { %3846 = vrot.lane.b32.xlu0 %v12909_v18, %s10860_s28 }
 0x435   : > { %v13605_v11 = vpop.permute.xlu0 %3698  ;;  %3750 = vrot.lane.b32.xlu2 %v10668_v57, %s10860_s28  ;;  %v4251_v57 = vsel %vm4152_vm8, %v13624_v55, %v18409_v54 }
 0x436   : > { %18408 = vst [vmem:[#allocation358_spill] sm:$0xff] %v13605_v11  ;;  %4126 = vrot.lane.b32.xlu1 %v12617_v20, %s10861_s29 }
 0x437   : > { %v13611_v37 = vpop.permute.xlu2 %4024 }
 0x438   : > { %v3809_v56 = vpop.permute.xlu1 %3808 }
 0x43b   : > { %4094 = vrot.lane.b32.xlu0 %v18377_v36, %s10861_s29  ;;  %v4411_v36 = vsel %vm4345_vm9, %v4251_v57, %v12698_v33  ;;  %v18411_v33 = vld [vmem:[#allocation132_spill] sm:$0xff]  ;;  %v18412_v57 = vld [vmem:[#allocation241_spill] sm:$0xff] }
 0x43c   : > { %v4299_v44 = vsel %vm4152_vm8, %v18412_v57, %v18411_v33 }
 0x43d   : > { %v13615_v24 = vpop.permute.xlu0 %3704  ;;  %3922 = vrot.lane.b32.xlu2 %v11363_v15, %s10862_s4  ;;  %v4540_v15 = vsel %vm4474_vm10, %v4411_v36, %v18410_v28 }
 0x43e   : > { %3890 = vrot.lane.b32.xlu1 %v11094_v46, %s10862_s4  ;;  %v4669_v46 = vsel %vm4603_vm11, %v4540_v15, %v13234_v8  ;;  %v18413_v8 = vld [vmem:[#allocation225_spill] sm:$0xff] }
 0x43f   : > { %v13621_v18 = vpop.permute.xlu2 %3842  ;;  %v4798_v54 = vsel %vm4732_vm12, %v4669_v46, %v13540_v30  ;;  %v18414_v30 = vld [vmem:[#allocation280_spill] sm:$0xff] }
 0x440   : > { %v3981_v11 = vpop.permute.xlu1 %3980  ;;  %v4927_v28 = vsel %vm4861_vm14, %v4798_v54, %v3809_v56  ;;  %v10357_v54 = vld [vmem:[%s10965_s10] sm:$0xff] }
 0x443   : > { %3782 = vrot.lane.b32.xlu0 %v10670_v3, %s10860_s28  ;;  %v4443_v3 = vsel %vm4345_vm9, %v4299_v44, %v18413_v8 }
 0x444   : > { %v4572_v46 = vsel %vm4474_vm10, %v4443_v3, %v18414_v30  ;;  %v18419_v3 = vld [vmem:[#allocation230_spill] sm:$0xff]  ;;  %v18420_v30 = vld [vmem:[#allocation305_spill] sm:$0xff] }
 0x445   : > { %v3949_v36 = vpop.permute.xlu0 %3948  ;;  %3708 = vrot.lane.b32.xlu2 %v12587_v63, %s10859_s27  ;;  %v4701_v56 = vsel %vm4603_vm11, %v4572_v46, %v13348_v38 }
 0x446   : > { %v5056_v15 = vsel %vm4990_vm13, %v4927_v28, %v3949_v36  ;;  %4062 = vrot.lane.b32.xlu1 %v18353_v49, %s10861_s29  ;;  %v4830_v63 = vsel %vm4732_vm12, %v4701_v56, %v3701_v23  ;;  %v18415_v28 = vld [vmem:[#allocation35_spill] sm:$0xff]  ;;  %v10671_v56 = vld [vmem:[%s10965_s10 + $0x18c] sm:$0xff] }
 0x447   : > { %v5185_v22 = vsel %vm5119_vm15, %v5056_v15, %v4089_v14  ;;  %v13653_v33 = vpop.permute.xlu2 %4090  ;;  %v4959_v14 = vsel %vm4861_vm14, %v4830_v63, %v13576_v58  ;;  %v18418_v58 = vld [vmem:[#allocation162_spill] sm:$0xff] }
 0x448   : > { %10062 = vmatmul.msk.bf16.vlgmr.msra.gmra.mxu2 %vm5263_vm0, %v5185_v22  ;;  %v3745_v44 = vpop.permute.xlu1 %3744  ;;  %v5088_v49 = vsel %vm4990_vm13, %v4959_v14, %v3981_v11  ;;  %v18416_v22 = vld [vmem:[#allocation254_spill] sm:$0xff] }
 0x44b   : > { %4030 = vrot.lane.b32.xlu0 %v18314_v19, %s10861_s29  ;;  %v18417_v19 = vld [vmem:[#allocation39_spill] sm:$0xff] }
 0x44c   : > { %v4155_v36 = vsel %vm4152_vm8, %v10357_v54, %v18417_v19  ;;  %v18421_v54 = vld [vmem:[#allocation191_spill] sm:$0xff] }
 0x44d   : > { %v4121_v57 = vpop.permute.xlu0 %4120  ;;  %3956 = vrot.lane.b32.xlu2 %v18415_v28, %s10862_s4  ;;  %v4347_v11 = vsel %vm4345_vm9, %v4155_v36, %v18418_v58  ;;  %v13690_v28 = vld [vmem:[%s10965_s10 + $0x90] sm:$0xff]  ;;  %v18424_v58 = vld [vmem:[#allocation261_spill] sm:$0xff] }
 0x44e   : > { %v5217_v38 = vsel %vm5119_vm15, %v5088_v49, %v4121_v57  ;;  %3848 = vrot.lane.b32.xlu1 %v18416_v22, %s10860_s28  ;;  %v4476_v15 = vsel %vm4474_vm10, %v4347_v11, %v18419_v3 }
 0x44f   : > { %10078 = vmatmul.msk.bf16.vlgmr.msra.gmra.mxu3 %vm5263_vm0, %v5217_v38  ;;  %v13671_v23 = vpop.permute.xlu2 %3778  ;;  %v4605_v46 = vsel %vm4603_vm11, %v4476_v15, %v18420_v30  ;;  %v18422_v38 = vld [vmem:[#allocation62_spill] sm:$0xff] }
 0x450   : > { %v3917_v8 = vpop.permute.xlu1 %3916  ;;  %v4734_v63 = vsel %vm4732_vm12, %v4605_v46, %v13404_v40  ;;  %v4203_v22 = vsel %vm4152_vm8, %v13690_v28, %v18422_v38 }
 0x451   : > { %v4863_v14 = vsel %vm4861_vm14, %v4734_v63, %v3745_v44  ;;  %v18423_v44 = vld [vmem:[#allocation173_spill] sm:$0xff]  ;;  %v18426_v63 = vld [vmem:[#allocation8_spill] sm:$0xff] }
 0x452   : > { %v4379_v36 = vsel %vm4345_vm9, %v4203_v22, %v18423_v44 }
 0x453   : > { %3816 = vrot.lane.b32.xlu0 %v10671_v56, %s10860_s28  ;;  %v4508_v11 = vsel %vm4474_vm10, %v4379_v36, %v18424_v58  ;;  %v10675_v58 = vld [vmem:[%s10965_s10 + $0x6c] sm:$0xff] }
 0x454   : > { %v4637_v15 = vsel %vm4603_vm11, %v4508_v11, %v13200_v53  ;;  %v10673_v53 = vld [vmem:[%s10965_s10 + $0xfc] sm:$0xff] }
 0x455   : > { %v3885_v49 = vpop.permute.xlu0 %3884  ;;  %4128 = vrot.lane.b32.xlu2 %v18421_v54, %s10861_s29 }
 0x456   : > { %v4992_v57 = vsel %vm4990_vm13, %v4863_v14, %v3885_v49  ;;  %4096 = vrot.lane.b32.xlu1 %v18376_v0, %s10861_s29  ;;  %v18425_v0 = vld [vmem:[#allocation83_spill] sm:$0xff]  ;;  %v13724_v49 = vld [vmem:[%s10965_s10 + $0x128] sm:$0xff] }
 0x457   : > { %v5121_v19 = vsel %vm5119_vm15, %v4992_v57, %v13611_v37  ;;  %v13699_v40 = vpop.permute.xlu2 %4026  ;;  %v4766_v37 = vsel %vm4732_vm12, %v4637_v15, %v13426_v41  ;;  %v18427_v57 = vld [vmem:[#allocation98_spill] sm:$0xff] }
 0x458   : > { %10030 = vmatmul.msk.bf16.vlgmr.msra.gmra.mxu0 %vm5263_vm0, %v5121_v19  ;;  %v3811_v3 = vpop.permute.xlu1 %3810  ;;  %v4895_v30 = vsel %vm4861_vm14, %v4766_v37, %v13601_v62  ;;  %v4254_v62 = vsel %vm4152_vm8, %v13724_v49, %v18427_v57  ;;  %v18429_v19 = vld [vmem:[#allocation265_spill] sm:$0xff] }
 0x459   : > { %v5024_v46 = vsel %vm4990_vm13, %v4895_v30, %v3917_v8  ;;  %v18428_v8 = vld [vmem:[#allocation211_spill] sm:$0xff] }
 0x45a   : > { %v4413_v38 = vsel %vm4345_vm9, %v4254_v62, %v18428_v8  ;;  %v13744_v30 = vld [vmem:[%s10965_s10 + $0x1b8] sm:$0xff]  ;;  %v10358_v62 = vld [vmem:[%s10965_s10 + $0x8] sm:$0xff] }
 0x45b   : > { %3988 = vrot.lane.b32.xlu0 %v18425_v0, %s10862_s4  ;;  %v4542_v44 = vsel %vm4474_vm10, %v4413_v38, %v18429_v19 }
 0x45c   : > { %v4671_v36 = vsel %vm4603_vm11, %v4542_v44, %v13288_v4  ;;  %v10677_v44 = vld [vmem:[%s10965_s10 + $0x224] sm:$0xff] }
 0x45d   : > { %v4057_v56 = vpop.permute.xlu0 %4056  ;;  %3892 = vrot.lane.b32.xlu2 %v18426_v63, %s10862_s4  ;;  %v4800_v11 = vsel %vm4732_vm12, %v4671_v36, %v13536_v52  ;;  %v18432_v63 = vld [vmem:[#allocation294_spill] sm:$0xff] }
 0x45e   : > { %v5153_v14 = vsel %vm5119_vm15, %v5024_v46, %v4057_v56  ;;  %3784 = vrot.lane.b32.xlu1 %v10673_v53, %s10860_s28  ;;  %v4929_v15 = vsel %vm4861_vm14, %v4800_v11, %v3811_v3  ;;  %v18430_v46 = vld [vmem:[#allocation128_spill] sm:$0xff]  ;;  %v18431_v3 = vld [vmem:[#allocation215_spill] sm:$0xff] }
 0x45f   : > { %10046 = vmatmul.msk.bf16.vlgmr.msra.gmra.mxu1 %vm5263_vm0, %v5153_v14  ;;  %v13721_v41 = vpop.permute.xlu2 %3844  ;;  %v4302_v4 = vsel %vm4152_vm8, %v13744_v30, %v18430_v46  ;;  %v18437_v46 = vld [vmem:[#allocation304_spill] sm:$0xff] }
 0x460   : > { %v3983_v22 = vpop.permute.xlu1 %3982 }
 0x463   : > { %3752 = vrot.lane.b32.xlu0 %v10675_v58, %s10860_s28  ;;  %v18434_v58 = vld [vmem:[#allocation44_spill] sm:$0xff] }
 0x464   : > { %v4158_v11 = vsel %vm4152_vm8, %v10358_v62, %v18434_v58  ;;  %v18441_v62 = vld [vmem:[#allocation196_spill] sm:$0xff]  ;;  %v18444_v58 = vld [vmem:[#allocation46_spill] sm:$0xff] }
 0x465   : > { %v3951_v37 = vpop.permute.xlu0 %3950  ;;  %4064 = vrot.lane.b32.xlu2 %v18350_v17, %s10861_s29  ;;  %v4445_v17 = vsel %vm4345_vm9, %v4302_v4, %v18431_v3 }
 0x466   : > { %v5058_v0 = vsel %vm4990_vm13, %v4929_v15, %v3951_v37  ;;  %4032 = vrot.lane.b32.xlu1 %v18324_v2, %s10861_s29  ;;  %v4574_v14 = vsel %vm4474_vm10, %v4445_v17, %v18432_v63  ;;  %v18433_v2 = vld [vmem:[#allocation19_spill] sm:$0xff]  ;;  %v18436_v37 = vld [vmem:[#allocation245_spill] sm:$0xff]  ;;  %v18438_v63 = vld [vmem:[#allocation164_spill] sm:$0xff] }
 0x467   : > { %v5187_v56 = vsel %vm5119_vm15, %v5058_v0, %v13653_v33  ;;  %v13753_v52 = vpop.permute.xlu2 %4092  ;;  %v4703_v57 = vsel %vm4603_vm11, %v4574_v14, %v13344_v9  ;;  %v10678_v9 = vld [vmem:[%s10965_s10 + $0x194] sm:$0xff] }
 0x468   : > { %10063 = vmatmul.msk.bf16.gmra.mxu2 %vm5263_vm0, %v5187_v56  ;;  %v3747_v53 = vpop.permute.xlu1 %3746  ;;  %v4832_v33 = vsel %vm4732_vm12, %v4703_v57, %v13558_v51  ;;  %v13795_v57 = vld [vmem:[%s10965_s10 + $0x98] sm:$0xff] }
 0x469   : > { %v4961_v8 = vsel %vm4861_vm14, %v4832_v33, %v13621_v18  ;;  %v18435_v18 = vld [vmem:[#allocation143_spill] sm:$0xff]  ;;  %v18439_v33 = vld [vmem:[#allocation48_spill] sm:$0xff] }
 0x46a   : > { %v5090_v38 = vsel %vm4990_vm13, %v4961_v8, %v3983_v22  ;;  %v4349_v22 = vsel %vm4345_vm9, %v4158_v11, %v18435_v18 }
 0x46b   : > { %3924 = vrot.lane.b32.xlu0 %v18433_v2, %s10862_s4  ;;  %v4478_v0 = vsel %vm4474_vm10, %v4349_v22, %v18436_v37  ;;  %v4206_v2 = vsel %vm4152_vm8, %v13795_v57, %v18439_v33  ;;  %v10680_v37 = vld [vmem:[%s10965_s10 + $0x104] sm:$0xff]  ;;  %v18448_v33 = vld [vmem:[#allocation326_spill] sm:$0xff] }
 0x46c   : > { %v4607_v4 = vsel %vm4603_vm11, %v4478_v0, %v18437_v46  ;;  %v4381_v8 = vsel %vm4345_vm9, %v4206_v2, %v18441_v62  ;;  %v10681_v46 = vld [vmem:[%s10965_s10 + $0x74] sm:$0xff] }
 0x46d   : > { %v4123_v19 = vpop.permute.xlu0 %4122  ;;  %3850 = vrot.lane.b32.xlu2 %v10677_v44, %s10860_s28  ;;  %v4736_v56 = vsel %vm4732_vm12, %v4607_v4, %v13366_v29  ;;  %v18440_v29 = vld [vmem:[#allocation80_spill] sm:$0xff]  ;;  %v13829_v4 = vld [vmem:[%s10965_s10 + $0x130] sm:$0xff] }
 0x46e   : > { %v5219_v36 = vsel %vm5119_vm15, %v5090_v38, %v4123_v19  ;;  %3818 = vrot.lane.b32.xlu1 %v10678_v9, %s10860_s28  ;;  %v4865_v3 = vsel %vm4861_vm14, %v4736_v56, %v3747_v53  ;;  %v18442_v38 = vld [vmem:[#allocation260_spill] sm:$0xff]  ;;  %v18445_v56 = vld [vmem:[#allocation94_spill] sm:$0xff] }
 0x46f   : > { %10079 = vmatmul.msk.bf16.gmra.mxu3 %vm5263_vm0, %v5219_v36  ;;  %v13776_v51 = vpop.permute.xlu2 %3780  ;;  %v4510_v19 = vsel %vm4474_vm10, %v4381_v8, %v18442_v38  ;;  %v18443_v36 = vld [vmem:[#allocation309_spill] sm:$0xff]  ;;  %v18450_v38 = vld [vmem:[#allocation102_spill] sm:$0xff] }
 0x470   : > { %v3919_v15 = vpop.permute.xlu1 %3918  ;;  %v4639_v9 = vsel %vm4603_vm11, %v4510_v19, %v18443_v36  ;;  %v13849_v36 = vld [vmem:[%s10965_s10 + $0x1c0] sm:$0xff] }
 0x473   : > { %3710 = vrot.lane.b32.xlu0 %v12574_v48, %s10859_s27 }
 0x475   : > { %v3887_v17 = vpop.permute.xlu0 %3886  ;;  %4098 = vrot.lane.b32.xlu2 %v18438_v63, %s10861_s29  ;;  %v18447_v63 = vld [vmem:[#allocation279_spill] sm:$0xff] }
 0x476   : > { %v4994_v14 = vsel %vm4990_vm13, %v4865_v3, %v3887_v17  ;;  %3990 = vrot.lane.b32.xlu1 %v18440_v29, %s10862_s4 }
 0x477   : > { %v5123_v48 = vsel %vm5119_vm15, %v4994_v14, %v13699_v40  ;;  %v13804_v53 = vpop.permute.xlu2 %4028  ;;  %v4768_v40 = vsel %vm4732_vm12, %v4639_v9, %v13480_v26  ;;  %v18451_v9 = vld [vmem:[#allocation110_spill] sm:$0xff] }
 0x478   : > { %10031 = vmatmul.msk.bf16.gmra.mxu0 %vm5263_vm0, %v5123_v48  ;;  %v3813_v44 = vpop.permute.xlu1 %3812  ;;  %v4897_v11 = vsel %vm4861_vm14, %v4768_v40, %v13671_v23  ;;  %v4257_v23 = vsel %vm4152_vm8, %v13829_v4, %v18445_v56  ;;  %v18449_v48 = vld [vmem:[#allocation190_spill] sm:$0xff]  ;;  %v4305_v40 = vsel %vm4152_vm8, %v13849_v36, %v18451_v9 }
 0x479   : > { %v5026_v18 = vsel %vm4990_vm13, %v4897_v11, %v3919_v15  ;;  %v18446_v15 = vld [vmem:[#allocation201_spill] sm:$0xff]  ;;  %v18460_v9 = vld [vmem:[#allocation298_spill] sm:$0xff] }
 0x47a   : > { %v4415_v3 = vsel %vm4345_vm9, %v4257_v23, %v18446_v15  ;;  %v18453_v11 = vld [vmem:[#allocation229_spill] sm:$0xff]  ;;  %v18456_v23 = vld [vmem:[#allocation7_spill] sm:$0xff]  ;;  %v10359_v15 = vld [vmem:[%s10965_s10 + $0x10] sm:$0xff] }
 0x47b   : > { %3958 = vrot.lane.b32.xlu0 %v18444_v58, %s10862_s4  ;;  %v4544_v14 = vsel %vm4474_vm10, %v4415_v3, %v18447_v63 }
 0x47c   : > { %v4673_v2 = vsel %vm4603_vm11, %v4544_v14, %v18448_v33  ;;  %v10684_v33 = vld [vmem:[%s10965_s10 + $0x19c] sm:$0xff] }
 0x47d   : > { %v4059_v22 = vpop.permute.xlu0 %4058  ;;  %3786 = vrot.lane.b32.xlu2 %v10680_v37, %s10860_s28  ;;  %v4802_v29 = vsel %vm4732_vm12, %v4673_v2, %v13498_v43  ;;  %v18452_v43 = vld [vmem:[#allocation18_spill] sm:$0xff] }
 0x47e   : > { %v5155_v0 = vsel %vm5119_vm15, %v5026_v18, %v4059_v22  ;;  %3754 = vrot.lane.b32.xlu1 %v10681_v46, %s10860_s28  ;;  %v4931_v62 = vsel %vm4861_vm14, %v4802_v29, %v3813_v44  ;;  %v4447_v18 = vsel %vm4345_vm9, %v4305_v40, %v18453_v11  ;;  %v18454_v22 = vld [vmem:[#allocation293_spill] sm:$0xff]  ;;  %v18455_v46 = vld [vmem:[#allocation330_spill] sm:$0xff]  ;;  %v18457_v29 = vld [vmem:[#allocation36_spill] sm:$0xff] }
 0x47f   : > { %10047 = vmatmul.msk.bf16.gmra.mxu1 %vm5263_vm0, %v5155_v0  ;;  %v13826_v26 = vpop.permute.xlu2 %3814  ;;  %v4576_v37 = vsel %vm4474_vm10, %v4447_v18, %v18454_v22  ;;  %v18462_v18 = vld [vmem:[#allocation78_spill] sm:$0xff] }
 0x480   : > { %v3985_v17 = vpop.permute.xlu1 %3984  ;;  %v4705_v56 = vsel %vm4603_vm11, %v4576_v37, %v18455_v46  ;;  %v13900_v37 = vld [vmem:[%s10965_s10 + $0xa0] sm:$0xff]  ;;  %v18463_v46 = vld [vmem:[#allocation70_spill] sm:$0xff] }
 0x483   : > { %4130 = vrot.lane.b32.xlu0 %v18449_v48, %s10861_s29 }
 0x485   : > { %v3953_v8 = vpop.permute.xlu0 %3952  ;;  %4034 = vrot.lane.b32.xlu2 %v18450_v38, %s10861_s29  ;;  %v18459_v38 = vld [vmem:[#allocation244_spill] sm:$0xff] }
 0x486   : > { %v5060_v19 = vsel %vm4990_vm13, %v4931_v62, %v3953_v8  ;;  %3926 = vrot.lane.b32.xlu1 %v18452_v43, %s10862_s4  ;;  %v4161_v62 = vsel %vm4152_vm8, %v10359_v15, %v18457_v29  ;;  %v10686_v29 = vld [vmem:[%s10965_s10 + $0x22c] sm:$0xff] }
 0x487   : > { %v5189_v58 = vsel %vm5119_vm15, %v5060_v19, %v13753_v52  ;;  %v13858_v44 = vpop.permute.xlu2 %3986  ;;  %v4834_v52 = vsel %vm4732_vm12, %v4705_v56, %v13615_v24  ;;  %v4209_v56 = vsel %vm4152_vm8, %v13900_v37, %v18463_v46  ;;  %v18473_v46 = vld [vmem:[#allocation337_spill] sm:$0xff] }
 0x488   : > { %10064 = vmatmul.msk.bf16.gmra.mxu2 %vm5263_vm0, %v5189_v58  ;;  %v3749_v0 = vpop.permute.xlu1 %3748  ;;  %v4963_v3 = vsel %vm4861_vm14, %v4834_v52, %v13721_v41  ;;  %v18458_v41 = vld [vmem:[#allocation171_spill] sm:$0xff]  ;;  %v18461_v58 = vld [vmem:[#allocation138_spill] sm:$0xff] }
 0x489   : > { %v5092_v63 = vsel %vm4990_vm13, %v4963_v3, %v3985_v17  ;;  %v4351_v17 = vsel %vm4345_vm9, %v4161_v62, %v18458_v41  ;;  %v18466_v3 = vld [vmem:[#allocation249_spill] sm:$0xff] }
 0x48a   : > { %v4480_v19 = vsel %vm4474_vm10, %v4351_v17, %v18459_v38  ;;  %v10687_v38 = vld [vmem:[%s10965_s10 + $0x7c] sm:$0xff] }
 0x48b   : > { %3894 = vrot.lane.b32.xlu0 %v18456_v23, %s10862_s4  ;;  %v4609_v40 = vsel %vm4603_vm11, %v4480_v19, %v18460_v9  ;;  %v18465_v23 = vld [vmem:[#allocation194_spill] sm:$0xff]  ;;  %v18468_v9 = vld [vmem:[#allocation197_spill] sm:$0xff] }
 0x48c   : > { %v4383_v15 = vsel %vm4345_vm9, %v4209_v56, %v18465_v23  ;;  %v18474_v23 = vld [vmem:[#allocation22_spill] sm:$0xff] }
 0x48d   : > { %v4125_v14 = vpop.permute.xlu0 %4124  ;;  %3820 = vrot.lane.b32.xlu2 %v10684_v33, %s10860_s28  ;;  %v18467_v33 = vld [vmem:[#allocation321_spill] sm:$0xff] }
 0x48e   : > { %v5221_v2 = vsel %vm5119_vm15, %v5092_v63, %v4125_v14  ;;  %3712 = vrot.lane.b32.xlu1 %v12566_v31, %s10859_s27  ;;  %v4738_v31 = vsel %vm4732_vm12, %v4609_v40, %v13420_v13  ;;  %v18464_v13 = vld [vmem:[#allocation45_spill] sm:$0xff]  ;;  %v4512_v63 = vsel %vm4474_vm10, %v4383_v15, %v18466_v3  ;;  %v13952_v3 = vld [vmem:[%s10965_s10 + $0x138] sm:$0xff] }
 0x48f   : > { %10080 = vmatmul.msk.bf16.gmra.mxu3 %vm5263_vm0, %v5221_v2  ;;  %v13881_v24 = vpop.permute.xlu2 %3750  ;;  %v4867_v43 = vsel %vm4861_vm14, %v4738_v31, %v3749_v0  ;;  %v4641_v2 = vsel %vm4603_vm11, %v4512_v63, %v18467_v33  ;;  %v13934_v40 = vld [vmem:[%s10965_s10 + $0x1c8] sm:$0xff]  ;;  %v18470_v31 = vld [vmem:[#allocation228_spill] sm:$0xff]  ;;  %v18475_v63 = vld [vmem:[#allocation79_spill] sm:$0xff] }
 0x490   : > { %v3921_v8 = vpop.permute.xlu1 %3920  ;;  %v4260_v33 = vsel %vm4152_vm8, %v13952_v3, %v18475_v63 }
 0x493   : > { %4066 = vrot.lane.b32.xlu0 %v18461_v58, %s10861_s29  ;;  %v18469_v58 = vld [vmem:[#allocation139_spill] sm:$0xff] }
 0x495   : > { %v3889_v11 = vpop.permute.xlu0 %3888  ;;  %3992 = vrot.lane.b32.xlu2 %v18462_v18, %s10862_s4 }
 0x496   : > { %v4996_v22 = vsel %vm4990_vm13, %v4867_v43, %v3889_v11  ;;  %3960 = vrot.lane.b32.xlu1 %v18464_v13, %s10862_s4  ;;  %v18471_v11 = vld [vmem:[#allocation283_spill] sm:$0xff] }
 0x497   : > { %v5125_v52 = vsel %vm5119_vm15, %v4996_v22, %v13804_v53  ;;  %v13909_v0 = vpop.permute.xlu2 %3922  ;;  %v4770_v53 = vsel %vm4732_vm12, %v4641_v2, %v13476_v1  ;;  %v18472_v22 = vld [vmem:[#allocation163_spill] sm:$0xff]  ;;  %v18476_v2 = vld [vmem:[#allocation6_spill] sm:$0xff] }
 0x498   : > { %10032 = vmatmul.msk.bf16.gmra.mxu0 %vm5263_vm0, %v5125_v52  ;;  %v3707_v14 = vpop.permute.xlu1 %3706  ;;  %v4899_v62 = vsel %vm4861_vm14, %v4770_v53, %v13776_v51  ;;  %v4308_v51 = vsel %vm4152_vm8, %v13934_v40, %v18469_v58 }
 0x499   : > { %v5028_v41 = vsel %vm4990_vm13, %v4899_v62, %v3921_v8  ;;  %v4449_v43 = vsel %vm4345_vm9, %v4308_v51, %v18470_v31  ;;  %v18478_v62 = vld [vmem:[#allocation278_spill] sm:$0xff] }
 0x49a   : > { %v4578_v18 = vsel %vm4474_vm10, %v4449_v43, %v18471_v11  ;;  %v10690_v43 = vld [vmem:[%s10965_s10 + $0x10c] sm:$0xff] }
 0x49b   : > { %3852 = vrot.lane.b32.xlu0 %v10686_v29, %s10860_s28  ;;  %v4707_v56 = vsel %vm4603_vm11, %v4578_v18, %v18473_v46  ;;  %v18477_v29 = vld [vmem:[#allocation214_spill] sm:$0xff] }
 0x49c   : > { %v4836_v52 = vsel %vm4732_vm12, %v4707_v56, %v3707_v14  ;;  %v4417_v14 = vsel %vm4345_vm9, %v4260_v33, %v18477_v29  ;;  %v13987_v56 = vld [vmem:[%s10965_s10 + $0xa8] sm:$0xff]  ;;  %v18484_v33 = vld [vmem:[#allocation111_spill] sm:$0xff] }
 0x49d   : > { %v4061_v17 = vpop.permute.xlu0 %4060  ;;  %3756 = vrot.lane.b32.xlu2 %v10687_v38, %s10860_s28 }
 0x49e   : > { %v5157_v19 = vsel %vm5119_vm15, %v5028_v41, %v4061_v17  ;;  %4132 = vrot.lane.b32.xlu1 %v18468_v9, %s10861_s29  ;;  %v4546_v41 = vsel %vm4474_vm10, %v4417_v14, %v18478_v62 }
 0x49f   : > { %10048 = vmatmul.msk.bf16.gmra.mxu1 %vm5263_vm0, %v5157_v19  ;;  %v13931_v1 = vpop.permute.xlu2 %3708  ;;  %v18479_v19 = vld [vmem:[#allocation100_spill] sm:$0xff] }
 0x4a0   : > { %v3955_v8 = vpop.permute.xlu1 %3954  ;;  %v4675_v58 = vsel %vm4603_vm11, %v4546_v41, %v18479_v19  ;;  %v18486_v41 = vld [vmem:[#allocation42_spill] sm:$0xff] }
 0x4a1   : > { %v4804_v31 = vsel %vm4732_vm12, %v4675_v58, %v13552_v47  ;;  %v18480_v47 = vld [vmem:[#allocation136_spill] sm:$0xff]  ;;  %v10692_v58 = vld [vmem:[%s10965_s10 + $0x234] sm:$0xff] }
 0x4a2   : > { %v4933_v11 = vsel %vm4861_vm14, %v4804_v31, %v13826_v26 }
 0x4a3   : > { %4100 = vrot.lane.b32.xlu0 %v18472_v22, %s10861_s29  ;;  %v5062_v18 = vsel %vm4990_vm13, %v4933_v11, %v3955_v8  ;;  %v18489_v11 = vld [vmem:[#allocation233_spill] sm:$0xff] }
 0x4a5   : > { %v3847_v13 = vpop.permute.xlu0 %3846  ;;  %3928 = vrot.lane.b32.xlu2 %v18474_v23, %s10862_s4  ;;  %v10360_v23 = vld [vmem:[%s10965_s10 + $0x18] sm:$0xff] }
 0x4a6   : > { %v4965_v15 = vsel %vm4861_vm14, %v4836_v52, %v3847_v13  ;;  %3896 = vrot.lane.b32.xlu1 %v18476_v2, %s10862_s4  ;;  %v18481_v52 = vld [vmem:[#allocation67_spill] sm:$0xff]  ;;  %v18485_v2 = vld [vmem:[#allocation320_spill] sm:$0xff] }
 0x4a7   : > { %v13959_v53 = vpop.permute.xlu2 %3956  ;;  %v5094_v38 = vsel %vm4990_vm13, %v4965_v15, %v13858_v44  ;;  %v4212_v26 = vsel %vm4152_vm8, %v13987_v56, %v18481_v52  ;;  %v18482_v13 = vld [vmem:[#allocation179_spill] sm:$0xff]  ;;  %v18483_v15 = vld [vmem:[#allocation264_spill] sm:$0xff] }
 0x4a8   : > { %v4127_v17 = vpop.permute.xlu1 %4126 }
 0x4a9   : > { %v5223_v51 = vsel %vm5119_vm15, %v5094_v38, %v4127_v17  ;;  %v18487_v38 = vld [vmem:[#allocation41_spill] sm:$0xff] }
 0x4aa   : > { %10081 = vmatmul.msk.bf16.gmra.mxu3 %vm5263_vm0, %v5223_v51  ;;  %v4164_v19 = vsel %vm4152_vm8, %v10360_v23, %v18487_v38  ;;  %v18488_v51 = vld [vmem:[#allocation168_spill] sm:$0xff]  ;;  %v18496_v38 = vld [vmem:[#allocation87_spill] sm:$0xff] }
 0x4ab   : > { %3788 = vrot.lane.b32.xlu0 %v10690_v43, %s10860_s28  ;;  %v4353_v31 = vsel %vm4345_vm9, %v4164_v19, %v18488_v51  ;;  %v18497_v19 = vld [vmem:[#allocation329_spill] sm:$0xff] }
 0x4ad   : > { %v4095_v44 = vpop.permute.xlu0 %4094  ;;  %3714 = vrot.lane.b32.xlu2 %v12617_v20, %s10859_s27  ;;  %v4385_v20 = vsel %vm4345_vm9, %v4212_v26, %v18482_v13  ;;  %v10693_v13 = vld [vmem:[%s10965_s10 + $0x1a4] sm:$0xff] }
 0x4ae   : > { %v5191_v22 = vsel %vm5119_vm15, %v5062_v18, %v4095_v44  ;;  %4068 = vrot.lane.b32.xlu1 %v18480_v47, %s10861_s29  ;;  %v4514_v63 = vsel %vm4474_vm10, %v4385_v20, %v18483_v15 }
 0x4af   : > { %10065 = vmatmul.msk.bf16.gmra.mxu2 %vm5263_vm0, %v5191_v22  ;;  %v13984_v46 = vpop.permute.xlu2 %4128  ;;  %v4643_v29 = vsel %vm4603_vm11, %v4514_v63, %v18485_v2  ;;  %v18490_v22 = vld [vmem:[#allocation308_spill] sm:$0xff]  ;;  %v18493_v2 = vld [vmem:[#allocation105_spill] sm:$0xff] }
 0x4b0   : > { %v3891_v8 = vpop.permute.xlu1 %3890  ;;  %v4772_v14 = vsel %vm4732_vm12, %v4643_v29, %v13438_v5  ;;  %v4482_v5 = vsel %vm4474_vm10, %v4353_v31, %v18489_v11  ;;  %v18494_v29 = vld [vmem:[#allocation213_spill] sm:$0xff]  ;;  %v18498_v11 = vld [vmem:[#allocation11_spill] sm:$0xff] }
 0x4b1   : > { %v4611_v47 = vsel %vm4603_vm11, %v4482_v5, %v18490_v22  ;;  %v18499_v22 = vld [vmem:[#allocation135_spill] sm:$0xff] }
 0x4b2   : > { %v4740_v26 = vsel %vm4732_vm12, %v4611_v47, %v13416_v45  ;;  %v18492_v45 = vld [vmem:[#allocation172_spill] sm:$0xff] }
 0x4b3   : > { %4036 = vrot.lane.b32.xlu0 %v18484_v33, %s10861_s29  ;;  %v4869_v20 = vsel %vm4861_vm14, %v4740_v26, %v13881_v24  ;;  %v14036_v33 = vld [vmem:[%s10965_s10 + $0x144] sm:$0xff] }
 0x4b4   : > { %v4998_v23 = vsel %vm4990_vm13, %v4869_v20, %v3891_v8  ;;  %v4263_v24 = vsel %vm4152_vm8, %v14036_v33, %v18493_v2  ;;  %v18501_v20 = vld [vmem:[#allocation297_spill] sm:$0xff] }
 0x4b5   : > { %v3783_v62 = vpop.permute.xlu0 %3782  ;;  %3962 = vrot.lane.b32.xlu2 %v18486_v41, %s10862_s4  ;;  %v18495_v41 = vld [vmem:[#allocation268_spill] sm:$0xff] }
 0x4b6   : > { %v4901_v17 = vsel %vm4861_vm14, %v4772_v14, %v3783_v62  ;;  %3854 = vrot.lane.b32.xlu1 %v10692_v58, %s10860_s28  ;;  %v4419_v14 = vsel %vm4345_vm9, %v4263_v24, %v18494_v29  ;;  %v10697_v2 = vld [vmem:[%s10965_s10 + $0x84] sm:$0xff] }
 0x4b7   : > { %v14012_v43 = vpop.permute.xlu2 %3892  ;;  %v5030_v44 = vsel %vm4990_vm13, %v4901_v17, %v13909_v0  ;;  %v18491_v0 = vld [vmem:[#allocation195_spill] sm:$0xff]  ;;  %v4548_v17 = vsel %vm4474_vm10, %v4419_v14, %v18495_v41  ;;  %v18503_v41 = vld [vmem:[#allocation134_spill] sm:$0xff] }
 0x4b8   : > { %v4063_v18 = vpop.permute.xlu1 %4062  ;;  %v4677_v58 = vsel %vm4603_vm11, %v4548_v17, %v18497_v19  ;;  %v18504_v19 = vld [vmem:[#allocation109_spill] sm:$0xff] }
 0x4b9   : > { %v5159_v52 = vsel %vm5119_vm15, %v5030_v44, %v4063_v18  ;;  %v4806_v51 = vsel %vm4732_vm12, %v4677_v58, %v13548_v10  ;;  %v10695_v18 = vld [vmem:[%s10965_s10 + $0x114] sm:$0xff] }
 0x4ba   : > { %10049 = vmatmul.msk.bf16.gmra.mxu1 %vm5263_vm0, %v5159_v52  ;;  %v14059_v44 = vld [vmem:[%s10965_s10 + $0x1d4] sm:$0xff] }
 0x4bb   : > { %3822 = vrot.lane.b32.xlu0 %v10693_v13, %s10860_s28  ;;  %v4311_v47 = vsel %vm4152_vm8, %v14059_v44, %v18499_v22  ;;  %v18500_v52 = vld [vmem:[#allocation218_spill] sm:$0xff]  ;;  %v18505_v58 = vld [vmem:[#allocation27_spill] sm:$0xff] }
 0x4bc   : > { %v4451_v26 = vsel %vm4345_vm9, %v4311_v47, %v18500_v52  ;;  %v18509_v22 = vld [vmem:[#allocation307_spill] sm:$0xff]  ;;  %v18510_v52 = vld [vmem:[#allocation160_spill] sm:$0xff] }
 0x4bd   : > { %v4031_v15 = vpop.permute.xlu0 %4030  ;;  %4134 = vrot.lane.b32.xlu2 %v18491_v0, %s10861_s29 }
 0x4be   : > { %v5127_v63 = vsel %vm5119_vm15, %v4998_v23, %v4031_v15  ;;  %4102 = vrot.lane.b32.xlu1 %v18492_v45, %s10861_s29  ;;  %v4580_v23 = vsel %vm4474_vm10, %v4451_v26, %v18501_v20 }
 0x4bf   : > { %10033 = vmatmul.msk.bf16.gmra.mxu0 %vm5263_vm0, %v5127_v63  ;;  %v14043_v62 = vpop.permute.xlu2 %4064  ;;  %v18502_v63 = vld [vmem:[#allocation336_spill] sm:$0xff] }
 0x4c0   : > { %v3849_v8 = vpop.permute.xlu1 %3848  ;;  %v4709_v45 = vsel %vm4603_vm11, %v4580_v23, %v18502_v63  ;;  %v14108_v63 = vld [vmem:[%s10965_s10 + $0xb4] sm:$0xff] }
 0x4c1   : > { %v4838_v24 = vsel %vm4732_vm12, %v4709_v45, %v13931_v1  ;;  %v10698_v1 = vld [vmem:[%s10965_s10 + $0x24] sm:$0xff] }
 0x4c2   : > { %v18511_v45 = vld [vmem:[#allocation53_spill] sm:$0xff] }
 0x4c3   : > { %3994 = vrot.lane.b32.xlu0 %v18496_v38, %s10862_s4 }
 0x4c5   : > { %v3817_v31 = vpop.permute.xlu0 %3816  ;;  %3898 = vrot.lane.b32.xlu2 %v18498_v11, %s10862_s4 }
 0x4c6   : > { %v4935_v5 = vsel %vm4861_vm14, %v4806_v51, %v3817_v31  ;;  %3790 = vrot.lane.b32.xlu1 %v10695_v18, %s10860_s28  ;;  %v18506_v31 = vld [vmem:[#allocation150_spill] sm:$0xff] }
 0x4c7   : > { %v5064_v10 = vsel %vm4990_vm13, %v4935_v5, %v13959_v53  ;;  %v14078_v29 = vpop.permute.xlu2 %3850  ;;  %v4967_v53 = vsel %vm4861_vm14, %v4838_v24, %v3849_v8  ;;  %v4167_v8 = vsel %vm4152_vm8, %v10698_v1, %v18505_v58  ;;  %v18507_v5 = vld [vmem:[#allocation248_spill] sm:$0xff] }
 0x4c8   : > { %v4097_v13 = vpop.permute.xlu1 %4096  ;;  %v4355_v11 = vsel %vm4345_vm9, %v4167_v8, %v18506_v31  ;;  %v10702_v24 = vld [vmem:[%s10965_s10 + $0x244] sm:$0xf]  ;;  %v18514_v8 = vld [vmem:[#allocation75_spill] sm:$0xff] }
 0x4c9   : > { %v5193_v15 = vsel %vm5119_vm15, %v5064_v10, %v4097_v13  ;;  %v4484_v18 = vsel %vm4474_vm10, %v4355_v11, %v18507_v5  ;;  %v10699_v10 = vld [vmem:[%s10965_s10 + $0x240] sm:$0xff] }
 0x4ca   : > { %10066 = vmatmul.msk.bf16.gmra.mxu2 %vm5263_vm0, %v5193_v15  ;;  %v4613_v47 = vsel %vm4603_vm11, %v4484_v18, %v18509_v22  ;;  %v10700_v15 = vld [vmem:[%s10965_s10 + $0x1b0] sm:$0xff]  ;;  %v10703_v5 = vld [vmem:[%s10965_s10 + $0x240] sm:$0xf] }
 0x4cb   : > { %3758 = vrot.lane.b32.xlu0 %v10697_v2, %s10860_s28  ;;  %v4742_v26 = vsel %vm4732_vm12, %v4613_v47, %v18510_v52  ;;  %v4215_v2 = vsel %vm4152_vm8, %v14108_v63, %v18511_v45  ;;  %v9732_v18 = vrot.slane %v10703_v5, 9 }
 0x4cd   : > { %v3989_v14 = vpop.permute.xlu0 %3988  ;;  %4070 = vrot.lane.b32.xlu2 %v18503_v41, %s10861_s29 }
 0x4ce   : > { %v5096_v17 = vsel %vm4990_vm13, %v4967_v53, %v3989_v14  ;;  %4038 = vrot.lane.b32.xlu1 %v18504_v19, %s10861_s29  ;;  %v2339_v53 = vrot.slane %v10702_v24, 5  ;;  %v18512_v14 = vld [vmem:[#allocation200_spill] sm:$0xff]  ;;  %v18513_v19 = vld [vmem:[#allocation263_spill] sm:$0xff] }
 0x4cf   : > { %v5225_v38 = vsel %vm5119_vm15, %v5096_v17, %v13984_v46  ;;  %v18508_v46 = vld [vmem:[#allocation21_spill] sm:$0xff]  ;;  %v4099_v20 = vpop.permute.xlu2 %4098  ;;  %v4387_v41 = vsel %vm4345_vm9, %v4215_v2, %v18512_v14  ;;  %v18518_v2 = vld [vmem:[#allocation54_spill] sm:$0xff] }
 0x4d0   : > { %10082 = vmatmul.msk.bf16.gmra.mxu3 %vm5263_vm0, %v5225_v38  ;;  %v3785_v51 = vpop.permute.xlu1 %3784  ;;  %v4516_v1 = vsel %vm4474_vm10, %v4387_v41, %v18513_v19  ;;  %v18520_v19 = vld [vmem:[#allocation204_spill] sm:$0xff] }
 0x4d1   : > { %v4645_v31 = vsel %vm4603_vm11, %v4516_v1, %v18514_v8  ;;  %v18521_v8 = vld [vmem:[#allocation282_spill] sm:$0xff] }
 0x4d2   : > { %v4774_v11 = vsel %vm4732_vm12, %v4645_v31, %v13492_v7 }
 0x4d3   : > { %3930 = vrot.lane.b32.xlu0 %v18508_v46, %s10862_s4  ;;  %v2341_v46 = vrot.slane %v2339_v53, 4  ;;  %v4903_v47 = vsel %vm4861_vm14, %v4774_v11, %v3785_v51  ;;  %v2340_v51 = vsel %vm11835_vm5, %v9732_v18, %v2339_v53  ;;  %v14154_v53 = vld [vmem:[%s10965_s10 + $0x14c] sm:$0xff]  ;;  %v14170_v18 = vld [vmem:[%s10965_s10 + $0x1dc] sm:$0xff] }
 0x4d4   : > { %v3592_v24 = vunpack.c.l.b16 %v2340_v51  ;;  %v18526_v51 = vld [vmem:[#allocation296_spill] sm:$0xff] }
 0x4d5   : > { %v3753_v13 = vpop.permute.xlu0 %3752  ;;  %3856 = vrot.lane.b32.xlu2 %v10699_v10, %s10860_s28  ;;  %v18516_v10 = vld [vmem:[#allocation318_spill] sm:$0xff] }
 0x4d6   : > { %v4871_v23 = vsel %vm4861_vm14, %v4742_v26, %v3753_v13  ;;  %3824 = vrot.lane.b32.xlu1 %v10700_v15, %s10860_s28  ;;  %v18515_v26 = vld [vmem:[#allocation170_spill] sm:$0xff] }
 0x4d7   : > { %v5000_v38 = vsel %vm4990_vm13, %v4871_v23, %v14012_v43  ;;  %v10704_v43 = vld [vmem:[%s10965_s10 + $0x248] sm:$0xf]  ;;  %v14138_v7 = vpop.permute.xlu2 %3786 }
 0x4d8   : > { %v4033_v17 = vpop.permute.xlu1 %4032  ;;  %v2342_v22 = vrot.slane %v10704_v43, 5 }
 0x4d9   : > { %v5129_v58 = vsel %vm5119_vm15, %v5000_v38, %v4033_v17  ;;  %v18519_v17 = vld [vmem:[#allocation101_spill] sm:$0xff] }
 0x4da   : > { %10034 = vmatmul.msk.bf16.gmra.mxu0 %vm5263_vm0, %v5129_v58  ;;  %v2343_v15 = vsel %vm11835_vm5, %v2341_v46, %v2342_v22  ;;  %v4266_v38 = vsel %vm4152_vm8, %v14154_v53, %v18519_v17  ;;  %v18523_v46 = vld [vmem:[#allocation116_spill] sm:$0xff] }
 0x4db   : > { %3716 = vrot.lane.b32.xlu0 %v18421_v54, %s10859_s27  ;;  %v4421_v1 = vsel %vm4345_vm9, %v4266_v38, %v18520_v19  ;;  %v4314_v43 = vsel %vm4152_vm8, %v14170_v18, %v18523_v46  ;;  %v18529_v38 = vld [vmem:[#allocation10_spill] sm:$0xff] }
 0x4dc   : > { %v4550_v31 = vsel %vm4474_vm10, %v4421_v1, %v18521_v8  ;;  %v10707_v1 = vld [vmem:[%s10965_s10 + $0x24c] sm:$0xf] }
 0x4dd   : > { %v3925_v52 = vpop.permute.xlu0 %3924  ;;  %4104 = vrot.lane.b32.xlu2 %v18515_v26, %s10861_s29  ;;  %v18524_v26 = vld [vmem:[#allocation108_spill] sm:$0xff]  ;;  %v2345_v8 = vrot.slane %v10707_v1, 5 }
 0x4de   : > { %v5032_v13 = vsel %vm4990_vm13, %v4903_v47, %v3925_v52  ;;  %3996 = vrot.lane.b32.xlu1 %v18516_v10, %s10862_s4 }
 0x4df   : > { %v5161_v54 = vsel %vm5119_vm15, %v5032_v13, %v14043_v62  ;;  %v3593_v62 = vunpack.c.l.b16 %v2343_v15  ;;  %v4035_v11 = vpop.permute.xlu2 %4034  ;;  %v18525_v13 = vld [vmem:[#allocation232_spill] sm:$0xff] }
 0x4e0   : > { %10050 = vmatmul.msk.bf16.gmra.mxu1 %vm5263_vm0, %v5161_v54  ;;  %v3819_v45 = vpop.permute.xlu1 %3818  ;;  %v4453_v54 = vsel %vm4345_vm9, %v4314_v43, %v18525_v13  ;;  %v2347_v43 = vrot.slane %v2345_v8, 4  ;;  %v18532_v13 = vld [vmem:[#allocation247_spill] sm:$0xff] }
 0x4e1   : > { %v14151_v41 = vpack.c.b16 %v3593_v62, %v3592_v24  ;;  %v18528_v24 = vld [vmem:[#allocation133_spill] sm:$0xff] }
 0x4e3   : > { %3964 = vrot.lane.b32.xlu0 %v18518_v2, %s10862_s4  ;;  %v18527_v2 = vld [vmem:[#allocation20_spill] sm:$0xff] }
 0x4e5   : > { %v3711_v14 = vpop.permute.xlu0 %3710  ;;  %3792 = vrot.lane.b32.xlu2 %v13624_v55, %s10860_s28  ;;  %v18522_v55 = vld [vmem:[#allocation328_spill] sm:$0xff] }
 0x4e6   : > { %3760 = vrot.lane.b32.xlu1 %v13690_v28, %s10860_s28  ;;  %v4679_v5 = vsel %vm4603_vm11, %v4550_v31, %v18522_v55 }
 0x4e7   : > { %v4808_v28 = vsel %vm4732_vm12, %v4679_v5, %v13510_v34  ;;  %v4582_v34 = vsel %vm4474_vm10, %v4453_v54, %v18526_v51  ;;  %v14192_v19 = vpop.permute.xlu2 %3820  ;;  %v10708_v5 = vld [vmem:[%s10965_s10 + $0x2c] sm:$0xff]  ;;  %v18534_v51 = vld [vmem:[#allocation144_spill] sm:$0xff] }
 0x4e8   : > { %v3991_v58 = vpop.permute.xlu1 %3990  ;;  %v4937_v47 = vsel %vm4861_vm14, %v4808_v28, %v3819_v45  ;;  %v4711_v45 = vsel %vm4603_vm11, %v4582_v34, %v18528_v24  ;;  %v18530_v28 = vld [vmem:[#allocation30_spill] sm:$0xff] }
 0x4e9   : > { %v4840_v62 = vsel %vm4732_vm12, %v4711_v45, %v3711_v14  ;;  %v4170_v46 = vsel %vm4152_vm8, %v10708_v5, %v18530_v28  ;;  %v18535_v45 = vld [vmem:[#allocation316_spill] sm:$0xff] }
 0x4ea   : > { %v18539_v28 = vld [vmem:[#allocation252_spill] sm:$0xff] }
 0x4eb   : > { %4136 = vrot.lane.b32.xlu0 %v14151_v41, %s10861_s29 }
 0x4ed   : > { %v3959_v52 = vpop.permute.xlu0 %3958  ;;  %4040 = vrot.lane.b32.xlu2 %v18524_v26, %s10861_s29 }
 0x4ee   : > { %v5066_v10 = vsel %vm4990_vm13, %v4937_v47, %v3959_v52  ;;  %3932 = vrot.lane.b32.xlu1 %v18527_v2, %s10862_s4  ;;  %v14208_v47 = vld [vmem:[%s10965_s10 + $0x250] sm:$0xf]  ;;  %v18531_v52 = vld [vmem:[#allocation177_spill] sm:$0xff] }
 0x4ef   : > { %v5195_v15 = vsel %vm5119_vm15, %v5066_v10, %v4099_v20  ;;  %v4969_v20 = vsel %vm4861_vm14, %v4840_v62, %v14078_v29  ;;  %v2344_v29 = vrot.slane %v2342_v22, 4  ;;  %v18533_v10 = vld [vmem:[#allocation40_spill] sm:$0xff]  ;;  %v3993_v62 = vpop.permute.xlu2 %3992 }
 0x4f0   : > { %10067 = vmatmul.msk.bf16.gmra.mxu2 %vm5263_vm0, %v5195_v15  ;;  %v3755_v17 = vpop.permute.xlu1 %3754  ;;  %v5098_v31 = vsel %vm4990_vm13, %v4969_v20, %v3991_v58  ;;  %v2348_v58 = vrot.slane %v14208_v47, 5  ;;  %v14232_v20 = vld [vmem:[%s10965_s10 + $0xbc] sm:$0xff]  ;;  %v18554_v47 = vld [vmem:[#allocation185_spill] sm:$0xff] }
 0x4f1   : > { %v2346_v34 = vsel %vm11835_vm5, %v2344_v29, %v2345_v8 }
 0x4f2   : > { %v2349_v15 = vsel %vm11835_vm5, %v2347_v43, %v2348_v58  ;;  %v18540_v43 = vld [vmem:[#allocation322_spill] sm:$0xff] }
 0x4f3   : > { %3900 = vrot.lane.b32.xlu0 %v18529_v38, %s10862_s4 }
 0x4f5   : > { %v4131_v55 = vpop.permute.xlu0 %4130  ;;  %3826 = vrot.lane.b32.xlu2 %v13744_v30, %s10860_s28  ;;  %v4357_v30 = vsel %vm4345_vm9, %v4170_v46, %v18531_v52 }
 0x4f6   : > { %v5227_v14 = vsel %vm5119_vm15, %v5098_v31, %v4131_v55  ;;  %3718 = vrot.lane.b32.xlu1 %v18449_v48, %s10859_s27  ;;  %v4486_v54 = vsel %vm4474_vm10, %v4357_v30, %v18532_v13  ;;  %v18537_v31 = vld [vmem:[#allocation51_spill] sm:$0xff]  ;;  %v3595_v55 = vunpack.c.l.b16 %v2349_v15  ;;  %v10711_v30 = vld [vmem:[%s10965_s10 + $0x248] sm:$0xff] }
 0x4f7   : > { %10083 = vmatmul.msk.bf16.gmra.mxu3 %vm5263_vm0, %v5227_v14  ;;  %v4615_v48 = vsel %vm4603_vm11, %v4486_v54, %v18533_v10  ;;  %v18538_v14 = vld [vmem:[#allocation199_spill] sm:$0xff] }
 0x4f8   : > { %v3927_v26 = vpop.permute.xlu1 %3926  ;;  %v4744_v22 = vsel %vm4732_vm12, %v4615_v48, %v13432_v50  ;;  %v18536_v50 = vld [vmem:[#allocation76_spill] sm:$0xff]  ;;  %v18542_v15 = vld [vmem:[#allocation231_spill] sm:$0xff] }
 0x4f9   : > { %v4873_v2 = vsel %vm4861_vm14, %v4744_v22, %v3755_v17  ;;  %v4218_v1 = vsel %vm4152_vm8, %v14232_v20, %v18536_v50  ;;  %v3594_v17 = vunpack.c.l.b16 %v2346_v34  ;;  %v14265_v22 = vld [vmem:[%s10965_s10 + $0x1e4] sm:$0xff] }
 0x4fa   : > { %v4389_v5 = vsel %vm4345_vm9, %v4218_v1, %v18538_v14  ;;  %v18541_v34 = vld [vmem:[#allocation145_spill] sm:$0xff] }
 0x4fb   : > { %4072 = vrot.lane.b32.xlu0 %v18534_v51, %s10861_s29  ;;  %v4518_v46 = vsel %vm4474_vm10, %v4389_v5, %v18539_v28  ;;  %v14251_v13 = vpack.c.b16 %v3595_v55, %v3594_v17  ;;  %v14283_v55 = vld [vmem:[%s10965_s10 + $0x154] sm:$0xff]  ;;  %v18547_v14 = vld [vmem:[#allocation85_spill] sm:$0xff] }
 0x4fc   : > { %v4647_v52 = vsel %vm4603_vm11, %v4518_v46, %v18540_v43  ;;  %v4269_v5 = vsel %vm4152_vm8, %v14283_v55, %v18547_v14  ;;  %v18548_v28 = vld [vmem:[#allocation9_spill] sm:$0xff] }
 0x4fd   : > { %v3895_v24 = vpop.permute.xlu0 %3894  ;;  %3998 = vrot.lane.b32.xlu2 %v18535_v45, %s10862_s4  ;;  %v18544_v45 = vld [vmem:[#allocation169_spill] sm:$0xff] }
 0x4fe   : > { %v5002_v38 = vsel %vm4990_vm13, %v4873_v2, %v3895_v24  ;;  %3966 = vrot.lane.b32.xlu1 %v18537_v31, %s10862_s4  ;;  %v18543_v2 = vld [vmem:[#allocation286_spill] sm:$0xff]  ;;  %v18546_v31 = vld [vmem:[#allocation25_spill] sm:$0xff] }
 0x4ff   : > { %v5131_v8 = vsel %vm5119_vm15, %v5002_v38, %v4035_v11  ;;  %v4776_v11 = vsel %vm4732_vm12, %v4647_v52, %v13488_v16  ;;  %v14262_v16 = vpop.permute.xlu2 %3756  ;;  %v18545_v38 = vld [vmem:[#allocation339_spill] sm:$0xff]  ;;  %v18549_v46 = vld [vmem:[#allocation217_spill] sm:$0xff] }
 0x500   : > { %10035 = vmatmul.msk.bf16.gmra.mxu0 %vm5263_vm0, %v5131_v8  ;;  %v3713_v29 = vpop.permute.xlu1 %3712  ;;  %v4905_v54 = vsel %vm4861_vm14, %v4776_v11, %v14138_v7  ;;  %v4317_v7 = vsel %vm4152_vm8, %v14265_v22, %v18541_v34  ;;  %v4423_v43 = vsel %vm4345_vm9, %v4269_v5, %v18549_v46  ;;  %v18550_v52 = vld [vmem:[#allocation281_spill] sm:$0xff]  ;;  %v10714_v34 = vld [vmem:[%s10965_s10 + $0x254] sm:$0xf] }
 0x501   : > { %v5034_v10 = vsel %vm4990_vm13, %v4905_v54, %v3927_v26  ;;  %v18551_v54 = vld [vmem:[#allocation106_spill] sm:$0xff]  ;;  %v18556_v5 = vld [vmem:[#allocation117_spill] sm:$0xff] }
 0x503   : > { %3858 = vrot.lane.b32.xlu0 %v10711_v30, %s10860_s28 }
 0x505   : > { %v4067_v48 = vpop.permute.xlu0 %4066  ;;  %3762 = vrot.lane.b32.xlu2 %v13795_v57, %s10860_s28  ;;  %v4455_v57 = vsel %vm4345_vm9, %v4317_v7, %v18542_v15  ;;  %v2351_v7 = vrot.slane %v10714_v34, 5  ;;  %v18559_v34 = vld [vmem:[#allocation50_spill] sm:$0xff] }
 0x506   : > { %v5163_v51 = vsel %vm5119_vm15, %v5034_v10, %v4067_v48  ;;  %4138 = vrot.lane.b32.xlu1 %v14251_v13, %s10861_s29  ;;  %v4584_v24 = vsel %vm4474_vm10, %v4455_v57, %v18543_v2 }
 0x507   : > { %10051 = vmatmul.msk.bf16.gmra.mxu1 %vm5263_vm0, %v5163_v51  ;;  %v4713_v50 = vsel %vm4603_vm11, %v4584_v24, %v18545_v38  ;;  %v3929_v48 = vpop.permute.xlu2 %3928  ;;  %v14313_v38 = vld [vmem:[%s10965_s10 + $0x258] sm:$0xf] }
 0x508   : > { %v3961_v26 = vpop.permute.xlu1 %3960  ;;  %v4842_v1 = vsel %vm4732_vm12, %v4713_v50, %v3713_v29  ;;  %v4552_v29 = vsel %vm4474_vm10, %v4423_v43, %v18550_v52  ;;  %v18553_v50 = vld [vmem:[#allocation72_spill] sm:$0xff] }
 0x509   : > { %v4681_v10 = vsel %vm4603_vm11, %v4552_v29, %v18551_v54 }
 0x50a   : > { %v4810_v15 = vsel %vm4732_vm12, %v4681_v10, %v13570_v42  ;;  %v2353_v42 = vrot.slane %v2351_v7, 4 }
 0x50b   : > { %4106 = vrot.lane.b32.xlu0 %v18544_v45, %s10861_s29  ;;  %v2350_v45 = vrot.slane %v2348_v58, 4 }
 0x50d   : > { %v3853_v8 = vpop.permute.xlu0 %3852  ;;  %3934 = vrot.lane.b32.xlu2 %v18546_v31, %s10862_s4 }
 0x50e   : > { %v4971_v17 = vsel %vm4861_vm14, %v4842_v1, %v3853_v8  ;;  %3902 = vrot.lane.b32.xlu1 %v18548_v28, %s10862_s4  ;;  %v2352_v8 = vsel %vm11835_vm5, %v2350_v45, %v2351_v7  ;;  %v18557_v28 = vld [vmem:[#allocation88_spill] sm:$0xff] }
 0x50f   : > { %v5100_v30 = vsel %vm4990_vm13, %v4971_v17, %v3993_v62  ;;  %v4939_v62 = vsel %vm4861_vm14, %v4810_v15, %v14192_v19  ;;  %v18552_v19 = vld [vmem:[#allocation141_spill] sm:$0xff]  ;;  %v18555_v17 = vld [vmem:[#allocation267_spill] sm:$0xff]  ;;  %v3715_v43 = vpop.permute.xlu2 %3714  ;;  %v10718_v15 = vld [vmem:[%s10965_s10 + $0x250] sm:$0xff] }
 0x510   : > { %v4133_v11 = vpop.permute.xlu1 %4132  ;;  %v5068_v57 = vsel %vm4990_vm13, %v4939_v62, %v3961_v26  ;;  %v14320_v26 = vld [vmem:[%s10965_s10 + $0xc4] sm:$0xff]  ;;  %v18560_v62 = vld [vmem:[#allocation174_spill] sm:$0xff] }
 0x511   : > { %v5229_v51 = vsel %vm5119_vm15, %v5100_v30, %v4133_v11  ;;  %v18558_v11 = vld [vmem:[#allocation49_spill] sm:$0xff]  ;;  %v3596_v30 = vunpack.c.l.b16 %v2352_v8 }
 0x512   : > { %10084 = vmatmul.msk.bf16.gmra.mxu3 %vm5263_vm0, %v5229_v51  ;;  %v10717_v51 = vld [vmem:[%s10965_s10 + $0x34] sm:$0xff] }
 0x513   : > { %3794 = vrot.lane.b32.xlu0 %v13724_v49, %s10860_s28  ;;  %v2354_v49 = vrot.slane %v14313_v38, 5  ;;  %v4173_v7 = vsel %vm4152_vm8, %v10717_v51, %v18559_v34 }
 0x515   : > { %v4101_v2 = vpop.permute.xlu0 %4100  ;;  %3720 = vrot.lane.b32.xlu2 %v18468_v9, %s10859_s27  ;;  %v4221_v9 = vsel %vm4152_vm8, %v14320_v26, %v18553_v50  ;;  %v2355_v31 = vsel %vm11835_vm5, %v2353_v42, %v2354_v49 }
 0x516   : > { %v5197_v24 = vsel %vm5119_vm15, %v5068_v57, %v4101_v2  ;;  %4074 = vrot.lane.b32.xlu1 %v18552_v19, %s10861_s29  ;;  %v4391_v58 = vsel %vm4345_vm9, %v4221_v9, %v18554_v47  ;;  %v3597_v54 = vunpack.c.l.b16 %v2355_v31  ;;  %v4359_v57 = vsel %vm4345_vm9, %v4173_v7, %v18560_v62  ;;  %v18561_v2 = vld [vmem:[#allocation236_spill] sm:$0xff]  ;;  %v18562_v19 = vld [vmem:[#allocation311_spill] sm:$0xff]  ;;  %v18570_v7 = vld [vmem:[#allocation14_spill] sm:$0xff] }
 0x517   : > { %10068 = vmatmul.msk.bf16.gmra.mxu2 %vm5263_vm0, %v5197_v24  ;;  %v4520_v14 = vsel %vm4474_vm10, %v4391_v58, %v18555_v17  ;;  %v18563_v47 = vld [vmem:[#allocation344_spill] sm:$0xff]  ;;  %v3963_v17 = vpop.permute.xlu2 %3962  ;;  %v14395_v62 = vld [vmem:[%s10965_s10 + $0x1ec] sm:$0xff] }
 0x518   : > { %v3897_v1 = vpop.permute.xlu1 %3896  ;;  %v4649_v46 = vsel %vm4603_vm11, %v4520_v14, %v18557_v28  ;;  %v14354_v42 = vpack.c.b16 %v3597_v54, %v3596_v30  ;;  %v18565_v28 = vld [vmem:[#allocation112_spill] sm:$0xff]  ;;  %v18568_v30 = vld [vmem:[#allocation315_spill] sm:$0xff] }
 0x519   : > { %v4778_v52 = vsel %vm4732_vm12, %v4649_v46, %v13450_v25  ;;  %v4488_v25 = vsel %vm4474_vm10, %v4359_v57, %v18561_v2  ;;  %v18566_v46 = vld [vmem:[#allocation216_spill] sm:$0xff]  ;;  %v18571_v57 = vld [vmem:[#allocation142_spill] sm:$0xff] }
 0x51a   : > { %v4617_v50 = vsel %vm4603_vm11, %v4488_v25, %v18562_v19  ;;  %v18569_v54 = vld [vmem:[#allocation332_spill] sm:$0xff]  ;;  %v4320_v2 = vsel %vm4152_vm8, %v14395_v62, %v18571_v57  ;;  %v10722_v57 = vld [vmem:[%s10965_s10 + $0x258] sm:$0xff] }
 0x51b   : > { %4042 = vrot.lane.b32.xlu0 %v18556_v5, %s10861_s29  ;;  %v4746_v58 = vsel %vm4732_vm12, %v4617_v50, %v18563_v47  ;;  %v18564_v5 = vld [vmem:[#allocation178_spill] sm:$0xff]  ;;  %v18573_v50 = vld [vmem:[#allocation300_spill] sm:$0xff] }
 0x51c   : > { %v4875_v8 = vsel %vm4861_vm14, %v4746_v58, %v14262_v16 }
 0x51d   : > { %v3789_v29 = vpop.permute.xlu0 %3788  ;;  %3968 = vrot.lane.b32.xlu2 %v18558_v11, %s10862_s4 }
 0x51e   : > { %v4907_v10 = vsel %vm4861_vm14, %v4778_v52, %v3789_v29  ;;  %3860 = vrot.lane.b32.xlu1 %v10718_v15, %s10860_s28  ;;  %v18567_v29 = vld [vmem:[#allocation271_spill] sm:$0xff] }
 0x51f   : > { %v5036_v45 = vsel %vm4990_vm13, %v4907_v10, %v3929_v48  ;;  %v5004_v48 = vsel %vm4990_vm13, %v4875_v8, %v3897_v1  ;;  %v4135_v25 = vpop.permute.xlu2 %4134 }
 0x520   : > { %v4069_v24 = vpop.permute.xlu1 %4068 }
 0x521   : > { %v5165_v9 = vsel %vm5119_vm15, %v5036_v45, %v4069_v24  ;;  %v18572_v24 = vld [vmem:[#allocation221_spill] sm:$0xff] }
 0x522   : > { %10052 = vmatmul.msk.bf16.gmra.mxu1 %vm5263_vm0, %v5165_v9  ;;  %v4457_v45 = vsel %vm4345_vm9, %v4320_v2, %v18572_v24  ;;  %v18583_v24 = vld [vmem:[#allocation59_spill] sm:$0xff] }
 0x523   : > { %3828 = vrot.lane.b32.xlu0 %v13849_v36, %s10860_s28  ;;  %v14374_v36 = vld [vmem:[%s10965_s10 + $0x15c] sm:$0xff]  ;;  %v4586_v9 = vsel %vm4474_vm10, %v4457_v45, %v18573_v50 }
 0x524   : > { %v4272_v16 = vsel %vm4152_vm8, %v14374_v36, %v18565_v28  ;;  %v18576_v28 = vld [vmem:[#allocation114_spill] sm:$0xff]  ;;  %v18584_v50 = vld [vmem:[#allocation203_spill] sm:$0xff] }
 0x525   : > { %v4037_v31 = vpop.permute.xlu0 %4036  ;;  %4140 = vrot.lane.b32.xlu2 %v14354_v42, %s10861_s29  ;;  %v4425_v52 = vsel %vm4345_vm9, %v4272_v16, %v18566_v46  ;;  %v18577_v16 = vld [vmem:[#allocation47_spill] sm:$0xff]  ;;  %v18578_v46 = vld [vmem:[#allocation156_spill] sm:$0xff] }
 0x526   : > { %v5133_v14 = vsel %vm5119_vm15, %v5004_v48, %v4037_v31  ;;  %4108 = vrot.lane.b32.xlu1 %v18564_v5, %s10861_s29  ;;  %v4554_v11 = vsel %vm4474_vm10, %v4425_v52, %v18567_v29 }
 0x527   : > { %10036 = vmatmul.msk.bf16.gmra.mxu0 %vm5263_vm0, %v5133_v14  ;;  %v4683_v10 = vsel %vm4603_vm11, %v4554_v11, %v18569_v54  ;;  %v3899_v29 = vpop.permute.xlu2 %3898  ;;  %v18579_v11 = vld [vmem:[#allocation251_spill] sm:$0xff]  ;;  %v18580_v54 = vld [vmem:[#allocation24_spill] sm:$0xff] }
 0x528   : > { %v3855_v1 = vpop.permute.xlu1 %3854  ;;  %v4812_v51 = vsel %vm4732_vm12, %v4683_v10, %v13560_v61  ;;  %v18581_v10 = vld [vmem:[#allocation310_spill] sm:$0xff] }
 0x52b   : > { %4000 = vrot.lane.b32.xlu0 %v18568_v30, %s10862_s4 }
 0x52d   : > { %v3823_v34 = vpop.permute.xlu0 %3822  ;;  %3904 = vrot.lane.b32.xlu2 %v18570_v7, %s10862_s4 }
 0x52e   : > { %v4941_v15 = vsel %vm4861_vm14, %v4812_v51, %v3823_v34  ;;  %3796 = vrot.lane.b32.xlu1 %v13829_v4, %s10860_s28  ;;  %v18574_v4 = vld [vmem:[#allocation338_spill] sm:$0xff] }
 0x52f   : > { %v5070_v19 = vsel %vm4990_vm13, %v4941_v15, %v3963_v17  ;;  %v4715_v58 = vsel %vm4603_vm11, %v4586_v9, %v18574_v4  ;;  %v18575_v17 = vld [vmem:[#allocation140_spill] sm:$0xff]  ;;  %v18582_v34 = vld [vmem:[#allocation166_spill] sm:$0xff] }
 0x530   : > { %v4103_v61 = vpop.permute.xlu1 %4102  ;;  %v4844_v8 = vsel %vm4732_vm12, %v4715_v58, %v3715_v43  ;;  %v18585_v58 = vld [vmem:[#allocation266_spill] sm:$0xff] }
 0x531   : > { %v5199_v47 = vsel %vm5119_vm15, %v5070_v19, %v4103_v61  ;;  %v4973_v48 = vsel %vm4861_vm14, %v4844_v8, %v3855_v1  ;;  %v10724_v61 = vld [vmem:[%s10965_s10 + $0x25c] sm:$0xf] }
 0x532   : > { %10069 = vmatmul.msk.bf16.gmra.mxu2 %vm5263_vm0, %v5199_v47  ;;  %v2357_v19 = vrot.slane %v10724_v61, 5 }
 0x533   : > { %3764 = vrot.lane.b32.xlu0 %v13900_v37, %s10860_s28  ;;  %v10721_v37 = vld [vmem:[%s10965_s10 + $0x3c] sm:$0xff] }
 0x534   : > { %v4176_v43 = vsel %vm4152_vm8, %v10721_v37, %v18577_v16  ;;  %v10725_v37 = vld [vmem:[%s10965_s10 + $0x260] sm:$0x1] }
 0x535   : > { %v3995_v31 = vpop.permute.xlu0 %3994  ;;  %4076 = vrot.lane.b32.xlu2 %v18575_v17, %s10861_s29  ;;  %v4361_v52 = vsel %vm4345_vm9, %v4176_v43, %v18578_v46  ;;  %v2360_v16 = vrot.slane %v10725_v37, 5  ;;  %v18599_v37 = vld [vmem:[#allocation299_spill] sm:$0xff] }
 0x536   : > { %v5102_v14 = vsel %vm4990_vm13, %v4973_v48, %v3995_v31  ;;  %4044 = vrot.lane.b32.xlu1 %v18576_v28, %s10861_s29  ;;  %v4490_v30 = vsel %vm4474_vm10, %v4361_v52, %v18579_v11  ;;  %v18586_v48 = vld [vmem:[#allocation71_spill] sm:$0xff]  ;;  %v2359_v28 = vrot.slane %v2357_v19, 4 }
 0x537   : > { %v5231_v5 = vsel %vm5119_vm15, %v5102_v14, %v4135_v25  ;;  %v4619_v51 = vsel %vm4603_vm11, %v4490_v30, %v18581_v10  ;;  %v14439_v25 = vld [vmem:[%s10965_s10 + $0xcc] sm:$0xff]  ;;  %v4071_v14 = vpop.permute.xlu2 %4070 }
 0x538   : > { %10085 = vmatmul.msk.bf16.gmra.mxu3 %vm5263_vm0, %v5231_v5  ;;  %v3791_v1 = vpop.permute.xlu1 %3790  ;;  %v4748_v7 = vsel %vm4732_vm12, %v4619_v51, %v18582_v34  ;;  %v4224_v45 = vsel %vm4152_vm8, %v14439_v25, %v18583_v24  ;;  %v2356_v5 = vrot.slane %v2354_v49, 4  ;;  %v2361_v49 = vsel %vm11835_vm5, %v2359_v28, %v2360_v16  ;;  %v10726_v10 = vld [vmem:[%s10965_s10 + $0x168] sm:$0xff]  ;;  %v18589_v51 = vld [vmem:[#allocation107_spill] sm:$0xff]  ;;  %v18600_v16 = vld [vmem:[#allocation58_spill] sm:$0xff] }
 0x539   : > { %v4393_v9 = vsel %vm4345_vm9, %v4224_v45, %v18584_v50  ;;  %v4275_v34 = vsel %vm4152_vm8, %v10726_v10, %v18589_v51  ;;  %v10728_v10 = vld [vmem:[%s10965_s10 + $0x48] sm:$0xff]  ;;  %v18602_v51 = vld [vmem:[#allocation34_spill] sm:$0xff] }
 0x53a   : > { %v4522_v8 = vsel %vm4474_vm10, %v4393_v9, %v18585_v58  ;;  %v2358_v38 = vsel %vm11835_vm5, %v2356_v5, %v2357_v19  ;;  %v18593_v19 = vld [vmem:[#allocation113_spill] sm:$0xff]  ;;  %v18598_v5 = vld [vmem:[#allocation235_spill] sm:$0xff] }
 0x53b   : > { %3936 = vrot.lane.b32.xlu0 %v18580_v54, %s10862_s4  ;;  %v4651_v31 = vsel %vm4603_vm11, %v4522_v8, %v18586_v48  ;;  %v18595_v8 = vld [vmem:[#allocation13_spill] sm:$0xff]  ;;  %v10727_v48 = vld [vmem:[%s10965_s10 + $0x1f8] sm:$0xff] }
 0x53c   : > { %v4780_v17 = vsel %vm4732_vm12, %v4651_v31, %v13504_v60  ;;  %v18587_v60 = vld [vmem:[#allocation95_spill] sm:$0xff] }
 0x53d   : > { %v3759_v15 = vpop.permute.xlu0 %3758  ;;  %3862 = vrot.lane.b32.xlu2 %v10722_v57, %s10860_s28  ;;  %v4909_v43 = vsel %vm4861_vm14, %v4780_v17, %v3791_v1  ;;  %v18588_v1 = vld [vmem:[#allocation61_spill] sm:$0xff]  ;;  %v18597_v31 = vld [vmem:[#allocation123_spill] sm:$0xff] }
 0x53e   : > { %v4877_v2 = vsel %vm4861_vm14, %v4748_v7, %v3759_v15  ;;  %3830 = vrot.lane.b32.xlu1 %v13934_v40, %s10860_s28  ;;  %v18590_v7 = vld [vmem:[#allocation207_spill] sm:$0xff]  ;;  %v18591_v57 = vld [vmem:[#allocation285_spill] sm:$0xff]  ;;  %v4323_v17 = vsel %vm4152_vm8, %v10727_v48, %v18597_v31  ;;  %v18607_v48 = vld [vmem:[#allocation82_spill] sm:$0xff] }
 0x53f   : > { %v5006_v4 = vsel %vm4990_vm13, %v4877_v2, %v3899_v29  ;;  %v3598_v29 = vunpack.c.l.b16 %v2358_v38  ;;  %v3857_v30 = vpop.permute.xlu2 %3856  ;;  %v4427_v15 = vsel %vm4345_vm9, %v4275_v34, %v18590_v7  ;;  %v4459_v28 = vsel %vm4345_vm9, %v4323_v17, %v18598_v5  ;;  %v18603_v34 = vld [vmem:[#allocation183_spill] sm:$0xff]  ;;  %v18608_v5 = vld [vmem:[#allocation202_spill] sm:$0xff] }
 0x540   : > { %v4039_v47 = vpop.permute.xlu1 %4038  ;;  %v4556_v2 = vsel %vm4474_vm10, %v4427_v15, %v18591_v57 }
 0x541   : > { %v5135_v40 = vsel %vm5119_vm15, %v5006_v4, %v4039_v47  ;;  %v18594_v47 = vld [vmem:[#allocation23_spill] sm:$0xff] }
 0x542   : > { %10037 = vmatmul.msk.bf16.gmra.mxu0 %vm5263_vm0, %v5135_v40 }
 0x543   : > { %3722 = vrot.lane.b32.xlu0 %v18491_v0, %s10859_s27 }
 0x545   : > { %v3931_v46 = vpop.permute.xlu0 %3930  ;;  %4110 = vrot.lane.b32.xlu2 %v18391_v59, %s10861_s29  ;;  %v3599_v59 = vunpack.c.l.b16 %v2361_v49 }
 0x546   : > { %v5038_v0 = vsel %vm4990_vm13, %v4909_v43, %v3931_v46  ;;  %4002 = vrot.lane.b32.xlu1 %v18587_v60, %s10862_s4 }
 0x547   : > { %v5167_v52 = vsel %vm5119_vm15, %v5038_v0, %v4071_v14  ;;  %v14479_v54 = vpack.c.b16 %v3599_v59, %v3598_v29  ;;  %v4105_v4 = vpop.permute.xlu2 %4104  ;;  %v10425_v0 = vld [vmem:[%s10965_s10 + $0x264] sm:$0xff] }
 0x548   : > { %10053 = vmatmul.msk.bf16.gmra.mxu1 %vm5263_vm0, %v5167_v52  ;;  %v3825_v24 = vpop.permute.xlu1 %3824  ;;  %v341_v59 = vld [vmem:[%s10965_s10 + $0x264] sm:$0xf] }
 0x549   : > { %v2363_v15 = vshrl.u32 %v341_v59, 16  ;;  %v2366_v57 = vshll.u32 %v341_v59, 16 }
 0x54b   : > { %3970 = vrot.lane.b32.xlu0 %v18588_v1, %s10862_s4 }
 0x54d   : > { %v3717_v11 = vpop.permute.xlu0 %3716  ;;  %3798 = vrot.lane.b32.xlu2 %v13952_v3, %s10860_s28  ;;  %v18592_v3 = vld [vmem:[#allocation331_spill] sm:$0xff] }
 0x54e   : > { %3766 = vrot.lane.b32.xlu1 %v13987_v56, %s10860_s28  ;;  %v4685_v56 = vsel %vm4603_vm11, %v4556_v2, %v18592_v3  ;;  %v18606_v3 = vld [vmem:[#allocation301_spill] sm:$0xff] }
 0x54f   : > { %v4814_v45 = vsel %vm4732_vm12, %v4685_v56, %v13522_v32  ;;  %v18596_v32 = vld [vmem:[#allocation149_spill] sm:$0xff]  ;;  %v3793_v14 = vpop.permute.xlu2 %3792 }
 0x550   : > { %v4943_v50 = vsel %vm4861_vm14, %v4814_v45, %v3825_v24  ;;  %v3997_v40 = vpop.permute.xlu1 %3996  ;;  %v18605_v24 = vld [vmem:[#allocation175_spill] sm:$0xff] }
 0x553   : > { %4142 = vrot.lane.b32.xlu0 %v14479_v54, %s10861_s29 }
 0x555   : > { %v3965_v61 = vpop.permute.xlu0 %3964  ;;  %4046 = vrot.lane.b32.xlu2 %v18593_v19, %s10861_s29 }
 0x556   : > { %v5072_v9 = vsel %vm4990_vm13, %v4943_v50, %v3965_v61  ;;  %3938 = vrot.lane.b32.xlu1 %v18594_v47, %s10862_s4  ;;  %v2365_v50 = vrot.slane %v2363_v15, 4 }
 0x557   : > { %v5201_v58 = vsel %vm5119_vm15, %v5072_v9, %v4105_v4  ;;  %v4041_v29 = vpop.permute.xlu2 %4040  ;;  %v2368_v9 = vrot.slane %v2366_v57, 5 }
 0x558   : > { %10070 = vmatmul.msk.bf16.gmra.mxu2 %vm5263_vm0, %v5201_v58  ;;  %v3761_v49 = vpop.permute.xlu1 %3760 }
 0x55b   : > { %3906 = vrot.lane.b32.xlu0 %v18595_v8, %s10862_s4  ;;  %v342_v8 = vld [vmem:[%s10965_s10 + $0x268] sm:$0xf] }
 0x55c   : > { %v2372_v17 = vshll.u32 %v342_v8, 16 }
 0x55d   : > { %3832 = vrot.lane.b32.xlu2 %v14059_v44, %s10860_s28  ;;  %v4588_v44 = vsel %vm4474_vm10, %v4459_v28, %v18599_v37  ;;  %v4137_v52 = vpop.permute.xlu0 %4136  ;;  %v18609_v37 = vld [vmem:[#allocation256_spill] sm:$0xff] }
 0x55e   : > { %3724 = vrot.lane.b32.xlu1 %v14151_v41, %s10859_s27  ;;  %v18601_v41 = vld [vmem:[#allocation129_spill] sm:$0xff] }
 0x55f   : > { %v4717_v43 = vsel %vm4603_vm11, %v4588_v44, %v18601_v41  ;;  %v14544_v58 = vpop.permute.xlu2 %3826 }
 0x560   : > { %v4846_v46 = vsel %vm4732_vm12, %v4717_v43, %v3717_v11  ;;  %v4179_v11 = vsel %vm4152_vm8, %v10728_v10, %v18602_v51  ;;  %v3933_v4 = vpop.permute.xlu1 %3932  ;;  %v2374_v43 = vrot.slane %v2372_v17, 5  ;;  %v10731_v17 = vld [vmem:[%s10965_s10 + $0x200] sm:$0xff]  ;;  %v18716_v10 = vld [vmem:[#allocation243_spill] sm:$0xff] }
 0x561   : > { %v4975_v60 = vsel %vm4861_vm14, %v4846_v46, %v3857_v30  ;;  %v4363_v7 = vsel %vm4345_vm9, %v4179_v11, %v18603_v34  ;;  %v18604_v30 = vld [vmem:[#allocation250_spill] sm:$0xff]  ;;  %v2376_v46 = vshrl.u32 %v342_v8, 16 }
 0x562   : > { %v5104_v38 = vsel %vm4990_vm13, %v4975_v60, %v3997_v40  ;;  %v4492_v2 = vsel %vm4474_vm10, %v4363_v7, %v18604_v30  ;;  %v2369_v40 = vor.u32 %v2368_v9, %v2365_v50  ;;  %v9733_v30 = vrot.slane %v341_v59, 9 }
 0x563   : > { %4078 = vrot.lane.b32.xlu0 %v18596_v32, %s10861_s29  ;;  %v5233_v1 = vsel %vm5119_vm15, %v5104_v38, %v4137_v52  ;;  %v4621_v56 = vsel %vm4603_vm11, %v4492_v2, %v18606_v3  ;;  %v2378_v60 = vrot.slane %v2376_v46, 4  ;;  %v18617_v46 = vld [vmem:[#allocation284_spill] sm:$0xff] }
 0x564   : > { %10086 = vmatmul.msk.bf16.gmra.mxu3 %vm5263_vm0, %v5233_v1  ;;  %v4750_v61 = vsel %vm4732_vm12, %v4621_v56, %v13444_v35  ;;  %v10729_v35 = vld [vmem:[%s10965_s10 + $0xd8] sm:$0xff]  ;;  %v2370_v41 = vrot.slane %v2369_v40, 4 }
 0x565   : > { %v3901_v45 = vpop.permute.xlu0 %3900  ;;  %v4879_v19 = vsel %vm4861_vm14, %v4750_v61, %v3761_v49  ;;  %v4227_v31 = vsel %vm4152_vm8, %v10729_v35, %v18607_v48  ;;  %v2379_v11 = vor.u32 %v2378_v60, %v2374_v43  ;;  %v10730_v35 = vld [vmem:[%s10965_s10 + $0x170] sm:$0xff] }
 0x566   : > { %3972 = vrot.lane.b32.xlu1 %v18600_v16, %s10862_s4  ;;  %v5008_v47 = vsel %vm4990_vm13, %v4879_v19, %v3901_v45  ;;  %v4395_v28 = vsel %vm4345_vm9, %v4227_v31, %v18608_v5  ;;  %v14559_v16 = vld [vmem:[%s10965_s10 + $0x26c] sm:$0xf]  ;;  %v2375_v51 = vsel %vm10976_vm2, %v2370_v41, %v2374_v43  ;;  %v18613_v48 = vld [vmem:[#allocation90_spill] sm:$0xff]  ;;  %v18614_v5 = vld [vmem:[#allocation152_spill] sm:$0xff] }
 0x567   : > { %v5137_v32 = vsel %vm5119_vm15, %v5008_v47, %v4041_v29  ;;  %v4524_v44 = vsel %vm4474_vm10, %v4395_v28, %v18609_v37  ;;  %v2382_v1 = vshll.u32 %v14559_v16, 16  ;;  %v3999_v7 = vpop.permute.xlu2 %3998  ;;  %v2380_v2 = vrot.slane %v2379_v11, 4  ;;  %v18615_v37 = vld [vmem:[#allocation220_spill] sm:$0xff]  ;;  %v18616_v41 = vld [vmem:[#allocation234_spill] sm:$0xff] }
 0x568   : > { %10038 = vmatmul.msk.bf16.gmra.mxu0 %vm5263_vm0, %v5137_v32  ;;  %v3719_v34 = vpop.permute.xlu1 %3718  ;;  %v3872_v3 = vunpack.c.l.b16 %v2375_v51  ;;  %v4278_v31 = vsel %vm4152_vm8, %v10730_v35, %v18613_v48  ;;  %v4326_v28 = vsel %vm4152_vm8, %v10731_v17, %v18614_v5  ;;  %v18627_v35 = vld [vmem:[#allocation188_spill] sm:$0xff] }
 0x569   : > { %v14570_v15 = vrot.slane %v2382_v1, 5  ;;  %v4461_v43 = vsel %vm4345_vm9, %v4326_v28, %v18616_v41  ;;  %v18630_v28 = vld [vmem:[#allocation312_spill] sm:$0xff] }
 0x56a   : > { %v18631_v41 = vld [vmem:[#allocation92_spill] sm:$0xff] }
 0x56b   : > { %3864 = vrot.lane.b32.xlu0 %v10425_v0, %s10860_s28  ;;  %v18610_v0 = vld [vmem:[#allocation93_spill] sm:$0xff]  ;;  %v2385_v56 = vsel %vm10976_vm2, %v2380_v2, %v14570_v15 }
 0x56c   : > { %v4653_v52 = vsel %vm4603_vm11, %v4524_v44, %v18610_v0  ;;  %v3873_v61 = vunpack.c.l.b16 %v2385_v56  ;;  %v4429_v44 = vsel %vm4345_vm9, %v4278_v31, %v18615_v37  ;;  %v18618_v0 = vld [vmem:[#allocation289_spill] sm:$0xff]  ;;  %v18628_v31 = vld [vmem:[#allocation239_spill] sm:$0xff] }
 0x56d   : > { %v4073_v38 = vpop.permute.xlu0 %4072 }
 0x56e   : > { %v3880_v9 = vpack.c.b16 %v3873_v61, %v3872_v3  ;;  %v18623_v3 = vld [vmem:[#allocation147_spill] sm:$0xff] }
 0x56f   : > { %v3763_v40 = vpop.permute.xlu2 %3762 }
 0x570   : > { %4004 = vrot.lane.b32.xlu2 %v3880_v9, %s10862_s4  ;;  %v3967_v32 = vpop.permute.xlu1 %3966  ;;  %v10733_v9 = vld [vmem:[%s10965_s10 + $0xe0] sm:$0xff] }
 0x573   : > { %4112 = vrot.lane.b32.xlu0 %v18605_v24, %s10861_s29  ;;  %v2460_v24 = vrot.slane %v14559_v16, 5 }
 0x578   : > { %3768 = vrot.lane.b32.xlu2 %v14108_v63, %s10860_s28  ;;  %v4139_v2 = vpop.permute.xlu1 %4138  ;;  %v3935_v63 = vpop.permute.xlu2 %3934 }
 0x57b   : > { %3800 = vrot.lane.b32.xlu0 %v14036_v33, %s10860_s28  ;;  %v4782_v33 = vsel %vm4732_vm12, %v4653_v52, %v13500_v6  ;;  %v18612_v6 = vld [vmem:[#allocation122_spill] sm:$0xff]  ;;  %v4590_v52 = vsel %vm4474_vm10, %v4461_v43, %v18618_v0 }
 0x57c   : > { %v4911_v49 = vsel %vm4861_vm14, %v4782_v33, %v3793_v14  ;;  %v2457_v14 = vrot.slane %v342_v8, 5  ;;  %v18619_v33 = vld [vmem:[#allocation323_spill] sm:$0xff] }
 0x57d   : > { %v5040_v29 = vsel %vm4990_vm13, %v4911_v49, %v3933_v4  ;;  %v3859_v4 = vpop.permute.xlu0 %3858 }
 0x57e   : > { %v5169_v57 = vsel %vm5119_vm15, %v5040_v29, %v4073_v38  ;;  %v2458_v45 = vsel %vm11835_vm5, %v9733_v30, %v2457_v14  ;;  %v2459_v59 = vrot.slane %v2457_v14, 4  ;;  %v18620_v38 = vld [vmem:[#allocation340_spill] sm:$0xff] }
 0x57f   : > { %10054 = vmatmul.msk.bf16.gmra.mxu1 %vm5263_vm0, %v5169_v57  ;;  %v4012_v19 = vunpack.c.l.b16 %v2458_v45  ;;  %v4719_v49 = vsel %vm4603_vm11, %v4590_v52, %v18620_v38  ;;  %v18621_v30 = vld [vmem:[#allocation12_spill] sm:$0xff] }
 0x580   : > { %v2461_v50 = vsel %vm11835_vm5, %v2459_v59, %v2460_v24  ;;  %v4848_v29 = vsel %vm4732_vm12, %v4719_v49, %v3719_v34  ;;  %v14628_v45 = vpop.permute.xlu2 %3720  ;;  %v10426_v59 = vld [vmem:[%s10965_s10 + $0x26c] sm:$0xff]  ;;  %v3903_v61 = vpop.permute.xlu1 %3902 }
 0x581   : > { %v4013_v47 = vunpack.c.l.b16 %v2461_v50  ;;  %v4977_v57 = vsel %vm4861_vm14, %v4848_v29, %v3859_v4 }
 0x582   : > { %v5106_v34 = vsel %vm4990_vm13, %v4977_v57, %v3999_v7  ;;  %v10732_v7 = vld [vmem:[%s10965_s10 + $0x50] sm:$0xff] }
 0x583   : > { %4048 = vrot.lane.b32.xlu0 %v18612_v6, %s10861_s29  ;;  %v4020_v8 = vpack.c.b16 %v4013_v47, %v4012_v19  ;;  %v5235_v14 = vsel %vm5119_vm15, %v5106_v34, %v4139_v2  ;;  %v18624_v19 = vld [vmem:[#allocation55_spill] sm:$0xff]  ;;  %v18625_v47 = vld [vmem:[#allocation77_spill] sm:$0xff] }
 0x584   : > { %10087 = vmatmul.msk.bf16.gmra.mxu3 %vm5263_vm0, %v5235_v14  ;;  %v4182_v50 = vsel %vm4152_vm8, %v10732_v7, %v18624_v19  ;;  %v4230_v4 = vsel %vm4152_vm8, %v10733_v9, %v18625_v47 }
 0x585   : > { %4144 = vrot.lane.b32.xlu1 %v4020_v8, %s10861_s29  ;;  %v4107_v51 = vpop.permute.xlu0 %4106  ;;  %v18626_v8 = vld [vmem:[#allocation180_spill] sm:$0xff]  ;;  %v4397_v48 = vsel %vm4345_vm9, %v4230_v4, %v18627_v35 }
 0x58b   : > { %3834 = vrot.lane.b32.xlu0 %v14170_v18, %s10860_s28  ;;  %v4558_v18 = vsel %vm4474_vm10, %v4429_v44, %v18617_v46  ;;  %v18632_v46 = vld [vmem:[#allocation176_spill] sm:$0xff] }
 0x58c   : > { %v4687_v60 = vsel %vm4603_vm11, %v4558_v18, %v18619_v33  ;;  %v14657_v33 = vpop.permute.xlu2 %3968 }
 0x58d   : > { %v4816_v1 = vsel %vm4732_vm12, %v4687_v60, %v13585_v27  ;;  %3908 = vrot.lane.b32.xlu1 %v18621_v30, %s10862_s4  ;;  %v3795_v56 = vpop.permute.xlu0 %3794  ;;  %v18633_v60 = vld [vmem:[#allocation56_spill] sm:$0xff] }
 0x58e   : > { %v4945_v11 = vsel %vm4861_vm14, %v4816_v1, %v14544_v58  ;;  %v18622_v58 = vld [vmem:[#allocation29_spill] sm:$0xff]  ;;  %v4075_v1 = vpop.permute.xlu1 %4074 }
 0x58f   : > { %v5074_v6 = vsel %vm4990_vm13, %v4945_v11, %v3967_v32  ;;  %3940 = vrot.lane.b32.xlu2 %v18622_v58, %s10862_s4  ;;  %v4365_v32 = vsel %vm4345_vm9, %v4182_v50, %v18626_v8  ;;  %v2462_v11 = vrot.slane %v2460_v24, 4  ;;  %v2386_v24 = vshrl.u32 %v14559_v16, 16  ;;  %v10734_v8 = vld [vmem:[%s10965_s10 + $0x178] sm:$0xff] }
 0x590   : > { %v5203_v27 = vsel %vm5119_vm15, %v5074_v6, %v4107_v51  ;;  %v4494_v17 = vsel %vm4474_vm10, %v4365_v32, %v18628_v31  ;;  %v18634_v51 = vld [vmem:[#allocation184_spill] sm:$0xff]  ;;  %v14674_v6 = vld [vmem:[%s10965_s10 + $0x274] sm:$0xf]  ;;  %v18635_v32 = vld [vmem:[#allocation119_spill] sm:$0xff] }
 0x591   : > { %10071 = vmatmul.msk.bf16.gmra.mxu2 %vm5263_vm0, %v5203_v27  ;;  %v4623_v37 = vsel %vm4603_vm11, %v4494_v17, %v18630_v28  ;;  %v2466_v14 = vrot.slane %v14674_v6, 5  ;;  %v2388_v50 = vrot.slane %v2386_v24, 4  ;;  %v4281_v35 = vsel %vm4152_vm8, %v10734_v8, %v18635_v32  ;;  %v18647_v8 = vld [vmem:[#allocation182_spill] sm:$0xff] }
 0x592   : > { %v4752_v18 = vsel %vm4732_vm12, %v4623_v37, %v18632_v46  ;;  %v18638_v37 = vld [vmem:[#allocation224_spill] sm:$0xff] }
 0x593   : > { %v4881_v52 = vsel %vm4861_vm14, %v4752_v18, %v3763_v40  ;;  %v344_v40 = vld [vmem:[%s10965_s10 + $0x270] sm:$0xf]  ;;  %v2389_v16 = vor.u32 %v2388_v50, %v14570_v15  ;;  %v18640_v46 = vld [vmem:[#allocation32_spill] sm:$0xff]  ;;  %v14739_v50 = vpop.f32.mrf.mxu2 }
 0x594   : > { %v5010_v38 = vsel %vm4990_vm13, %v4881_v52, %v3903_v61  ;;  %v2463_v30 = vrot.slane %v344_v40, 5  ;;  %v2402_v61 = vshll.u32 %v14674_v6, 16  ;;  %v18641_v52 = vld [vmem:[#allocation125_spill] sm:$0xff] }
 0x595   : > { %4080 = vrot.lane.b32.xlu1 %v18623_v3, %s10861_s29  ;;  %v4043_v44 = vpop.permute.xlu0 %4042  ;;  %v2392_v3 = vshll.u32 %v344_v40, 16  ;;  %v2390_v15 = vrot.slane %v2389_v16, 4 }
 0x596   : > { %v5139_v29 = vsel %vm5119_vm15, %v5010_v38, %v4043_v44  ;;  %v2464_v2 = vsel %vm11835_vm5, %v2462_v11, %v2463_v30  ;;  %v2465_v34 = vrot.slane %v2463_v30, 4  ;;  %v3861_v7 = vpop.permute.xlu1 %3860  ;;  %v18642_v38 = vld [vmem:[#allocation151_spill] sm:$0xff] }
 0x597   : > { %3726 = vrot.lane.b32.xlu2 %v14251_v13, %s10859_s27  ;;  %v18629_v13 = vld [vmem:[#allocation270_spill] sm:$0xff]  ;;  %10039 = vmatmul.msk.bf16.gmra.mxu0 %vm5263_vm0, %v5139_v29  ;;  %v4014_v58 = vunpack.c.l.b16 %v2464_v2  ;;  %v2394_v9 = vrot.slane %v2392_v3, 5 }
 0x598   : > { %v4526_v5 = vsel %vm4474_vm10, %v4397_v48, %v18629_v13  ;;  %v18636_v48 = vld [vmem:[#allocation148_spill] sm:$0xff]  ;;  %v14694_v13 = vrot.slane %v2402_v61, 5 }
 0x599   : > { %v4655_v43 = vsel %vm4603_vm11, %v4526_v5, %v18631_v41  ;;  %v18637_v5 = vld [vmem:[#allocation219_spill] sm:$0xff]  ;;  %v18639_v41 = vld [vmem:[#allocation274_spill] sm:$0xff] }
 0x59a   : > { %v4784_v0 = vsel %vm4732_vm12, %v4655_v43, %v13462_v39  ;;  %v4431_v28 = vsel %vm4345_vm9, %v4281_v35, %v18637_v5 }
 0x59b   : > { %v4913_v49 = vsel %vm4861_vm14, %v4784_v0, %v3795_v56  ;;  %v2396_v56 = vshrl.u32 %v344_v40, 16  ;;  %v4560_v43 = vsel %vm4474_vm10, %v4431_v28, %v18639_v41  ;;  %v10737_v28 = vld [vmem:[%s10965_s10 + $0xe8] sm:$0xff]  ;;  %v18652_v41 = vld [vmem:[#allocation206_spill] sm:$0xff] }
 0x59c   : > { %v5042_v39 = vsel %vm4990_vm13, %v4913_v49, %v3935_v63  ;;  %v4141_v63 = vpop.permute.xlu2 %4140 }
 0x59d   : > { %3866 = vrot.lane.b32.xlu1 %v10426_v59, %s10860_s28  ;;  %v5171_v57 = vsel %vm5119_vm15, %v5042_v39, %v4075_v1  ;;  %v3829_v27 = vpop.permute.xlu0 %3828  ;;  %v2467_v59 = vsel %vm11835_vm5, %v2465_v34, %v2466_v14  ;;  %v2398_v47 = vrot.slane %v2396_v56, 4  ;;  %v2395_v1 = vsel %vm10976_vm2, %v2390_v15, %v2394_v9 }
 0x59e   : > { %10055 = vmatmul.msk.bf16.gmra.mxu1 %vm5263_vm0, %v5171_v57  ;;  %v4015_v19 = vunpack.c.l.b16 %v2467_v59  ;;  %v3874_v57 = vunpack.c.l.b16 %v2395_v1  ;;  %v4109_v24 = vpop.permute.xlu1 %4108 }
 0x59f   : > { %3974 = vrot.lane.b32.xlu2 %v18633_v60, %s10862_s4  ;;  %v2399_v17 = vor.u32 %v2398_v47, %v2394_v9  ;;  %v4689_v60 = vsel %vm4603_vm11, %v4560_v43, %v18641_v52  ;;  %v14741_v9 = vpop.f32.mrf.mxu3  ;;  %v18654_v52 = vld [vmem:[#allocation68_spill] sm:$0xff] }
 0x5a0   : > { %v4021_v4 = vpack.c.b16 %v4015_v19, %v4014_v58  ;;  %v4818_v39 = vsel %vm4732_vm12, %v4689_v60, %v13578_v12  ;;  %v18655_v60 = vld [vmem:[#allocation269_spill] sm:$0xff] }
 0x5a1   : > { %v2400_v0 = vrot.slane %v2399_v17, 4  ;;  %v4947_v58 = vsel %vm4861_vm14, %v4818_v39, %v3829_v27  ;;  %v18649_v17 = vld [vmem:[#allocation161_spill] sm:$0xff] }
 0x5a2   : > { %v5076_v12 = vsel %vm4990_vm13, %v4947_v58, %v14657_v33  ;;  %v18645_v33 = vld [vmem:[#allocation146_spill] sm:$0xff] }
 0x5a3   : > { %v2405_v11 = vsel %vm10976_vm2, %v2400_v0, %v14694_v13  ;;  %v5205_v59 = vsel %vm5119_vm15, %v5076_v12, %v4109_v24  ;;  %v14772_v0 = vpop.f32.mrf.mxu0 }
 0x5a4   : > { %v3905_v30 = vpop.permute.xlu2 %3904  ;;  %v3875_v2 = vunpack.c.l.b16 %v2405_v11  ;;  %10072 = vmatmul.msk.bf16.gmra.mxu2 %vm5263_vm0, %v5205_v59 }
 0x5a5   : > { %4114 = vrot.lane.b32.xlu1 %v18634_v51, %s10861_s29  ;;  %v4001_v29 = vpop.permute.xlu0 %4000  ;;  %v18643_v51 = vld [vmem:[#allocation120_spill] sm:$0xff] }
 0x5a6   : > { %v3881_v56 = vpack.c.b16 %v3875_v2, %v3874_v57  ;;  %v3797_v19 = vpop.permute.xlu1 %3796 }
 0x5a7   : > { %4146 = vrot.lane.b32.xlu2 %v4021_v4, %s10861_s29  ;;  %v14750_v4 = vpop.f32.mrf.mxu2  ;;  %v14754_v32 = vpop.f32.mrf.mxu3 }
 0x5a8   : > { %4006 = vrot.lane.b32.xlu0 %v3881_v56, %s10862_s4  ;;  %v14798_v56 = vld [vmem:[%s10965_s10 + $0x27c] sm:$0xf] }
 0x5ac   : > { %v4077_v27 = vpop.permute.xlu2 %4076 }
 0x5ad   : > { %3802 = vrot.lane.b32.xlu1 %v14154_v53, %s10860_s28  ;;  %v10735_v53 = vld [vmem:[%s10965_s10 + $0x208] sm:$0xff] }
 0x5ae   : > { %v4329_v31 = vsel %vm4152_vm8, %v10735_v53, %v18636_v48  ;;  %v10736_v53 = vld [vmem:[%s10965_s10 + $0x58] sm:$0xff]  ;;  %v18648_v48 = vld [vmem:[#allocation52_spill] sm:$0xff] }
 0x5af   : > { %v4463_v44 = vsel %vm4345_vm9, %v4329_v31, %v18638_v37  ;;  %v4185_v31 = vsel %vm4152_vm8, %v10736_v53, %v18648_v48 }
 0x5b0   : > { %v4592_v18 = vsel %vm4474_vm10, %v4463_v44, %v18640_v46  ;;  %3770 = vrot.lane.b32.xlu0 %v14232_v20, %s10860_s28  ;;  %v4045_v20 = vpop.permute.xlu1 %4044  ;;  %v4367_v5 = vsel %vm4345_vm9, %v4185_v31, %v18649_v17  ;;  %v18651_v44 = vld [vmem:[#allocation255_spill] sm:$0xff] }
 0x5b1   : > { %v4721_v49 = vsel %vm4603_vm11, %v4592_v18, %v18642_v38  ;;  %v4496_v15 = vsel %vm4474_vm10, %v4367_v5, %v18651_v44  ;;  %v18653_v46 = vld [vmem:[#allocation63_spill] sm:$0xff]  ;;  %v2468_v5 = vrot.slane %v2466_v14, 4  ;;  %v10738_v44 = vld [vmem:[%s10965_s10 + $0x180] sm:$0xff] }
 0x5b2   : > { %v4850_v40 = vsel %vm4732_vm12, %v4721_v49, %v14628_v45  ;;  %v18644_v45 = vld [vmem:[#allocation17_spill] sm:$0xff]  ;;  %v4625_v18 = vsel %vm4603_vm11, %v4496_v15, %v18653_v46  ;;  %v18659_v15 = vld [vmem:[#allocation115_spill] sm:$0xff]  ;;  %v18660_v46 = vld [vmem:[#allocation210_spill] sm:$0xff] }
 0x5b3   : > { %v4979_v34 = vsel %vm4861_vm14, %v4850_v40, %v3861_v7  ;;  %3910 = vrot.lane.b32.xlu2 %v18644_v45, %s10862_s4  ;;  %v10427_v7 = vld [vmem:[%s10965_s10 + $0x274] sm:$0xff]  ;;  %v18656_v49 = vld [vmem:[#allocation341_spill] sm:$0xff]  ;;  %v14786_v40 = vpop.f32.mrf.mxu3 }
 0x5b4   : > { %v5108_v3 = vsel %vm4990_vm13, %v4979_v34, %v4001_v29  ;;  %v14743_v47 = vpop.permute.xlu2 %3862  ;;  %v4754_v1 = vsel %vm4732_vm12, %v4625_v18, %v18656_v49  ;;  %v14780_v29 = vpop.f32.mrf.mxu2 }
 0x5b5   : > { %4050 = vrot.lane.b32.xlu1 %v18643_v51, %s10861_s29  ;;  %v5237_v61 = vsel %vm5119_vm15, %v5108_v3, %v4141_v63  ;;  %v3765_v63 = vpop.permute.xlu0 %3764  ;;  %v18657_v51 = vld [vmem:[#allocation314_spill] sm:$0xff]  ;;  %v346_v3 = vld [vmem:[%s10965_s10 + $0x278] sm:$0xf] }
 0x5b6   : > { %10088 = vmatmul.msk.bf16.gmra.mxu3 %vm5263_vm0, %v5237_v61  ;;  %v4883_v11 = vsel %vm4861_vm14, %v4754_v1, %v3765_v63  ;;  %v2406_v61 = vshrl.u32 %v14674_v6, 16 }
 0x5b7   : > { %v5012_v12 = vsel %vm4990_vm13, %v4883_v11, %v3905_v30  ;;  %v18658_v30 = vld [vmem:[#allocation118_spill] sm:$0xff] }
 0x5b8   : > { %v3831_v57 = vpop.permute.xlu1 %3830  ;;  %v5141_v45 = vsel %vm5119_vm15, %v5012_v12, %v4045_v20  ;;  %v14810_v20 = vpop.f32.mrf.mxu0 }
 0x5b9   : > { %10040 = vmatmul.msk.bf16.gmra.mxu0 %vm5263_vm0, %v5141_v45 }
 0x5bb   : > { %4082 = vrot.lane.b32.xlu2 %v18645_v33, %s10861_s29  ;;  %v2416_v33 = vshrl.u32 %v346_v3, 16  ;;  %v14819_v31 = vpop.f32.mrf.mxu3 }
 0x5bc   : > { %v14756_v35 = vpop.permute.xlu2 %4110 }
 0x5bd   : > { %3836 = vrot.lane.b32.xlu1 %v14265_v22, %s10860_s28  ;;  %v18646_v22 = vld [vmem:[#allocation28_spill] sm:$0xff]  ;;  %v3937_v16 = vpop.permute.xlu0 %3936 }
 0x5be   : > { %3942 = vrot.lane.b32.xlu0 %v18646_v22, %s10862_s4  ;;  %v2418_v22 = vrot.slane %v2416_v33, 4 }
 0x5c3   : > { %3868 = vrot.lane.b32.xlu2 %v10427_v7, %s10860_s28  ;;  %v2422_v7 = vshll.u32 %v14798_v56, 16 }
 0x5c4   : > { %v14794_v24 = vpop.permute.xlu2 %3798 }
 0x5c5   : > { %v14791_v34 = vpop.permute.xlu0 %3722  ;;  %v14817_v48 = vrot.slane %v2422_v7, 5 }
 0x5c6   : > { %3728 = vrot.lane.b32.xlu0 %v14354_v42, %s10859_s27  ;;  %v18650_v42 = vld [vmem:[#allocation64_spill] sm:$0xff] }
 0x5c7   : > { %v4233_v37 = vsel %vm4152_vm8, %v10737_v28, %v18650_v42  ;;  %v2469_v28 = vrot.slane %v346_v3, 5  ;;  %v17931_v42 = vrot.slane %v14798_v56, 5 }
 0x5c8   : > { %v4399_v43 = vsel %vm4345_vm9, %v4233_v37, %v18652_v41  ;;  %v4003_v37 = vpop.permute.xlu1 %4002 }
 0x5c9   : > { %v4528_v38 = vsel %vm4474_vm10, %v4399_v43, %v18655_v60  ;;  %v2470_v6 = vsel %vm11835_vm5, %v2468_v5, %v2469_v28  ;;  %v2471_v14 = vrot.slane %v2469_v28, 4  ;;  %v18667_v5 = vld [vmem:[#allocation16_spill] sm:$0xff] }
 0x5ca   : > { %v4657_v39 = vsel %vm4603_vm11, %v4528_v38, %v18657_v51  ;;  %v18661_v38 = vld [vmem:[#allocation288_spill] sm:$0xff]  ;;  %v4016_v12 = vunpack.c.l.b16 %v2470_v6  ;;  %v18672_v6 = vld [vmem:[#allocation26_spill] sm:$0xff] }
 0x5cb   : > { %4116 = vrot.lane.b32.xlu2 %v18647_v8, %s10861_s29  ;;  %v4786_v2 = vsel %vm4732_vm12, %v4657_v39, %v13516_v21  ;;  %v2412_v21 = vshll.u32 %v346_v3, 16  ;;  %v14815_v8 = vpop.f32.mrf.mxu2  ;;  %v18662_v39 = vld [vmem:[#allocation124_spill] sm:$0xff]  ;;  %v18663_v3 = vld [vmem:[#allocation354_spill] sm:$0xff] }
 0x5cc   : > { %v4915_v58 = vsel %vm4861_vm14, %v4786_v2, %v3797_v19  ;;  %v2408_v19 = vrot.slane %v2406_v61, 4  ;;  %v14831_v60 = vpop.permute.xlu2 %4046 }
 0x5cd   : > { %v2414_v63 = vrot.slane %v2412_v21, 5  ;;  %v3971_v43 = vpop.permute.xlu0 %3970 }
 0x5ce   : > { %3976 = vrot.lane.b32.xlu0 %v18654_v52, %s10862_s4 }
 0x5cf   : > { %v2419_v53 = vor.u32 %v2418_v22, %v2414_v63 }
 0x5d1   : > { %v2420_v41 = vrot.slane %v2419_v53, 4 }
 0x5d3   : > { %3804 = vrot.lane.b32.xlu2 %v14283_v55, %s10860_s28  ;;  %v5044_v55 = vsel %vm4990_vm13, %v4915_v58, %v3937_v16  ;;  %v14813_v16 = vpop.f32.mrf.mxu1  ;;  %v2425_v1 = vsel %vm10976_vm2, %v2420_v41, %v14817_v48  ;;  %v2473_v58 = vsel %vm11835_vm5, %v2471_v14, %v17931_v42  ;;  %v14853_v33 = vpop.f32.mrf.mxu2  ;;  %v10739_v41 = vld [vmem:[%s10965_s10 + $0x210] sm:$0xff]  ;;  %v18673_v14 = vld [vmem:[#allocation31_spill] sm:$0xff] }
 0x5d4   : > { %v5173_v59 = vsel %vm5119_vm15, %v5044_v55, %v4077_v27  ;;  %v2409_v27 = vor.u32 %v2408_v19, %v14694_v13  ;;  %v4284_v13 = vsel %vm4152_vm8, %v10738_v44, %v18659_v15  ;;  %v3877_v2 = vunpack.c.l.b16 %v2425_v1  ;;  %18664 = vst [vmem:[#allocation74_spill] sm:$0xff] %v14853_v33  ;;  %v18675_v1 = vld [vmem:[#allocation154_spill] sm:$0xff] }
 0x5d5   : > { %10056 = vmatmul.msk.bf16.gmra.mxu1 %vm5263_vm0, %v5173_v59  ;;  %v4433_v18 = vsel %vm4345_vm9, %v4284_v13, %v18660_v46  ;;  %v4017_v45 = vunpack.c.l.b16 %v2473_v58  ;;  %v14850_v59 = vpop.f32.mrf.mxu0 }
 0x5d6   : > { %v2410_v17 = vrot.slane %v2409_v27, 4  ;;  %v4562_v49 = vsel %vm4474_vm10, %v4433_v18, %v18661_v38  ;;  %v14865_v27 = vpop.permute.xlu2 %3832 }
 0x5d7   : > { %v4691_v11 = vsel %vm4603_vm11, %v4562_v49, %v18662_v39  ;;  %v4022_v7 = vpack.c.b16 %v4017_v45, %v4016_v12 }
 0x5d8   : > { %v2415_v52 = vsel %vm10976_vm2, %v2410_v17, %v2414_v63  ;;  %v4820_v55 = vsel %vm4732_vm12, %v4691_v11, %v18663_v3  ;;  %v14856_v63 = vpop.f32.mrf.mxu3  ;;  %v10428_v3 = vld [vmem:[%s10965_s10 + $0x27c] sm:$0xff] }
 0x5d9   : > { %v3876_v51 = vunpack.c.l.b16 %v2415_v52  ;;  %v4949_v21 = vsel %vm4861_vm14, %v4820_v55, %v3831_v57  ;;  %18665 = vst [vmem:[#allocation275_spill] sm:$0xff] %v14856_v63  ;;  %4148 = vrot.lane.b32.xlu0 %v4022_v7, %s10861_s29  ;;  %v3767_v57 = vpop.permute.xlu1 %3766 }
 0x5da   : > { %v5078_v19 = vsel %vm4990_vm13, %v4949_v21, %v3971_v43  ;;  %v18669_v43 = vld [vmem:[#allocation130_spill] sm:$0xff] }
 0x5db   : > { %4052 = vrot.lane.b32.xlu2 %v18658_v30, %s10861_s29  ;;  %v3882_v61 = vpack.c.b16 %v3877_v2, %v3876_v51  ;;  %v14862_v22 = vpop.f32.mrf.mxu1  ;;  %v4143_v30 = vpop.permute.xlu0 %4142  ;;  %v4332_v46 = vsel %vm4152_vm8, %v10739_v41, %v18669_v43  ;;  %v18676_v51 = vld [vmem:[#allocation334_spill] sm:$0xff] }
 0x5dc   : > { %v14871_v17 = vpop.f32.mrf.mxu2 }
 0x5dd   : > { %4008 = vrot.lane.b32.xlu1 %v3882_v61, %s10862_s4  ;;  %v14867_v53 = vpop.f32.mrf.mxu0  ;;  %18666 = vst [vmem:[#allocation132_spill] sm:$0xff] %v14871_v17 }
 0x5de   : > { %v14881_v13 = vpop.permute.xlu2 %4004 }
 0x5e1   : > { %3912 = vrot.lane.b32.xlu0 %v18667_v5, %s10862_s4  ;;  %v14879_v44 = vpop.permute.xlu1 %3938 }
 0x5e3   : > { %3838 = vrot.lane.b32.xlu2 %v14395_v62, %s10860_s28  ;;  %v5207_v62 = vsel %vm5119_vm15, %v5078_v19, %v14756_v35  ;;  %v14875_v28 = vpop.f32.mrf.mxu1  ;;  %v14877_v35 = vpop.f32.mrf.mxu3  ;;  %v18679_v19 = vld [vmem:[#allocation38_spill] sm:$0xff] }
 0x5e4   : > { %10073 = vmatmul.msk.bf16.gmra.mxu2 %vm5263_vm0, %v5207_v62  ;;  %18668 = vst [vmem:[#allocation241_spill] sm:$0xff] %v14877_v35  ;;  %v3907_v15 = vpop.permute.xlu0 %3906  ;;  %v14894_v49 = vpop.f32.mrf.mxu2  ;;  %v18774_v35 = vld [vmem:[#allocation208_spill] sm:$0xff] }
 0x5e5   : > { %3772 = vrot.lane.b32.xlu1 %v14320_v26, %s10860_s28  ;;  %v18670_v26 = vld [vmem:[#allocation238_spill] sm:$0xff]  ;;  %v14888_v52 = vpop.f32.mrf.mxu0  ;;  %18674 = vst [vmem:[#allocation280_spill] sm:$0xff] %v14894_v49 }
 0x5e6   : > { %v4465_v18 = vsel %vm4345_vm9, %v4332_v46, %v18670_v26  ;;  %18671 = vst [vmem:[#allocation225_spill] sm:$0xff] %v14888_v52  ;;  %v14915_v7 = vpop.permute.xlu2 %3768  ;;  %v18686_v26 = vld [vmem:[#allocation303_spill] sm:$0xff] }
 0x5e7   : > { %v4594_v38 = vsel %vm4474_vm10, %v4465_v18, %v18673_v14 }
 0x5e8   : > { %v4723_v39 = vsel %vm4603_vm11, %v4594_v38, %v18676_v51 }
 0x5e9   : > { %4084 = vrot.lane.b32.xlu0 %v18675_v1, %s10861_s29  ;;  %v4852_v2 = vsel %vm4732_vm12, %v4723_v39, %v14791_v34  ;;  %v14909_v12 = vpop.permute.xlu1 %3724  ;;  %v10740_v34 = vld [vmem:[%s10965_s10 + $0x60] sm:$0xff] }
 0x5ea   : > { %v4981_v55 = vsel %vm4861_vm14, %v4852_v2, %v14743_v47  ;;  %v4188_v47 = vsel %vm4152_vm8, %v10740_v34, %v18679_v19  ;;  %v18688_v2 = vld [vmem:[#allocation66_spill] sm:$0xff] }
 0x5eb   : > { %v14900_v11 = vpop.f32.mrf.mxu3  ;;  %v14904_v58 = vpop.f32.mrf.mxu1  ;;  %v5110_v45 = vsel %vm4990_vm13, %v4981_v55, %v4003_v37  ;;  %v18681_v37 = vld [vmem:[#allocation187_spill] sm:$0xff]  ;;  %v18691_v34 = vld [vmem:[#allocation86_spill] sm:$0xff] }
 0x5ec   : > { %18677 = vst [vmem:[#allocation35_spill] sm:$0xff] %v14900_v11  ;;  %v4079_v61 = vpop.permute.xlu0 %4078  ;;  %v5239_v21 = vsel %vm5119_vm15, %v5110_v45, %v4143_v30  ;;  %v4369_v5 = vsel %vm4345_vm9, %v4188_v47, %v18681_v37  ;;  %v14926_v30 = vpop.f32.mrf.mxu2  ;;  %v14951_v45 = vld [vmem:[%s10965_s10 + $0x280] sm:$0xf]  ;;  %v18692_v37 = vld [vmem:[#allocation205_spill] sm:$0xff]  ;;  %v18700_v11 = vld [vmem:[#allocation159_spill] sm:$0xff] }
 0x5ed   : > { %3944 = vrot.lane.b32.xlu1 %v18672_v6, %s10862_s4  ;;  %18678 = vst [vmem:[#allocation254_spill] sm:$0xff] %v14904_v58  ;;  %10089 = vmatmul.msk.bf16.gmra.mxu3 %vm5263_vm0, %v5239_v21  ;;  %v14922_v62 = vpop.f32.mrf.mxu0  ;;  %v18687_v6 = vld [vmem:[#allocation346_spill] sm:$0xff]  ;;  %v2436_v49 = vshrl.u32 %v14951_v45, 16 }
 0x5ee   : > { %18680 = vst [vmem:[#allocation39_spill] sm:$0xff] %v14922_v62  ;;  %v14953_v21 = vpop.permute.xlu2 %3940  ;;  %v18767_v62 = vld [vmem:[#allocation103_spill] sm:$0xff] }
 0x5ef   : > { %18682 = vst [vmem:[#allocation162_spill] sm:$0xff] %v14926_v30  ;;  %v10745_v30 = vld [vmem:[%s10965_s10 + $0x21c] sm:$0xff] }
 0x5f1   : > { %3870 = vrot.lane.b32.xlu0 %v10428_v3, %s10860_s28  ;;  %v14939_v1 = vpop.permute.xlu1 %3972  ;;  %v18689_v3 = vld [vmem:[#allocation181_spill] sm:$0xff] }
 0x5f3   : > { %v14930_v43 = vpop.f32.mrf.mxu1  ;;  %v14932_v46 = vpop.f32.mrf.mxu3 }
 0x5f4   : > { %18684 = vst [vmem:[#allocation230_spill] sm:$0xff] %v14930_v43  ;;  %v14941_v51 = vpop.permute.xlu0 %3864  ;;  %v14958_v47 = vpop.f32.mrf.mxu2 }
 0x5f5   : > { %3730 = vrot.lane.b32.xlu1 %v14479_v54, %s10859_s27  ;;  %v18683_v54 = vld [vmem:[#allocation253_spill] sm:$0xff]  ;;  %18685 = vst [vmem:[#allocation305_spill] sm:$0xff] %v14932_v46  ;;  %v14948_v55 = vpop.f32.mrf.mxu0 }
 0x5f6   : > { %v4498_v41 = vsel %vm4474_vm10, %v4369_v5, %v18683_v54  ;;  %18690 = vst [vmem:[#allocation191_spill] sm:$0xff] %v14948_v55  ;;  %v10744_v46 = vld [vmem:[%s10965_s10 + $0x18c] sm:$0xff] }
 0x5f7   : > { %v4627_v18 = vsel %vm4603_vm11, %v4498_v41, %v18686_v26  ;;  %v2426_v41 = vshrl.u32 %v14798_v56, 16  ;;  %v18693_v26 = vld [vmem:[#allocation259_spill] sm:$0xff] }
 0x5f8   : > { %v4756_v14 = vsel %vm4732_vm12, %v4627_v18, %v18687_v6  ;;  %v2432_v6 = vshll.u32 %v14951_v45, 16 }
 0x5f9   : > { %v4885_v38 = vsel %vm4861_vm14, %v4756_v14, %v3767_v57  ;;  %4118 = vrot.lane.b32.xlu0 %v18689_v3, %s10861_s29  ;;  %v10741_v57 = vld [vmem:[%s10965_s10 + $0xf0] sm:$0xff]  ;;  %v18694_v14 = vld [vmem:[#allocation99_spill] sm:$0xff] }
 0x5fa   : > { %v5014_v39 = vsel %vm4990_vm13, %v4885_v38, %v3907_v15  ;;  %v4236_v19 = vsel %vm4152_vm8, %v10741_v57, %v18691_v34  ;;  %v18697_v57 = vld [vmem:[#allocation351_spill] sm:$0xff] }
 0x5fb   : > { %v5143_v15 = vsel %vm5119_vm15, %v5014_v39, %v14831_v60  ;;  %v4401_v5 = vsel %vm4345_vm9, %v4236_v19, %v18692_v37  ;;  %v14964_v54 = vpop.f32.mrf.mxu3  ;;  %v14973_v38 = vpop.f32.mrf.mxu1  ;;  %v10742_v39 = vld [vmem:[%s10965_s10 + $0x6c] sm:$0xff]  ;;  %v14981_v19 = vld [vmem:[%s10965_s10 + $0x284] sm:$0x1] }
 0x5fc   : > { %10041 = vmatmul.msk.bf16.gmra.mxu0 %vm5263_vm0, %v5143_v15  ;;  %v4530_v18 = vsel %vm4474_vm10, %v4401_v5, %v18693_v26  ;;  %18695 = vst [vmem:[#allocation62_spill] sm:$0xff] %v14973_v38  ;;  %v2428_v15 = vrot.slane %v2426_v41, 4  ;;  %v4145_v37 = vpop.permute.xlu1 %4144  ;;  %v4113_v42 = vpop.permute.xlu0 %4112  ;;  %v10743_v5 = vld [vmem:[%s10965_s10 + $0xfc] sm:$0xff] }
 0x5fd   : > { %3978 = vrot.lane.b32.xlu1 %v18688_v2, %s10862_s4  ;;  %v4659_v60 = vsel %vm4603_vm11, %v4530_v18, %v18694_v14  ;;  %v18696_v2 = vld [vmem:[#allocation60_spill] sm:$0xff] }
 0x5fe   : > { %v4191_v3 = vsel %vm4152_vm8, %v10742_v39, %v18696_v2  ;;  %v4788_v34 = vsel %vm4732_vm12, %v4659_v60, %v18697_v57  ;;  %v18698_v26 = vld [vmem:[#allocation84_spill] sm:$0xff]  ;;  %v4335_v39 = vsel %vm4152_vm8, %v10745_v30, %v18700_v11  ;;  %v2429_v2 = vor.u32 %v2428_v15, %v14817_v48 }
 0x5ff   : > { %v4239_v55 = vsel %vm4152_vm8, %v10743_v5, %v18698_v26  ;;  %v18699_v18 = vld [vmem:[#allocation96_spill] sm:$0xff]  ;;  %v4917_v60 = vsel %vm4861_vm14, %v4788_v34, %v14794_v24  ;;  %v2434_v57 = vrot.slane %v2432_v6, 5  ;;  %v18701_v5 = vld [vmem:[#allocation223_spill] sm:$0xff]  ;;  %v18702_v26 = vld [vmem:[#allocation237_spill] sm:$0xff]  ;;  %v2442_v30 = vshll.u32 %v14981_v19, 16 }
 0x600   : > { %v4287_v14 = vsel %vm4152_vm8, %v10744_v46, %v18699_v18  ;;  %v5046_v41 = vsel %vm4990_vm13, %v4917_v60, %v14879_v44  ;;  %v4467_v11 = vsel %vm4345_vm9, %v4335_v39, %v18702_v26  ;;  %v18703_v34 = vld [vmem:[#allocation287_spill] sm:$0xff]  ;;  %v18704_v48 = vld [vmem:[#allocation292_spill] sm:$0xff]  ;;  %v2430_v15 = vrot.slane %v2429_v2, 4  ;;  %v18706_v60 = vld [vmem:[#allocation325_spill] sm:$0xff] }
 0x601   : > { %3806 = vrot.lane.b32.xlu0 %v14374_v36, %s10860_s28  ;;  %v4435_v46 = vsel %vm4345_vm9, %v4287_v14, %v18701_v5  ;;  %v5175_v24 = vsel %vm5119_vm15, %v5046_v41, %v4079_v61  ;;  %v4596_v6 = vsel %vm4474_vm10, %v4467_v11, %v18704_v48  ;;  %v2438_v18 = vrot.slane %v2436_v49, 4  ;;  %v18705_v36 = vld [vmem:[#allocation193_spill] sm:$0xff]  ;;  %v18707_v5 = vld [vmem:[#allocation158_spill] sm:$0xff]  ;;  %v15017_v61 = vpop.f32.mrf.mxu0  ;;  %v15025_v11 = vpop.f32.mrf.mxu2 }
 0x602   : > { %v4564_v44 = vsel %vm4474_vm10, %v4435_v46, %v18703_v34  ;;  %10057 = vmatmul.msk.bf16.gmra.mxu1 %vm5263_vm0, %v5175_v24  ;;  %v4403_v14 = vsel %vm4345_vm9, %v4239_v55, %v18705_v36  ;;  %v4725_v26 = vsel %vm4603_vm11, %v4596_v6, %v18707_v5  ;;  %18708 = vst [vmem:[#allocation173_spill] sm:$0xff] %v15017_v61  ;;  %v18709_v41 = vrot.slane %v14798_v56, 5  ;;  %v15021_v34 = vpop.permute.xlu2 %3726  ;;  %v18710_v2 = vld [vmem:[#allocation357_spill] sm:$0xff] }
 0x603   : > { %v4693_v39 = vsel %vm4603_vm11, %v4564_v44, %v18706_v60  ;;  %v2435_v55 = vsel %vm10976_vm2, %v2430_v15, %v2434_v57  ;;  %v2439_v24 = vor.u32 %v2438_v18, %v2434_v57  ;;  %v2444_v44 = vrot.slane %v2442_v30, 5  ;;  %v15029_v48 = vpop.f32.mrf.mxu1  ;;  %v15031_v6 = vpop.f32.mrf.mxu3 }
 0x604   : > { %v2474_v46 = vrot.slane %v18709_v41, 4  ;;  %v4822_v49 = vsel %vm4732_vm12, %v4693_v39, %v18710_v2  ;;  %18711 = vst [vmem:[#allocation261_spill] sm:$0xff] %v15029_v48  ;;  %v4854_v36 = vsel %vm4732_vm12, %v4725_v26, %v14909_v12  ;;  %v2475_v60 = vrot.slane %v14951_v45, 5  ;;  %v3909_v15 = vpop.permute.xlu1 %3908  ;;  %v3801_v18 = vpop.permute.xlu0 %3800 }
 0x605   : > { %v4951_v56 = vsel %vm4861_vm14, %v4822_v49, %v14865_v27  ;;  %v2478_v39 = vrot.slane %v14981_v19, 5  ;;  %v2440_v5 = vrot.slane %v2439_v24, 4  ;;  %v3878_v41 = vunpack.c.l.b16 %v2435_v55  ;;  %v18712_v19 = vld [vmem:[#allocation273_spill] sm:$0xff]  ;;  %v18713_v55 = vld [vmem:[#allocation127_spill] sm:$0xff] }
 0x606   : > { %v5080_v57 = vsel %vm4990_vm13, %v4951_v56, %v14939_v1  ;;  %v4983_v30 = vsel %vm4861_vm14, %v4854_v36, %v14941_v51  ;;  %v2476_v27 = vsel %vm11835_vm5, %v2474_v46, %v2475_v60  ;;  %v2477_v2 = vrot.slane %v2475_v60, 4  ;;  %v18714_v46 = vld [vmem:[#allocation186_spill] sm:$0xff] }
 0x607   : > { %v5112_v12 = vsel %vm4990_vm13, %v4983_v30, %v14881_v13  ;;  %v5209_v45 = vsel %vm5119_vm15, %v5080_v57, %v4113_v42  ;;  %v4532_v26 = vsel %vm4474_vm10, %v4403_v14, %v18712_v19  ;;  %v2445_v1 = vsel %vm10976_vm2, %v2440_v5, %v2444_v44  ;;  %v18715_v13 = vld [vmem:[#allocation97_spill] sm:$0xff] }
 0x608   : > { %v4018_v49 = vunpack.c.l.b16 %v2476_v27  ;;  %v5241_v51 = vsel %vm5119_vm15, %v5112_v12, %v4145_v37  ;;  %10074 = vmatmul.msk.bf16.gmra.mxu2 %vm5263_vm0, %v5209_v45  ;;  %v4371_v24 = vsel %vm4345_vm9, %v4191_v3, %v18714_v46  ;;  %v4661_v42 = vsel %vm4603_vm11, %v4532_v26, %v18715_v13  ;;  %v18717_v44 = vld [vmem:[#allocation349_spill] sm:$0xff]  ;;  %v18722_v13 = vld [vmem:[#allocation15_spill] sm:$0xff] }
 0x609   : > { %4054 = vrot.lane.b32.xlu0 %v18713_v55, %s10861_s29  ;;  %v3879_v56 = vunpack.c.l.b16 %v2445_v1  ;;  %v2479_v14 = vsel %vm11835_vm5, %v2477_v2, %v2478_v39  ;;  %10090 = vmatmul.msk.bf16.gmra.mxu3 %vm5263_vm0, %v5241_v51  ;;  %v4500_v37 = vsel %vm4474_vm10, %v4371_v24, %v18716_v10  ;;  %v4790_v36 = vsel %vm4732_vm12, %v4661_v42, %v18717_v44  ;;  %v18718_v5 = vld [vmem:[#allocation73_spill] sm:$0xff]  ;;  %v15069_v3 = vpop.f32.mrf.mxu0  ;;  %v15074_v39 = vpop.f32.mrf.mxu2  ;;  %v18721_v24 = vld [vmem:[#allocation126_spill] sm:$0xff] }
 0x60a   : > { %v4019_v60 = vunpack.c.l.b16 %v2479_v14  ;;  %v4629_v57 = vsel %vm4603_vm11, %v4500_v37, %v18718_v5  ;;  %v4919_v27 = vsel %vm4861_vm14, %v4790_v36, %v3801_v18  ;;  %v18719_v12 = vld [vmem:[#allocation345_spill] sm:$0xff]  ;;  %v3975_v26 = vpop.permute.xlu2 %3974  ;;  %v18723_v14 = vld [vmem:[#allocation222_spill] sm:$0xff]  ;;  %vm7527_vm2 = vcmask 1043459  }
 0x60b   : > { %v3883_v30 = vpack.c.b16 %v3879_v56, %v3878_v41  ;;  %v4758_v23 = vsel %vm4732_vm12, %v4629_v57, %v18719_v12  ;;  %v15076_v45 = vpop.f32.mrf.mxu3  ;;  %v5048_v1 = vsel %vm4990_vm13, %v4919_v27, %v14953_v21  ;;  %v15087_v46 = vpop.f32.mrf.mxu1  ;;  %v18724_v36 = vld [vmem:[#allocation277_spill] sm:$0xff]  ;;  %v18726_v12 = vld [vmem:[#allocation131_spill] sm:$0xff]  ;;  %vm8551_vm5 = vcmask 1047556  }
 0x60c   : > { %v4023_v2 = vpack.c.b16 %v4019_v60, %v4018_v49  ;;  %v4887_v19 = vsel %vm4861_vm14, %v4758_v23, %v14915_v7  ;;  %v4081_v18 = vpop.permute.xlu1 %4080  ;;  %v4049_v51 = vpop.permute.xlu0 %4048  ;;  %18720 = vst [vmem:[#allocation83_spill] sm:$0xff] %v15087_v46  ;;  %v10747_v57 = vld [vmem:[%s10965_s10 + $0x224] sm:$0xff] }
 0x60d   : > { %4010 = vrot.lane.b32.xlu2 %v3883_v30, %s10862_s4  ;;  %v5016_v41 = vsel %vm4990_vm13, %v4887_v19, %v3909_v15  ;;  %v5177_v49 = vsel %vm5119_vm15, %v5048_v1, %v4081_v18  ;;  %v10746_v15 = vld [vmem:[%s10965_s10 + $0x194] sm:$0xff]  ;;  %v18729_v1 = vld [vmem:[#allocation37_spill] sm:$0xff] }
 0x60e   : > { %4150 = vrot.lane.b32.xlu1 %v4023_v2, %s10861_s29  ;;  %v5145_v55 = vsel %vm5119_vm15, %v5016_v41, %v4049_v51  ;;  %v4290_v21 = vsel %vm4152_vm8, %v10746_v15, %v18721_v24  ;;  %v18725_v30 = vld [vmem:[#allocation155_spill] sm:$0xff]  ;;  %v18728_v41 = vld [vmem:[#allocation356_spill] sm:$0xff] }
 0x60f   : > { %10042 = vmatmul.msk.bf16.gmra.mxu0 %vm5263_vm0, %v5145_v55  ;;  %v4437_v10 = vsel %vm4345_vm9, %v4290_v21, %v18723_v14  ;;  %v4338_v27 = vsel %vm4152_vm8, %v10747_v57, %v18725_v30  ;;  %v18727_v2 = vld [vmem:[#allocation227_spill] sm:$0xff]  ;;  %v18730_v55 = vld [vmem:[#allocation157_spill] sm:$0xff] }
 0x610   : > { %v4566_v60 = vsel %vm4474_vm10, %v4437_v10, %v18724_v36  ;;  %v4469_v19 = vsel %vm4345_vm9, %v4338_v27, %v18727_v2  ;;  %v18732_v14 = vld [vmem:[#allocation153_spill] sm:$0xff] }
 0x611   : > { %v15091_v7 = vpop.f32.mrf.mxu0  ;;  %v15102_v37 = vpop.f32.mrf.mxu2  ;;  %v4695_v23 = vsel %vm4603_vm11, %v4566_v60, %v18726_v12  ;;  %v4598_v51 = vsel %vm4474_vm10, %v4469_v19, %v18729_v1  ;;  %v18735_v2 = vld [vmem:[#allocation57_spill] sm:$0xff]  ;;  %v18736_v1 = vld [vmem:[#allocation167_spill] sm:$0xff] }
 0x612   : > { %10058 = vmatmul.msk.bf16.gmra.mxu1 %vm5263_vm0, %v5177_v49  ;;  %v4147_v44 = vpop.permute.xlu2 %4146  ;;  %v4824_v18 = vsel %vm4732_vm12, %v4695_v23, %v18728_v41  ;;  %v4727_v15 = vsel %vm4603_vm11, %v4598_v51, %v18730_v55 }
 0x613   : > { %v15106_v5 = vpop.f32.mrf.mxu1  ;;  %v4856_v21 = vsel %vm4732_vm12, %v4727_v15, %v15021_v34 }
 0x614   : > { %v3867_v42 = vpop.permute.xlu1 %3866  ;;  %v3835_v56 = vpop.permute.xlu0 %3834 }
 0x615   : > { %3774 = vrot.lane.b32.xlu2 %v14439_v25, %s10860_s28  ;;  %v15108_v25 = vpop.f32.mrf.mxu3  ;;  %v4953_v49 = vsel %vm4861_vm14, %v4824_v18, %v3835_v56  ;;  %v4985_v10 = vsel %vm4861_vm14, %v4856_v21, %v3867_v42  ;;  %v18738_v21 = vld [vmem:[#allocation69_spill] sm:$0xff]  ;;  %s175_s28 = sand.u32 1, %s10829_s13  }
 0x616   : > { %3914 = vrot.lane.b32.xlu1 %v18722_v13, %s10862_s4  ;;  %v18731_v13 = vld [vmem:[#allocation33_spill] sm:$0xff]  ;;  %v5082_v56 = vsel %vm4990_vm13, %v4953_v49, %v3975_v26  ;;  %v10748_v26 = vld [vmem:[%s10965_s10 + $0x74] sm:$0xff]  ;;  %s9613_s24 = scalar_lea.sflag [#allocation3], %s175_s28 }
 0x617   : > { %v4194_v19 = vsel %vm4152_vm8, %v10748_v26, %v18735_v2  ;;  %v18737_v49 = vld [vmem:[#allocation258_spill] sm:$0xff]  ;;  %v18744_v2 = vld [vmem:[#allocation272_spill] sm:$0xff] }
 0x618   : > { %v4373_v51 = vsel %vm4345_vm9, %v4194_v19, %v18736_v1 }
 0x619   : > { %v15124_v24 = vpop.f32.mrf.mxu0  ;;  %v15134_v57 = vpop.f32.mrf.mxu2  ;;  %v4502_v55 = vsel %vm4474_vm10, %v4373_v51, %v18737_v49  ;;  %v18745_v49 = vld [vmem:[#allocation319_spill] sm:$0xff] }
 0x61a   : > { %18733 = vst [vmem:[#allocation8_spill] sm:$0xff] %v15134_v57  ;;  %v3911_v23 = vpop.permute.xlu2 %3910 }
 0x61b   : > { %v15143_v42 = vpop.f32.mrf.mxu1 }
 0x61c   : > { %v4115_v36 = vpop.permute.xlu1 %4114  ;;  %v4007_v60 = vpop.permute.xlu0 %4006 }
 0x61d   : > { %3946 = vrot.lane.b32.xlu2 %v18731_v13, %s10862_s4  ;;  %v5211_v30 = vsel %vm5119_vm15, %v5082_v56, %v4115_v36  ;;  %v5114_v34 = vsel %vm4990_vm13, %v4985_v10, %v4007_v60  ;;  %v15138_v27 = vpop.f32.mrf.mxu3  ;;  %v18741_v56 = vld [vmem:[#allocation209_spill] sm:$0xff] }
 0x61e   : > { %4086 = vrot.lane.b32.xlu1 %v18732_v14, %s10861_s29  ;;  %18734 = vst [vmem:[#allocation98_spill] sm:$0xff] %v15138_v27  ;;  %10075 = vmatmul.msk.bf16.gmra.mxu2 %vm5263_vm0, %v5211_v30  ;;  %v5243_v12 = vsel %vm5119_vm15, %v5114_v34, %v4147_v44  ;;  %v10749_v44 = vld [vmem:[%s10965_s10 + $0x104] sm:$0xff]  ;;  %v18742_v30 = vld [vmem:[#allocation343_spill] sm:$0xff]  ;;  %s17235_s29 = sshll.u32 %s175_s28, 5 }
 0x61f   : > { %10091 = vmatmul.msk.bf16.gmra.mxu3 %vm5263_vm0, %v5243_v12  ;;  %v4242_v13 = vsel %vm4152_vm8, %v10749_v44, %v18738_v21  ;;  %v18739_v14 = vld [vmem:[#allocation313_spill] sm:$0xff]  ;;  %s17286_s4 = scalar_lea.vmem [#allocation2], %s17235_s29 }
 0x620   : > { %v4631_v10 = vsel %vm4603_vm11, %v4502_v55, %v18739_v14  ;;  %v4405_v60 = vsel %vm4345_vm9, %v4242_v13, %v18741_v56  ;;  %v18746_v44 = vld [vmem:[#allocation353_spill] sm:$0xff] }
 0x621   : > { %v15152_v15 = vpop.f32.mrf.mxu0  ;;  %v15159_v36 = vpop.f32.mrf.mxu2  ;;  %v4760_v34 = vsel %vm4732_vm12, %v4631_v10, %v18742_v30  ;;  %v4534_v19 = vsel %vm4474_vm10, %v4405_v60, %v18744_v2 }
 0x622   : > { %18740 = vst [vmem:[#allocation211_spill] sm:$0xff] %v15159_v36  ;;  %v4083_v1 = vpop.permute.xlu2 %4082  ;;  %v4663_v55 = vsel %vm4603_vm11, %v4534_v19, %v18745_v49  ;;  %v10750_v49 = vld [vmem:[%s10965_s10 + $0x19c] sm:$0xff] }
 0x623   : > { %v15165_v12 = vpop.f32.mrf.mxu1  ;;  %v4792_v21 = vsel %vm4732_vm12, %v4663_v55, %v18746_v44  ;;  %v18751_v55 = vld [vmem:[#allocation121_spill] sm:$0xff] }
 0x624   : > { %v3803_v41 = vpop.permute.xlu1 %3802  ;;  %v3771_v18 = vpop.permute.xlu0 %3770  ;;  %v4293_v44 = vsel %vm4152_vm8, %v10750_v49, %v18751_v55  ;;  %v18759_v55 = vld [vmem:[#allocation355_spill] sm:$0xff] }
 0x625   : > { %v15167_v26 = vpop.f32.mrf.mxu3  ;;  %v4889_v51 = vsel %vm4861_vm14, %v4760_v34, %v3771_v18  ;;  %v4921_v13 = vsel %vm4861_vm14, %v4792_v21, %v3803_v41  ;;  %v18752_v21 = vld [vmem:[#allocation212_spill] sm:$0xff] }
 0x626   : > { %18743 = vst [vmem:[#allocation265_spill] sm:$0xff] %v15167_v26  ;;  %v5018_v10 = vsel %vm4990_vm13, %v4889_v51, %v3911_v23  ;;  %v18777_v26 = vld [vmem:[#allocation240_spill] sm:$0xff] }
 0x629   : > { %v15180_v2 = vpop.f32.mrf.mxu0  ;;  %v15184_v34 = vpop.f32.mrf.mxu2 }
 0x62a   : > { %18747 = vst [vmem:[#allocation128_spill] sm:$0xff] %v15180_v2  ;;  %v15191_v23 = vpop.permute.xlu2 %3868  ;;  %v18773_v2 = vld [vmem:[#allocation335_spill] sm:$0xff] }
 0x62b   : > { %18748 = vst [vmem:[#allocation215_spill] sm:$0xff] %v15184_v34  ;;  %v15189_v41 = vpop.f32.mrf.mxu1  ;;  %v18764_v34 = vld [vmem:[#allocation91_spill] sm:$0xff] }
 0x62c   : > { %v4051_v14 = vpop.permute.xlu1 %4050  ;;  %18750 = vst [vmem:[#allocation19_spill] sm:$0xff] %v15189_v41 }
 0x62d   : > { %v5147_v30 = vsel %vm5119_vm15, %v5018_v10, %v4051_v14  ;;  %v15187_v19 = vpop.f32.mrf.mxu3 }
 0x62e   : > { %10043 = vmatmul.msk.bf16.gmra.mxu0 %vm5263_vm0, %v5147_v30  ;;  %18749 = vst [vmem:[#allocation294_spill] sm:$0xff] %v15187_v19  ;;  %v10755_v19 = vld [vmem:[%s10965_s10 + $0x10c] sm:$0xff] }
 0x62f   : > { %v4245_v38 = vsel %vm4152_vm8, %v10755_v19, %v18764_v34  ;;  %v18769_v34 = vld [vmem:[#allocation189_spill] sm:$0xff] }
 0x630   : > { %v3943_v56 = vpop.permute.xlu0 %3942 }
 0x631   : > { %v5050_v60 = vsel %vm4990_vm13, %v4921_v13, %v3943_v56  ;;  %v4439_v13 = vsel %vm4345_vm9, %v4293_v44, %v18752_v21  ;;  %v15198_v14 = vpop.f32.mrf.mxu0  ;;  %v15202_v56 = vpop.f32.mrf.mxu2  ;;  %v15214_v21 = vmax.f32 %v14739_v50, %v14958_v47  ;;  %v10752_v50 = vld [vmem:[%s10965_s10 + $0x84] sm:$0xff] }
 0x632   : > { %v5179_v18 = vsel %vm5119_vm15, %v5050_v60, %v4083_v1  ;;  %18753 = vst [vmem:[#allocation44_spill] sm:$0xff] %v15198_v14  ;;  %v18754_v1 = vld [vmem:[#allocation291_spill] sm:$0xff]  ;;  %v18756_v60 = vld [vmem:[#allocation333_spill] sm:$0xff]  ;;  %v4117_v61 = vpop.permute.xlu2 %4116 }
 0x633   : > { %10059 = vmatmul.msk.bf16.gmra.mxu1 %vm5263_vm0, %v5179_v18  ;;  %v4568_v10 = vsel %vm4474_vm10, %v4439_v13, %v18754_v1  ;;  %18755 = vst [vmem:[#allocation143_spill] sm:$0xff] %v15202_v56  ;;  %v15206_v46 = vpop.f32.mrf.mxu1  ;;  %v5952_v48 = vrot.slane %v15214_v21, 2  ;;  %v18761_v47 = vld [vmem:[#allocation65_spill] sm:$0xff] }
 0x634   : > { %v3837_v30 = vpop.permute.xlu1 %3836  ;;  %v4697_v18 = vsel %vm4603_vm11, %v4568_v10, %v18756_v60  ;;  %18757 = vst [vmem:[#allocation245_spill] sm:$0xff] %v15206_v46  ;;  %v18762_v56 = vld [vmem:[#allocation137_spill] sm:$0xff]  ;;  %v18772_v46 = vld [vmem:[#allocation198_spill] sm:$0xff] }
 0x635   : > { %v15208_v49 = vpop.f32.mrf.mxu3  ;;  %v4826_v44 = vsel %vm4732_vm12, %v4697_v18, %v18759_v55  ;;  %v10751_v18 = vld [vmem:[%s10965_s10 + $0x7c] sm:$0xff] }
 0x636   : > { %18758 = vst [vmem:[#allocation304_spill] sm:$0xff] %v15208_v49  ;;  %v4955_v13 = vsel %vm4861_vm14, %v4826_v44, %v3837_v30  ;;  %v18760_v55 = vld [vmem:[#allocation43_spill] sm:$0xff]  ;;  %v4200_v30 = vsel %vm4152_vm8, %v10752_v50, %v18761_v47  ;;  %v10753_v44 = vld [vmem:[%s10965_s10 + $0x22c] sm:$0xff]  ;;  %v15241_v50 = vmax.f32 %v14741_v9, %v14964_v54  ;;  %v18771_v54 = vld [vmem:[#allocation192_spill] sm:$0xff] }
 0x637   : > { %v4197_v49 = vsel %vm4152_vm8, %v10751_v18, %v18760_v55  ;;  %v18765_v18 = vld [vmem:[#allocation242_spill] sm:$0xff]  ;;  %v4377_v19 = vsel %vm4345_vm9, %v4200_v30, %v18769_v34 }
 0x638   : > { %v3729_v51 = vpop.permute.xlu0 %3728 }
 0x639   : > { %v15243_v47 = vpop.f32.mrf.mxu0 }
 0x63a   : > { %18766 = vst [vmem:[#allocation164_spill] sm:$0xff] %v15243_v47  ;;  %v4375_v47 = vsel %vm4345_vm9, %v4197_v49, %v18771_v54  ;;  %v18778_v54 = vld [vmem:[#allocation246_spill] sm:$0xff]  ;;  %v15289_v17 = vpop.permute.xlu2 %3804 }
 0x63d   : > { %v15257_v9 = vpop.f32.mrf.mxu3 }
 0x640   : > { %v3977_v1 = vpop.permute.xlu0 %3976 }
 0x641   : > { %v5084_v10 = vsel %vm4990_vm13, %v4955_v13, %v3977_v1  ;;  %v4341_v13 = vsel %vm4152_vm8, %v10753_v44, %v18762_v56  ;;  %v10754_v1 = vld [vmem:[%s10965_s10 + $0x114] sm:$0xff]  ;;  %v15245_v56 = vpop.f32.mrf.mxu2  ;;  %v10756_v44 = vld [vmem:[%s10965_s10 + $0x1a4] sm:$0xff] }
 0x642   : > { %v5213_v60 = vsel %vm5119_vm15, %v5084_v10, %v4117_v61  ;;  %v5954_v61 = vrot.slane %v15214_v21, 6  ;;  %v18763_v10 = vld [vmem:[#allocation89_spill] sm:$0xff]  ;;  %v4471_v55 = vsel %vm4345_vm9, %v4341_v13, %v18765_v18  ;;  %v4296_v14 = vsel %vm4152_vm8, %v10756_v44, %v18767_v62  ;;  %v18770_v13 = vld [vmem:[#allocation302_spill] sm:$0xff] }
 0x643   : > { %10076 = vmatmul.msk.bf16.gmra.mxu2 %vm5263_vm0, %v5213_v60  ;;  %v4248_v60 = vsel %vm4152_vm8, %v10754_v1, %v18763_v10  ;;  %v10757_v1 = vld [vmem:[%s10965_s10 + $0x234] sm:$0xff]  ;;  %v18768_v10 = vld [vmem:[#allocation165_spill] sm:$0xff]  ;;  %v4600_v18 = vsel %vm4474_vm10, %v4471_v55, %v18770_v13  ;;  %v10223_v44 = vrot.slane %v5952_v48, 9  ;;  %v15269_v55 = vpop.f32.mrf.mxu1  ;;  %s10865_s10 = smov 32  }
 0x644   : > { %v4344_v43 = vsel %vm4152_vm8, %v10757_v1, %v18768_v10  ;;  %v4409_v52 = vsel %vm4345_vm9, %v4248_v60, %v18772_v46  ;;  %v4729_v62 = vsel %vm4603_vm11, %v4600_v18, %v18773_v2  ;;  %v4407_v1 = vsel %vm4345_vm9, %v4245_v38, %v18774_v35  ;;  %v18775_v10 = vld [vmem:[#allocation226_spill] sm:$0xff]  ;;  %18776 = vst [vmem:[#allocation48_spill] sm:$0xff] %v15269_v55  ;;  %v18779_v18 = vld [vmem:[#allocation257_spill] sm:$0xff] }
 0x645   : > { %v4441_v30 = vsel %vm4345_vm9, %v4296_v14, %v18775_v10  ;;  %v10225_v34 = vrot.slane %v5954_v61, 9  ;;  %v4858_v13 = vsel %vm4732_vm12, %v4729_v62, %v3729_v51  ;;  %v4473_v49 = vsel %vm4345_vm9, %v4344_v43, %v18777_v26  ;;  %v18780_v38 = vld [vmem:[#allocation262_spill] sm:$0xff]  ;;  %v18781_v10 = vld [vmem:[#allocation276_spill] sm:$0xff]  ;;  %v18783_v26 = vld [vmem:[#allocation295_spill] sm:$0xff] }
 0x646   : > { %v4506_v46 = vsel %vm4474_vm10, %v4377_v19, %v18778_v54  ;;  %v6000_v2 = vrot.slane %v15241_v50, 2  ;;  %v6002_v60 = vrot.slane %v15241_v50, 6  ;;  %v4504_v35 = vsel %vm4474_vm10, %v4375_v47, %v18779_v18  ;;  %v18782_v62 = vld [vmem:[#allocation290_spill] sm:$0xff] }
 0x647   : > { %v4536_v14 = vsel %vm4474_vm10, %v4407_v1, %v18780_v38  ;;  %v4538_v55 = vsel %vm4474_vm10, %v4409_v52, %v18781_v10  ;;  %v5953_v51 = vrot.slane %v15214_v21, 4  ;;  %v4570_v43 = vsel %vm4474_vm10, %v4441_v30, %v18782_v62  ;;  %v18784_v18 = vld [vmem:[#allocation306_spill] sm:$0xff] }
 0x648   : > { %v4602_v19 = vsel %vm4474_vm10, %v4473_v49, %v18783_v26  ;;  %v7137_v54 = vmax.f32 %v5952_v48, %v10223_v44  ;;  %v4987_v47 = vsel %vm4861_vm14, %v4858_v13, %v15191_v23  ;;  %v4633_v1 = vsel %vm4603_vm11, %v4504_v35, %v18784_v18  ;;  %v18785_v49 = vld [vmem:[#allocation317_spill] sm:$0xff]  ;;  %v18786_v13 = vld [vmem:[#allocation324_spill] sm:$0xff] }
 0x649   : > { %v10222_v52 = vrot.slane %v15214_v21, 9  ;;  %v7139_v38 = vmax.f32 %v5954_v61, %v10225_v34  ;;  %v10287_v30 = vrot.slane %v6000_v2, 9  ;;  %v10289_v62 = vrot.slane %v6002_v60, 9  ;;  %v18787_v26 = vld [vmem:[#allocation104_spill] sm:$0xff] }
 0x64a   : > { %v15299_v48 = vmax.f32 %v14750_v4, %v15025_v11  ;;  %v4635_v23 = vsel %vm4603_vm11, %v4506_v46, %v18785_v49  ;;  %v4667_v35 = vsel %vm4603_vm11, %v4538_v55, %v18786_v13  ;;  %v4665_v61 = vsel %vm4603_vm11, %v4536_v14, %v18787_v26  ;;  %v15318_v11 = vpop.f32.mrf.mxu0  ;;  %v15320_v55 = vpop.f32.mrf.mxu2  ;;  %v18791_v46 = vld [vmem:[#allocation342_spill] sm:$0xff] }
 0x64b   : > { %v4149_v63 = vpop.permute.xlu0 %4148  ;;  %v10224_v34 = vrot.slane %v5953_v51, 9  ;;  %v15311_v18 = vrot.slane %v7137_v54, 7  ;;  %v6001_v4 = vrot.slane %v15241_v50, 4  ;;  %18789 = vst [vmem:[#allocation80_spill] sm:$0xff] %v15318_v11  ;;  %v15324_v14 = vsel %vm4603_vm11, %v4602_v19, %v18791_v46  ;;  %v15332_v54 = vpop.f32.mrf.mxu1 }
 0x64c   : > { %18790 = vst [vmem:[#allocation196_spill] sm:$0xff] %v15320_v55  ;;  %v15334_v49 = vpop.f32.mrf.mxu3  ;;  %v7203_v13 = vmax.f32 %v6002_v60, %v10289_v62  ;;  %v5955_v26 = vrot.slane %v15299_v48, 2  ;;  %vm9531_vm8 = vcmask 785408  }
 0x64d   : > { %18793 = vst [vmem:[#allocation260_spill] sm:$0xff] %v15332_v54  ;;  %v7138_v46 = vmax.f32 %v5953_v51, %v10224_v34  ;;  %v10288_v11 = vrot.slane %v6001_v4, 9 }
 0x64e   : > { %18794 = vst [vmem:[#allocation309_spill] sm:$0xff] %v15334_v49  ;;  %v15354_v62 = vrot.slane %v7203_v13, 7  ;;  %v10227_v34 = vrot.slane %v5955_v26, 9 }
 0x64f   : > { %v4009_v36 = vpop.permute.xlu1 %4008 }
 0x650   : > { %v5116_v10 = vsel %vm4990_vm13, %v4987_v47, %v4009_v36  ;;  %v18788_v36 = vld [vmem:[#allocation327_spill] sm:$0xff] }
 0x651   : > { %v5245_v44 = vsel %vm5119_vm15, %v5116_v10, %v4149_v63  ;;  %v4699_v47 = vsel %vm4603_vm11, %v4570_v43, %v18788_v36  ;;  %v15316_v63 = vmax.f32 %v14754_v32, %v15031_v6  ;;  %v18792_v10 = vld [vmem:[#allocation347_spill] sm:$0xff]  ;;  %v15330_v43 = vrot.slane %v7139_v38, 7  ;;  %v18795_v36 = vld [vmem:[#allocation348_spill] sm:$0xff] }
 0x652   : > { %10092 = vmatmul.msk.bf16.gmra.mxu3 %vm5263_vm0, %v5245_v44  ;;  %v15328_v44 = vsel %vm4732_vm12, %v4635_v23, %v18792_v10  ;;  %v7136_v32 = vmax.f32 %v15214_v21, %v10222_v52  ;;  %v7201_v6 = vmax.f32 %v6000_v2, %v10287_v30  ;;  %v4762_v19 = vsel %vm4732_vm12, %v4633_v1, %v18795_v36  ;;  %v18796_v2 = vld [vmem:[#allocation350_spill] sm:$0xff]  ;;  %v15366_v27 = vpop.f32.mrf.mxu2 }
 0x653   : > { %v10286_v23 = vrot.slane %v15241_v50, 9  ;;  %v5957_v10 = vrot.slane %v15299_v48, 6  ;;  %v6003_v54 = vrot.slane %v15316_v63, 2  ;;  %v15347_v60 = vsel %vm4732_vm12, %v4667_v35, %v18796_v2  ;;  %v3913_v52 = vpop.permute.xlu0 %3912  ;;  %18797 = vst [vmem:[#allocation46_spill] sm:$0xff] %v15366_v27 }
 0x654   : > { %v7977_v38 = vsel %vm7525_vm1, %v15311_v18, %v7136_v32  ;;  %v7984_v51 = vsel %vm7525_vm1, %v15330_v43, %v7138_v46  ;;  %v15352_v30 = vrot.slane %v7201_v6, 7  ;;  %v4053_v32 = vpop.permute.xlu2 %4052  ;;  %v7202_v46 = vmax.f32 %v6001_v4, %v10288_v11  ;;  %v15376_v4 = vpop.f32.mrf.mxu3 }
 0x655   : > { %v7978_v49 = vsel %vm7527_vm2, %v15311_v18, %v7977_v38  ;;  %v7200_v35 = vmax.f32 %v15241_v50, %v10286_v23  ;;  %v10229_v2 = vrot.slane %v5957_v10, 9  ;;  %v6005_v6 = vrot.slane %v15316_v63, 6  ;;  %v18799_v50 = vld [vmem:[#allocation358_spill] sm:$0xff]  ;;  %18800 = vst [vmem:[#allocation94_spill] sm:$0xff] %v15376_v4 }
 0x656   : > { %v10291_v13 = vrot.slane %v6003_v54, 9  ;;  %v15373_v23 = vsel %vm4732_vm12, %v4699_v47, %v18799_v50  ;;  %v7979_v11 = vsel %vm7529_vm3, %v15311_v18, %v7978_v49  ;;  %v10226_v47 = vrot.slane %v15299_v48, 9  ;;  %v15391_v50 = vpop.f32.mrf.mxu1 }
 0x657   : > { %v3773_v21 = vpop.permute.xlu1 %3772  ;;  %18801 = vst [vmem:[#allocation201_spill] sm:$0xff] %v15391_v50  ;;  %v10293_v49 = vrot.slane %v6005_v6, 9 }
 0x658   : > { %v4891_v1 = vsel %vm4861_vm14, %v4762_v19, %v3773_v21  ;;  %v7985_v19 = vsel %vm7527_vm2, %v15330_v43, %v7984_v51  ;;  %v15364_v21 = vpop.f32.mrf.mxu0  ;;  %v5956_v51 = vrot.slane %v15299_v48, 4  ;;  %v7205_v4 = vmax.f32 %v6003_v54, %v10291_v13 }
 0x659   : > { %v5020_v36 = vsel %vm4990_vm13, %v4891_v1, %v3913_v52  ;;  %v18798_v1 = vld [vmem:[#allocation352_spill] sm:$0xff]  ;;  %v8201_v52 = vsel %vm7525_vm1, %v15352_v30, %v7200_v35  ;;  %v15395_v35 = vmax.f32 %v14813_v16, %v15106_v5  ;;  %v6004_v54 = vrot.slane %v15316_v63, 4 }
 0x65a   : > { %v5149_v55 = vsel %vm5119_vm15, %v5020_v36, %v4053_v32  ;;  %v4794_v38 = vsel %vm4732_vm12, %v4665_v61, %v18798_v1  ;;  %v7141_v32 = vmax.f32 %v5955_v26, %v10227_v34  ;;  %v7986_v61 = vsel %vm7529_vm3, %v15330_v43, %v7985_v19 }
 0x65b   : > { %10044 = vmatmul.msk.bf16.gmra.mxu0 %vm5263_vm0, %v5149_v55  ;;  %v8208_v55 = vsel %vm7525_vm1, %v15354_v62, %v7202_v46  ;;  %v7143_v36 = vmax.f32 %v5957_v10, %v10229_v2  ;;  %v15389_v1 = vmax.f32 %v14772_v0, %v15069_v3  ;;  %v4923_v26 = vsel %vm4861_vm14, %v4794_v38, %v15289_v17  ;;  %v4085_v2 = vpop.permute.xlu0 %4084 }
 0x65c   : > { %v8202_v19 = vsel %vm7527_vm2, %v15352_v30, %v8201_v52  ;;  %v8209_v10 = vsel %vm7527_vm2, %v15354_v62, %v8208_v55  ;;  %v10228_v0 = vrot.slane %v5956_v51, 9  ;;  %v15404_v46 = vrot.slane %v7141_v32, 7 }
 0x65d   : > { %v10290_v16 = vrot.slane %v15316_v63, 9  ;;  %v15411_v17 = vsel %vm7531_vm4, %v15311_v18, %v7979_v11  ;;  %v15413_v13 = vrot.slane %v7143_v36, 7  ;;  %v5856_v38 = vrot.slane %v15389_v1, 2 }
 0x65e   : > { %v5858_v52 = vrot.slane %v15389_v1, 6  ;;  %v7140_v55 = vmax.f32 %v15299_v48, %v10226_v47  ;;  %v7207_v32 = vmax.f32 %v6005_v6, %v10293_v49  ;;  %v8210_v18 = vsel %vm7529_vm3, %v15354_v62, %v8209_v10  ;;  %v15436_v47 = vpop.f32.mrf.mxu2 }
 0x65f   : > { %v3945_v34 = vpop.permute.xlu1 %3944  ;;  %v7142_v11 = vmax.f32 %v5956_v51, %v10228_v0  ;;  %v5906_v36 = vrot.slane %v15395_v35, 6  ;;  %v7204_v48 = vmax.f32 %v15316_v63, %v10290_v16  ;;  %v15432_v6 = vmax.f32 %v14810_v20, %v15091_v7  ;;  %18803 = vst [vmem:[#allocation326_spill] sm:$0xff] %v15436_v47  ;;  %v15441_v0 = vpop.f32.mrf.mxu1 }
 0x660   : > { %v5052_v3 = vsel %vm4990_vm13, %v4923_v26, %v3945_v34  ;;  %v15419_v26 = vrot.slane %v7205_v4, 7  ;;  %v5904_v34 = vrot.slane %v15395_v35, 2  ;;  %v15434_v4 = vpop.f32.mrf.mxu0  ;;  %v5857_v51 = vrot.slane %v15389_v1, 4 }
 0x661   : > { %v5181_v5 = vsel %vm5119_vm15, %v5052_v3, %v4085_v2  ;;  %v8203_v3 = vsel %vm7529_vm3, %v15352_v30, %v8202_v19  ;;  %v7991_v2 = vsel %vm7525_vm1, %v15404_v46, %v7140_v55  ;;  %18802 = vst [vmem:[#allocation279_spill] sm:$0xff] %v15434_v4  ;;  %v7998_v49 = vsel %vm7525_vm1, %v15413_v13, %v7142_v11  ;;  %v15443_v55 = vpop.f32.mrf.mxu3 }
 0x662   : > { %10060 = vmatmul.msk.bf16.gmra.mxu1 %vm5263_vm0, %v5181_v5  ;;  %v10292_v5 = vrot.slane %v6004_v54, 9  ;;  %v10095_v19 = vrot.slane %v5856_v38, 9  ;;  %v10097_v10 = vrot.slane %v5858_v52, 9  ;;  %18804 = vst [vmem:[#allocation190_spill] sm:$0xff] %v15443_v55  ;;  %v15447_v63 = vsel %vm7531_vm4, %v15330_v43, %v7986_v61 }
 0x663   : > { %v8215_v20 = vsel %vm7525_vm1, %v15419_v26, %v7204_v48  ;;  %v15451_v7 = vrot.slane %v7207_v32, 7  ;;  %v10159_v16 = vrot.slane %v5904_v34, 9  ;;  %v15457_v11 = vsel %vm7531_vm4, %v15352_v30, %v8203_v3  ;;  %v15465_v55 = vpop.permute.xlu0 %3870 }
 0x664   : > { %v15461_v47 = vsel %vm7531_vm4, %v15354_v62, %v8210_v18  ;;  %v7992_v43 = vsel %vm7527_vm2, %v15404_v46, %v7991_v2  ;;  %v10161_v61 = vrot.slane %v5906_v36, 9  ;;  %v7999_v32 = vsel %vm7527_vm2, %v15413_v13, %v7998_v49 }
 0x665   : > { %v7206_v48 = vmax.f32 %v6004_v54, %v10292_v5  ;;  %v10094_v27 = vrot.slane %v15389_v1, 9  ;;  %v5859_v4 = vrot.slane %v15432_v6, 2  ;;  %v8216_v30 = vsel %vm7527_vm2, %v15419_v26, %v8215_v20 }
 0x666   : > { %v10096_v3 = vrot.slane %v5857_v51, 9  ;;  %v7009_v62 = vmax.f32 %v5856_v38, %v10095_v19  ;;  %v7011_v18 = vmax.f32 %v5858_v52, %v10097_v10  ;;  %v5905_v33 = vrot.slane %v15395_v35, 4  ;;  %v3839_v38 = vpop.permute.xlu2 %3838 }
 0x667   : > { %v15453_v50 = vpop.permute.xlu1 %3730  ;;  %v8222_v2 = vsel %vm7525_vm1, %v15451_v7, %v7206_v48  ;;  %v7073_v57 = vmax.f32 %v5904_v34, %v10159_v16  ;;  %v15478_v49 = vmax.f32 %v14862_v22, %v15143_v42  ;;  %v7993_v54 = vsel %vm7529_vm3, %v15404_v46, %v7992_v43  ;;  %v15491_v42 = vpop.f32.mrf.mxu2 }
 0x668   : > { %v10158_v5 = vrot.slane %v15395_v35, 9  ;;  %v7075_v58 = vmax.f32 %v5906_v36, %v10161_v61  ;;  %v5861_v20 = vrot.slane %v15432_v6, 6  ;;  %v8000_v52 = vsel %vm7529_vm3, %v15413_v13, %v7999_v32  ;;  %v15489_v22 = vpop.f32.mrf.mxu0  ;;  %18806 = vst [vmem:[#allocation110_spill] sm:$0xff] %v15491_v42 }
 0x669   : > { %v8217_v19 = vsel %vm7529_vm3, %v15419_v26, %v8216_v30  ;;  %v7008_v34 = vmax.f32 %v15389_v1, %v10094_v27  ;;  %v10099_v10 = vrot.slane %v5859_v4, 9  ;;  %18805 = vst [vmem:[#allocation102_spill] sm:$0xff] %v15489_v22  ;;  %v8223_v16 = vsel %vm7527_vm2, %v15451_v7, %v8222_v2  ;;  %v15499_v48 = vpop.f32.mrf.mxu3 }
 0x66a   : > { %v7010_v36 = vmax.f32 %v5857_v51, %v10096_v3  ;;  %v15495_v43 = vrot.slane %v7009_v62, 7  ;;  %v15497_v61 = vrot.slane %v7011_v18, 7  ;;  %18807 = vst [vmem:[#allocation18_spill] sm:$0xff] %v15499_v48  ;;  %v10160_v32 = vrot.slane %v5905_v33, 9  ;;  %v15509_v3 = vpop.f32.mrf.mxu1 }
 0x66b   : > { %v15501_v41 = vrot.slane %v7073_v57, 7  ;;  %v5907_v27 = vrot.slane %v15478_v49, 2  ;;  %v4957_v1 = vsel %vm4861_vm14, %v15373_v23, %v3839_v38  ;;  %v7072_v42 = vmax.f32 %v15395_v35, %v10158_v5  ;;  %v4119_v18 = vpop.permute.xlu0 %4118 }
 0x66c   : > { %v15507_v22 = vrot.slane %v7075_v58, 7  ;;  %v10101_v51 = vrot.slane %v5861_v20, 9  ;;  %v7013_v2 = vmax.f32 %v5859_v4, %v10099_v10  ;;  %v5909_v57 = vrot.slane %v15478_v49, 6 }
 0x66d   : > { %v15515_v48 = vmax.f32 %v14780_v29, %v15074_v39  ;;  %v15520_v35 = vsel %vm7531_vm4, %v15404_v46, %v7993_v54  ;;  %v7526_v58 = vsel %vm7525_vm1, %v15495_v43, %v7008_v34  ;;  %v7536_v5 = vsel %vm7525_vm1, %v15497_v61, %v7010_v36 }
 0x66e   : > { %18808 = vst [vmem:[#allocation229_spill] sm:$0xff] %v15520_v35  ;;  %v5860_v4 = vrot.slane %v15432_v6, 4  ;;  %v7074_v38 = vmax.f32 %v5905_v33, %v10160_v32  ;;  %v7753_v29 = vsel %vm7525_vm1, %v15501_v41, %v7072_v42  ;;  %v10098_v39 = vrot.slane %v15432_v6, 9 }
 0x66f   : > { %v3979_v30 = vpop.permute.xlu1 %3978  ;;  %v10163_v10 = vrot.slane %v5907_v27, 9  ;;  %v15533_v46 = vsel %vm7531_vm4, %v15413_v13, %v8000_v52  ;;  %v15537_v54 = vsel %vm7531_vm4, %v15419_v26, %v8217_v19  ;;  %v8224_v34 = vsel %vm7529_vm3, %v15451_v7, %v8223_v16 }
 0x670   : > { %v5086_v62 = vsel %vm4990_vm13, %v4957_v1, %v3979_v30  ;;  %18809 = vst [vmem:[#allocation293_spill] sm:$0xff] %v15533_v46  ;;  %v7015_v36 = vmax.f32 %v5861_v20, %v10101_v51  ;;  %v7760_v33 = vsel %vm7525_vm1, %v15507_v22, %v7074_v38  ;;  %v7542_v32 = vrot.slane %v7013_v2, 7 }
 0x671   : > { %v5215_v23 = vsel %vm5119_vm15, %v5086_v62, %v4119_v18  ;;  %18810 = vst [vmem:[#allocation330_spill] sm:$0xff] %v15537_v54  ;;  %v10165_v42 = vrot.slane %v5909_v57, 9  ;;  %v5958_v1 = vrot.slane %v15515_v48, 2  ;;  %v7528_v30 = vsel %vm7527_vm2, %v15495_v43, %v7526_v58  ;;  %v15553_v62 = vpop.f32.mrf.mxu0  ;;  %v15555_v18 = vpop.f32.mrf.mxu2 }
 0x672   : > { %10077 = vmatmul.msk.bf16.gmra.mxu2 %vm5263_vm0, %v5215_v23  ;;  %v7537_v13 = vsel %vm7527_vm2, %v15497_v61, %v7536_v5  ;;  %v7754_v26 = vsel %vm7527_vm2, %v15501_v41, %v7753_v29  ;;  %v10100_v52 = vrot.slane %v5860_v4, 9  ;;  %v7012_v19 = vmax.f32 %v15432_v6, %v10098_v39  ;;  %18811 = vst [vmem:[#allocation7_spill] sm:$0xff] %v15553_v62  ;;  %v15566_v6 = vpop.f32.mrf.mxu1  ;;  %v15568_v38 = vpop.f32.mrf.mxu3 }
 0x673   : > { %v5908_v20 = vrot.slane %v15478_v49, 4  ;;  %v10162_v16 = vrot.slane %v15478_v49, 9  ;;  %v7077_v51 = vmax.f32 %v5907_v27, %v10163_v10  ;;  %18812 = vst [vmem:[#allocation36_spill] sm:$0xff] %v15555_v18  ;;  %v7761_v2 = vsel %vm7527_vm2, %v15507_v22, %v7760_v33 }
 0x674   : > { %v15559_v23 = vrot.slane %v7015_v36, 7  ;;  %v5960_v58 = vrot.slane %v15515_v48, 6  ;;  %v15564_v5 = vmax.f32 %v14786_v40, %v15076_v45  ;;  %18813 = vst [vmem:[#allocation171_spill] sm:$0xff] %v15566_v6  ;;  %v15572_v27 = vsel %vm7531_vm4, %v15451_v7, %v8224_v34 }
 0x675   : > { %18814 = vst [vmem:[#allocation244_spill] sm:$0xff] %v15568_v38  ;;  %v7543_v29 = vsel %vm7525_vm1, %v7542_v32, %v7012_v19  ;;  %v7079_v39 = vmax.f32 %v5909_v57, %v10165_v42  ;;  %v10231_v10 = vrot.slane %v5958_v1, 9  ;;  %v7530_v36 = vsel %vm7529_vm3, %v15495_v43, %v7528_v30 }
 0x676   : > { %18815 = vst [vmem:[#allocation298_spill] sm:$0xff] %v15572_v27  ;;  %v7538_v33 = vsel %vm7529_vm3, %v15497_v61, %v7537_v13  ;;  %v7755_v40 = vsel %vm7529_vm3, %v15501_v41, %v7754_v26  ;;  %v7014_v45 = vmax.f32 %v5860_v4, %v10100_v52  ;;  %v7762_v38 = vsel %vm7529_vm3, %v15507_v22, %v7761_v2  ;;  %v4011_v2 = vpop.permute.xlu2 %4010 }
 0x677   : > { %v10164_v18 = vrot.slane %v5908_v20, 9  ;;  %v7076_v7 = vmax.f32 %v15478_v49, %v10162_v16  ;;  %v15584_v34 = vrot.slane %v7077_v51, 7  ;;  %v7544_v57 = vsel %vm7527_vm2, %v7542_v32, %v7543_v29 }
 0x678   : > { %v7550_v42 = vsel %vm7525_vm1, %v15559_v23, %v7014_v45  ;;  %v10233_v30 = vrot.slane %v5960_v58, 9  ;;  %v6006_v13 = vrot.slane %v15564_v5, 2  ;;  %v15590_v19 = vrot.slane %v7079_v39, 7 }
 0x679   : > { %v7145_v26 = vmax.f32 %v5958_v1, %v10231_v10  ;;  %v6008_v4 = vrot.slane %v15564_v5, 6  ;;  %v15595_v52 = vmax.f32 %v14815_v8, %v15102_v37  ;;  %v15599_v49 = vsel %vm7531_vm4, %v15495_v43, %v7530_v36  ;;  %v15614_v43 = vpop.f32.mrf.mxu0  ;;  %v15616_v10 = vpop.f32.mrf.mxu2 }
 0x67a   : > { %v15603_v16 = vsel %vm7531_vm4, %v15497_v61, %v7538_v33  ;;  %v15607_v51 = vsel %vm7531_vm4, %v15501_v41, %v7755_v40  ;;  %v5959_v1 = vrot.slane %v15515_v48, 4  ;;  %v7545_v29 = vsel %vm7529_vm3, %v7542_v32, %v7544_v57  ;;  %18816 = vst [vmem:[#allocation138_spill] sm:$0xff] %v15614_v43  ;;  %v15624_v40 = vpop.f32.mrf.mxu3 }
 0x67b   : > { %v7078_v39 = vmax.f32 %v5908_v20, %v10164_v18  ;;  %v7767_v8 = vsel %vm7525_vm1, %v15584_v34, %v7076_v7  ;;  %v10230_v37 = vrot.slane %v15515_v48, 9  ;;  %18817 = vst [vmem:[#allocation78_spill] sm:$0xff] %v15616_v10  ;;  %v15620_v61 = vsel %vm7531_vm4, %v15507_v22, %v7762_v38 }
 0x67c   : > { %v7551_v41 = vsel %vm7527_vm2, %v15559_v23, %v7550_v42  ;;  %v7147_v36 = vmax.f32 %v5960_v58, %v10233_v30  ;;  %v10295_v33 = vrot.slane %v6006_v13, 9  ;;  %18818 = vst [vmem:[#allocation70_spill] sm:$0xff] %v15624_v40  ;;  %v15628_v18 = vrot.slane %v7145_v26, 7  ;;  %v15636_v42 = vpop.f32.mrf.mxu1 }
 0x67d   : > { %v7774_v20 = vsel %vm7525_vm1, %v15590_v19, %v7078_v39  ;;  %v10297_v45 = vrot.slane %v6008_v4, 9  ;;  %v5961_v7 = vrot.slane %v15595_v52, 2  ;;  %v15632_v57 = vsel %vm7531_vm4, %v7542_v32, %v7545_v29  ;;  %18820 = vst [vmem:[#allocation194_spill] sm:$0xff] %v15636_v42  ;;  %v3807_v29 = vpop.permute.xlu0 %3806 }
 0x67e   : > { %18819 = vst [vmem:[#allocation45_spill] sm:$0xff] %v15632_v57  ;;  %v7768_v22 = vsel %vm7527_vm2, %v15584_v34, %v7767_v8  ;;  %v10232_v38 = vrot.slane %v5959_v1, 9  ;;  %v4860_v58 = vsel %vm4732_vm12, %v15324_v14, %v15453_v50  ;;  %v7144_v30 = vmax.f32 %v15515_v48, %v10230_v37 }
 0x67f   : > { %v6007_v26 = vrot.slane %v15564_v5, 4  ;;  %v15645_v39 = vmax.f32 %v14850_v59, %v15124_v24  ;;  %v4989_v32 = vsel %vm4861_vm14, %v4860_v58, %v15465_v55  ;;  %v7552_v8 = vsel %vm7529_vm3, %v15559_v23, %v7551_v41 }
 0x680   : > { %v7775_v40 = vsel %vm7527_vm2, %v15590_v19, %v7774_v20  ;;  %v15653_v10 = vrot.slane %v7147_v36, 7  ;;  %v7209_v14 = vmax.f32 %v6006_v13, %v10295_v33  ;;  %v8005_v50 = vsel %vm7525_vm1, %v15628_v18, %v7144_v30  ;;  %v4151_v41 = vpop.permute.xlu1 %4150 }
 0x681   : > { %v7211_v48 = vmax.f32 %v6008_v4, %v10297_v45  ;;  %v5963_v59 = vrot.slane %v15595_v52, 6  ;;  %v10235_v24 = vrot.slane %v5961_v7, 9  ;;  %v7769_v55 = vsel %vm7529_vm3, %v15584_v34, %v7768_v22 }
 0x682   : > { %v7146_v37 = vmax.f32 %v5959_v1, %v10232_v38  ;;  %v10294_v58 = vrot.slane %v15564_v5, 9  ;;  %v5118_v43 = vsel %vm4990_vm13, %v4989_v32, %v4011_v2  ;;  %v10296_v20 = vrot.slane %v6007_v26, 9  ;;  %v3775_v38 = vpop.permute.xlu2 %3774  ;;  %v15693_v42 = vpop.f32.mrf.mxu3 }
 0x683   : > { %v5862_v36 = vrot.slane %v15645_v39, 2  ;;  %v5864_v13 = vrot.slane %v15645_v39, 6  ;;  %v5247_v33 = vsel %vm5119_vm15, %v5118_v43, %v4151_v41  ;;  %v7776_v4 = vsel %vm7529_vm3, %v15590_v19, %v7775_v40  ;;  %v15677_v41 = vpop.f32.mrf.mxu0  ;;  %v15679_v40 = vpop.f32.mrf.mxu2  ;;  %18826 = vst [vmem:[#allocation283_spill] sm:$0xff] %v15693_v42 }
 0x684   : > { %v8006_v45 = vsel %vm7527_vm2, %v15628_v18, %v8005_v50  ;;  %v15669_v22 = vrot.slane %v7209_v14, 7  ;;  %v5962_v1 = vrot.slane %v15595_v52, 4  ;;  %10093 = vmatmul.msk.bf16.gmra.mxu3 %vm5263_vm0, %v5247_v33  ;;  %v8012_v2 = vsel %vm7525_vm1, %v15653_v10, %v7146_v37  ;;  %18821 = vst [vmem:[#allocation249_spill] sm:$0xff] %v15677_v41 }
 0x685   : > { %v15675_v30 = vrot.slane %v7211_v48, 7  ;;  %v10237_v32 = vrot.slane %v5963_v59, 9  ;;  %v7149_v43 = vmax.f32 %v5961_v7, %v10235_v24  ;;  %18822 = vst [vmem:[#allocation321_spill] sm:$0xff] %v15679_v40  ;;  %v15683_v14 = vsel %vm7531_vm4, %v15559_v23, %v7552_v8  ;;  %v15691_v48 = vpop.f32.mrf.mxu1  ;;  %v4055_v42 = vpop.permute.xlu0 %4054 }
 0x686   : > { %18823 = vst [vmem:[#allocation197_spill] sm:$0xff] %v15683_v14  ;;  %v15687_v50 = vsel %vm7531_vm4, %v15584_v34, %v7769_v55  ;;  %v7208_v33 = vmax.f32 %v15564_v5, %v10294_v58  ;;  %v5863_v37 = vrot.slane %v15645_v39, 4  ;;  %v7210_v7 = vmax.f32 %v6007_v26, %v10296_v20 }
 0x687   : > { %18824 = vst [vmem:[#allocation139_spill] sm:$0xff] %v15687_v50  ;;  %v10234_v24 = vrot.slane %v15595_v52, 9  ;;  %v10103_v40 = vrot.slane %v5862_v36, 9  ;;  %v10105_v41 = vrot.slane %v5864_v13, 9  ;;  %v15698_v23 = vsel %vm7531_vm4, %v15590_v19, %v7776_v4 }
 0x688   : > { %18825 = vst [vmem:[#allocation228_spill] sm:$0xff] %v15691_v48  ;;  %v15702_v34 = vsel %vm7529_vm3, %v15628_v18, %v8006_v45  ;;  %v8013_v5 = vsel %vm7527_vm2, %v15653_v10, %v8012_v2  ;;  %v8229_v8 = vsel %vm7525_vm1, %v15669_v22, %v7208_v33  ;;  %v8236_v26 = vsel %vm7525_vm1, %v15675_v30, %v7210_v7  ;;  %v3915_v48 = vpop.permute.xlu1 %3914 }
 0x689   : > { %18827 = vst [vmem:[#allocation163_spill] sm:$0xff] %v15698_v23  ;;  %v10236_v55 = vrot.slane %v5962_v1, 9  ;;  %v7151_v58 = vmax.f32 %v5963_v59, %v10237_v32  ;;  %v15710_v20 = vrot.slane %v7149_v43, 7  ;;  %v10102_v19 = vrot.slane %v15645_v39, 9 }
 0x68a   : > { %v10104_v4 = vrot.slane %v5863_v37, 9  ;;  %v15715_v45 = vmax.f32 %v14819_v31, %v15108_v25  ;;  %v4893_v2 = vsel %vm4861_vm14, %v15328_v44, %v3775_v38  ;;  %v7148_v33 = vmax.f32 %v15595_v52, %v10234_v24  ;;  %v3947_v25 = vpop.permute.xlu2 %3946 }
 0x68b   : > { %v7017_v62 = vmax.f32 %v5862_v36, %v10103_v40  ;;  %v7019_v7 = vmax.f32 %v5864_v13, %v10105_v41  ;;  %v5022_v59 = vsel %vm4990_vm13, %v4893_v2, %v3915_v48  ;;  %v15723_v32 = vsel %vm7529_vm3, %v15653_v10, %v8013_v5  ;;  %v15744_v41 = vpop.f32.mrf.mxu0 }
 0x68c   : > { %v15727_v43 = vsel %vm7527_vm2, %v15669_v22, %v8229_v8  ;;  %v4925_v31 = vsel %vm4861_vm14, %v15347_v60, %v3807_v29  ;;  %v5151_v44 = vsel %vm5119_vm15, %v5022_v59, %v4055_v42  ;;  %v15734_v52 = vsel %vm7527_vm2, %v15675_v30, %v8236_v26  ;;  %18828 = vst [vmem:[#allocation337_spill] sm:$0xff] %v15744_v41  ;;  %v5628_v60 = vpop.f32.mrf.mxu2  ;;  %v5708_v48 = vpop.f32.mrf.mxu3 }
 0x68d   : > { %v15736_v36 = vmax.f32 %v5962_v1, %v10236_v55  ;;  %v15740_v13 = vsel %vm7525_vm1, %v15710_v20, %v7148_v33  ;;  %v15742_v38 = vrot.slane %v7151_v58, 7  ;;  %10045 = vmatmul.msk.bf16.gmra.mxu0 %vm5263_vm0, %v5151_v44  ;;  %v15748_v29 = vmax.f32 %v15645_v39, %v10102_v19  ;;  %v15760_v55 = vpop.f32.mrf.mxu1 }
 0x68e   : > { %v15750_v42 = vmax.f32 %v5863_v37, %v10104_v4  ;;  %v5768_v1 = vmax.f32 %v15245_v56, %v5628_v60  ;;  %v15754_v24 = vrot.slane %v7017_v62, 7  ;;  %v15756_v5 = vrot.slane %v7019_v7, 7  ;;  %18829 = vst [vmem:[#allocation22_spill] sm:$0xff] %v15760_v55 }
 0x68f   : > { %v5054_v8 = vsel %vm4990_vm13, %v4925_v31, %v3947_v25  ;;  %v5784_v26 = vmax.f32 %v15257_v9, %v5708_v48  ;;  %v6011_v9 = vrot.slane %v15715_v45, 6  ;;  %v10864_v55 = vmov 1934713408  }
 0x690   : > { %v5976_v58 = vrot.slane %v5768_v1, 2  ;;  %v5977_v39 = vrot.slane %v5768_v1, 4  ;;  %v5978_v19 = vrot.slane %v5768_v1, 6  ;;  %v10254_v37 = vrot.slane %v5768_v1, 9  ;;  %v4087_v59 = vpop.permute.xlu1 %4086 }
 0x691   : > { %v6024_v4 = vrot.slane %v5784_v26, 2  ;;  %v6025_v2 = vrot.slane %v5784_v26, 4  ;;  %v6026_v33 = vrot.slane %v5784_v26, 6  ;;  %v10318_v60 = vrot.slane %v5784_v26, 9 }
 0x692   : > { %v10255_v56 = vrot.slane %v5976_v58, 9  ;;  %v10256_v44 = vrot.slane %v5977_v39, 9  ;;  %v10257_v62 = vrot.slane %v5978_v19, 9  ;;  %v5183_v7 = vsel %vm5119_vm15, %v5054_v8, %v4087_v59 }
 0x693   : > { %v10319_v40 = vrot.slane %v6024_v4, 9  ;;  %v10320_v31 = vrot.slane %v6025_v2, 9  ;;  %v10321_v25 = vrot.slane %v6026_v33, 9  ;;  %10061 = vmatmul.msk.bf16.gmra.mxu1 %vm5263_vm0, %v5183_v7  ;;  %v8554_v27 = vunpack.c.l.s4 %v10864_v55  ;;  %v15771_v35 = vpop.f32.mrf.mxu0 }
 0x694   : > { %v7169_v48 = vmax.f32 %v5976_v58, %v10255_v56  ;;  %v7171_v41 = vmax.f32 %v5978_v19, %v10257_v62  ;;  %v18830_v46 = vrot.slane %v15715_v45, 2  ;;  %v15769_v14 = vmax.f32 %v14875_v28, %v15165_v12  ;;  %18831 = vst [vmem:[#allocation79_spill] sm:$0xff] %v15771_v35 }
 0x695   : > { %v7233_v6 = vmax.f32 %v6024_v4, %v10319_v40  ;;  %v7235_v8 = vmax.f32 %v6026_v33, %v10321_v25  ;;  %v7168_v59 = vmax.f32 %v5768_v1, %v10254_v37  ;;  %v7170_v50 = vmax.f32 %v5977_v39, %v10256_v44  ;;  %v15773_v55 = vpop.f32.mrf.mxu1 }
 0x696   : > { %v10299_v23 = vrot.slane %v18830_v46, 9  ;;  %v8088_v57 = vrot.slane %v7169_v48, 7  ;;  %v8095_v54 = vrot.slane %v7171_v41, 7  ;;  %v7232_v7 = vmax.f32 %v5784_v26, %v10318_v60 }
 0x697   : > { %v7234_v58 = vmax.f32 %v6025_v2, %v10320_v31  ;;  %v8312_v19 = vrot.slane %v7233_v6, 7  ;;  %v8319_v56 = vrot.slane %v7235_v8, 7  ;;  %v15777_v28 = vunpack.c.0.s8 %v8554_v27 }
 0x698   : > { %v8089_v46 = vsel %vm7525_vm1, %v8088_v57, %v7168_v59  ;;  %v8096_v62 = vsel %vm7525_vm1, %v8095_v54, %v7170_v50  ;;  %v10301_v25 = vrot.slane %v6011_v9, 9  ;;  %v18832_v48 = vrot.slane %v15715_v45, 2 }
 0x699   : > { %v8090_v12 = vsel %vm7527_vm2, %v8088_v57, %v8089_v46  ;;  %v8097_v40 = vsel %vm7527_vm2, %v8095_v54, %v8096_v62  ;;  %v8313_v41 = vsel %vm7525_vm1, %v8312_v19, %v7232_v7  ;;  %v8320_v1 = vsel %vm7525_vm1, %v8319_v56, %v7234_v58 }
 0x69a   : > { %v8091_v6 = vsel %vm7529_vm3, %v8088_v57, %v8090_v12  ;;  %v8098_v26 = vsel %vm7529_vm3, %v8095_v54, %v8097_v40  ;;  %v8314_v39 = vsel %vm7527_vm2, %v8312_v19, %v8313_v41  ;;  %v8321_v37 = vsel %vm7527_vm2, %v8319_v56, %v8320_v1 }
 0x69b   : > { %v8092_v50 = vsel %vm7531_vm4, %v8088_v57, %v8091_v6  ;;  %v8099_v27 = vsel %vm7531_vm4, %v8095_v54, %v8098_v26  ;;  %v8315_v4 = vsel %vm7529_vm3, %v8312_v19, %v8314_v39  ;;  %v8322_v2 = vsel %vm7529_vm3, %v8319_v56, %v8321_v37  ;;  %v5468_v12 = vpop.f32.mrf.mxu0 }
 0x69c   : > { %v8567_v33 = vrot.slane %v8092_v50, 4  ;;  %v8599_v44 = vrot.slane %v8099_v27, 4  ;;  %v8316_v60 = vsel %vm7531_vm4, %v8312_v19, %v8315_v4  ;;  %v8323_v31 = vsel %vm7531_vm4, %v8319_v56, %v8322_v2 }
 0x69d   : > { %v7213_v8 = vmax.f32 %v18832_v48, %v10299_v23  ;;  %v8575_v59 = vrot.slane %v8316_v60, 4  ;;  %v8607_v7 = vrot.slane %v8323_v31, 4  ;;  %v6010_v57 = vrot.slane %v15715_v45, 4  ;;  %v15840_v26 = vpop.f32.mrf.mxu1 }
 0x69e   : > { %v5910_v54 = vrot.slane %v15769_v14, 2  ;;  %v8568_v58 = vsel %vm8551_vm5, %v8567_v33, %v15411_v17  ;;  %v15801_v46 = vsel %vm8551_vm5, %v8599_v44, %v15447_v63  ;;  %v10298_v19 = vrot.slane %v15715_v45, 9  ;;  %18833 = vst [vmem:[#allocation6_spill] sm:$0xff] %v15840_v26 }
 0x69f   : > { %v15805_v56 = vperm.slane %v8568_v58, %v15777_v28  ;;  %v8576_v23 = vsel %vm8551_vm5, %v8575_v59, %v15457_v11  ;;  %v15811_v62 = vsel %vm8551_vm5, %v8607_v7, %v15461_v47  ;;  %v8020_v17 = vsel %vm7527_vm2, %v15710_v20, %v15740_v13 }
 0x6a0   : > { %v8026_v63 = vsel %vm7525_vm1, %v15742_v38, %v15736_v36  ;;  %v7557_v40 = vsel %vm7525_vm1, %v15754_v24, %v15748_v29  ;;  %v15823_v41 = vperm.slane %v8576_v23, %v15777_v28  ;;  %v7564_v47 = vsel %vm7525_vm1, %v15756_v5, %v15750_v42 }
 0x6a1   : > { %v7215_v11 = vmax.f32 %v6011_v9, %v10301_v25  ;;  %v8242_v1 = vrot.slane %v7213_v8, 7  ;;  %v5912_v6 = vrot.slane %v15769_v14, 6  ;;  %9071 = vst [vmem:[#allocation1 + $0x2] ss:$4 sm:$0xff] %v15805_v56  ;;  %v15833_v36 = vsel %vm7531_vm4, %v15628_v18, %v15702_v34 }
 0x6a2   : > { %v15838_v13 = vsel %vm7531_vm4, %v15653_v10, %v15723_v32  ;;  %v10167_v29 = vrot.slane %v5910_v54, 9  ;;  %9073 = vst [vmem:[#allocation1 + $0x3] ss:$4 sm:$0xff] %v15823_v41  ;;  %v15844_v42 = vmax.f32 %v15364_v21, %v5468_v12  ;;  %v8231_v9 = vsel %vm7529_vm3, %v15669_v22, %v15727_v43 }
 0x6a3   : > { %v8238_v18 = vsel %vm7529_vm3, %v15675_v30, %v15734_v52  ;;  %v10300_v34 = vrot.slane %v6010_v57, 9  ;;  %v7212_v10 = vmax.f32 %v15715_v45, %v10298_v19  ;;  %v8021_v32 = vsel %vm7529_vm3, %v15710_v20, %v8020_v17 }
 0x6a4   : > { %v8027_v39 = vsel %vm7527_vm2, %v15742_v38, %v8026_v63  ;;  %v7558_v21 = vsel %vm7527_vm2, %v15754_v24, %v7557_v40  ;;  %v7565_v37 = vsel %vm7527_vm2, %v15756_v5, %v7564_v47  ;;  %v15862_v50 = vrot.slane %v7215_v11, 7 }
 0x6a5   : > { %v8243_v43 = vsel %vm7525_vm1, %v8242_v1, %v7212_v10  ;;  %v5911_v52 = vrot.slane %v15769_v14, 4  ;;  %v10169_v27 = vrot.slane %v5912_v6, 9  ;;  %v15867_v45 = vsel %vm7531_vm4, %v15669_v22, %v8231_v9  ;;  %v5548_v19 = vpop.f32.mrf.mxu1 }
 0x6a6   : > { %v15871_v4 = vsel %vm7531_vm4, %v15675_v30, %v8238_v18  ;;  %v7081_v2 = vmax.f32 %v5910_v54, %v10167_v29  ;;  %v5880_v33 = vrot.slane %v15844_v42, 2  ;;  %v15876_v44 = vsel %vm7531_vm4, %v15710_v20, %v8021_v32 }
 0x6a7   : > { %v8028_v60 = vsel %vm7529_vm3, %v15742_v38, %v8027_v39  ;;  %v7214_v31 = vmax.f32 %v6010_v57, %v10300_v34  ;;  %v15882_v25 = vmax.f32 %v14867_v53, %v15152_v15  ;;  %v7559_v22 = vsel %vm7529_vm3, %v15754_v24, %v7558_v21 }
 0x6a8   : > { %v7566_v30 = vsel %vm7529_vm3, %v15756_v5, %v7565_v37  ;;  %v8244_v48 = vsel %vm7527_vm2, %v8242_v1, %v8243_v43  ;;  %v10166_v8 = vrot.slane %v15769_v14, 9  ;;  %v10168_v59 = vrot.slane %v5911_v52, 9  ;;  %v18834_v37 = vld [vmem:[#allocation19_spill] sm:$0xff]  ;;  %v18835_v43 = vld [vmem:[#allocation254_spill] sm:$0xff] }
 0x6a9   : > { %v8250_v20 = vsel %vm7525_vm1, %v15862_v50, %v7214_v31  ;;  %v7083_v7 = vmax.f32 %v5912_v6, %v10169_v27  ;;  %v5882_v57 = vrot.slane %v15844_v42, 6  ;;  %v15895_v53 = vsel %vm7531_vm4, %v15742_v38, %v8028_v60 }
 0x6aa   : > { %v15897_v15 = vrot.slane %v7081_v2, 7  ;;  %v5881_v54 = vrot.slane %v15844_v42, 4  ;;  %v10127_v58 = vrot.slane %v5880_v33, 9  ;;  %v15902_v23 = vsel %vm7531_vm4, %v15754_v24, %v7559_v22 }
 0x6ab   : > { %v15906_v12 = vsel %vm7531_vm4, %v15756_v5, %v7566_v30  ;;  %v8245_v17 = vsel %vm7529_vm3, %v8242_v1, %v8244_v48  ;;  %v5865_v63 = vrot.slane %v15882_v25, 2  ;;  %v8251_v38 = vsel %vm7527_vm2, %v15862_v50, %v8250_v20 }
 0x6ac   : > { %v7080_v40 = vmax.f32 %v15769_v14, %v10166_v8  ;;  %v10126_v47 = vrot.slane %v15844_v42, 9  ;;  %v10129_v11 = vrot.slane %v5882_v57, 9  ;;  %v7082_v6 = vmax.f32 %v5911_v52, %v10168_v59 }
 0x6ad   : > { %v15914_v29 = vrot.slane %v7083_v7, 7  ;;  %v5866_v24 = vrot.slane %v15882_v25, 4  ;;  %v5752_v5 = vmax.f32 %v15441_v0, %v5548_v19  ;;  %v15919_v9 = vsel %vm7531_vm4, %v8242_v1, %v8245_v17 }
 0x6ae   : > { %v7781_v18 = vsel %vm7525_vm1, %v15897_v15, %v7080_v40  ;;  %v10128_v34 = vrot.slane %v5881_v54, 9  ;;  %v7041_v10 = vmax.f32 %v5880_v33, %v10127_v58  ;;  %v15925_v14 = vsel %vm7529_vm3, %v15862_v50, %v8251_v38 }
 0x6af   : > { %v5867_v32 = vrot.slane %v15882_v25, 6  ;;  %v10106_v39 = vrot.slane %v15882_v25, 9  ;;  %v10107_v21 = vrot.slane %v5865_v63, 9  ;;  %v15931_v0 = vmax.f32 %v18835_v43, %v18834_v37 }
 0x6b0   : > { %v7040_v1 = vmax.f32 %v15844_v42, %v10126_v47  ;;  %v7043_v52 = vmax.f32 %v5882_v57, %v10129_v11  ;;  %v7640_v27 = vrot.slane %v7041_v10, 7  ;;  %v7782_v2 = vsel %vm7527_vm2, %v15897_v15, %v7781_v18 }
 0x6b1   : > { %v7788_v33 = vsel %vm7525_vm1, %v15914_v29, %v7082_v6  ;;  %v10108_v60 = vrot.slane %v5866_v24, 9  ;;  %v5928_v31 = vrot.slane %v5752_v5, 2  ;;  %v7042_v22 = vmax.f32 %v5881_v54, %v10128_v34 }
 0x6b2   : > { %v7641_v30 = vsel %vm7525_vm1, %v7640_v27, %v7040_v1  ;;  %v7647_v48 = vrot.slane %v7043_v52, 7  ;;  %v5929_v8 = vrot.slane %v5752_v5, 4  ;;  %v10109_v20 = vrot.slane %v5867_v32, 9 }
 0x6b3   : > { %v7021_v59 = vmax.f32 %v5865_v63, %v10107_v21  ;;  %v7642_v42 = vsel %vm7527_vm2, %v7640_v27, %v7641_v30  ;;  %v5930_v7 = vrot.slane %v5752_v5, 6  ;;  %v5913_v57 = vrot.slane %v15931_v0, 2 }
 0x6b4   : > { %v7643_v58 = vsel %vm7529_vm3, %v7640_v27, %v7642_v42  ;;  %v7648_v19 = vsel %vm7525_vm1, %v7647_v48, %v7042_v22  ;;  %v10191_v17 = vrot.slane %v5928_v31, 9  ;;  %v5915_v38 = vrot.slane %v15931_v0, 6 }
 0x6b5   : > { %v7644_v54 = vsel %vm7531_vm4, %v7640_v27, %v7643_v58  ;;  %v7649_v40 = vsel %vm7527_vm2, %v7647_v48, %v7648_v19  ;;  %v10190_v47 = vrot.slane %v5752_v5, 9  ;;  %v10192_v6 = vrot.slane %v5929_v8, 9 }
 0x6b6   : > { %v7650_v11 = vsel %vm7529_vm3, %v7647_v48, %v7649_v40  ;;  %v8550_v63 = vrot.slane %v7644_v54, 4  ;;  %v10193_v18 = vrot.slane %v5930_v7, 9  ;;  %v7023_v34 = vmax.f32 %v5867_v32, %v10109_v20  ;;  %v18836_v54 = vld [vmem:[#allocation8_spill] sm:$0xff]  ;;  %v18837_v40 = vld [vmem:[#allocation74_spill] sm:$0xff] }
 0x6b7   : > { %v15949_v10 = vrot.slane %v7021_v59, 7  ;;  %v7651_v21 = vsel %vm7531_vm4, %v7647_v48, %v7650_v11  ;;  %v7105_v37 = vmax.f32 %v5928_v31, %v10191_v17  ;;  %v10171_v43 = vrot.slane %v5913_v57, 9 }
 0x6b8   : > { %v8552_v1 = vsel %vm8551_vm5, %v8550_v63, %v15599_v49  ;;  %v8583_v52 = vrot.slane %v7651_v21, 4  ;;  %v7107_v27 = vmax.f32 %v5930_v7, %v10193_v18  ;;  %v10173_v22 = vrot.slane %v5915_v38, 9 }
 0x6b9   : > { %v15955_v30 = vperm.slane %v8552_v1, %v15777_v28  ;;  %v7104_v42 = vmax.f32 %v5752_v5, %v10190_v47  ;;  %v7864_v58 = vrot.slane %v7105_v37, 7  ;;  %v7020_v19 = vmax.f32 %v15882_v25, %v10106_v39 }
 0x6ba   : > { %v15960_v32 = vsel %vm8551_vm5, %v8583_v52, %v15603_v16  ;;  %v7106_v48 = vmax.f32 %v5929_v8, %v10192_v6  ;;  %v7871_v31 = vrot.slane %v7107_v27, 7  ;;  %v7783_v20 = vsel %vm7529_vm3, %v15897_v15, %v7782_v2 }
 0x6bb   : > { %v15964_v49 = vrot.slane %v7023_v34, 7  ;;  %v5914_v59 = vrot.slane %v15931_v0, 4  ;;  %9067 = vst [vmem:[#allocation1] ss:$4 sm:$0xff] %v15955_v30  ;;  %v7865_v5 = vsel %vm7525_vm1, %v7864_v58, %v7104_v42  ;;  %v7571_v39 = vsel %vm7525_vm1, %v15949_v10, %v7020_v19  ;;  %v5710_v19 = vpop.f32.mrf.mxu3 }
 0x6bc   : > { %v7085_v7 = vmax.f32 %v5913_v57, %v10171_v43  ;;  %v7866_v16 = vsel %vm7527_vm2, %v7864_v58, %v7865_v5  ;;  %v7872_v8 = vsel %vm7525_vm1, %v7871_v31, %v7106_v48  ;;  %v7087_v17 = vmax.f32 %v5915_v38, %v10173_v22 }
 0x6bd   : > { %v15975_v2 = vmax.f32 %v18837_v40, %v18836_v54  ;;  %v7867_v47 = vsel %vm7529_vm3, %v7864_v58, %v7866_v16  ;;  %v7873_v11 = vsel %vm7527_vm2, %v7871_v31, %v7872_v8  ;;  %v7022_v63 = vmax.f32 %v5866_v24, %v10108_v60  ;;  %v18839_v16 = vld [vmem:[#allocation275_spill] sm:$0xff]  ;;  %v5550_v40 = vpop.f32.mrf.mxu1 }
 0x6be   : > { %v10170_v6 = vrot.slane %v15931_v0, 9  ;;  %v7868_v57 = vsel %vm7531_vm4, %v7864_v58, %v7867_v47  ;;  %v7874_v18 = vsel %vm7529_vm3, %v7871_v31, %v7873_v11  ;;  %v7789_v38 = vsel %vm7527_vm2, %v15914_v29, %v7788_v33  ;;  %v5630_v33 = vpop.f32.mrf.mxu2 }
 0x6bf   : > { %v10172_v34 = vrot.slane %v5914_v59, 9  ;;  %v7875_v21 = vsel %vm7531_vm4, %v7871_v31, %v7874_v18  ;;  %v8559_v37 = vrot.slane %v7868_v57, 4  ;;  %v7572_v43 = vsel %vm7527_vm2, %v15949_v10, %v7571_v39  ;;  %v18842_v18 = vld [vmem:[#allocation279_spill] sm:$0xff] }
 0x6c0   : > { %v7578_v25 = vsel %vm7525_vm1, %v15964_v49, %v7022_v63  ;;  %v15991_v24 = vrot.slane %v7085_v7, 7  ;;  %v8591_v60 = vrot.slane %v7875_v21, 4  ;;  %v15993_v1 = vrot.slane %v7087_v17, 7  ;;  %v18840_v17 = vld [vmem:[#allocation196_spill] sm:$0xff]  ;;  %v18841_v63 = vld [vmem:[#allocation309_spill] sm:$0xff] }
 0x6c1   : > { %v5964_v52 = vrot.slane %v15975_v2, 2  ;;  %v5966_v27 = vrot.slane %v15975_v2, 6  ;;  %v8560_v22 = vsel %vm8551_vm5, %v8559_v37, %v15607_v51  ;;  %v16002_v42 = vsel %vm7531_vm4, %v15862_v50, %v15925_v14  ;;  %v5470_v14 = vpop.f32.mrf.mxu0 }
 0x6c2   : > { %v7084_v58 = vmax.f32 %v15931_v0, %v10170_v6  ;;  %v8564_v48 = vperm.slane %v8560_v22, %v15777_v28  ;;  %v16008_v31 = vsel %vm8551_vm5, %v8591_v60, %v15620_v61  ;;  %v7790_v5 = vsel %vm7529_vm3, %v15914_v29, %v7789_v38  ;;  %v18838_v61 = vld [vmem:[#allocation98_spill] sm:$0xff] }
 0x6c3   : > { %v7573_v51 = vsel %vm7529_vm3, %v15949_v10, %v7572_v43  ;;  %v7579_v39 = vsel %vm7527_vm2, %v15964_v49, %v7578_v25  ;;  %v7086_v50 = vmax.f32 %v5914_v59, %v10172_v34  ;;  %v16018_v0 = vsel %vm7531_vm4, %v15897_v15, %v7783_v20 }
 0x6c4   : > { %v7795_v7 = vsel %vm7525_vm1, %v15991_v24, %v7084_v58  ;;  %v16024_v8 = vmax.f32 %v18839_v16, %v18838_v61  ;;  %v16027_v54 = vmax.f32 %v18840_v17, %v5630_v33  ;;  %9069 = vst [vmem:[#allocation1 + $0x1] ss:$4 sm:$0xff] %v8564_v48  ;;  %v10239_v47 = vrot.slane %v5964_v52, 9 }
 0x6c5   : > { %v7802_v59 = vsel %vm7525_vm1, %v15993_v1, %v7086_v50  ;;  %v10241_v11 = vrot.slane %v5966_v27, 9  ;;  %v16032_v15 = vmax.f32 %v18841_v63, %v5710_v19  ;;  %v16036_v20 = vsel %vm7531_vm4, %v15914_v29, %v7790_v5 }
 0x6c6   : > { %v16040_v6 = vsel %vm7531_vm4, %v15949_v10, %v7573_v51  ;;  %v7580_v57 = vsel %vm7529_vm3, %v15964_v49, %v7579_v39  ;;  %v16045_v38 = vmax.f32 %v18842_v18, %v5470_v14  ;;  %v7796_v34 = vsel %vm7527_vm2, %v15991_v24, %v7795_v7 }
 0x6c7   : > { %v5965_v21 = vrot.slane %v15975_v2, 4  ;;  %v8557_v37 = vrot.slane %v15955_v30, 4  ;;  %v16052_v29 = vmax.f32 %v15509_v3, %v5550_v40  ;;  %v7803_v10 = vsel %vm7527_vm2, %v15993_v1, %v7802_v59 }
 0x6c8   : > { %v6012_v43 = vrot.slane %v16024_v8, 2  ;;  %v5979_v25 = vrot.slane %v16027_v54, 2  ;;  %v8565_v60 = vrot.slane %v8564_v48, 4  ;;  %v7153_v33 = vmax.f32 %v5964_v52, %v10239_v47 }
 0x6c9   : > { %v7155_v22 = vmax.f32 %v5966_v27, %v10241_v11  ;;  %v8573_v58 = vrot.slane %v15805_v56, 4  ;;  %v6027_v19 = vrot.slane %v16032_v15, 2  ;;  %v10238_v5 = vrot.slane %v15975_v2, 9 }
 0x6ca   : > { %v6014_v30 = vrot.slane %v16024_v8, 6  ;;  %v8581_v3 = vrot.slane %v15823_v41, 4  ;;  %v5883_v51 = vrot.slane %v16045_v38, 2  ;;  %v7797_v39 = vsel %vm7529_vm3, %v15991_v24, %v7796_v34 }
 0x6cb   : > { %v10240_v50 = vrot.slane %v5965_v21, 9  ;;  %v8558_v48 = vsel %vm8551_vm5, 0.0, %v8557_v37  ;;  %v16067_v52 = vld.sshfl [vmem:[#allocation1] sm:$0xff pattern:$0x73625140]  ;;  %v5931_v56 = vrot.slane %v16052_v29, 2  ;;  %v7804_v27 = vsel %vm7529_vm3, %v15993_v1, %v7803_v10 }
 0x6cc   : > { %18843 = vst [vmem:[#allocation214_spill] sm:$0xff] %v16067_v52  ;;  %v10303_v14 = vrot.slane %v6012_v43, 9  ;;  %v10259_v7 = vrot.slane %v5979_v25, 9  ;;  %v8566_v61 = vsel %vm8551_vm5, 0.0, %v8565_v60  ;;  %v16073_v41 = vrot.slane %v7153_v33, 7 }
 0x6cd   : > { %9080 = vst [vmem:[#allocation1] ss:$4 sm:$0xff] %v8558_v48  ;;  %v16075_v16 = vrot.slane %v7155_v22, 7  ;;  %v8574_v17 = vsel %vm8551_vm5, 0.0, %v8573_v58  ;;  %v10323_v40 = vrot.slane %v6027_v19, 9  ;;  %v7152_v59 = vmax.f32 %v15975_v2, %v10238_v5 }
 0x6ce   : > { %9082 = vst [vmem:[#allocation1 + $0x1] ss:$4 sm:$0xff] %v8566_v61  ;;  %v10305_v47 = vrot.slane %v6014_v30, 9  ;;  %v8582_v11 = vsel %vm8551_vm5, 0.0, %v8581_v3  ;;  %v10131_v63 = vrot.slane %v5883_v51, 9  ;;  %v7154_v18 = vmax.f32 %v5965_v21, %v10240_v50 }
 0x6cf   : > { %9084 = vst [vmem:[#allocation1 + $0x2] ss:$4 sm:$0xff] %v8574_v17  ;;  %v6013_v34 = vrot.slane %v16024_v8, 4  ;;  %v10302_v37 = vrot.slane %v16024_v8, 9  ;;  %v10195_v10 = vrot.slane %v5931_v56, 9  ;;  %v16084_v60 = vsel %vm7531_vm4, %v15964_v49, %v7580_v57  ;;  %v18844_v49 = vld [vmem:[#allocation211_spill] sm:$0xff] }
 0x6d0   : > { %9086 = vst [vmem:[#allocation1 + $0x3] ss:$4 sm:$0xff] %v8582_v11  ;;  %v16088_v33 = vsel %vm7531_vm4, %v15991_v24, %v7797_v39  ;;  %v16092_v2 = vsel %vm7531_vm4, %v15993_v1, %v7804_v27  ;;  %v7173_v22 = vmax.f32 %v5979_v25, %v10259_v7  ;;  %v8033_v21 = vsel %vm7525_vm1, %v16073_v41, %v7152_v59  ;;  %v18845_v57 = vld [vmem:[#allocation132_spill] sm:$0xff] }
 0x6d1   : > { %v8040_v58 = vsel %vm7525_vm1, %v16075_v16, %v7154_v18  ;;  %v7217_v5 = vmax.f32 %v6012_v43, %v10303_v14  ;;  %v7237_v3 = vmax.f32 %v6027_v19, %v10323_v40  ;;  %v7219_v50 = vmax.f32 %v6014_v30, %v10305_v47 }
 0x6d2   : > { %v16100_v48 = vmax.f32 %v18845_v57, %v18844_v49  ;;  %v10258_v24 = vrot.slane %v16027_v54, 9  ;;  %v7045_v39 = vmax.f32 %v5883_v51, %v10131_v63  ;;  %v10304_v61 = vrot.slane %v6013_v34, 9 }
 0x6d3   : > { %v7216_v1 = vmax.f32 %v16024_v8, %v10302_v37  ;;  %v10322_v25 = vrot.slane %v16032_v15, 9  ;;  %v7109_v27 = vmax.f32 %v5931_v56, %v10195_v10  ;;  %v8034_v7 = vsel %vm7527_vm2, %v16073_v41, %v8033_v21 }
 0x6d4   : > { %v8041_v43 = vsel %vm7527_vm2, %v16075_v16, %v8040_v58  ;;  %v8102_v19 = vrot.slane %v7173_v22, 7  ;;  %v10130_v30 = vrot.slane %v16045_v38, 9  ;;  %v16110_v14 = vrot.slane %v7217_v5, 7 }
 0x6d5   : > { %v8326_v17 = vrot.slane %v7237_v3, 7  ;;  %v8588_v51 = vperm.slane %v15960_v32, %v15777_v28  ;;  %v10194_v8 = vrot.slane %v16052_v29, 9  ;;  %v16115_v40 = vrot.slane %v7219_v50, 7 }
 0x6d6   : > { %v7172_v56 = vmax.f32 %v16027_v54, %v10258_v24  ;;  %v8596_v59 = vperm.slane %v16008_v31, %v15777_v28  ;;  %v7654_v11 = vrot.slane %v7045_v39, 7  ;;  %v7218_v63 = vmax.f32 %v6013_v34, %v10304_v61 }
 0x6d7   : > { %v9087_v47 = vld.sshfl [vmem:[#allocation1] sm:$0xff pattern:$0x73625140]  ;;  %v8604_v18 = vperm.slane %v15801_v46, %v15777_v28  ;;  %v7236_v37 = vmax.f32 %v16032_v15, %v10322_v25  ;;  %v16123_v10 = vrot.slane %v7109_v27, 7  ;;  %v5967_v32 = vrot.slane %v16100_v48, 2 }
 0x6d8   : > { %9095 = vst [vmem:[#allocation1] ss:$4 sm:$0xff] %v8588_v51  ;;  %9088 = vrot.lane.b32.xlu2 %v9087_v47, %s10865_s10  ;;  %v8612_v22 = vperm.slane %v15811_v62, %v15777_v28  ;;  %v8103_v31 = vsel %vm7525_vm1, %v8102_v19, %v7172_v56  ;;  %v7044_v34 = vmax.f32 %v16045_v38, %v10130_v30  ;;  %v5968_v50 = vrot.slane %v16100_v48, 4 }
 0x6d9   : > { %9097 = vst [vmem:[#allocation1 + $0x1] ss:$4 sm:$0xff] %v8596_v59  ;;  %v8035_v46 = vsel %vm7529_vm3, %v16073_v41, %v8034_v7  ;;  %v8042_v21 = vsel %vm7529_vm3, %v16075_v16, %v8041_v43  ;;  %v8327_v58 = vsel %vm7525_vm1, %v8326_v17, %v7236_v37  ;;  %v7108_v5 = vmax.f32 %v16052_v29, %v10194_v8 }
 0x6da   : > { %9099 = vst [vmem:[#allocation1 + $0x2] ss:$4 sm:$0xff] %v8604_v18  ;;  %v8257_v3 = vsel %vm7525_vm1, %v16110_v14, %v7216_v1  ;;  %v8264_v62 = vsel %vm7525_vm1, %v16115_v40, %v7218_v63  ;;  %v7655_v49 = vsel %vm7525_vm1, %v7654_v11, %v7044_v34  ;;  %v17932_v57 = vrot.slane %v16100_v48, 6 }
 0x6db   : > { %9101 = vst [vmem:[#allocation1 + $0x3] ss:$4 sm:$0xff] %v8612_v22  ;;  %v10242_v24 = vrot.slane %v16100_v48, 9  ;;  %v8104_v39 = vsel %vm7527_vm2, %v8102_v19, %v8103_v31  ;;  %v7879_v61 = vsel %vm7525_vm1, %v16123_v10, %v7108_v5  ;;  %v16150_v1 = vsel %vm7531_vm4, %v16073_v41, %v8035_v46 }
 0x6dc   : > { %v16154_v25 = vsel %vm7531_vm4, %v16075_v16, %v8042_v21  ;;  %v10243_v27 = vrot.slane %v5967_v32, 9  ;;  %v8328_v7 = vsel %vm7527_vm2, %v8326_v17, %v8327_v58  ;;  %v8258_v43 = vsel %vm7527_vm2, %v16110_v14, %v8257_v3 }
 0x6dd   : > { %v8265_v30 = vsel %vm7527_vm2, %v16115_v40, %v8264_v62  ;;  %v8589_v8 = vrot.slane %v8588_v51, 4  ;;  %v7656_v56 = vsel %vm7527_vm2, %v7654_v11, %v7655_v49  ;;  %v8105_v41 = vsel %vm7529_vm3, %v8102_v19, %v8104_v39 }
 0x6de   : > { %v8597_v47 = vrot.slane %v8596_v59, 4  ;;  %v5885_v16 = vrot.slane %v16045_v38, 6  ;;  %v7880_v63 = vsel %vm7527_vm2, %v16123_v10, %v7879_v61  ;;  %v8605_v37 = vrot.slane %v8604_v18, 4 }
 0x6df   : > { %v5981_v31 = vrot.slane %v16027_v54, 6  ;;  %v8329_v34 = vsel %vm7529_vm3, %v8326_v17, %v8328_v7  ;;  %v5933_v46 = vrot.slane %v16052_v29, 6  ;;  %v10244_v51 = vrot.slane %v5968_v50, 9 }
 0x6e0   : > { %v10245_v21 = vrot.slane %v17932_v57, 9  ;;  %v8613_v58 = vrot.slane %v8612_v22, 4  ;;  %v7657_v59 = vsel %vm7529_vm3, %v7654_v11, %v7656_v56  ;;  %v8106_v5 = vsel %vm7531_vm4, %v8102_v19, %v8105_v41 }
 0x6e1   : > { %v6029_v3 = vrot.slane %v16032_v15, 6  ;;  %v8590_v18 = vsel %vm8551_vm5, 0.0, %v8589_v8  ;;  %v7881_v49 = vsel %vm7529_vm3, %v16123_v10, %v7880_v63  ;;  %v8259_v39 = vsel %vm7529_vm3, %v16110_v14, %v8258_v43 }
 0x6e2   : > { %v9102_v62 = vld.sshfl [vmem:[#allocation1] sm:$0xff pattern:$0x73625140]  ;;  %v8330_v61 = vsel %vm7531_vm4, %v8326_v17, %v8329_v34  ;;  %v8598_v7 = vsel %vm8551_vm5, 0.0, %v8597_v47  ;;  %v10133_v22 = vrot.slane %v5885_v16, 9  ;;  %v8606_v56 = vsel %vm8551_vm5, 0.0, %v8605_v37 }
 0x6e3   : > { %9110 = vst [vmem:[#allocation1] ss:$4 sm:$0xff] %v8590_v18  ;;  %v10261_v19 = vrot.slane %v5981_v31, 9  ;;  %v7658_v41 = vsel %vm7531_vm4, %v7654_v11, %v7657_v59  ;;  %v10197_v8 = vrot.slane %v5933_v46, 9  ;;  %9103 = vrot.lane.b32.xlu0 %v9102_v62, %s10866_s20  ;;  %v8614_v63 = vsel %vm8551_vm5, 0.0, %v8613_v58 }
 0x6e4   : > { %9112 = vst [vmem:[#allocation1 + $0x1] ss:$4 sm:$0xff] %v8598_v7  ;;  %v8631_v57 = vrot.slane %v8106_v5, 4  ;;  %v5884_v17 = vrot.slane %v16045_v38, 4  ;;  %v7882_v43 = vsel %vm7531_vm4, %v16123_v10, %v7881_v49  ;;  %v8266_v47 = vsel %vm7529_vm3, %v16115_v40, %v8265_v30  ;;  %v18846_v7 = vld [vmem:[#allocation229_spill] sm:$0xff] }
 0x6e5   : > { %9114 = vst [vmem:[#allocation1 + $0x2] ss:$4 sm:$0xff] %v8606_v56  ;;  %v10325_v37 = vrot.slane %v6029_v3, 9  ;;  %v8639_v34 = vrot.slane %v8330_v61, 4  ;;  %v5932_v11 = vrot.slane %v16052_v29, 4  ;;  %v7156_v59 = vmax.f32 %v16100_v48, %v10242_v24 }
 0x6e6   : > { %9116 = vst [vmem:[#allocation1 + $0x3] ss:$4 sm:$0xff] %v8614_v63  ;;  %v5980_v18 = vrot.slane %v16027_v54, 4  ;;  %v7047_v58 = vmax.f32 %v5885_v16, %v10133_v22  ;;  %v8615_v5 = vrot.slane %v7658_v41, 4  ;;  %v7157_v38 = vmax.f32 %v5967_v32, %v10243_v27  ;;  %v18847_v22 = vld [vmem:[#allocation330_spill] sm:$0xff] }
 0x6e7   : > { %v6028_v62 = vrot.slane %v16032_v15, 4  ;;  %v7111_v10 = vmax.f32 %v5933_v46, %v10197_v8  ;;  %v8623_v49 = vrot.slane %v7882_v43, 4  ;;  %v16202_v30 = vsel %vm7531_vm4, %v16110_v14, %v8259_v39 }
 0x6e8   : > { %v7175_v61 = vmax.f32 %v5981_v31, %v10261_v19  ;;  %v8632_v29 = vsel %vm8551_vm5, %v8631_v57, %v18846_v7  ;;  %v10132_v24 = vrot.slane %v5884_v17, 9  ;;  %v16208_v54 = vsel %vm7531_vm4, %v16115_v40, %v8266_v47  ;;  %v18848_v31 = vld [vmem:[#allocation45_spill] sm:$0xff]  ;;  %v18853_v7 = vld [vmem:[#allocation128_spill] sm:$0xff] }
 0x6e9   : > { %v7239_v16 = vmax.f32 %v6029_v3, %v10325_v37  ;;  %v8640_v32 = vsel %vm8551_vm5, %v8639_v34, %v18847_v22  ;;  %v10196_v15 = vrot.slane %v5932_v11, 9  ;;  %v7158_v27 = vmax.f32 %v5968_v50, %v10244_v51  ;;  %v18849_v3 = vld [vmem:[#allocation139_spill] sm:$0xff] }
 0x6ea   : > { %v10260_v46 = vrot.slane %v5980_v18, 9  ;;  %v16214_v14 = vrot.slane %v7047_v58, 7  ;;  %v8616_v39 = vsel %vm8551_vm5, %v8615_v5, %v18848_v31  ;;  %v16219_v57 = vperm.slane %v8632_v29, %v15777_v28  ;;  %v5633_v5 = vpop.f32.mrf.mxu2  ;;  %v18854_v29 = vld [vmem:[#allocation225_spill] sm:$0xff]  ;;  %v18857_v31 = vld [vmem:[#allocation44_spill] sm:$0xff] }
 0x6eb   : > { %v10324_v56 = vrot.slane %v6028_v62, 9  ;;  %v16221_v40 = vrot.slane %v7111_v10, 7  ;;  %v8624_v19 = vsel %vm8551_vm5, %v8623_v49, %v18849_v3  ;;  %v18850_v41 = vrot.slane %v16100_v48, 6  ;;  %v18851_v48 = vld [vmem:[#allocation265_spill] sm:$0xff] }
 0x6ec   : > { %v16227_v63 = vrot.slane %v7175_v61, 7  ;;  %v16230_v50 = vperm.slane %v8640_v32, %v15777_v28  ;;  %v7046_v43 = vmax.f32 %v5884_v17, %v10132_v24  ;;  %v16232_v47 = vrot.slane %v7157_v38, 7  ;;  %v5713_v61 = vpop.f32.mrf.mxu3  ;;  %v18855_v24 = vld [vmem:[#allocation245_spill] sm:$0xff] }
 0x6ed   : > { %v7159_v8 = vmax.f32 %v18850_v41, %v10245_v21  ;;  %v9117_v51 = vld.sshfl [vmem:[#allocation1] sm:$0xff pattern:$0x73625140]  ;;  %v16234_v37 = vrot.slane %v7239_v16, 7  ;;  %v8620_v34 = vperm.slane %v8616_v39, %v15777_v28  ;;  %v7110_v58 = vmax.f32 %v5932_v11, %v10196_v15  ;;  %v18852_v21 = vld [vmem:[#allocation241_spill] sm:$0xff]  ;;  %v18856_v16 = vld [vmem:[#allocation230_spill] sm:$0xff]  ;;  %v5473_v15 = vpop.f32.mrf.mxu0 }
 0x6ee   : > { %9129 = vst [vmem:[#allocation1 + $0x2] ss:$4 sm:$0xff] %v16219_v57  ;;  %9118 = vrot.lane.b32.xlu1 %v9117_v51, %s10867_s21  ;;  %v16241_v10 = vmax.f32 %v18852_v21, %v18851_v48  ;;  %v7174_v49 = vmax.f32 %v5980_v18, %v10260_v46  ;;  %v7662_v17 = vsel %vm7525_vm1, %v16214_v14, %v7046_v43  ;;  %v18858_v39 = vld [vmem:[#allocation39_spill] sm:$0xff]  ;;  %v18859_v41 = vld [vmem:[#allocation46_spill] sm:$0xff]  ;;  %v5553_v43 = vpop.f32.mrf.mxu1 }
 0x6ef   : > { %9131 = vst [vmem:[#allocation1 + $0x3] ss:$4 sm:$0xff] %v16230_v50  ;;  %v8628_v38 = vperm.slane %v8624_v19, %v15777_v28  ;;  %v16249_v11 = vmax.f32 %v18854_v29, %v18853_v7  ;;  %v16253_v22 = vmax.f32 %v18856_v16, %v18855_v24  ;;  %v7238_v32 = vmax.f32 %v6028_v62, %v10324_v56  ;;  %v18861_v7 = vld [vmem:[#allocation102_spill] sm:$0xff] }
 0x6f0   : > { %9125 = vst [vmem:[#allocation1] ss:$4 sm:$0xff] %v8620_v34  ;;  %v7886_v18 = vsel %vm7525_vm1, %v16221_v40, %v7110_v58  ;;  %v16257_v46 = vrot.slane %v7159_v8, 7  ;;  %v16261_v3 = vmax.f32 %v18858_v39, %v18857_v31  ;;  %v8110_v19 = vsel %vm7525_vm1, %v16227_v63, %v7174_v49  ;;  %v18860_v58 = vld [vmem:[#allocation94_spill] sm:$0xff] }
 0x6f1   : > { %9127 = vst [vmem:[#allocation1 + $0x1] ss:$4 sm:$0xff] %v8628_v38  ;;  %v16266_v51 = vmax.f32 %v18859_v41, %v5633_v5  ;;  %v8047_v62 = vsel %vm7525_vm1, %v16232_v47, %v7156_v59  ;;  %v8334_v56 = vsel %vm7525_vm1, %v16234_v37, %v7238_v32  ;;  %v7663_v8 = vsel %vm7527_vm2, %v16214_v14, %v7662_v17  ;;  %v18862_v17 = vld [vmem:[#allocation171_spill] sm:$0xff] }
 0x6f2   : > { %v16275_v48 = vmax.f32 %v18860_v58, %v5713_v61  ;;  %v6015_v21 = vrot.slane %v16241_v10, 2  ;;  %v7887_v5 = vsel %vm7527_vm2, %v16221_v40, %v7886_v18  ;;  %v16282_v29 = vmax.f32 %v18861_v7, %v5473_v15 }
 0x6f3   : > { %v8111_v24 = vsel %vm7527_vm2, %v16227_v63, %v8110_v19  ;;  %v8621_v16 = vrot.slane %v8620_v34, 4  ;;  %v16288_v32 = vmax.f32 %v18862_v17, %v5553_v43  ;;  %v8335_v61 = vsel %vm7527_vm2, %v16234_v37, %v8334_v56 }
 0x6f4   : > { %v7664_v31 = vsel %vm7529_vm3, %v16214_v14, %v7663_v8  ;;  %v8629_v39 = vrot.slane %v8628_v38, 4  ;;  %v5982_v18 = vrot.slane %v16266_v51, 2  ;;  %v8048_v15 = vsel %vm7527_vm2, %v16232_v47, %v8047_v62 }
 0x6f5   : > { %v8637_v41 = vrot.slane %v16219_v57, 4  ;;  %v7888_v34 = vsel %vm7529_vm3, %v16221_v40, %v7887_v5  ;;  %v6030_v19 = vrot.slane %v16275_v48, 2  ;;  %v8054_v43 = vsel %vm7525_vm1, %v16257_v46, %v7158_v27 }
 0x6f6   : > { %v8112_v56 = vsel %vm7529_vm3, %v16227_v63, %v8111_v24  ;;  %v8645_v38 = vrot.slane %v16230_v50, 4  ;;  %v5886_v8 = vrot.slane %v16282_v29, 2  ;;  %v8336_v62 = vsel %vm7529_vm3, %v16234_v37, %v8335_v61 }
 0x6f7   : > { %v7665_v57 = vsel %vm7531_vm4, %v16214_v14, %v7664_v31  ;;  %v8622_v58 = vsel %vm8551_vm5, 0.0, %v8621_v16  ;;  %v5934_v7 = vrot.slane %v16288_v32, 2  ;;  %v8049_v27 = vsel %vm7529_vm3, %v16232_v47, %v8048_v15 }
 0x6f8   : > { %v16312_v5 = vld.sshfl [vmem:[#allocation1] sm:$0xff pattern:$0x73625140]  ;;  %v7889_v50 = vsel %vm7531_vm4, %v16221_v40, %v7888_v34  ;;  %v8630_v24 = vsel %vm8551_vm5, 0.0, %v8629_v39  ;;  %v10263_v17 = vrot.slane %v5982_v18, 9  ;;  %v8055_v61 = vsel %vm7527_vm2, %v16257_v46, %v8054_v43 }
 0x6f9   : > { %18863 = vst [vmem:[#allocation278_spill] sm:$0xff] %v16312_v5  ;;  %v8113_v14 = vsel %vm7531_vm4, %v16227_v63, %v8112_v56  ;;  %v8638_v16 = vsel %vm8551_vm5, 0.0, %v8637_v41  ;;  %v10327_v31 = vrot.slane %v6030_v19, 9  ;;  %v8337_v15 = vsel %vm7531_vm4, %v16234_v37, %v8336_v62  ;;  %v18869_v5 = vld [vmem:[#allocation298_spill] sm:$0xff] }
 0x6fa   : > { %9138 = vst [vmem:[#allocation1] ss:$4 sm:$0xff] %v8622_v58  ;;  %v8646_v59 = vsel %vm8551_vm5, 0.0, %v8645_v38  ;;  %v8647_v40 = vrot.slane %v7665_v57, 4  ;;  %v10135_v39 = vrot.slane %v5886_v8, 9  ;;  %v10306_v34 = vrot.slane %v16241_v10, 9 }
 0x6fb   : > { %9140 = vst [vmem:[#allocation1 + $0x1] ss:$4 sm:$0xff] %v8630_v24  ;;  %v8655_v43 = vrot.slane %v7889_v50, 4  ;;  %v10199_v49 = vrot.slane %v5934_v7, 9  ;;  %v10307_v63 = vrot.slane %v6015_v21, 9  ;;  %v18864_v41 = vrot.slane %v16241_v10, 4 }
 0x6fc   : > { %9142 = vst [vmem:[#allocation1 + $0x2] ss:$4 sm:$0xff] %v8638_v16  ;;  %v8663_v24 = vrot.slane %v8113_v14, 4  ;;  %v7177_v26 = vmax.f32 %v5982_v18, %v10263_v17  ;;  %v16334_v37 = vsel %vm7531_vm4, %v16232_v47, %v8049_v27  ;;  %v8056_v38 = vsel %vm7529_vm3, %v16257_v46, %v8055_v61  ;;  %v18867_v17 = vld [vmem:[#allocation163_spill] sm:$0xff] }
 0x6fd   : > { %9144 = vst [vmem:[#allocation1 + $0x3] ss:$4 sm:$0xff] %v8646_v59  ;;  %v10308_v56 = vrot.slane %v18864_v41, 9  ;;  %v8671_v62 = vrot.slane %v8337_v15, 4  ;;  %v7241_v57 = vmax.f32 %v6030_v19, %v10327_v31  ;;  %v18865_v16 = vrot.slane %v16241_v10, 6  ;;  %v18866_v59 = vld [vmem:[#allocation197_spill] sm:$0xff] }
 0x6fe   : > { %v8648_v58 = vsel %vm8551_vm5, %v8647_v40, %v18866_v59  ;;  %v10262_v35 = vrot.slane %v16266_v51, 9  ;;  %v7049_v41 = vmax.f32 %v5886_v8, %v10135_v39  ;;  %v7220_v18 = vmax.f32 %v16241_v10, %v10306_v34  ;;  %v18868_v15 = vld [vmem:[#allocation293_spill] sm:$0xff] }
 0x6ff   : > { %v10309_v50 = vrot.slane %v18865_v16, 9  ;;  %v8656_v47 = vsel %vm8551_vm5, %v8655_v43, %v18867_v17  ;;  %v10326_v27 = vrot.slane %v16275_v48, 9  ;;  %v7113_v14 = vmax.f32 %v5934_v7, %v10199_v49 }
 0x700   : > { %v7221_v61 = vmax.f32 %v6015_v21, %v10307_v63  ;;  %v8664_v19 = vsel %vm8551_vm5, %v8663_v24, %v18868_v15  ;;  %v8116_v31 = vrot.slane %v7177_v26, 7  ;;  %v10134_v16 = vrot.slane %v16282_v29, 9 }
 0x701   : > { %v8672_v40 = vsel %vm8551_vm5, %v8671_v62, %v18869_v5  ;;  %v8652_v8 = vperm.slane %v8648_v58, %v15777_v28  ;;  %v8340_v39 = vrot.slane %v7241_v57, 7  ;;  %v10198_v34 = vrot.slane %v16288_v32, 9 }
 0x702   : > { %v5869_v43 = vrot.slane %v16249_v11, 4  ;;  %v8660_v59 = vperm.slane %v8656_v47, %v15777_v28  ;;  %v7176_v21 = vmax.f32 %v16266_v51, %v10262_v35  ;;  %v7668_v7 = vrot.slane %v7049_v41, 7 }
 0x703   : > { %v18870_v26 = vrot.slane %v16241_v10, 6  ;;  %v8668_v24 = vperm.slane %v8664_v19, %v15777_v28  ;;  %v7240_v5 = vmax.f32 %v16275_v48, %v10326_v27  ;;  %v7892_v58 = vrot.slane %v7113_v14, 7 }
 0x704   : > { %v9145_v49 = vld.sshfl [vmem:[#allocation1] sm:$0xff pattern:$0x73625140]  ;;  %v17933_v62 = vrot.slane %v16249_v11, 6  ;;  %v8676_v57 = vperm.slane %v8672_v40, %v15777_v28  ;;  %v8117_v17 = vsel %vm7525_vm1, %v8116_v31, %v7176_v21  ;;  %v7048_v35 = vmax.f32 %v16282_v29, %v10134_v16 }
 0x705   : > { %v7223_v63 = vmax.f32 %v18870_v26, %v10309_v50  ;;  %9153 = vst [vmem:[#allocation1] ss:$4 sm:$0xff] %v8652_v8  ;;  %9146 = vrot.lane.b32.xlu2 %v9145_v49, %s10865_s10  ;;  %v10110_v41 = vrot.slane %v16249_v11, 9  ;;  %v18871_v50 = vrot.slane %v16249_v11, 2  ;;  %v8341_v27 = vsel %vm7525_vm1, %v8340_v39, %v7240_v5 }
 0x706   : > { %9155 = vst [vmem:[#allocation1 + $0x1] ss:$4 sm:$0xff] %v8660_v59  ;;  %v7112_v14 = vmax.f32 %v16288_v32, %v10198_v34  ;;  %v16373_v15 = vsel %vm7531_vm4, %v16257_v46, %v8056_v38  ;;  %v18873_v19 = vrot.slane %v16241_v10, 4  ;;  %v16377_v49 = vrot.slane %v7221_v61, 7 }
 0x707   : > { %v10111_v47 = vrot.slane %v18871_v50, 9  ;;  %9157 = vst [vmem:[#allocation1 + $0x2] ss:$4 sm:$0xff] %v8668_v24  ;;  %v7669_v16 = vsel %vm7525_vm1, %v7668_v7, %v7048_v35  ;;  %v10112_v21 = vrot.slane %v5869_v43, 9  ;;  %v8118_v50 = vsel %vm7527_vm2, %v8116_v31, %v8117_v17 }
 0x708   : > { %18872 = vst [vmem:[#allocation100_spill] sm:$0xff] %v16373_v15  ;;  %v7222_v40 = vmax.f32 %v18873_v19, %v10308_v56  ;;  %v7893_v5 = vsel %vm7525_vm1, %v7892_v58, %v7112_v14  ;;  %v16383_v34 = vrot.slane %v7223_v63, 7  ;;  %v10113_v46 = vrot.slane %v17933_v62, 9 }
 0x709   : > { %9159 = vst [vmem:[#allocation1 + $0x3] ss:$4 sm:$0xff] %v8676_v57  ;;  %v8342_v56 = vsel %vm7527_vm2, %v8340_v39, %v8341_v27  ;;  %v16390_v38 = vmax.f32 %v16249_v11, %v10110_v41  ;;  %v18874_v61 = vrot.slane %v16249_v11, 2  ;;  %v8653_v19 = vrot.slane %v8652_v8, 4 }
 0x70a   : > { %v7670_v17 = vsel %vm7527_vm2, %v7668_v7, %v7669_v16  ;;  %v8661_v26 = vrot.slane %v8660_v59, 4  ;;  %v8119_v63 = vsel %vm7529_vm3, %v8116_v31, %v8118_v50  ;;  %v5888_v14 = vrot.slane %v16282_v29, 6 }
 0x70b   : > { %v7025_v35 = vmax.f32 %v18874_v61, %v10111_v47  ;;  %v7894_v62 = vsel %vm7527_vm2, %v7892_v58, %v7893_v5  ;;  %v8669_v15 = vrot.slane %v8668_v24, 4  ;;  %v8677_v10 = vrot.slane %v8676_v57, 4 }
 0x70c   : > { %v8343_v27 = vsel %vm7529_vm3, %v8340_v39, %v8342_v56  ;;  %v5936_v41 = vrot.slane %v16288_v32, 6  ;;  %v8271_v52 = vsel %vm7525_vm1, %v16377_v49, %v7220_v18  ;;  %v16402_v47 = vmax.f32 %v5869_v43, %v10112_v21 }
 0x70d   : > { %v5984_v8 = vrot.slane %v16266_v51, 6  ;;  %v7671_v59 = vsel %vm7529_vm3, %v7668_v7, %v7670_v17  ;;  %v8654_v16 = vsel %vm8551_vm5, 0.0, %v8653_v19  ;;  %v8120_v5 = vsel %vm7531_vm4, %v8116_v31, %v8119_v63 }
 0x70e   : > { %v6032_v24 = vrot.slane %v16275_v48, 6  ;;  %v7895_v57 = vsel %vm7529_vm3, %v7892_v58, %v7894_v62  ;;  %v8662_v61 = vsel %vm8551_vm5, 0.0, %v8661_v26  ;;  %v8344_v18 = vsel %vm7531_vm4, %v8340_v39, %v8343_v27 }
 0x70f   : > { %v10137_v43 = vrot.slane %v5888_v14, 9  ;;  %v8670_v21 = vsel %vm8551_vm5, 0.0, %v8669_v15  ;;  %v8678_v19 = vsel %vm8551_vm5, 0.0, %v8677_v10  ;;  %v7672_v31 = vsel %vm7531_vm4, %v7668_v7, %v7671_v59 }
 0x710   : > { %v9160_v50 = vld.sshfl [vmem:[#allocation1] sm:$0xff pattern:$0x73625140]  ;;  %v10201_v17 = vrot.slane %v5936_v41, 9  ;;  %v10265_v62 = vrot.slane %v5984_v8, 9  ;;  %v8695_v63 = vrot.slane %v8120_v5, 4  ;;  %v7896_v26 = vsel %vm7531_vm4, %v7892_v58, %v7895_v57 }
 0x711   : > { %9168 = vst [vmem:[#allocation1] ss:$4 sm:$0xff] %v8654_v16  ;;  %9161 = vrot.lane.b32.xlu0 %v9160_v50, %s10866_s20  ;;  %v5887_v56 = vrot.slane %v16282_v29, 4  ;;  %v10174_v39 = vrot.slane %v16253_v22, 9  ;;  %v10329_v27 = vrot.slane %v6032_v24, 9  ;;  %v8703_v16 = vrot.slane %v8344_v18, 4 }
 0x712   : > { %9170 = vst [vmem:[#allocation1 + $0x1] ss:$4 sm:$0xff] %v8662_v61  ;;  %v5935_v15 = vrot.slane %v16288_v32, 4  ;;  %v8272_v10 = vsel %vm7527_vm2, %v16377_v49, %v8271_v52  ;;  %v5983_v7 = vrot.slane %v16266_v51, 4  ;;  %v7051_v59 = vmax.f32 %v5888_v14, %v10137_v43 }
 0x713   : > { %9172 = vst [vmem:[#allocation1 + $0x2] ss:$4 sm:$0xff] %v8670_v21  ;;  %v8679_v50 = vrot.slane %v7672_v31, 4  ;;  %v8278_v5 = vsel %vm7525_vm1, %v16383_v34, %v7222_v40  ;;  %v6031_v29 = vrot.slane %v16275_v48, 4  ;;  %v7115_v58 = vmax.f32 %v5936_v41, %v10201_v17 }
 0x714   : > { %9174 = vst [vmem:[#allocation1 + $0x3] ss:$4 sm:$0xff] %v8678_v19  ;;  %v8687_v57 = vrot.slane %v7896_v26, 4  ;;  %v18875_v61 = vrot.slane %v16249_v11, 6  ;;  %v7179_v18 = vmax.f32 %v5984_v8, %v10265_v62  ;;  %v8696_v32 = vsel %vm8551_vm5, %v8695_v63, %v15833_v36  ;;  %v5635_v26 = vpop.f32.mrf.mxu2 }
 0x715   : > { %v10136_v19 = vrot.slane %v5887_v56, 9  ;;  %v16431_v52 = vrot.slane %v7025_v35, 7  ;;  %v7243_v51 = vmax.f32 %v6032_v24, %v10329_v27  ;;  %v8704_v14 = vsel %vm8551_vm5, %v8703_v16, %v15867_v45 }
 0x716   : > { %v7027_v21 = vmax.f32 %v18875_v61, %v10113_v46  ;;  %v10200_v43 = vrot.slane %v5935_v15, 9  ;;  %v8273_v48 = vsel %vm7529_vm3, %v16377_v49, %v8272_v10  ;;  %v10264_v40 = vrot.slane %v5983_v7, 9 }
 0x717   : > { %v7675_v41 = vrot.slane %v7051_v59, 7  ;;  %v8680_v11 = vsel %vm8551_vm5, %v8679_v50, %v15902_v23  ;;  %v16440_v46 = vperm.slane %v8696_v32, %v15777_v28  ;;  %v10328_v36 = vrot.slane %v6031_v29, 9 }
 0x718   : > { %v16442_v8 = vrot.slane %v7115_v58, 7  ;;  %v8688_v35 = vsel %vm8551_vm5, %v8687_v57, %v16018_v0  ;;  %v8279_v45 = vsel %vm7527_vm2, %v16383_v34, %v8278_v5  ;;  %v16448_v31 = vrot.slane %v7179_v18, 7 }
 0x719   : > { %v16451_v17 = vperm.slane %v8704_v14, %v15777_v28  ;;  %v7050_v62 = vmax.f32 %v5887_v56, %v10136_v19  ;;  %v7585_v23 = vsel %vm7525_vm1, %v16431_v52, %v16390_v38  ;;  %v16457_v63 = vrot.slane %v7243_v51, 7  ;;  %v5715_v56 = vpop.f32.mrf.mxu3  ;;  %v18878_v19 = vld [vmem:[#allocation326_spill] sm:$0xff] }
 0x71a   : > { %v8684_v0 = vperm.slane %v8680_v11, %v15777_v28  ;;  %v7114_v27 = vmax.f32 %v5935_v15, %v10200_v43  ;;  %v18876_v16 = vrot.slane %v16253_v22, 2  ;;  %v7178_v59 = vmax.f32 %v5983_v7, %v10264_v40  ;;  %v5475_v7 = vpop.f32.mrf.mxu0 }
 0x71b   : > { %v9175_v24 = vld.sshfl [vmem:[#allocation1] sm:$0xff pattern:$0x73625140]  ;;  %v7676_v50 = vsel %vm7525_vm1, %v7675_v41, %v7050_v62  ;;  %v8692_v38 = vperm.slane %v8688_v35, %v15777_v28  ;;  %v16468_v5 = vsel %vm7531_vm4, %v16377_v49, %v8273_v48  ;;  %v18877_v58 = vrot.slane %v16253_v22, 4  ;;  %v18879_v48 = vld [vmem:[#allocation190_spill] sm:$0xff] }
 0x71c   : > { %9187 = vst [vmem:[#allocation1 + $0x2] ss:$4 sm:$0xff] %v16440_v46  ;;  %9176 = vrot.lane.b32.xlu1 %v9175_v24, %s10867_s21  ;;  %v10175_v10 = vrot.slane %v18876_v16, 9  ;;  %v7242_v57 = vmax.f32 %v6031_v29, %v10328_v36  ;;  %v7900_v61 = vsel %vm7525_vm1, %v16442_v8, %v7114_v27  ;;  %v16476_v18 = vsel %vm7529_vm3, %v16383_v34, %v8279_v45  ;;  %v5555_v29 = vpop.f32.mrf.mxu1  ;;  %v18881_v24 = vld [vmem:[#allocation7_spill] sm:$0xff]  ;;  %v18882_v16 = vld [vmem:[#allocation194_spill] sm:$0xff] }
 0x71d   : > { %9189 = vst [vmem:[#allocation1 + $0x3] ss:$4 sm:$0xff] %v16451_v17  ;;  %v10176_v15 = vrot.slane %v18877_v58, 9  ;;  %v7586_v32 = vsel %vm7527_vm2, %v16431_v52, %v7585_v23  ;;  %v8124_v49 = vsel %vm7525_vm1, %v16448_v31, %v7178_v59  ;;  %v16483_v51 = vmax.f32 %v18878_v19, %v5635_v26 }
 0x71e   : > { %9183 = vst [vmem:[#allocation1] ss:$4 sm:$0xff] %v8684_v0  ;;  %v16485_v14 = vrot.slane %v7027_v21, 7  ;;  %v8348_v43 = vsel %vm7525_vm1, %v16457_v63, %v7242_v57  ;;  %v16490_v40 = vmax.f32 %v18879_v48, %v5715_v56  ;;  %v7677_v11 = vsel %vm7527_vm2, %v7675_v41, %v7676_v50 }
 0x71f   : > { %9185 = vst [vmem:[#allocation1 + $0x1] ss:$4 sm:$0xff] %v8692_v38  ;;  %v18880_v36 = vrot.slane %v16253_v22, 6  ;;  %v16498_v45 = vmax.f32 %v16253_v22, %v10174_v39  ;;  %v7901_v21 = vsel %vm7527_vm2, %v16442_v8, %v7900_v61  ;;  %v16503_v62 = vmax.f32 %v18881_v24, %v5475_v7 }
 0x720   : > { %v16507_v23 = vsel %vm7529_vm3, %v16431_v52, %v7586_v32  ;;  %v8125_v26 = vsel %vm7527_vm2, %v16448_v31, %v8124_v49  ;;  %v8685_v27 = vrot.slane %v8684_v0, 4  ;;  %v16512_v59 = vmax.f32 %v18882_v16, %v5555_v29 }
 0x721   : > { %v10177_v35 = vrot.slane %v18880_v36, 9  ;;  %v8349_v39 = vsel %vm7527_vm2, %v16457_v63, %v8348_v43  ;;  %v5985_v56 = vrot.slane %v16483_v51, 2  ;;  %v7678_v50 = vsel %vm7529_vm3, %v7675_v41, %v7677_v11 }
 0x722   : > { %v8693_v58 = vrot.slane %v8692_v38, 4  ;;  %v7592_v57 = vsel %vm7525_vm1, %v16485_v14, %v16402_v47  ;;  %v8701_v61 = vrot.slane %v16440_v46, 4  ;;  %v6033_v7 = vrot.slane %v16490_v40, 2 }
 0x723   : > { %v7902_v0 = vsel %vm7529_vm3, %v16442_v8, %v7901_v21  ;;  %v18883_v32 = vrot.slane %v16253_v22, 2  ;;  %v8126_v19 = vsel %vm7529_vm3, %v16448_v31, %v8125_v26  ;;  %v8709_v29 = vrot.slane %v16451_v17, 4 }
 0x724   : > { %v5889_v38 = vrot.slane %v16503_v62, 2  ;;  %v8350_v47 = vsel %vm7529_vm3, %v16457_v63, %v8349_v39  ;;  %v7679_v46 = vsel %vm7531_vm4, %v7675_v41, %v7678_v50  ;;  %v8686_v43 = vsel %vm8551_vm5, 0.0, %v8685_v27 }
 0x725   : > { %v7089_v49 = vmax.f32 %v18883_v32, %v10175_v10  ;;  %v5937_v11 = vrot.slane %v16512_v59, 2  ;;  %v7593_v10 = vsel %vm7527_vm2, %v16485_v14, %v7592_v57  ;;  %v10267_v36 = vrot.slane %v5985_v56, 9 }
 0x726   : > { %v16535_v48 = vld.sshfl [vmem:[#allocation1] sm:$0xff pattern:$0x73625140]  ;;  %v7903_v17 = vsel %vm7531_vm4, %v16442_v8, %v7902_v0  ;;  %v8694_v21 = vsel %vm8551_vm5, 0.0, %v8693_v58  ;;  %v18884_v24 = vrot.slane %v16253_v22, 6  ;;  %v8127_v41 = vsel %vm7531_vm4, %v16448_v31, %v8126_v19 }
 0x727   : > { %9196 = vst [vmem:[#allocation1] ss:$4 sm:$0xff] %v8686_v43  ;;  %v8702_v27 = vsel %vm8551_vm5, 0.0, %v8701_v61  ;;  %v10331_v16 = vrot.slane %v6033_v7, 9  ;;  %v8351_v39 = vsel %vm7531_vm4, %v16457_v63, %v8350_v47  ;;  %v8710_v50 = vsel %vm8551_vm5, 0.0, %v8709_v29 }
 0x728   : > { %v7091_v26 = vmax.f32 %v18884_v24, %v10177_v35  ;;  %9198 = vst [vmem:[#allocation1 + $0x1] ss:$4 sm:$0xff] %v8694_v21  ;;  %v8711_v57 = vrot.slane %v7679_v46, 4  ;;  %v10139_v8 = vrot.slane %v5889_v38, 9  ;;  %v18885_v58 = vrot.slane %v16253_v22, 4 }
 0x729   : > { %9200 = vst [vmem:[#allocation1 + $0x2] ss:$4 sm:$0xff] %v8702_v27  ;;  %v5871_v35 = vrot.slane %v16261_v3, 2  ;;  %v8719_v32 = vrot.slane %v7903_v17, 4  ;;  %v10203_v31 = vrot.slane %v5937_v11, 9  ;;  %v7594_v61 = vsel %vm7529_vm3, %v16485_v14, %v7593_v10 }
 0x72a   : > { %v7090_v0 = vmax.f32 %v18885_v58, %v10176_v15  ;;  %9202 = vst [vmem:[#allocation1 + $0x3] ss:$4 sm:$0xff] %v8710_v50  ;;  %v16556_v19 = vrot.slane %v7089_v49, 7  ;;  %v8727_v43 = vrot.slane %v8127_v41, 4  ;;  %v7181_v63 = vmax.f32 %v5985_v56, %v10267_v36 }
 0x72b   : > { %v5872_v29 = vrot.slane %v16261_v3, 4  ;;  %v5873_v47 = vrot.slane %v16261_v3, 6  ;;  %v8735_v46 = vrot.slane %v8351_v39, 4  ;;  %v7245_v21 = vmax.f32 %v6033_v7, %v10331_v16 }
 0x72c   : > { %v16560_v22 = vrot.slane %v7091_v26, 7  ;;  %v10266_v15 = vrot.slane %v16483_v51, 9  ;;  %v8712_v17 = vsel %vm8551_vm5, %v8711_v57, %v15906_v12  ;;  %v7053_v24 = vmax.f32 %v5889_v38, %v10139_v8 }
 0x72d   : > { %v10114_v10 = vrot.slane %v16261_v3, 9  ;;  %v10330_v49 = vrot.slane %v16490_v40, 9  ;;  %v8720_v56 = vsel %vm8551_vm5, %v8719_v32, %v16036_v20  ;;  %v7117_v36 = vmax.f32 %v5937_v11, %v10203_v31 }
 0x72e   : > { %v10115_v41 = vrot.slane %v5871_v35, 9  ;;  %v8728_v7 = vsel %vm8551_vm5, %v8727_v43, %v15838_v13  ;;  %v8130_v26 = vrot.slane %v7181_v63, 7  ;;  %v10138_v27 = vrot.slane %v16503_v62, 9 }
 0x72f   : > { %v8736_v16 = vsel %vm8551_vm5, %v8735_v46, %v15871_v4  ;;  %v8354_v12 = vrot.slane %v7245_v21, 7  ;;  %v8716_v38 = vperm.slane %v8712_v17, %v15777_v28  ;;  %v10202_v39 = vrot.slane %v16512_v59, 9 }
 0x730   : > { %v7809_v20 = vsel %vm7525_vm1, %v16556_v19, %v16498_v45  ;;  %v7180_v11 = vmax.f32 %v16483_v51, %v10266_v15  ;;  %v8724_v50 = vperm.slane %v8720_v56, %v15777_v28  ;;  %v7682_v57 = vrot.slane %v7053_v24, 7 }
 0x731   : > { %v9203_v13 = vld.sshfl [vmem:[#allocation1] sm:$0xff pattern:$0x73625140]  ;;  %v10116_v8 = vrot.slane %v5872_v29, 9  ;;  %v8732_v58 = vperm.slane %v8728_v7, %v15777_v28  ;;  %v7244_v4 = vmax.f32 %v16490_v40, %v10330_v49  ;;  %v7906_v32 = vrot.slane %v7117_v36, 7 }
 0x732   : > { %9211 = vst [vmem:[#allocation1] ss:$4 sm:$0xff] %v8716_v38  ;;  %9204 = vrot.lane.b32.xlu2 %v9203_v13, %s10865_s10  ;;  %v10117_v31 = vrot.slane %v5873_v47, 9  ;;  %v8740_v43 = vperm.slane %v8736_v16, %v15777_v28  ;;  %v8131_v45 = vsel %vm7525_vm1, %v8130_v26, %v7180_v11  ;;  %v7052_v63 = vmax.f32 %v16503_v62, %v10138_v27  ;;  %v18886_v7 = vld [vmem:[#allocation48_spill] sm:$0xff]  ;;  %v18887_v27 = vld [vmem:[#allocation62_spill] sm:$0xff] }
 0x733   : > { %9213 = vst [vmem:[#allocation1 + $0x1] ss:$4 sm:$0xff] %v8724_v50  ;;  %v7810_v46 = vsel %vm7527_vm2, %v16556_v19, %v7809_v20  ;;  %v7816_v21 = vsel %vm7525_vm1, %v16560_v22, %v7090_v0  ;;  %v8355_v15 = vsel %vm7525_vm1, %v8354_v12, %v7244_v4  ;;  %v7116_v17 = vmax.f32 %v16512_v59, %v10202_v39 }
 0x734   : > { %9215 = vst [vmem:[#allocation1 + $0x2] ss:$4 sm:$0xff] %v8732_v58  ;;  %v16596_v24 = vsel %vm7531_vm4, %v16383_v34, %v16476_v18  ;;  %v16601_v49 = vsel %vm7531_vm4, %v16431_v52, %v16507_v23  ;;  %v16605_v56 = vsel %vm7531_vm4, %v16485_v14, %v7594_v61  ;;  %v7683_v0 = vsel %vm7525_vm1, %v7682_v57, %v7052_v63 }
 0x735   : > { %9217 = vst [vmem:[#allocation1 + $0x3] ss:$4 sm:$0xff] %v8740_v43  ;;  %v16609_v36 = vmax.f32 %v16261_v3, %v10114_v10  ;;  %v16613_v16 = vmax.f32 %v18887_v27, %v18886_v7  ;;  %v8132_v34 = vsel %vm7527_vm2, %v8130_v26, %v8131_v45  ;;  %v7907_v18 = vsel %vm7525_vm1, %v7906_v32, %v7116_v17 }
 0x736   : > { %v7811_v52 = vsel %vm7529_vm3, %v16556_v19, %v7810_v46  ;;  %v16621_v14 = vsel %vm7527_vm2, %v16560_v22, %v7816_v21  ;;  %v7029_v23 = vmax.f32 %v5871_v35, %v10115_v41  ;;  %v8356_v61 = vsel %vm7527_vm2, %v8354_v12, %v8355_v15 }
 0x737   : > { %v16624_v3 = vmax.f32 %v5872_v29, %v10116_v8  ;;  %v7031_v10 = vmax.f32 %v5873_v47, %v10117_v31  ;;  %v8717_v39 = vrot.slane %v8716_v38, 4  ;;  %v7684_v20 = vsel %vm7527_vm2, %v7682_v57, %v7683_v0 }
 0x738   : > { %v8133_v11 = vsel %vm7529_vm3, %v8130_v26, %v8132_v34  ;;  %v8725_v13 = vrot.slane %v8724_v50, 4  ;;  %v5891_v4 = vrot.slane %v16503_v62, 6  ;;  %v7908_v45 = vsel %vm7527_vm2, %v7906_v32, %v7907_v18 }
 0x739   : > { %v8733_v63 = vrot.slane %v8732_v58, 4  ;;  %v5987_v46 = vrot.slane %v16483_v51, 6  ;;  %v8357_v35 = vsel %vm7529_vm3, %v8354_v12, %v8356_v61  ;;  %v5939_v41 = vrot.slane %v16512_v59, 6 }
 0x73a   : > { %v16635_v29 = vsel %vm7531_vm4, %v16556_v19, %v7811_v52  ;;  %v16637_v47 = vrot.slane %v7029_v23, 7  ;;  %v8741_v38 = vrot.slane %v8740_v43, 4  ;;  %v7685_v50 = vsel %vm7529_vm3, %v7682_v57, %v7684_v20 }
 0x73b   : > { %v8134_v8 = vsel %vm7531_vm4, %v8130_v26, %v8133_v11  ;;  %v6035_v31 = vrot.slane %v16490_v40, 6  ;;  %v8718_v58 = vsel %vm8551_vm5, 0.0, %v8717_v39  ;;  %v7909_v15 = vsel %vm7529_vm3, %v7906_v32, %v7908_v45 }
 0x73c   : > { %v9218_v21 = vld.sshfl [vmem:[#allocation1] sm:$0xff pattern:$0x73625140]  ;;  %v5919_v17 = vrot.slane %v16613_v16, 2  ;;  %v8358_v0 = vsel %vm7531_vm4, %v8354_v12, %v8357_v35  ;;  %v8726_v19 = vsel %vm8551_vm5, 0.0, %v8725_v13  ;;  %v10141_v7 = vrot.slane %v5891_v4, 9 }
 0x73d   : > { %9226 = vst [vmem:[#allocation1] ss:$4 sm:$0xff] %v8718_v58  ;;  %9219 = vrot.lane.b32.xlu0 %v9218_v21, %s10866_s20  ;;  %v8734_v43 = vsel %vm8551_vm5, 0.0, %v8733_v63  ;;  %v10269_v26 = vrot.slane %v5987_v46, 9  ;;  %v7686_v27 = vsel %vm7531_vm4, %v7682_v57, %v7685_v50  ;;  %v10205_v34 = vrot.slane %v5939_v41, 9 }
 0x73e   : > { %9228 = vst [vmem:[#allocation1 + $0x1] ss:$4 sm:$0xff] %v8726_v19  ;;  %v8742_v18 = vsel %vm8551_vm5, 0.0, %v8741_v38  ;;  %v8759_v52 = vrot.slane %v8134_v8, 4  ;;  %v5890_v23 = vrot.slane %v16503_v62, 4  ;;  %v7910_v12 = vsel %vm7531_vm4, %v7906_v32, %v7909_v15 }
 0x73f   : > { %9230 = vst [vmem:[#allocation1 + $0x2] ss:$4 sm:$0xff] %v8734_v43  ;;  %v16653_v61 = vrot.slane %v7031_v10, 7  ;;  %v10333_v39 = vrot.slane %v6035_v31, 9  ;;  %v8767_v20 = vrot.slane %v8358_v0, 4  ;;  %v5938_v11 = vrot.slane %v16512_v59, 4 }
 0x740   : > { %9232 = vst [vmem:[#allocation1 + $0x3] ss:$4 sm:$0xff] %v8742_v18  ;;  %v10179_v13 = vrot.slane %v5919_v17, 9  ;;  %v5986_v45 = vrot.slane %v16483_v51, 4  ;;  %v7055_v57 = vmax.f32 %v5891_v4, %v10141_v7  ;;  %v8743_v63 = vrot.slane %v7686_v27, 4  ;;  %v5638_v18 = vpop.f32.mrf.mxu2 }
 0x741   : > { %v5920_v35 = vrot.slane %v16613_v16, 4  ;;  %v6034_v38 = vrot.slane %v16490_v40, 4  ;;  %v7119_v50 = vmax.f32 %v5939_v41, %v10205_v34  ;;  %v8751_v62 = vrot.slane %v7910_v12, 4 }
 0x742   : > { %v5921_v32 = vrot.slane %v16613_v16, 6  ;;  %v7183_v10 = vmax.f32 %v5987_v46, %v10269_v26  ;;  %v8760_v8 = vsel %vm8551_vm5, %v8759_v52, %v15876_v44  ;;  %v10140_v58 = vrot.slane %v5890_v23, 9 }
 0x743   : > { %v7599_v59 = vsel %vm7525_vm1, %v16637_v47, %v16609_v36  ;;  %v7247_v51 = vmax.f32 %v6035_v31, %v10333_v39  ;;  %v8768_v4 = vsel %vm8551_vm5, %v8767_v20, %v15919_v9  ;;  %v10204_v21 = vrot.slane %v5938_v11, 9  ;;  %v5718_v20 = vpop.f32.mrf.mxu3 }
 0x744   : > { %v7093_v15 = vmax.f32 %v5919_v17, %v10179_v13  ;;  %v10268_v40 = vrot.slane %v5986_v45, 9  ;;  %v7689_v41 = vrot.slane %v7055_v57, 7  ;;  %v8744_v0 = vsel %vm8551_vm5, %v8743_v63, %v16040_v6  ;;  %v5478_v63 = vpop.f32.mrf.mxu0 }
 0x745   : > { %v16670_v46 = vperm.slane %v8760_v8, %v15777_v28  ;;  %v10332_v44 = vrot.slane %v6034_v38, 9  ;;  %v7913_v19 = vrot.slane %v7119_v50, 7  ;;  %v8752_v7 = vsel %vm8551_vm5, %v8751_v62, %v16088_v33 }
 0x746   : > { %v10178_v36 = vrot.slane %v16613_v16, 9  ;;  %v16675_v31 = vrot.slane %v7183_v10, 7  ;;  %v16678_v9 = vperm.slane %v8768_v4, %v15777_v28  ;;  %v7054_v43 = vmax.f32 %v5890_v23, %v10140_v58  ;;  %v18888_v10 = vld [vmem:[#allocation110_spill] sm:$0xff] }
 0x747   : > { %v16680_v17 = vld.sshfl [vmem:[#allocation1] sm:$0xff pattern:$0x73625140]  ;;  %v10181_v26 = vrot.slane %v5921_v32, 9  ;;  %v16682_v6 = vrot.slane %v7247_v51, 7  ;;  %v8748_v27 = vperm.slane %v8744_v0, %v15777_v28  ;;  %v7118_v34 = vmax.f32 %v5938_v11, %v10204_v21  ;;  %v18889_v4 = vld [vmem:[#allocation18_spill] sm:$0xff] }
 0x748   : > { %9245 = vst [vmem:[#allocation1 + $0x2] ss:$4 sm:$0xff] %v16670_v46  ;;  %v10180_v33 = vrot.slane %v5920_v35, 9  ;;  %v7182_v52 = vmax.f32 %v5986_v45, %v10268_v40  ;;  %v7690_v12 = vsel %vm7525_vm1, %v7689_v41, %v7054_v43  ;;  %v8756_v39 = vperm.slane %v8752_v7, %v15777_v28  ;;  %v18890_v40 = vld [vmem:[#allocation138_spill] sm:$0xff] }
 0x749   : > { %9247 = vst [vmem:[#allocation1 + $0x3] ss:$4 sm:$0xff] %v16678_v9  ;;  %v7606_v23 = vsel %vm7525_vm1, %v16653_v61, %v16624_v3  ;;  %v16692_v13 = vrot.slane %v7093_v15, 7  ;;  %v7246_v57 = vmax.f32 %v6034_v38, %v10332_v44  ;;  %v7914_v11 = vsel %vm7525_vm1, %v7913_v19, %v7118_v34  ;;  %v5558_v3 = vpop.f32.mrf.mxu1 }
 0x74a   : > { %9241 = vst [vmem:[#allocation1] ss:$4 sm:$0xff] %v8748_v27  ;;  %v7600_v45 = vsel %vm7527_vm2, %v16637_v47, %v7599_v59  ;;  %v7092_v50 = vmax.f32 %v16613_v16, %v10178_v36  ;;  %v8138_v62 = vsel %vm7525_vm1, %v16675_v31, %v7182_v52  ;;  %v16701_v8 = vmax.f32 %v18888_v10, %v5638_v18  ;;  %v18891_v36 = vld [vmem:[#allocation228_spill] sm:$0xff]  ;;  %v18892_v10 = vld [vmem:[#allocation215_spill] sm:$0xff] }
 0x74b   : > { %9243 = vst [vmem:[#allocation1 + $0x1] ss:$4 sm:$0xff] %v8756_v39  ;;  %v7095_v58 = vmax.f32 %v5921_v32, %v10181_v26  ;;  %v8362_v38 = vsel %vm7525_vm1, %v16682_v6, %v7246_v57  ;;  %v7691_v51 = vsel %vm7527_vm2, %v7689_v41, %v7690_v12  ;;  %v16707_v21 = vmax.f32 %v18889_v4, %v5718_v20 }
 0x74c   : > { %v7607_v16 = vsel %vm7527_vm2, %v16653_v61, %v7606_v23  ;;  %v7094_v59 = vmax.f32 %v5920_v35, %v10180_v33  ;;  %v7915_v15 = vsel %vm7527_vm2, %v7913_v19, %v7914_v11  ;;  %v16713_v0 = vmax.f32 %v18890_v40, %v5478_v63 }
 0x74d   : > { %v7823_v32 = vsel %vm7525_vm1, %v16692_v13, %v7092_v50  ;;  %v8139_v44 = vsel %vm7527_vm2, %v16675_v31, %v8138_v62  ;;  %v8749_v7 = vrot.slane %v8748_v27, 4  ;;  %v16720_v43 = vmax.f32 %v18891_v36, %v5558_v3  ;;  %v18893_v3 = vld [vmem:[#allocation280_spill] sm:$0xff] }
 0x74e   : > { %v8363_v26 = vsel %vm7527_vm2, %v16682_v6, %v8362_v38  ;;  %v7692_v35 = vsel %vm7529_vm3, %v7689_v41, %v7691_v51  ;;  %v8757_v34 = vrot.slane %v8756_v39, 4  ;;  %v5988_v18 = vrot.slane %v16701_v8, 2 }
 0x74f   : > { %v16726_v33 = vrot.slane %v7095_v58, 7  ;;  %v8765_v52 = vrot.slane %v16670_v46, 4  ;;  %v7916_v12 = vsel %vm7529_vm3, %v7913_v19, %v7915_v15  ;;  %v6036_v20 = vrot.slane %v16707_v21, 2 }
 0x750   : > { %v7824_v27 = vsel %vm7527_vm2, %v16692_v13, %v7823_v32  ;;  %v8140_v23 = vsel %vm7529_vm3, %v16675_v31, %v8139_v44  ;;  %v8773_v57 = vrot.slane %v16678_v9, 4  ;;  %v5892_v39 = vrot.slane %v16713_v0, 2 }
 0x751   : > { %v8364_v11 = vsel %vm7529_vm3, %v16682_v6, %v8363_v26  ;;  %v7693_v63 = vsel %vm7531_vm4, %v7689_v41, %v7692_v35  ;;  %v8750_v46 = vsel %vm8551_vm5, 0.0, %v8749_v7  ;;  %v5940_v62 = vrot.slane %v16720_v43, 2 }
 0x752   : > { %v16741_v50 = vld.sshfl [vmem:[#allocation1] sm:$0xff pattern:$0x73625140]  ;;  %v16746_v58 = vmax.f32 %v18893_v3, %v18892_v10  ;;  %v7917_v38 = vsel %vm7531_vm4, %v7913_v19, %v7916_v12  ;;  %v8758_v9 = vsel %vm8551_vm5, 0.0, %v8757_v34  ;;  %v10271_v51 = vrot.slane %v5988_v18, 9 }
 0x753   : > { %9254 = vst [vmem:[#allocation1] ss:$4 sm:$0xff] %v8750_v46  ;;  %v7830_v4 = vsel %vm7525_vm1, %v16726_v33, %v7094_v59  ;;  %v8141_v41 = vsel %vm7531_vm4, %v16675_v31, %v8140_v23  ;;  %v8766_v15 = vsel %vm8551_vm5, 0.0, %v8765_v52  ;;  %v10335_v40 = vrot.slane %v6036_v20, 9 }
 0x754   : > { %9256 = vst [vmem:[#allocation1 + $0x1] ss:$4 sm:$0xff] %v8758_v9  ;;  %v8365_v32 = vsel %vm7531_vm4, %v16682_v6, %v8364_v11  ;;  %v8774_v44 = vsel %vm8551_vm5, 0.0, %v8773_v57  ;;  %v8775_v19 = vrot.slane %v7693_v63, 4  ;;  %v10143_v7 = vrot.slane %v5892_v39, 9 }
 0x755   : > { %9258 = vst [vmem:[#allocation1 + $0x2] ss:$4 sm:$0xff] %v8766_v15  ;;  %v7818_v36 = vsel %vm7529_vm3, %v16560_v22, %v16621_v14  ;;  %v7601_v59 = vsel %vm7529_vm3, %v16637_v47, %v7600_v45  ;;  %v8783_v31 = vrot.slane %v7917_v38, 4  ;;  %v10207_v26 = vrot.slane %v5940_v62, 9 }
 0x756   : > { %9260 = vst [vmem:[#allocation1 + $0x3] ss:$4 sm:$0xff] %v8774_v44  ;;  %v7608_v35 = vsel %vm7529_vm3, %v16653_v61, %v7607_v16  ;;  %v5970_v6 = vrot.slane %v16746_v58, 2  ;;  %v8791_v34 = vrot.slane %v8141_v41, 4  ;;  %v7185_v52 = vmax.f32 %v5988_v18, %v10271_v51 }
 0x757   : > { %v7825_v12 = vsel %vm7529_vm3, %v16692_v13, %v7824_v27  ;;  %v7831_v23 = vsel %vm7527_vm2, %v16726_v33, %v7830_v4  ;;  %v8799_v14 = vrot.slane %v8365_v32, 4  ;;  %v7249_v57 = vmax.f32 %v6036_v20, %v10335_v40 }
 0x758   : > { %v5971_v45 = vrot.slane %v16746_v58, 4  ;;  %v8776_v11 = vsel %vm8551_vm5, %v8775_v19, %v16084_v60  ;;  %v10270_v63 = vrot.slane %v16701_v8, 9  ;;  %v7057_v16 = vmax.f32 %v5892_v39, %v10143_v7 }
 0x759   : > { %v5972_v46 = vrot.slane %v16746_v58, 6  ;;  %v8784_v18 = vsel %vm8551_vm5, %v8783_v31, %v16092_v2  ;;  %v10334_v27 = vrot.slane %v16707_v21, 9  ;;  %v7121_v10 = vmax.f32 %v5940_v62, %v10207_v26 }
 0x75a   : > { %v10247_v3 = vrot.slane %v5970_v6, 9  ;;  %v8792_v20 = vsel %vm8551_vm5, %v8791_v34, %v15895_v53  ;;  %v8144_v38 = vrot.slane %v7185_v52, 7  ;;  %v10142_v9 = vrot.slane %v16713_v0, 9 }
 0x75b   : > { %v8800_v60 = vsel %vm8551_vm5, %v8799_v14, %v16002_v42  ;;  %v8780_v39 = vperm.slane %v8776_v11, %v15777_v28  ;;  %v8368_v51 = vrot.slane %v7249_v57, 7  ;;  %v10206_v4 = vrot.slane %v16720_v43, 9 }
 0x75c   : > { %v7832_v2 = vsel %vm7529_vm3, %v16726_v33, %v7831_v23  ;;  %v8788_v62 = vperm.slane %v8784_v18, %v15777_v28  ;;  %v7184_v15 = vmax.f32 %v16701_v8, %v10270_v63  ;;  %v7696_v53 = vrot.slane %v7057_v16, 7 }
 0x75d   : > { %v9261_v41 = vld.sshfl [vmem:[#allocation1] sm:$0xff pattern:$0x73625140]  ;;  %v10246_v40 = vrot.slane %v16746_v58, 9  ;;  %v8796_v32 = vperm.slane %v8792_v20, %v15777_v28  ;;  %v7248_v42 = vmax.f32 %v16707_v21, %v10334_v27  ;;  %v7920_v44 = vrot.slane %v7121_v10, 7 }
 0x75e   : > { %9269 = vst [vmem:[#allocation1] ss:$4 sm:$0xff] %v8780_v39  ;;  %9262 = vrot.lane.b32.xlu1 %v9261_v41, %s10865_s10  ;;  %v10249_v19 = vrot.slane %v5972_v46, 9  ;;  %v8804_v7 = vperm.slane %v8800_v60, %v15777_v28  ;;  %v8145_v31 = vsel %vm7525_vm1, %v8144_v38, %v7184_v15  ;;  %v7056_v26 = vmax.f32 %v16713_v0, %v10142_v9 }
 0x75f   : > { %9271 = vst [vmem:[#allocation1 + $0x1] ss:$4 sm:$0xff] %v8788_v62  ;;  %v10248_v34 = vrot.slane %v5971_v45, 9  ;;  %v7161_v52 = vmax.f32 %v5970_v6, %v10247_v3  ;;  %v8369_v23 = vsel %vm7525_vm1, %v8368_v51, %v7248_v42  ;;  %v7120_v14 = vmax.f32 %v16720_v43, %v10206_v4 }
 0x760   : > { %9273 = vst [vmem:[#allocation1 + $0x2] ss:$4 sm:$0xff] %v8796_v32  ;;  %v16800_v57 = vsel %vm7531_vm4, %v16560_v22, %v7818_v36  ;;  %v16804_v11 = vsel %vm7531_vm4, %v16637_v47, %v7601_v59  ;;  %v16808_v63 = vsel %vm7531_vm4, %v16653_v61, %v7608_v35  ;;  %v7697_v6 = vsel %vm7525_vm1, %v7696_v53, %v7056_v26  ;;  %v18894_v61 = vld [vmem:[#allocation294_spill] sm:$0xff]  ;;  %v18895_v35 = vld [vmem:[#allocation35_spill] sm:$0xff] }
 0x761   : > { %9275 = vst [vmem:[#allocation1 + $0x3] ss:$4 sm:$0xff] %v8804_v7  ;;  %v16813_v16 = vsel %vm7531_vm4, %v16692_v13, %v7825_v12  ;;  %v16817_v18 = vsel %vm7531_vm4, %v16726_v33, %v7832_v2  ;;  %v8146_v22 = vsel %vm7527_vm2, %v8144_v38, %v8145_v31  ;;  %v7921_v47 = vsel %vm7525_vm1, %v7920_v44, %v7120_v14 }
 0x762   : > { %v7160_v36 = vmax.f32 %v16746_v58, %v10246_v40  ;;  %v7163_v59 = vmax.f32 %v5972_v46, %v10249_v19  ;;  %v16824_v27 = vmax.f32 %v18895_v35, %v18894_v61  ;;  %v8370_v10 = vsel %vm7527_vm2, %v8368_v51, %v8369_v23 }
 0x763   : > { %v7162_v3 = vmax.f32 %v5971_v45, %v10248_v34  ;;  %v16827_v13 = vrot.slane %v7161_v52, 7  ;;  %v8781_v12 = vrot.slane %v8780_v39, 4  ;;  %v7698_v33 = vsel %vm7527_vm2, %v7696_v53, %v7697_v6 }
 0x764   : > { %v8789_v20 = vrot.slane %v8788_v62, 4  ;;  %v8147_v9 = vsel %vm7529_vm3, %v8144_v38, %v8146_v22  ;;  %v5894_v60 = vrot.slane %v16713_v0, 6  ;;  %v7922_v58 = vsel %vm7527_vm2, %v7920_v44, %v7921_v47 }
 0x765   : > { %v8797_v46 = vrot.slane %v8796_v32, 4  ;;  %v8805_v4 = vrot.slane %v8804_v7, 4  ;;  %v8371_v2 = vsel %vm7529_vm3, %v8368_v51, %v8370_v10  ;;  %v5942_v41 = vrot.slane %v16720_v43, 6 }
 0x766   : > { %v16835_v15 = vrot.slane %v7163_v59, 7  ;;  %v6018_v45 = vrot.slane %v16824_v27, 2  ;;  %v5990_v39 = vrot.slane %v16701_v8, 6  ;;  %v7699_v62 = vsel %vm7529_vm3, %v7696_v53, %v7698_v33 }
 0x767   : > { %v8782_v40 = vsel %vm8551_vm5, 0.0, %v8781_v12  ;;  %v8148_v19 = vsel %vm7531_vm4, %v8144_v38, %v8147_v9  ;;  %v6038_v32 = vrot.slane %v16707_v21, 6  ;;  %v7923_v7 = vsel %vm7529_vm3, %v7920_v44, %v7922_v58 }
 0x768   : > { %v16841_v42 = vld.sshfl [vmem:[#allocation1] sm:$0xff pattern:$0x73625140]  ;;  %v6019_v31 = vrot.slane %v16824_v27, 4  ;;  %v8790_v26 = vsel %vm8551_vm5, 0.0, %v8789_v20  ;;  %v8372_v34 = vsel %vm7531_vm4, %v8368_v51, %v8371_v2  ;;  %v10145_v52 = vrot.slane %v5894_v60, 9 }
 0x769   : > { %9284 = vst [vmem:[#allocation1] ss:$4 sm:$0xff] %v8782_v40  ;;  %v8798_v23 = vsel %vm8551_vm5, 0.0, %v8797_v46  ;;  %v8806_v14 = vsel %vm8551_vm5, 0.0, %v8805_v4  ;;  %v7700_v6 = vsel %vm7531_vm4, %v7696_v53, %v7699_v62  ;;  %v10209_v38 = vrot.slane %v5942_v41, 9 }
 0x76a   : > { %9286 = vst [vmem:[#allocation1 + $0x1] ss:$4 sm:$0xff] %v8790_v26  ;;  %v10273_v22 = vrot.slane %v5990_v39, 9  ;;  %v8823_v47 = vrot.slane %v8148_v19, 4  ;;  %v5893_v59 = vrot.slane %v16713_v0, 4  ;;  %v7924_v61 = vsel %vm7531_vm4, %v7920_v44, %v7923_v7 }
 0x76b   : > { %9288 = vst [vmem:[#allocation1 + $0x2] ss:$4 sm:$0xff] %v8798_v23  ;;  %v8061_v35 = vsel %vm7525_vm1, %v16827_v13, %v7160_v36  ;;  %v10337_v51 = vrot.slane %v6038_v32, 9  ;;  %v8831_v10 = vrot.slane %v8372_v34, 4  ;;  %v5941_v12 = vrot.slane %v16720_v43, 4 }
 0x76c   : > { %9290 = vst [vmem:[#allocation1 + $0x3] ss:$4 sm:$0xff] %v8806_v14  ;;  %v6020_v33 = vrot.slane %v16824_v27, 6  ;;  %v5989_v53 = vrot.slane %v16701_v8, 4  ;;  %v7059_v20 = vmax.f32 %v5894_v60, %v10145_v52  ;;  %v8807_v9 = vrot.slane %v7700_v6, 4  ;;  %v5640_v6 = vpop.f32.mrf.mxu2 }
 0x76d   : > { %v10310_v58 = vrot.slane %v16824_v27, 9  ;;  %v6037_v0 = vrot.slane %v16707_v21, 4  ;;  %v7123_v46 = vmax.f32 %v5942_v41, %v10209_v38  ;;  %v8815_v44 = vrot.slane %v7924_v61, 4 }
 0x76e   : > { %v8062_v36 = vsel %vm7527_vm2, %v16827_v13, %v8061_v35  ;;  %v7187_v4 = vmax.f32 %v5990_v39, %v10273_v22  ;;  %v8824_v2 = vsel %vm8551_vm5, %v8823_v47, %v16150_v1  ;;  %v10144_v43 = vrot.slane %v5893_v59, 9  ;;  %v5720_v35 = vpop.f32.mrf.mxu3 }
 0x76f   : > { %v8068_v62 = vsel %vm7525_vm1, %v16835_v15, %v7162_v3  ;;  %v7251_v8 = vmax.f32 %v6038_v32, %v10337_v51  ;;  %v8832_v60 = vsel %vm8551_vm5, %v8831_v10, %v16202_v30  ;;  %v10208_v40 = vrot.slane %v5941_v12, 9 }
 0x770   : > { %v10311_v21 = vrot.slane %v6018_v45, 9  ;;  %v10272_v41 = vrot.slane %v5989_v53, 9  ;;  %v7703_v19 = vrot.slane %v7059_v20, 7  ;;  %v8808_v39 = vsel %vm8551_vm5, %v8807_v9, %v16601_v49  ;;  %v5480_v9 = vpop.f32.mrf.mxu0 }
 0x771   : > { %v16874_v7 = vperm.slane %v8824_v2, %v15777_v28  ;;  %v10336_v1 = vrot.slane %v6037_v0, 9  ;;  %v16876_v26 = vrot.slane %v7123_v46, 7  ;;  %v8816_v3 = vsel %vm8551_vm5, %v8815_v44, %v16635_v29  ;;  %v5560_v2 = vpop.f32.mrf.mxu1 }
 0x772   : > { %v8069_v30 = vsel %vm7527_vm2, %v16835_v15, %v8068_v62  ;;  %v16884_v34 = vrot.slane %v7187_v4, 7  ;;  %v16887_v52 = vperm.slane %v8832_v60, %v15777_v28  ;;  %v7058_v49 = vmax.f32 %v5893_v59, %v10144_v43 }
 0x773   : > { %v16882_v32 = vld.sshfl [vmem:[#allocation1] sm:$0xff pattern:$0x73625140]  ;;  %v8063_v23 = vsel %vm7529_vm3, %v16827_v13, %v8062_v36  ;;  %v8375_v14 = vrot.slane %v7251_v8, 7  ;;  %v8812_v29 = vperm.slane %v8808_v39, %v15777_v28  ;;  %v7122_v38 = vmax.f32 %v5941_v12, %v10208_v40 }
 0x774   : > { %9303 = vst [vmem:[#allocation1 + $0x2] ss:$4 sm:$0xff] %v16874_v7  ;;  %v10312_v22 = vrot.slane %v6019_v31, 9  ;;  %v7186_v47 = vmax.f32 %v5989_v53, %v10272_v41  ;;  %v7704_v61 = vsel %vm7525_vm1, %v7703_v19, %v7058_v49  ;;  %v8820_v59 = vperm.slane %v8816_v3, %v15777_v28  ;;  %v18896_v36 = vld [vmem:[#allocation36_spill] sm:$0xff]  ;;  %v18898_v41 = vld [vmem:[#allocation249_spill] sm:$0xff]  ;;  %v18899_v3 = vld [vmem:[#allocation22_spill] sm:$0xff] }
 0x775   : > { %9305 = vst [vmem:[#allocation1 + $0x3] ss:$4 sm:$0xff] %v16887_v52  ;;  %v8070_v51 = vsel %vm7529_vm3, %v16835_v15, %v8069_v30  ;;  %v10313_v10 = vrot.slane %v6020_v33, 9  ;;  %v7250_v20 = vmax.f32 %v6037_v0, %v10336_v1  ;;  %v7928_v12 = vsel %vm7525_vm1, %v16876_v26, %v7122_v38  ;;  %v18897_v8 = vld [vmem:[#allocation244_spill] sm:$0xff] }
 0x776   : > { %9299 = vst [vmem:[#allocation1] ss:$4 sm:$0xff] %v8812_v29  ;;  %v16904_v53 = vsel %vm7531_vm4, %v16827_v13, %v8063_v23  ;;  %v7224_v46 = vmax.f32 %v16824_v27, %v10310_v58  ;;  %v8152_v44 = vsel %vm7525_vm1, %v16884_v34, %v7186_v47  ;;  %v16910_v4 = vmax.f32 %v18896_v36, %v5640_v6  ;;  %v18900_v23 = vld [vmem:[#allocation143_spill] sm:$0xff]  ;;  %v18901_v6 = vld [vmem:[#allocation162_spill] sm:$0xff]  ;;  %v18902_v47 = vld [vmem:[#allocation304_spill] sm:$0xff] }
 0x777   : > { %9301 = vst [vmem:[#allocation1 + $0x1] ss:$4 sm:$0xff] %v8820_v59  ;;  %v7225_v0 = vmax.f32 %v6018_v45, %v10311_v21  ;;  %v8376_v43 = vsel %vm7525_vm1, %v8375_v14, %v7250_v20  ;;  %v7705_v62 = vsel %vm7527_vm2, %v7703_v19, %v7704_v61  ;;  %v16917_v13 = vmax.f32 %v18897_v8, %v5720_v35  ;;  %v18903_v61 = vld [vmem:[#allocation305_spill] sm:$0xff]  ;;  %v18905_v8 = vld [vmem:[#allocation191_spill] sm:$0xff] }
 0x778   : > { %v16921_v58 = vsel %vm7531_vm4, %v16835_v15, %v8070_v51  ;;  %v16925_v60 = vmax.f32 %v6019_v31, %v10312_v22  ;;  %v7929_v40 = vsel %vm7527_vm2, %v16876_v26, %v7928_v12  ;;  %v16930_v45 = vmax.f32 %v18898_v41, %v5480_v9 }
 0x779   : > { %v7227_v21 = vmax.f32 %v6020_v33, %v10313_v10  ;;  %v8153_v39 = vsel %vm7527_vm2, %v16884_v34, %v8152_v44  ;;  %v8813_v1 = vrot.slane %v8812_v29, 4  ;;  %v16935_v30 = vmax.f32 %v18899_v3, %v5560_v2 }
 0x77a   : > { %v8377_v15 = vsel %vm7527_vm2, %v8375_v14, %v8376_v43  ;;  %v5991_v27 = vrot.slane %v16910_v4, 2  ;;  %v7706_v31 = vsel %vm7529_vm3, %v7703_v19, %v7705_v62  ;;  %v8821_v49 = vrot.slane %v8820_v59, 4  ;;  %v18904_v62 = vld [vmem:[#allocation164_spill] sm:$0xff] }
 0x77b   : > { %v16942_v38 = vmax.f32 %v18901_v6, %v18900_v23  ;;  %v8829_v33 = vrot.slane %v16874_v7, 4  ;;  %v6039_v22 = vrot.slane %v16917_v13, 2  ;;  %v7930_v29 = vsel %vm7529_vm3, %v16876_v26, %v7929_v40 }
 0x77c   : > { %v16950_v35 = vmax.f32 %v18903_v61, %v18902_v47  ;;  %v8154_v51 = vsel %vm7529_vm3, %v16884_v34, %v8153_v39  ;;  %v8837_v59 = vrot.slane %v16887_v52, 4  ;;  %v5895_v10 = vrot.slane %v16930_v45, 2 }
 0x77d   : > { %v8378_v20 = vsel %vm7529_vm3, %v8375_v14, %v8377_v15  ;;  %v7707_v7 = vsel %vm7531_vm4, %v7703_v19, %v7706_v31  ;;  %v8814_v12 = vsel %vm8551_vm5, 0.0, %v8813_v1  ;;  %v5943_v44 = vrot.slane %v16935_v30, 2  ;;  %v18906_v31 = vld [vmem:[#allocation260_spill] sm:$0xff] }
 0x77e   : > { %v16959_v9 = vld.sshfl [vmem:[#allocation1] sm:$0xff pattern:$0x73625140]  ;;  %v16962_v36 = vrot.slane %v7225_v0, 7  ;;  %v10275_v2 = vrot.slane %v5991_v27, 9  ;;  %v7931_v43 = vsel %vm7531_vm4, %v16876_v26, %v7930_v29  ;;  %v8822_v52 = vsel %vm8551_vm5, 0.0, %v8821_v49 }
 0x77f   : > { %9312 = vst [vmem:[#allocation1] ss:$4 sm:$0xff] %v8814_v12  ;;  %v16969_v40 = vmax.f32 %v18905_v8, %v18904_v62  ;;  %v8155_v19 = vsel %vm7531_vm4, %v16884_v34, %v8154_v51  ;;  %v8830_v41 = vsel %vm8551_vm5, 0.0, %v8829_v33  ;;  %v10339_v39 = vrot.slane %v6039_v22, 9  ;;  %v18907_v49 = vld [vmem:[#allocation261_spill] sm:$0xff] }
 0x780   : > { %9314 = vst [vmem:[#allocation1 + $0x1] ss:$4 sm:$0xff] %v8822_v52  ;;  %v8379_v0 = vsel %vm7531_vm4, %v8375_v14, %v8378_v20  ;;  %v8838_v1 = vsel %vm8551_vm5, 0.0, %v8837_v59  ;;  %v8839_v3 = vrot.slane %v7707_v7, 4  ;;  %v10147_v26 = vrot.slane %v5895_v10, 9 }
 0x781   : > { %9316 = vst [vmem:[#allocation1 + $0x2] ss:$4 sm:$0xff] %v8830_v41  ;;  %v16976_v15 = vrot.slane %v7227_v21, 7  ;;  %v16980_v23 = vmax.f32 %v18907_v49, %v18906_v31  ;;  %v8847_v6 = vrot.slane %v7931_v43, 4  ;;  %v10211_v34 = vrot.slane %v5943_v44, 9 }
 0x782   : > { %9318 = vst [vmem:[#allocation1 + $0x3] ss:$4 sm:$0xff] %v8838_v1  ;;  %v5973_v33 = vrot.slane %v16942_v38, 2  ;;  %v17934_v29 = vrot.slane %v16942_v38, 4  ;;  %v8855_v47 = vrot.slane %v8155_v19, 4  ;;  %v7189_v14 = vmax.f32 %v5991_v27, %v10275_v2 }
 0x783   : > { %v8285_v61 = vsel %vm7525_vm1, %v16962_v36, %v7224_v46  ;;  %v17935_v51 = vrot.slane %v16942_v38, 6  ;;  %v8863_v21 = vrot.slane %v8379_v0, 4  ;;  %v7253_v59 = vmax.f32 %v6039_v22, %v10339_v39 }
 0x784   : > { %v10250_v20 = vrot.slane %v16942_v38, 9  ;;  %v10274_v7 = vrot.slane %v16910_v4, 9  ;;  %v8840_v12 = vsel %vm8551_vm5, %v8839_v3, %v16605_v56  ;;  %v7061_v43 = vmax.f32 %v5895_v10, %v10147_v26 }
 0x785   : > { %v6021_v52 = vrot.slane %v16950_v35, 2  ;;  %v10338_v62 = vrot.slane %v16917_v13, 9  ;;  %v8848_v27 = vsel %vm8551_vm5, %v8847_v6, %v16800_v57  ;;  %v7125_v46 = vmax.f32 %v5943_v44, %v10211_v34 }
 0x786   : > { %v8286_v2 = vsel %vm7527_vm2, %v16962_v36, %v8285_v61  ;;  %v8856_v22 = vsel %vm8551_vm5, %v8855_v47, %v16154_v25  ;;  %v8158_v8 = vrot.slane %v7189_v14, 7  ;;  %v10146_v19 = vrot.slane %v16930_v45, 9 }
 0x787   : > { %v8864_v56 = vsel %vm8551_vm5, %v8863_v21, %v16208_v54  ;;  %v8844_v10 = vperm.slane %v8840_v12, %v15777_v28  ;;  %v8382_v41 = vrot.slane %v7253_v59, 7  ;;  %v10210_v39 = vrot.slane %v16935_v30, 9 }
 0x788   : > { %v8292_v57 = vsel %vm7525_vm1, %v16976_v15, %v16925_v60  ;;  %v7188_v44 = vmax.f32 %v16910_v4, %v10274_v7  ;;  %v8852_v0 = vperm.slane %v8848_v27, %v15777_v28  ;;  %v7710_v1 = vrot.slane %v7061_v43, 7 }
 0x789   : > { %v9319_v25 = vld.sshfl [vmem:[#allocation1] sm:$0xff pattern:$0x73625140]  ;;  %v8287_v3 = vsel %vm7529_vm3, %v16962_v36, %v8286_v2  ;;  %v8860_v54 = vperm.slane %v8856_v22, %v15777_v28  ;;  %v7252_v26 = vmax.f32 %v16917_v13, %v10338_v62  ;;  %v7934_v31 = vrot.slane %v7125_v46, 7 }
 0x78a   : > { %9327 = vst [vmem:[#allocation1] ss:$4 sm:$0xff] %v8844_v10  ;;  %9320 = vrot.lane.b32.xlu2 %v9319_v25, %s10865_s10  ;;  %v8868_v49 = vperm.slane %v8864_v56, %v15777_v28  ;;  %v5993_v60 = vrot.slane %v16910_v4, 6  ;;  %v8159_v6 = vsel %vm7525_vm1, %v8158_v8, %v7188_v44  ;;  %v7060_v34 = vmax.f32 %v16930_v45, %v10146_v19 }
 0x78b   : > { %9329 = vst [vmem:[#allocation1 + $0x1] ss:$4 sm:$0xff] %v8852_v0  ;;  %v10251_v47 = vrot.slane %v5973_v33, 9  ;;  %v8383_v61 = vsel %vm7525_vm1, %v8382_v41, %v7252_v26  ;;  %v7124_v21 = vmax.f32 %v16935_v30, %v10210_v39  ;;  %v8293_v59 = vsel %vm7527_vm2, %v16976_v15, %v8292_v57 }
 0x78c   : > { %9331 = vst [vmem:[#allocation1 + $0x2] ss:$4 sm:$0xff] %v8860_v54  ;;  %v17027_v7 = vrot.slane %v17934_v29, 9  ;;  %v17031_v12 = vrot.slane %v17935_v51, 9  ;;  %v7711_v43 = vsel %vm7525_vm1, %v7710_v1, %v7060_v34  ;;  %v17036_v62 = vsel %vm7531_vm4, %v16962_v36, %v8287_v3 }
 0x78d   : > { %9333 = vst [vmem:[#allocation1 + $0x3] ss:$4 sm:$0xff] %v8868_v49  ;;  %v17039_v27 = vmax.f32 %v16942_v38, %v10250_v20  ;;  %v8160_v46 = vsel %vm7527_vm2, %v8158_v8, %v8159_v6  ;;  %v7935_v2 = vsel %vm7525_vm1, %v7934_v31, %v7124_v21  ;;  %v5992_v22 = vrot.slane %v16910_v4, 4 }
 0x78e   : > { %v10277_v19 = vrot.slane %v5993_v60, 9  ;;  %v6041_v56 = vrot.slane %v16917_v13, 6  ;;  %v8384_v39 = vsel %vm7527_vm2, %v8382_v41, %v8383_v61  ;;  %v8294_v57 = vsel %vm7529_vm3, %v16976_v15, %v8293_v59 }
 0x78f   : > { %v8845_v44 = vrot.slane %v8844_v10, 4  ;;  %v5897_v36 = vrot.slane %v16930_v45, 6  ;;  %v7712_v20 = vsel %vm7527_vm2, %v7710_v1, %v7711_v43  ;;  %v8161_v25 = vsel %vm7529_vm3, %v8158_v8, %v8160_v46 }
 0x790   : > { %v8853_v3 = vrot.slane %v8852_v0, 4  ;;  %v5945_v26 = vrot.slane %v16935_v30, 6  ;;  %v7936_v4 = vsel %vm7527_vm2, %v7934_v31, %v7935_v2  ;;  %v17055_v6 = vmax.f32 %v5973_v33, %v10251_v47 }
 0x791   : > { %v8861_v34 = vrot.slane %v8860_v54, 4  ;;  %v8869_v61 = vrot.slane %v8868_v49, 4  ;;  %v8385_v21 = vsel %vm7529_vm3, %v8382_v41, %v8384_v39  ;;  %v10276_v10 = vrot.slane %v5992_v22, 9 }
 0x792   : > { %v7191_v59 = vmax.f32 %v5993_v60, %v10277_v19  ;;  %v10341_v29 = vrot.slane %v6041_v56, 9  ;;  %v7713_v43 = vsel %vm7529_vm3, %v7710_v1, %v7712_v20  ;;  %v8162_v46 = vsel %vm7531_vm4, %v8158_v8, %v8161_v25 }
 0x793   : > { %v8846_v0 = vsel %vm8551_vm5, 0.0, %v8845_v44  ;;  %v10149_v2 = vrot.slane %v5897_v36, 9  ;;  %v7937_v51 = vsel %vm7529_vm3, %v7934_v31, %v7936_v4  ;;  %v6040_v33 = vrot.slane %v16917_v13, 4 }
 0x794   : > { %v17061_v14 = vld.sshfl [vmem:[#allocation1] sm:$0xff pattern:$0x73625140]  ;;  %v8386_v54 = vsel %vm7531_vm4, %v8382_v41, %v8385_v21  ;;  %v8854_v49 = vsel %vm8551_vm5, 0.0, %v8853_v3  ;;  %v10213_v60 = vrot.slane %v5945_v26, 9  ;;  %v8862_v47 = vsel %vm8551_vm5, 0.0, %v8861_v34 }
 0x795   : > { %9342 = vst [vmem:[#allocation1] ss:$4 sm:$0xff] %v8846_v0  ;;  %v8870_v19 = vsel %vm8551_vm5, 0.0, %v8869_v61  ;;  %v5896_v8 = vrot.slane %v16930_v45, 4  ;;  %v7714_v39 = vsel %vm7531_vm4, %v7710_v1, %v7713_v43  ;;  %v8887_v44 = vrot.slane %v8162_v46, 4 }
 0x796   : > { %9344 = vst [vmem:[#allocation1 + $0x1] ss:$4 sm:$0xff] %v8854_v49  ;;  %v7255_v20 = vmax.f32 %v6041_v56, %v10341_v29  ;;  %v5944_v13 = vrot.slane %v16935_v30, 4  ;;  %v7938_v41 = vsel %vm7531_vm4, %v7934_v31, %v7937_v51  ;;  %v17075_v25 = vsel %vm7531_vm4, %v16976_v15, %v8294_v57 }
 0x797   : > { %9346 = vst [vmem:[#allocation1 + $0x2] ss:$4 sm:$0xff] %v8862_v47  ;;  %v17077_v3 = vrot.slane %v7191_v59, 7  ;;  %v8895_v4 = vrot.slane %v8386_v54, 4  ;;  %v7063_v34 = vmax.f32 %v5897_v36, %v10149_v2  ;;  %v17936_v45 = vrot.slane %v16950_v35, 6 }
 0x798   : > { %9348 = vst [vmem:[#allocation1 + $0x3] ss:$4 sm:$0xff] %v8870_v19  ;;  %v10340_v61 = vrot.slane %v6040_v33, 9  ;;  %v8871_v1 = vrot.slane %v7714_v39, 4  ;;  %v7127_v21 = vmax.f32 %v5945_v26, %v10213_v60  ;;  %v7190_v56 = vmax.f32 %v5992_v22, %v10276_v10 }
 0x799   : > { %v10148_v30 = vrot.slane %v5896_v8, 9  ;;  %v8879_v43 = vrot.slane %v7938_v41, 4  ;;  %v10315_v51 = vrot.slane %v6021_v52, 9  ;;  %v8888_v15 = vsel %vm8551_vm5, %v8887_v44, %v16334_v37 }
 0x79a   : > { %v17085_v31 = vrot.slane %v7255_v20, 7  ;;  %v10212_v57 = vrot.slane %v5944_v13, 9  ;;  %v5874_v36 = vrot.slane %v16969_v40, 2  ;;  %v8166_v59 = vsel %vm7525_vm1, %v17077_v3, %v7190_v56  ;;  %v5643_v20 = vpop.f32.mrf.mxu2 }
 0x79b   : > { %v8896_v26 = vsel %vm8551_vm5, %v8895_v4, %v16468_v5  ;;  %v17092_v22 = vrot.slane %v7063_v34, 7  ;;  %v17937_v10 = vrot.slane %v16969_v40, 4  ;;  %v7254_v46 = vmax.f32 %v6040_v33, %v10340_v61  ;;  %v5723_v61 = vpop.f32.mrf.mxu3 }
 0x79c   : > { %v8872_v0 = vsel %vm8551_vm5, %v8871_v1, %v16804_v11  ;;  %v17097_v37 = vrot.slane %v7127_v21, 7  ;;  %v5876_v2 = vrot.slane %v16969_v40, 6  ;;  %v17101_v54 = vperm.slane %v8888_v15, %v15777_v28 }
 0x79d   : > { %v7062_v49 = vmax.f32 %v5896_v8, %v10148_v30  ;;  %v8880_v60 = vsel %vm8551_vm5, %v8879_v43, %v16813_v16  ;;  %v8167_v5 = vsel %vm7527_vm2, %v17077_v3, %v8166_v59  ;;  %v8390_v33 = vsel %vm7525_vm1, %v17085_v31, %v7254_v46  ;;  %v5483_v30 = vpop.f32.mrf.mxu0  ;;  %v5563_v59 = vpop.f32.mrf.mxu1 }
 0x79e   : > { %v17110_v47 = vperm.slane %v8896_v26, %v15777_v28  ;;  %v7126_v19 = vmax.f32 %v5944_v13, %v10212_v57  ;;  %v10119_v39 = vrot.slane %v5874_v36, 9  ;;  %v17938_v44 = vrot.slane %v16980_v23, 2 }
 0x79f   : > { %v17112_v11 = vld.sshfl [vmem:[#allocation1] sm:$0xff pattern:$0x73625140]  ;;  %v7718_v16 = vsel %vm7525_vm1, %v17092_v22, %v7062_v49  ;;  %v8876_v8 = vperm.slane %v8872_v0, %v15777_v28  ;;  %v17120_v41 = vrot.slane %v17055_v6, 7  ;;  %v17124_v4 = vrot.slane %v17936_v45, 9  ;;  %v18909_v49 = vld [vmem:[#allocation70_spill] sm:$0xff] }
 0x7a0   : > { %9361 = vst [vmem:[#allocation1 + $0x2] ss:$4 sm:$0xff] %v17101_v54  ;;  %v7942_v13 = vsel %vm7525_vm1, %v17097_v37, %v7126_v19  ;;  %v8884_v34 = vperm.slane %v8880_v60, %v15777_v28  ;;  %v17132_v1 = vmax.f32 %v6021_v52, %v10315_v51  ;;  %v8168_v6 = vsel %vm7529_vm3, %v17077_v3, %v8167_v5  ;;  %v18908_v51 = vld [vmem:[#allocation78_spill] sm:$0xff]  ;;  %v9089_v5 = vpop.permute.xlu2 %9088 }
 0x7a1   : > { %9363 = vst [vmem:[#allocation1 + $0x3] ss:$4 sm:$0xff] %v17110_v47  ;;  %v8391_v56 = vsel %vm7527_vm2, %v17085_v31, %v8390_v33  ;;  %v17141_v43 = vrot.slane %v17937_v10, 9  ;;  %v10121_v15 = vrot.slane %v5876_v2, 9  ;;  %v7719_v52 = vsel %vm7527_vm2, %v17092_v22, %v7718_v16 }
 0x7a2   : > { %9357 = vst [vmem:[#allocation1] ss:$4 sm:$0xff] %v8876_v8  ;;  %v17148_v57 = vmax.f32 %v18908_v51, %v5643_v20  ;;  %v17150_v26 = vmax.f32 %v5874_v36, %v10119_v39  ;;  %v10183_v46 = vrot.slane %v17938_v44, 9  ;;  %v7943_v0 = vsel %vm7527_vm2, %v17097_v37, %v7942_v13  ;;  %v18910_v20 = vld [vmem:[#allocation337_spill] sm:$0xff] }
 0x7a3   : > { %9359 = vst [vmem:[#allocation1 + $0x1] ss:$4 sm:$0xff] %v8884_v34  ;;  %v17157_v60 = vmax.f32 %v18909_v49, %v5723_v61  ;;  %v8169_v33 = vsel %vm7531_vm4, %v17077_v3, %v8168_v6  ;;  %v8392_v19 = vsel %vm7529_vm3, %v17085_v31, %v8391_v56  ;;  %v8877_v16 = vrot.slane %v8876_v8, 4  ;;  %v9104_v8 = vpop.permute.xlu0 %9103  ;;  %v17178_v56 = vld [vmem:[%s17737_s2] sm:$0xff]  ;;  %v18911_v49 = vld [vmem:[#allocation214_spill] sm:$0xff] }
 0x7a4   : > { %v17164_v36 = vmax.f32 %v18910_v20, %v5483_v30  ;;  %v8893_v39 = vrot.slane %v17101_v54, 4  ;;  %v7720_v51 = vsel %vm7529_vm3, %v17092_v22, %v7719_v52  ;;  %v17170_v13 = vmax.f32 %v15773_v55, %v5563_v59  ;;  %v9119_v52 = vpop.permute.xlu1 %9118 }
 0x7a5   : > { %v7944_v61 = vsel %vm7529_vm3, %v17097_v37, %v7943_v0  ;;  %v8885_v3 = vrot.slane %v8884_v34, 4  ;;  %v5994_v6 = vrot.slane %v17148_v57, 2  ;;  %v8393_v54 = vsel %vm7531_vm4, %v17085_v31, %v8392_v19 }
 0x7a6   : > { %v8901_v55 = vrot.slane %v17110_v47, 4  ;;  %v6042_v30 = vrot.slane %v17157_v60, 2  ;;  %v7721_v34 = vsel %vm7531_vm4, %v17092_v22, %v7720_v51  ;;  %v8878_v59 = vsel %vm8551_vm5, 0.0, %v8877_v16 }
 0x7a7   : > { %v5898_v0 = vrot.slane %v17164_v36, 2  ;;  %v9528_v20 = vsel %vm9527_vm6, %v18911_v49, %v9089_v5  ;;  %v7945_v45 = vsel %vm7531_vm4, %v17097_v37, %v7944_v61  ;;  %v5946_v47 = vrot.slane %v17170_v13, 2 }
 0x7a8   : > { %v9530_v19 = vsel %vm9529_vm7, %v9528_v20, %v9104_v8  ;;  %v9556_v29 = vperm.slane %v17178_v56, 0  ;;  %v8919_v10 = vrot.slane %v8169_v33, 4  ;;  %v8886_v22 = vsel %vm8551_vm5, 0.0, %v8885_v3  ;;  %v9147_v61 = vpop.permute.xlu2 %9146 }
 0x7a9   : > { %v10279_v16 = vrot.slane %v5994_v6, 9  ;;  %v9532_v51 = vsel %vm9531_vm8, %v9530_v19, %v9119_v52  ;;  %v8894_v5 = vsel %vm8551_vm5, 0.0, %v8893_v39  ;;  %v8927_v49 = vrot.slane %v8393_v54, 4 }
 0x7aa   : > { %v17192_v31 = vld.sshfl [vmem:[#allocation1] sm:$0xff pattern:$0x73625140]  ;;  %v8903_v21 = vrot.slane %v7721_v34, 4  ;;  %v10343_v37 = vrot.slane %v6042_v30, 9  ;;  %v17202_v44 = vmax.f32 %v5876_v2, %v10121_v15  ;;  %v8902_v8 = vsel %vm8551_vm5, 0.0, %v8901_v55 }
 0x7ab   : > { %9370 = vst [vmem:[#allocation1] ss:$4 sm:$0xff] %v8878_v59  ;;  %v8911_v33 = vrot.slane %v7945_v45, 4  ;;  %v10151_v3 = vrot.slane %v5898_v0, 9  ;;  %v10182_v59 = vrot.slane %v16980_v23, 9  ;;  %v18912_v52 = vrot.slane %v16980_v23, 2  ;;  %v9162_v55 = vpop.permute.xlu0 %9161 }
 0x7ac   : > { %9372 = vst [vmem:[#allocation1 + $0x1] ss:$4 sm:$0xff] %v8886_v22  ;;  %v10215_v39 = vrot.slane %v5946_v47, 9  ;;  %v9572_v54 = vadd.f32 %v9556_v29, %v9532_v51  ;;  %v18913_v34 = vld [vmem:[#allocation100_spill] sm:$0xff]  ;;  %v7193_v22 = vmax.f32 %v5994_v6, %v10279_v16  ;;  %v18914_v2 = vld [vmem:[#allocation278_spill] sm:$0xff]  ;;  %v9557_v45 = vperm.slane %v17178_v56, 1  ;;  %v9177_v29 = vpop.permute.xlu1 %9176 }
 0x7ad   : > { %9374 = vst [vmem:[#allocation1 + $0x2] ss:$4 sm:$0xff] %v8894_v5  ;;  %v7097_v20 = vmax.f32 %v18912_v52, %v10183_v46  ;;  %v8920_v19 = vsel %vm8551_vm5, %v8919_v10, %v18913_v34  ;;  %v9533_v15 = vsel %vm9527_vm6, %v18914_v2, %v9147_v61  ;;  %v8928_v5 = vsel %vm8551_vm5, %v8927_v49, %v16596_v24 }
 0x7ae   : > { %9376 = vst [vmem:[#allocation1 + $0x3] ss:$4 sm:$0xff] %v8902_v8  ;;  %v8904_v46 = vsel %vm8551_vm5, %v8903_v21, %v16808_v63  ;;  %v7257_v8 = vmax.f32 %v6042_v30, %v10343_v37  ;;  %v9534_v52 = vsel %vm9529_vm7, %v9533_v15, %v9162_v55  ;;  %v8912_v10 = vsel %vm8551_vm5, %v8911_v33, %v16817_v18 }
 0x7af   : > { %v10278_v6 = vrot.slane %v17148_v57, 9  ;;  %v7065_v16 = vmax.f32 %v5898_v0, %v10151_v3  ;;  %v9535_v51 = vsel %vm9531_vm8, %v9534_v52, %v9177_v29  ;;  %v10342_v61 = vrot.slane %v17157_v60, 9 }
 0x7b0   : > { %v7129_v24 = vmax.f32 %v5946_v47, %v10215_v39  ;;  %v9588_v49 = vmul.f32 0.01, %v9572_v54  ;;  %v9573_v34 = vadd.f32 %v9557_v45, %v9535_v51  ;;  %v17225_v63 = vperm.slane %v8904_v46, %v15777_v28 }
 0x7b1   : > { %v17227_v21 = vrot.slane %v7193_v22, 7  ;;  %v10150_v30 = vrot.slane %v17164_v36, 9  ;;  %vm9580_vm9 = vcmp.gt.f32.partialorder %v9572_v54, 0.0  ;;  %v17230_v18 = vrot.slane %v7257_v8, 7 }
 0x7b2   : > { %v10214_v0 = vrot.slane %v17170_v13, 9  ;;  %vm9581_vm10 = vcmp.gt.f32.partialorder %v9573_v34, 0.0  ;;  %v9589_v37 = vmul.f32 0.01, %v9573_v34  ;;  %v17238_v47 = vperm.slane %v8920_v19, %v15777_v28 }
 0x7b3   : > { %v8916_v33 = vperm.slane %v8912_v10, %v15777_v28  ;;  %v7192_v39 = vmax.f32 %v17148_v57, %v10278_v6  ;;  %v17242_v22 = vrot.slane %v7065_v16, 7  ;;  %v7256_v2 = vmax.f32 %v17157_v60, %v10342_v61 }
 0x7b4   : > { %v17246_v15 = vrot.slane %v7129_v24, 7  ;;  %v9596_v55 = vsel %vm9580_vm9, %v9572_v54, %v9588_v49  ;;  %v9597_v45 = vsel %vm9581_vm10, %v9573_v34, %v9589_v37  ;;  %v8932_v19 = vperm.slane %v8928_v5, %v15777_v28 }
 0x7b5   : > { %v9377_v3 = vld.sshfl [vmem:[#allocation1] sm:$0xff pattern:$0x73625140]  ;;  %v8173_v46 = vsel %vm7525_vm1, %v17227_v21, %v7192_v39  ;;  %v7064_v8 = vmax.f32 %v17164_v36, %v10150_v30  ;;  %v9604_v52 = vpack.c.bf16 %v9597_v45, %v9596_v55  ;;  %v17254_v29 = vrot.slane %v17150_v26, 7 }
 0x7b6   : > { %9385 = vst [vmem:[#allocation1] ss:$4 sm:$0xff] %v17225_v63  ;;  %9378 = vrot.lane.b32.xlu0 %v9377_v3, %s10865_s10  ;;  %v17256_v10 = vrot.slane %v7097_v20, 7  ;;  %v8397_v54 = vsel %vm7525_vm1, %v17230_v18, %v7256_v2  ;;  %v7128_v5 = vmax.f32 %v17170_v13, %v10214_v0  ;;  %v17265_v6 = vsel %vm7525_vm1, %v17120_v41, %v17039_v27 }
 0x7b7   : > { %9387 = vst [vmem:[#allocation1 + $0x1] ss:$4 sm:$0xff] %v8916_v33  ;;  %v17268_v16 = vrot.slane %v17132_v1, 7  ;;  %v18915_v26 = vrot.slane %v16969_v40, 9  ;;  %v7725_v51 = vsel %vm7525_vm1, %v17242_v22, %v7064_v8  ;;  %v18916_v61 = vrot.slane %v16969_v40, 4 }
 0x7b8   : > { %9389 = vst [vmem:[#allocation1 + $0x2] ss:$4 sm:$0xff] %v17238_v47  ;;  %v7096_v49 = vmax.f32 %v16980_v23, %v10182_v59  ;;  %v8174_v27 = vsel %vm7527_vm2, %v17227_v21, %v8173_v46  ;;  %v7949_v1 = vsel %vm7525_vm1, %v17246_v15, %v7128_v5  ;;  %v17290_v34 = vrot.slane %v17202_v44, 7 }
 0x7b9   : > { %v7032_v20 = vmax.f32 %v16969_v40, %v18915_v26  ;;  %9391 = vst [vmem:[#allocation1 + $0x3] ss:$4 sm:$0xff] %v8932_v19  ;;  %v17278_v24 = vmax.f32 %v18916_v61, %v17141_v43  ;;  %v5923_v30 = vrot.slane %v16980_v23, 4  ;;  %v5924_v40 = vrot.slane %v16980_v23, 6 }
 0x7ba   : > { %9608 = vst [vmem:[%s17286_s4] sm:$0xff] %v9604_v52  ;;  %v8398_v43 = vsel %vm7527_vm2, %v17230_v18, %v8397_v54  ;;  %v7837_v0 = vsel %vm7525_vm1, %v17256_v10, %v7096_v49  ;;  %v8909_v37 = vrot.slane %v17225_v63, 4  ;;  %v7726_v3 = vsel %vm7527_vm2, %v17242_v22, %v7725_v51 }
 0x7bb   : > { %v7613_v59 = vsel %vm7525_vm1, %v17254_v29, %v7032_v20  ;;  %v8917_v44 = vrot.slane %v8916_v33, 4  ;;  %v8175_v39 = vsel %vm7529_vm3, %v17227_v21, %v8174_v27  ;;  %v5900_v2 = vrot.slane %v17164_v36, 6 }
 0x7bc   : > { %v7950_v55 = vsel %vm7527_vm2, %v17246_v15, %v7949_v1  ;;  %v8925_v45 = vrot.slane %v17238_v47, 4  ;;  %v8933_v46 = vrot.slane %v8932_v19, 4  ;;  %v8399_v8 = vsel %vm7529_vm3, %v17230_v18, %v8398_v43 }
 0x7bd   : > { %v5948_v63 = vrot.slane %v17170_v13, 6  ;;  %v7614_v33 = vsel %vm7527_vm2, %v17254_v29, %v7613_v59  ;;  %v10185_v52 = vrot.slane %v5924_v40, 9  ;;  %v5996_v54 = vrot.slane %v17148_v57, 6 }
 0x7be   : > { %9277 = vrot.lane.b32.xlu0 %v16841_v42, %s10866_s20  ;;  %v7727_v5 = vsel %vm7529_vm3, %v17242_v22, %v7726_v3  ;;  %v8910_v47 = vsel %vm8551_vm5, 0.0, %v8909_v37  ;;  %v8176_v26 = vsel %vm7531_vm4, %v17227_v21, %v8175_v39  ;;  %v6044_v20 = vrot.slane %v17157_v60, 6 }
 0x7bf   : > { %v7951_v42 = vsel %vm7529_vm3, %v17246_v15, %v7950_v55  ;;  %v7838_v51 = vsel %vm7527_vm2, %v17256_v10, %v7837_v0  ;;  %v8918_v61 = vsel %vm8551_vm5, 0.0, %v8917_v44  ;;  %v8400_v49 = vsel %vm7531_vm4, %v17230_v18, %v8399_v8 }
 0x7c0   : > { %v17320_v19 = vld.sshfl [vmem:[#allocation1] sm:$0xff pattern:$0x73625140]  ;;  %v10153_v27 = vrot.slane %v5900_v2, 9  ;;  %v8926_v1 = vsel %vm8551_vm5, 0.0, %v8925_v45  ;;  %v8934_v43 = vsel %vm8551_vm5, 0.0, %v8933_v46  ;;  %v7728_v21 = vsel %vm7531_vm4, %v17242_v22, %v7727_v5 }
 0x7c1   : > { %9400 = vst [vmem:[#allocation1] ss:$4 sm:$0xff] %v8910_v47  ;;  %v10217_v59 = vrot.slane %v5948_v63, 9  ;;  %v10281_v37 = vrot.slane %v5996_v54, 9  ;;  %v8951_v3 = vrot.slane %v8176_v26, 4  ;;  %v5899_v0 = vrot.slane %v17164_v36, 4 }
 0x7c2   : > { %9402 = vst [vmem:[#allocation1 + $0x1] ss:$4 sm:$0xff] %v8918_v61  ;;  %v7952_v44 = vsel %vm7531_vm4, %v17246_v15, %v7951_v42  ;;  %v7615_v18 = vsel %vm7529_vm3, %v17254_v29, %v7614_v33  ;;  %v10345_v39 = vrot.slane %v6044_v20, 9  ;;  %v8959_v55 = vrot.slane %v8400_v49, 4 }
 0x7c3   : > { %9404 = vst [vmem:[#allocation1 + $0x2] ss:$4 sm:$0xff] %v8926_v1  ;;  %v5947_v45 = vrot.slane %v17170_v13, 4  ;;  %v10184_v22 = vrot.slane %v5923_v30, 9  ;;  %v5995_v46 = vrot.slane %v17148_v57, 4  ;;  %v7067_v8 = vmax.f32 %v5900_v2, %v10153_v27 }
 0x7c4   : > { %9406 = vst [vmem:[#allocation1 + $0x3] ss:$4 sm:$0xff] %v8934_v43  ;;  %v8935_v5 = vrot.slane %v7728_v21, 4  ;;  %v7839_v36 = vsel %vm7529_vm3, %v17256_v10, %v7838_v51  ;;  %v6043_v15 = vrot.slane %v17157_v60, 4  ;;  %v7131_v47 = vmax.f32 %v5948_v63, %v10217_v59 }
 0x7c5   : > { %v8943_v26 = vrot.slane %v7952_v44, 4  ;;  %v7616_v33 = vsel %vm7531_vm4, %v17254_v29, %v7615_v18  ;;  %v7195_v42 = vmax.f32 %v5996_v54, %v10281_v37  ;;  %v8952_v13 = vsel %vm8551_vm5, %v8951_v3, %v16904_v53  ;;  %v5485_v18 = vpop.f32.mrf.mxu0 }
 0x7c6   : > { %v10152_v61 = vrot.slane %v5899_v0, 9  ;;  %v7099_v49 = vmax.f32 %v5924_v40, %v10185_v52  ;;  %v7259_v1 = vmax.f32 %v6044_v20, %v10345_v39  ;;  %v8960_v57 = vsel %vm8551_vm5, %v8959_v55, %v17036_v62 }
 0x7c7   : > { %v10216_v2 = vrot.slane %v5947_v45, 9  ;;  %v7840_v51 = vsel %vm7531_vm4, %v17256_v10, %v7839_v36  ;;  %v10280_v60 = vrot.slane %v5995_v46, 9  ;;  %v7731_v63 = vrot.slane %v7067_v8, 7  ;;  %v5565_v8 = vpop.f32.mrf.mxu1 }
 0x7c8   : > { %v8936_v27 = vsel %vm8551_vm5, %v8935_v5, %v7616_v33  ;;  %v17358_v29 = vperm.slane %v8952_v13, %v15777_v28  ;;  %v10344_v54 = vrot.slane %v6043_v15, 9  ;;  %v7955_v43 = vrot.slane %v7131_v47, 7  ;;  %v5645_v47 = vpop.f32.mrf.mxu2  ;;  %v18918_v13 = vld [vmem:[#allocation79_spill] sm:$0xff] }
 0x7c9   : > { %v8944_v53 = vsel %vm8551_vm5, %v8943_v26, %v7840_v51  ;;  %v7620_v40 = vsel %vm7525_vm1, %v17290_v34, %v17278_v24  ;;  %v17366_v52 = vrot.slane %v7195_v42, 7  ;;  %v17369_v10 = vperm.slane %v8960_v57, %v15777_v28  ;;  %v5725_v42 = vpop.f32.mrf.mxu3  ;;  %v18921_v51 = vld [vmem:[#allocation6_spill] sm:$0xff] }
 0x7ca   : > { %v7066_v20 = vmax.f32 %v5899_v0, %v10152_v61  ;;  %v18917_v21 = vrot.slane %v16950_v35, 9  ;;  %v8403_v37 = vrot.slane %v7259_v1, 7  ;;  %v8940_v3 = vperm.slane %v8936_v27, %v15777_v28 }
 0x7cb   : > { %v17364_v62 = vld.sshfl [vmem:[#allocation1] sm:$0xff pattern:$0x73625140]  ;;  %v7130_v44 = vmax.f32 %v5947_v45, %v10216_v2  ;;  %v17379_v24 = vsel %vm7527_vm2, %v17120_v41, %v17265_v6  ;;  %v7194_v39 = vmax.f32 %v5995_v46, %v10280_v60  ;;  %v8948_v55 = vperm.slane %v8944_v53, %v15777_v28 }
 0x7cc   : > { %v7228_v59 = vmax.f32 %v16950_v35, %v18917_v21  ;;  %9419 = vst [vmem:[#allocation1 + $0x2] ss:$4 sm:$0xff] %v17358_v29  ;;  %v7732_v0 = vsel %vm7525_vm1, %v7731_v63, %v7066_v20  ;;  %v7621_v5 = vsel %vm7527_vm2, %v17290_v34, %v7620_v40  ;;  %v17386_v36 = vrot.slane %v7099_v49, 7  ;;  %v18919_v49 = vld [vmem:[#allocation80_spill] sm:$0xff] }
 0x7cd   : > { %9421 = vst [vmem:[#allocation1 + $0x3] ss:$4 sm:$0xff] %v17369_v10  ;;  %v7258_v45 = vmax.f32 %v6043_v15, %v10344_v54  ;;  %v7956_v26 = vsel %vm7525_vm1, %v7955_v43, %v7130_v44  ;;  %v7098_v46 = vmax.f32 %v5923_v30, %v10184_v22  ;;  %v8180_v33 = vsel %vm7525_vm1, %v17366_v52, %v7194_v39  ;;  %v18920_v15 = vld [vmem:[#allocation173_spill] sm:$0xff]  ;;  %v18923_v22 = vld [vmem:[#allocation83_spill] sm:$0xff] }
 0x7ce   : > { %9415 = vst [vmem:[#allocation1] ss:$4 sm:$0xff] %v8940_v3  ;;  %v8299_v6 = vsel %vm7525_vm1, %v17268_v16, %v7228_v59  ;;  %v17396_v61 = vmax.f32 %v18918_v13, %v5485_v18  ;;  %v17400_v1 = vmax.f32 %v18920_v15, %v18919_v49  ;;  %v7733_v2 = vsel %vm7527_vm2, %v7731_v63, %v7732_v0  ;;  %v18922_v30 = vld [vmem:[#allocation201_spill] sm:$0xff]  ;;  %v18925_v59 = vld [vmem:[#allocation283_spill] sm:$0xff] }
 0x7cf   : > { %9417 = vst [vmem:[#allocation1 + $0x1] ss:$4 sm:$0xff] %v8948_v55  ;;  %v8404_v57 = vsel %vm7525_vm1, %v8403_v37, %v7258_v45  ;;  %v17405_v60 = vmax.f32 %v18921_v51, %v5565_v8  ;;  %v7622_v23 = vsel %vm7529_vm3, %v17290_v34, %v7621_v5  ;;  %v17411_v27 = vmax.f32 %v18923_v22, %v18922_v30  ;;  %v18924_v54 = vld [vmem:[#allocation321_spill] sm:$0xff] }
 0x7d0   : > { %v17414_v53 = vmax.f32 %v18924_v54, %v5645_v47  ;;  %v7957_v40 = vsel %vm7527_vm2, %v7955_v43, %v7956_v26  ;;  %v7844_v20 = vsel %vm7525_vm1, %v17386_v36, %v7098_v46  ;;  %v8181_v21 = vsel %vm7527_vm2, %v17366_v52, %v8180_v33 }
 0x7d1   : > { %v17422_v44 = vmax.f32 %v18925_v59, %v5725_v42  ;;  %v8941_v18 = vrot.slane %v8940_v3, 4  ;;  %v8405_v39 = vsel %vm7527_vm2, %v8403_v37, %v8404_v57  ;;  %v7734_v0 = vsel %vm7529_vm3, %v7731_v63, %v7733_v2 }
 0x7d2   : > { %v8949_v8 = vrot.slane %v8948_v55, 4  ;;  %v5901_v5 = vrot.slane %v17396_v61, 2  ;;  %v5877_v45 = vrot.slane %v17400_v1, 2  ;;  %v8957_v47 = vrot.slane %v17358_v29, 4 }
 0x7d3   : > { %v7958_v26 = vsel %vm7529_vm3, %v7955_v43, %v7957_v40  ;;  %v5949_v46 = vrot.slane %v17405_v60, 2  ;;  %v7845_v33 = vsel %vm7527_vm2, %v17386_v36, %v7844_v20  ;;  %v8182_v3 = vsel %vm7529_vm3, %v17366_v52, %v8181_v21 }
 0x7d4   : > { %v8965_v42 = vrot.slane %v17369_v10, 4  ;;  %v5997_v55 = vrot.slane %v17414_v53, 2  ;;  %v8406_v13 = vsel %vm7529_vm3, %v8403_v37, %v8405_v39  ;;  %v6045_v49 = vrot.slane %v17422_v44, 2 }
 0x7d5   : > { %v7735_v29 = vsel %vm7531_vm4, %v7731_v63, %v7734_v0  ;;  %v8942_v15 = vsel %vm8551_vm5, 0.0, %v8941_v18  ;;  %v5925_v2 = vrot.slane %v17411_v27, 2  ;;  %v7959_v51 = vsel %vm7531_vm4, %v7955_v43, %v7958_v26 }
 0x7d6   : > { %v17441_v57 = vld.sshfl [vmem:[#allocation1] sm:$0xff pattern:$0x73625140]  ;;  %v8950_v30 = vsel %vm8551_vm5, 0.0, %v8949_v8  ;;  %v10155_v22 = vrot.slane %v5901_v5, 9  ;;  %v10123_v10 = vrot.slane %v5877_v45, 9  ;;  %v8183_v54 = vsel %vm7531_vm4, %v17366_v52, %v8182_v3 }
 0x7d7   : > { %9428 = vst [vmem:[#allocation1] ss:$4 sm:$0xff] %v8942_v15  ;;  %v8958_v40 = vsel %vm8551_vm5, 0.0, %v8957_v47  ;;  %v10219_v20 = vrot.slane %v5949_v46, 9  ;;  %v8407_v63 = vsel %vm7531_vm4, %v8403_v37, %v8406_v13  ;;  %v8966_v21 = vsel %vm8551_vm5, 0.0, %v8965_v42 }
 0x7d8   : > { %9430 = vst [vmem:[#allocation1 + $0x1] ss:$4 sm:$0xff] %v8950_v30  ;;  %v10283_v59 = vrot.slane %v5997_v55, 9  ;;  %v8967_v18 = vrot.slane %v7735_v29, 4  ;;  %v8077_v43 = vsel %vm7529_vm3, %v17120_v41, %v17379_v24  ;;  %v7846_v39 = vsel %vm7529_vm3, %v17386_v36, %v7845_v33 }
 0x7d9   : > { %9432 = vst [vmem:[#allocation1 + $0x2] ss:$4 sm:$0xff] %v8958_v40  ;;  %v10347_v0 = vrot.slane %v6045_v49, 9  ;;  %v8975_v52 = vrot.slane %v7959_v51, 4  ;;  %v8300_v8 = vsel %vm7527_vm2, %v17268_v16, %v8299_v6  ;;  %v10187_v47 = vrot.slane %v5925_v2, 9 }
 0x7da   : > { %9434 = vst [vmem:[#allocation1 + $0x3] ss:$4 sm:$0xff] %v8966_v21  ;;  %v8983_v37 = vrot.slane %v8183_v54, 4  ;;  %v7069_v26 = vmax.f32 %v5901_v5, %v10155_v22  ;;  %v7623_v3 = vsel %vm7531_vm4, %v17290_v34, %v7622_v23  ;;  %v7037_v42 = vmax.f32 %v5877_v45, %v10123_v10 }
 0x7db   : > { %v8991_v13 = vrot.slane %v8407_v63, 4  ;;  %v7133_v29 = vmax.f32 %v5949_v46, %v10219_v20  ;;  %v7847_v24 = vsel %vm7531_vm4, %v17386_v36, %v7846_v39  ;;  %v7197_v15 = vmax.f32 %v5997_v55, %v10283_v59 }
 0x7dc   : > { %v8968_v33 = vsel %vm8551_vm5, %v8967_v18, %v7623_v3  ;;  %v10154_v51 = vrot.slane %v17396_v61, 9  ;;  %v10122_v30 = vrot.slane %v17400_v1, 9  ;;  %v7261_v6 = vmax.f32 %v6045_v49, %v10347_v0 }
 0x7dd   : > { %v8976_v54 = vsel %vm8551_vm5, %v8975_v52, %v7847_v24  ;;  %v10218_v5 = vrot.slane %v17405_v60, 9  ;;  %v7101_v22 = vmax.f32 %v5925_v2, %v10187_v47  ;;  %v8984_v34 = vsel %vm8551_vm5, %v8983_v37, %v16921_v58 }
 0x7de   : > { %v10282_v23 = vrot.slane %v17414_v53, 9  ;;  %v7738_v45 = vrot.slane %v7069_v26, 7  ;;  %v8992_v36 = vsel %vm8551_vm5, %v8991_v13, %v17075_v25  ;;  %v10346_v46 = vrot.slane %v17422_v44, 9 }
 0x7df   : > { %v8972_v55 = vperm.slane %v8968_v33, %v15777_v28  ;;  %v7962_v10 = vrot.slane %v7133_v29, 7  ;;  %v17474_v49 = vrot.slane %v7037_v42, 7  ;;  %v17476_v40 = vrot.slane %v7197_v15, 7 }
 0x7e0   : > { %v8980_v2 = vperm.slane %v8976_v54, %v15777_v28  ;;  %v7068_v20 = vmax.f32 %v17396_v61, %v10154_v51  ;;  %v10186_v63 = vrot.slane %v17411_v27, 9  ;;  %v8988_v21 = vperm.slane %v8984_v34, %v15777_v28 }
 0x7e1   : > { %v9435_v58 = vld.sshfl [vmem:[#allocation1] sm:$0xff pattern:$0x73625140]  ;;  %v8410_v59 = vrot.slane %v7261_v6, 7  ;;  %v7132_v25 = vmax.f32 %v17405_v60, %v10218_v5  ;;  %v7036_v18 = vmax.f32 %v17400_v1, %v10122_v30  ;;  %v8996_v39 = vperm.slane %v8992_v36, %v15777_v28 }
 0x7e2   : > { %9436 = vrot.lane.b32.xlu1 %v9435_v58, %s10865_s10  ;;  %9443 = vst [vmem:[#allocation1] ss:$4 sm:$0xff] %v8972_v55  ;;  %v7196_v0 = vmax.f32 %v17414_v53, %v10282_v23  ;;  %v7739_v52 = vsel %vm7525_vm1, %v7738_v45, %v7068_v20  ;;  %v8301_v47 = vsel %vm7529_vm3, %v17268_v16, %v8300_v8  ;;  %v17490_v37 = vrot.slane %v7101_v22, 7 }
 0x7e3   : > { %9445 = vst [vmem:[#allocation1 + $0x1] ss:$4 sm:$0xff] %v8980_v2  ;;  %v7260_v26 = vmax.f32 %v17422_v44, %v10346_v46  ;;  %v7963_v3 = vsel %vm7525_vm1, %v7962_v10, %v7132_v25  ;;  %v18926_v42 = vrot.slane %v16942_v38, 6  ;;  %v18927_v29 = vrot.slane %v16950_v35, 6 }
 0x7e4   : > { %9447 = vst [vmem:[#allocation1 + $0x2] ss:$4 sm:$0xff] %v8988_v21  ;;  %v7627_v8 = vsel %vm7525_vm1, %v17474_v49, %v7036_v18  ;;  %v8187_v15 = vsel %vm7525_vm1, %v17476_v40, %v7196_v0  ;;  %v17510_v33 = vsel %vm7531_vm4, %v17120_v41, %v8077_v43  ;;  %v7100_v51 = vmax.f32 %v17411_v27, %v10186_v63 }
 0x7e5   : > { %v17497_v13 = vmax.f32 %v18926_v42, %v17031_v12  ;;  %v17502_v24 = vmax.f32 %v18927_v29, %v17124_v4  ;;  %9449 = vst [vmem:[#allocation1 + $0x3] ss:$4 sm:$0xff] %v8996_v39  ;;  %v8411_v12 = vsel %vm7525_vm1, %v8410_v59, %v7260_v26  ;;  %v7740_v30 = vsel %vm7527_vm2, %v7738_v45, %v7739_v52 }
 0x7e6   : > { %v17517_v4 = vsel %vm7531_vm4, %v17268_v16, %v8301_v47  ;;  %v5878_v6 = vrot.slane %v17400_v1, 4  ;;  %v5879_v54 = vrot.slane %v17400_v1, 6  ;;  %v7964_v5 = vsel %vm7527_vm2, %v7962_v10, %v7963_v3 }
 0x7e7   : > { %v7628_v41 = vsel %vm7527_vm2, %v17474_v49, %v7627_v8  ;;  %v7851_v43 = vsel %vm7525_vm1, %v17490_v37, %v7100_v51  ;;  %v8188_v22 = vsel %vm7527_vm2, %v17476_v40, %v8187_v15  ;;  %v8973_v34 = vrot.slane %v8972_v55, 4 }
 0x7e8   : > { %v8412_v23 = vsel %vm7527_vm2, %v8410_v59, %v8411_v12  ;;  %v8981_v16 = vrot.slane %v8980_v2, 4  ;;  %v5903_v36 = vrot.slane %v17396_v61, 6  ;;  %v7741_v46 = vsel %vm7529_vm3, %v7738_v45, %v7740_v30 }
 0x7e9   : > { %v8989_v20 = vrot.slane %v8988_v21, 4  ;;  %v5999_v58 = vrot.slane %v17414_v53, 6  ;;  %v5951_v63 = vrot.slane %v17405_v60, 6  ;;  %v7965_v25 = vsel %vm7529_vm3, %v7962_v10, %v7964_v5 }
 0x7ea   : > { %9335 = vrot.lane.b32.xlu1 %v17061_v14, %s10866_s20  ;;  %v7629_v55 = vsel %vm7529_vm3, %v17474_v49, %v7628_v41  ;;  %v5927_v18 = vrot.slane %v17411_v27, 6  ;;  %v8997_v2 = vrot.slane %v8996_v39, 4  ;;  %v8189_v0 = vsel %vm7529_vm3, %v17476_v40, %v8188_v22 }
 0x7eb   : > { %v6047_v21 = vrot.slane %v17422_v44, 6  ;;  %v8413_v52 = vsel %vm7529_vm3, %v8410_v59, %v8412_v23  ;;  %v8974_v47 = vsel %vm8551_vm5, 0.0, %v8973_v34  ;;  %v7742_v26 = vsel %vm7531_vm4, %v7738_v45, %v7741_v46 }
 0x7ec   : > { %v9450_v3 = vld.sshfl [vmem:[#allocation1] sm:$0xff pattern:$0x73625140]  ;;  %v7852_v14 = vsel %vm7527_vm2, %v17490_v37, %v7851_v43  ;;  %v8982_v42 = vsel %vm8551_vm5, 0.0, %v8981_v16  ;;  %v10157_v29 = vrot.slane %v5903_v36, 9  ;;  %v7966_v39 = vsel %vm7531_vm4, %v7962_v10, %v7965_v25 }
 0x7ed   : > { %9451 = vrot.lane.b32.xlu0 %v9450_v3, %s10866_s20  ;;  %9458 = vst [vmem:[#allocation1] ss:$4 sm:$0xff] %v8974_v47  ;;  %v8990_v8 = vsel %vm8551_vm5, 0.0, %v8989_v20  ;;  %v10285_v15 = vrot.slane %v5999_v58, 9  ;;  %v8190_v51 = vsel %vm7531_vm4, %v17476_v40, %v8189_v0  ;;  %v10221_v12 = vrot.slane %v5951_v63, 9 }
 0x7ee   : > { %9460 = vst [vmem:[#allocation1 + $0x1] ss:$4 sm:$0xff] %v8982_v42  ;;  %v8998_v45 = vsel %vm8551_vm5, 0.0, %v8997_v2  ;;  %v8414_v30 = vsel %vm7531_vm4, %v8410_v59, %v8413_v52  ;;  %v5902_v5 = vrot.slane %v17396_v61, 4  ;;  %v8999_v41 = vrot.slane %v7742_v26, 4 }
 0x7ef   : > { %9462 = vst [vmem:[#allocation1 + $0x2] ss:$4 sm:$0xff] %v8990_v8  ;;  %v7853_v10 = vsel %vm7529_vm3, %v17490_v37, %v7852_v14  ;;  %v10349_v43 = vrot.slane %v6047_v21, 9  ;;  %v5950_v22 = vrot.slane %v17405_v60, 4  ;;  %v9007_v34 = vrot.slane %v7966_v39, 4 }
 0x7f0   : > { %9464 = vst [vmem:[#allocation1 + $0x3] ss:$4 sm:$0xff] %v8998_v45  ;;  %v10125_v40 = vrot.slane %v5879_v54, 9  ;;  %v5998_v23 = vrot.slane %v17414_v53, 4  ;;  %v9015_v16 = vrot.slane %v8190_v51, 4  ;;  %v7071_v46 = vmax.f32 %v5903_v36, %v10157_v29 }
 0x7f1   : > { %v7630_v61 = vsel %vm7531_vm4, %v17474_v49, %v7629_v55  ;;  %v6046_v59 = vrot.slane %v17422_v44, 4  ;;  %v9023_v20 = vrot.slane %v8414_v30, 4  ;;  %v7135_v25 = vmax.f32 %v5951_v63, %v10221_v12 }
 0x7f2   : > { %v7854_v2 = vsel %vm7531_vm4, %v17490_v37, %v7853_v10  ;;  %v7199_v60 = vmax.f32 %v5999_v58, %v10285_v15  ;;  %v10156_v0 = vrot.slane %v5902_v5, 9  ;;  %v9000_v52 = vsel %vm8551_vm5, %v8999_v41, %v7630_v61 }
 0x7f3   : > { %v10189_v47 = vrot.slane %v5927_v18, 9  ;;  %v7263_v26 = vmax.f32 %v6047_v21, %v10349_v43  ;;  %v10220_v3 = vrot.slane %v5950_v22, 9  ;;  %v9008_v53 = vsel %vm8551_vm5, %v9007_v34, %v7854_v2 }
 0x7f4   : > { %v5926_v36 = vrot.slane %v17411_v27, 4  ;;  %v10284_v14 = vrot.slane %v5998_v23, 9  ;;  %v9016_v44 = vsel %vm8551_vm5, %v9015_v16, %v17510_v33  ;;  %v7745_v49 = vrot.slane %v7071_v46, 7 }
 0x7f5   : > { %9292 = vrot.lane.b32.xlu0 %v16882_v32, %s10867_s21  ;;  %v10348_v37 = vrot.slane %v6046_v59, 9  ;;  %v9024_v58 = vsel %vm8551_vm5, %v9023_v20, %v17517_v4  ;;  %v9004_v63 = vperm.slane %v9000_v52, %v15777_v28  ;;  %v7969_v55 = vrot.slane %v7135_v25, 7 }
 0x7f6   : > { %v7039_v21 = vmax.f32 %v5879_v54, %v10125_v40  ;;  %v8193_v42 = vrot.slane %v7199_v60, 7  ;;  %v7070_v27 = vmax.f32 %v5902_v5, %v10156_v0  ;;  %v9012_v29 = vperm.slane %v9008_v53, %v15777_v28 }
 0x7f7   : > { %v9465_v39 = vld.sshfl [vmem:[#allocation1] sm:$0xff pattern:$0x73625140]  ;;  %v7103_v33 = vmax.f32 %v5927_v18, %v10189_v47  ;;  %v9020_v8 = vperm.slane %v9016_v44, %v15777_v28  ;;  %v8417_v15 = vrot.slane %v7263_v26, 7  ;;  %v7134_v32 = vmax.f32 %v5950_v22, %v10220_v3 }
 0x7f8   : > { %9473 = vst [vmem:[#allocation1] ss:$4 sm:$0xff] %v9004_v63  ;;  %v10124_v4 = vrot.slane %v5878_v6, 9  ;;  %v7198_v51 = vmax.f32 %v5998_v23, %v10284_v14  ;;  %v9028_v12 = vperm.slane %v9024_v58, %v15777_v28  ;;  %v7746_v45 = vsel %vm7525_vm1, %v7745_v49, %v7070_v27 }
 0x7f9   : > { %9475 = vst [vmem:[#allocation1 + $0x1] ss:$4 sm:$0xff] %v9012_v29  ;;  %v18928_v54 = vrot.slane %v16950_v35, 4  ;;  %v10188_v5 = vrot.slane %v5926_v36, 9  ;;  %v7262_v41 = vmax.f32 %v6046_v59, %v10348_v37  ;;  %v7970_v18 = vsel %vm7525_vm1, %v7969_v55, %v7134_v32 }
 0x7fa   : > { %9477 = vst [vmem:[#allocation1 + $0x2] ss:$4 sm:$0xff] %v9020_v8  ;;  %v7633_v10 = vrot.slane %v7039_v21, 7  ;;  %v8194_v43 = vsel %vm7525_vm1, %v8193_v42, %v7198_v51  ;;  %v18929_v22 = vrot.slane %v16942_v38, 4  ;;  %v7857_v40 = vrot.slane %v7103_v33, 7 }
 0x7fb   : > { %v10316_v30 = vrot.slane %v18928_v54, 9  ;;  %9479 = vst [vmem:[#allocation1 + $0x3] ss:$4 sm:$0xff] %v9028_v12  ;;  %v8418_v23 = vsel %vm7525_vm1, %v8417_v15, %v7262_v41  ;;  %v7747_v16 = vsel %vm7527_vm2, %v7745_v49, %v7746_v45  ;;  %v8081_v46 = vrot.slane %v17497_v13, 7 }
 0x7fc   : > { %v7166_v34 = vmax.f32 %v18929_v22, %v17027_v7  ;;  %v8305_v61 = vrot.slane %v17502_v24, 7  ;;  %v7038_v59 = vmax.f32 %v5878_v6, %v10124_v4  ;;  %v7971_v20 = vsel %vm7527_vm2, %v7969_v55, %v7970_v18 }
 0x7fd   : > { %9466 = vrot.lane.b32.xlu0 %v9465_v39, %s10867_s21  ;;  %v18930_v25 = vmov %v18928_v54  ;;  %v7102_v7 = vmax.f32 %v5926_v36, %v10188_v5  ;;  %v8195_v2 = vsel %vm7527_vm2, %v8193_v42, %v8194_v43  ;;  %v9005_v60 = vrot.slane %v9004_v63, 4 }
 0x7fe   : > { %v7230_v38 = vmax.f32 %v18930_v25, %v10316_v30  ;;  %v7634_v0 = vsel %vm7525_vm1, %v7633_v10, %v7038_v59  ;;  %v8419_v13 = vsel %vm7527_vm2, %v8417_v15, %v8418_v23  ;;  %v7748_v24 = vsel %vm7529_vm3, %v7745_v49, %v7747_v16 }
 0x7ff   : > { %v9013_v52 = vrot.slane %v9012_v29, 4  ;;  %v7858_v1 = vsel %vm7525_vm1, %v7857_v40, %v7102_v7  ;;  %v9021_v6 = vrot.slane %v9020_v8, 4  ;;  %v7972_v47 = vsel %vm7529_vm3, %v7969_v55, %v7971_v20 }
 0x800   : > { %v8082_v26 = vsel %vm7525_vm1, %v8081_v46, %v7166_v34  ;;  %v8306_v35 = vsel %vm7525_vm1, %v8305_v61, %v7230_v38  ;;  %v8196_v3 = vsel %vm7529_vm3, %v8193_v42, %v8195_v2  ;;  %v9029_v53 = vrot.slane %v9028_v12, 4 }
 0x801   : > { %v7635_v36 = vsel %vm7527_vm2, %v7633_v10, %v7634_v0  ;;  %v8420_v14 = vsel %vm7529_vm3, %v8417_v15, %v8419_v13  ;;  %v7749_v44 = vsel %vm7531_vm4, %v7745_v49, %v7748_v24  ;;  %v9006_v37 = vsel %vm8551_vm5, 0.0, %v9005_v60  ;;  %v9220_v13 = vpop.permute.xlu0 %9219 }
 0x802   : > { %v17615_v58 = vld.sshfl [vmem:[#allocation1] sm:$0xff pattern:$0x73625140]  ;;  %v7859_v63 = vsel %vm7527_vm2, %v7857_v40, %v7858_v1  ;;  %v7973_v21 = vsel %vm7531_vm4, %v7969_v55, %v7972_v47  ;;  %v9014_v27 = vsel %vm8551_vm5, 0.0, %v9013_v52  ;;  %v8083_v29 = vsel %vm7527_vm2, %v8081_v46, %v8082_v26  ;;  %v9205_v52 = vpop.permute.xlu2 %9204 }
 0x803   : > { %9486 = vst [vmem:[#allocation1] ss:$4 sm:$0xff] %v9006_v37  ;;  %v8307_v39 = vsel %vm7527_vm2, %v8305_v61, %v8306_v35  ;;  %v8197_v33 = vsel %vm7531_vm4, %v8193_v42, %v8196_v3  ;;  %v9022_v8 = vsel %vm8551_vm5, 0.0, %v9021_v6  ;;  %v7636_v49 = vsel %vm7529_vm3, %v7633_v10, %v7635_v36  ;;  %v9263_v35 = vpop.permute.xlu1 %9262 }
 0x804   : > { %9488 = vst [vmem:[#allocation1 + $0x1] ss:$4 sm:$0xff] %v9014_v27  ;;  %v8421_v32 = vsel %vm7531_vm4, %v8417_v15, %v8420_v14  ;;  %v9030_v4 = vsel %vm8551_vm5, 0.0, %v9029_v53  ;;  %v9031_v51 = vrot.slane %v7749_v44, 4  ;;  %v7860_v55 = vsel %vm7529_vm3, %v7857_v40, %v7859_v63 }
 0x805   : > { %9490 = vst [vmem:[#allocation1 + $0x2] ss:$4 sm:$0xff] %v9022_v8  ;;  %v9039_v12 = vrot.slane %v7973_v21, 4  ;;  %v8084_v45 = vsel %vm7529_vm3, %v8081_v46, %v8083_v29  ;;  %v9047_v54 = vrot.slane %v8197_v33, 4  ;;  %v8308_v42 = vsel %vm7529_vm3, %v8305_v61, %v8307_v39 }
 0x806   : > { %9492 = vst [vmem:[#allocation1 + $0x3] ss:$4 sm:$0xff] %v9030_v4  ;;  %v7637_v30 = vsel %vm7531_vm4, %v7633_v10, %v7636_v49  ;;  %v9055_v5 = vrot.slane %v8421_v32, 4  ;;  %v7861_v41 = vsel %vm7531_vm4, %v7857_v40, %v7860_v55  ;;  %v8085_v18 = vsel %vm7531_vm4, %v8081_v46, %v8084_v45 }
 0x807   : > { %v9032_v15 = vsel %vm8551_vm5, %v9031_v51, %v7637_v30  ;;  %v9040_v43 = vsel %vm8551_vm5, %v9039_v12, %v7861_v41  ;;  %v8309_v22 = vsel %vm7531_vm4, %v8305_v61, %v8308_v42  ;;  %v9048_v34 = vsel %vm8551_vm5, %v9047_v54, %v8085_v18  ;;  %v10758_v12 = vld [vmem:[%s17737_s2] sm:$0xff] }
 0x808   : > { %v9056_v23 = vsel %vm8551_vm5, %v9055_v5, %v8309_v22  ;;  %v9036_v16 = vperm.slane %v9032_v15, %v15777_v28  ;;  %v9044_v59 = vperm.slane %v9040_v43, %v15777_v28  ;;  %v9052_v20 = vperm.slane %v9048_v34, %v15777_v28 }
 0x809   : > { %v9060_v40 = vperm.slane %v9056_v23, %v15777_v28  ;;  %v9558_v44 = vperm.slane %v17178_v56, 2  ;;  %v9536_v37 = vsel %vm9527_vm6, %v16535_v48, %v9205_v52  ;;  %v9561_v45 = vperm.slane %v10758_v12, 5 }
 0x80a   : > { %v9037_v46 = vrot.slane %v9036_v16, 4  ;;  %v9045_v61 = vrot.slane %v9044_v59, 4  ;;  %v9053_v25 = vrot.slane %v9052_v20, 4  ;;  %v9321_v6 = vpop.permute.xlu2 %9320  ;;  %v9537_v63 = vsel %vm9529_vm7, %v9536_v37, %v9220_v13 }
 0x80b   : > { %v9061_v38 = vrot.slane %v9060_v40, 4  ;;  %v9560_v30 = vperm.slane %v10758_v12, 4  ;;  %v9542_v5 = vsel %vm9527_vm6, %v16959_v9, %v9321_v6  ;;  %v9562_v34 = vperm.slane %v10758_v12, 6 }
 0x80c   : > { %v9038_v7 = vsel %vm8551_vm5, 0.0, %v9037_v46  ;;  %v9046_v60 = vsel %vm8551_vm5, 0.0, %v9045_v61  ;;  %v9054_v28 = vsel %vm8551_vm5, 0.0, %v9053_v25  ;;  %v9563_v46 = vperm.slane %v10758_v12, 7 }
 0x80d   : > { %v9493_v10 = vld.sshfl [vmem:[#allocation1] sm:$0xff pattern:$0x73625140]  ;;  %v9062_v0 = vsel %vm8551_vm5, 0.0, %v9061_v38 }
 0x80e   : > { %9494 = vrot.lane.b32.xlu2 %v9493_v10, %s10865_s10  ;;  %9501 = vst [vmem:[#allocation1] ss:$4 sm:$0xff] %v9036_v16  ;;  %s9626_s10 = scalar_lea.hbm %s17738_s3, %s10353_s15 }
 0x80f   : > { %9503 = vst [vmem:[#allocation1 + $0x1] ss:$4 sm:$0xff] %v9044_v59 }
 0x810   : > { %9505 = vst [vmem:[#allocation1 + $0x2] ss:$4 sm:$0xff] %v9052_v20 }
 0x811   : > { %9507 = vst [vmem:[#allocation1 + $0x3] ss:$4 sm:$0xff] %v9060_v40 }
 0x816   : > { %9393 = vrot.lane.b32.xlu2 %v17320_v19, %s10866_s20 }
 0x818   : > { %v9508_v2 = vld.sshfl [vmem:[#allocation1] sm:$0xff pattern:$0x73625140] }
 0x819   : > { %9509 = vrot.lane.b32.xlu1 %v9508_v2, %s10866_s20  ;;  %9516 = vst [vmem:[#allocation1] ss:$4 sm:$0xff] %v9038_v7  ;;  %s9628_s20 = sshll.u32 %s17286_s4, 4  ;;  %s9629_s20 = int_to_ptr.vmem [resolvable:$true] %s9628_s20 }
 0x81a   : > { %9518 = vst [vmem:[#allocation1 + $0x1] ss:$4 sm:$0xff] %v9046_v60 }
 0x81b   : > { %9520 = vst [vmem:[#allocation1 + $0x2] ss:$4 sm:$0xff] %v9054_v28 }
 0x81c   : > { %9522 = vst [vmem:[#allocation1 + $0x3] ss:$4 sm:$0xff] %v9062_v0 }
 0x81e   : > { %9234 = vrot.lane.b32.xlu2 %v16680_v17, %s10867_s21  ;;  %v9539_v17 = vsel %vm9527_vm6, %v16741_v50, %v9263_v35 }
 0x821   : > { %9350 = vrot.lane.b32.xlu1 %v17112_v11, %s10867_s21 }
 0x823   : > { %v9523_v19 = vld.sshfl [vmem:[#allocation1] sm:$0xff pattern:$0x73625140] }
 0x826   : > { %9408 = vrot.lane.b32.xlu2 %v17364_v62, %s10867_s21  ;;  %v9559_v62 = vperm.slane %v17178_v56, 3 }
 0x828   : > { %v9379_v24 = vpop.permute.xlu0 %9378 }
 0x829   : > { %9524 = vrot.lane.b32.xlu1 %v9523_v19, %s10867_s21  ;;  %v9545_v51 = vsel %vm9527_vm6, %v17192_v31, %v9379_v24  ;;  %s9630_s21 = sshll.u32 %s9626_s10, 4  ;;  %s9631_s21 = int_to_ptr.hbm [resolvable:$true] %s9630_s21 }
 0x82a   : > { %s10773_s27 = sshra.s32 %s9631_s21, 4  ;;  %s10774_s27 = int_to_ptr.hbm [resolvable:$true] %s10773_s27 }
 0x82b   : > { %s10775_s29 = scalar_lea.hbm %s10774_s27, 32  ;;  %p10780_p2 = scmp.lt.s32.totalorder %s10774_s27, %s17738_s3 }
 0x82c   : > { %p10776_p13 = scmp.ne.s32.totalorder %s10774_s27, %s10775_s29  ;;  %p10781_p4 = scmp.lt.s32.totalorder %s10779_s7, %s10775_s29 }
 0x82e   : > { %p10777_p0 = pnand %p10776_p13, %p10939_p3  ;;  %p10782_p5 = por %p10781_p4, %p10780_p2 }
 0x830   : > { %v9278_v1 = vpop.permute.xlu0 %9277  ;;  %p10778_p1 = pneg %p10777_p0 }
 0x831   : > { %v9540_v11 = vsel %vm9529_vm7, %v9539_v17, %v9278_v1 }
 0x832   : > { %p10783_p6 = pnand %p10782_p5, %p10778_p1 }
 0x854   : > { %v9437_v27 = vpop.permute.xlu1 %9436 }
 0x855   : > { %v9548_v31 = vsel %vm9527_vm6, %v17441_v57, %v9437_v27 }
 0x85c   : > { %v9336_v56 = vpop.permute.xlu1 %9335 }
 0x85d   : > { %v9543_v41 = vsel %vm9529_vm7, %v9542_v5, %v9336_v56 }
 0x85f   : > { %v9452_v47 = vpop.permute.xlu0 %9451 }
 0x860   : > { %v9549_v22 = vsel %vm9529_vm7, %v9548_v31, %v9452_v47 }
 0x867   : > { %v9293_v53 = vpop.permute.xlu0 %9292 }
 0x868   : > { %v9495_v26 = vpop.permute.xlu2 %9494  ;;  %v9541_v36 = vsel %vm9531_vm8, %v9540_v11, %v9293_v53 }
 0x869   : > { %v9575_v14 = vadd.f32 %v9559_v62, %v9541_v36  ;;  %v9551_v57 = vsel %vm9527_vm6, %v17615_v58, %v9495_v26 }
 0x86b   : > { %v9591_v50 = vmul.f32 0.01, %v9575_v14  ;;  %vm9583_vm11 = vcmp.gt.f32.partialorder %v9575_v14, 0.0 }
 0x86d   : > { %v9599_v8 = vsel %vm9583_vm11, %v9575_v14, %v9591_v50 }
 0x86f   : > { %v9467_v15 = vpop.permute.xlu0 %9466 }
 0x870   : > { %v9394_v3 = vpop.permute.xlu2 %9393  ;;  %v9550_v59 = vsel %vm9531_vm8, %v9549_v22, %v9467_v15 }
 0x871   : > { %v9546_v55 = vsel %vm9529_vm7, %v9545_v51, %v9394_v3  ;;  %v9578_v10 = vadd.f32 %v9562_v34, %v9550_v59 }
 0x873   : > { %v9594_v2 = vmul.f32 0.01, %v9578_v10  ;;  %vm9586_vm15 = vcmp.gt.f32.partialorder %v9578_v10, 0.0 }
 0x875   : > { %v9602_v58 = vsel %vm9586_vm15, %v9578_v10, %v9594_v2 }
 0x878   : > { %v9235_v21 = vpop.permute.xlu2 %9234 }
 0x879   : > { %v9538_v29 = vsel %vm9531_vm8, %v9537_v63, %v9235_v21 }
 0x87a   : > { %v9574_v39 = vadd.f32 %v9558_v44, %v9538_v29 }
 0x87c   : > { %vm9582_vm12 = vcmp.gt.f32.partialorder %v9574_v39, 0.0  ;;  %v9590_v33 = vmul.f32 0.01, %v9574_v39 }
 0x87e   : > { %v9598_v49 = vsel %vm9582_vm12, %v9574_v39, %v9590_v33 }
 0x87f   : > { %v9605_v32 = vpack.c.bf16 %v9599_v8, %v9598_v49 }
 0x880   : > { %v9409_v4 = vpop.permute.xlu2 %9408 }
 0x881   : > { %9609 = vst [vmem:[%s17286_s4 + $0x8] sm:$0xff] %v9605_v32  ;;  %v9547_v54 = vsel %vm9531_vm8, %v9546_v55, %v9409_v4 }
 0x882   : > { %v9577_v42 = vadd.f32 %v9561_v45, %v9547_v54 }
 0x884   : > { %v9593_v23 = vmul.f32 0.01, %v9577_v42  ;;  %vm9585_vm13 = vcmp.gt.f32.partialorder %v9577_v42, 0.0 }
 0x886   : > { %v9601_v20 = vsel %vm9585_vm13, %v9577_v42, %v9593_v23 }
 0x88b   : > { %v9510_v48 = vpop.permute.xlu1 %9509 }
 0x88c   : > { %v9552_v25 = vsel %vm9529_vm7, %v9551_v57, %v9510_v48 }
 0x893   : > { %v9351_v18 = vpop.permute.xlu1 %9350 }
 0x894   : > { %v9544_v43 = vsel %vm9531_vm8, %v9543_v41, %v9351_v18 }
 0x895   : > { %v9576_v16 = vadd.f32 %v9560_v30, %v9544_v43 }
 0x897   : > { %vm9584_vm14 = vcmp.gt.f32.partialorder %v9576_v16, 0.0  ;;  %v9592_v9 = vmul.f32 0.01, %v9576_v16 }
 0x899   : > { %v9600_v40 = vsel %vm9584_vm14, %v9576_v16, %v9592_v9 }
 0x89a   : > { %v9606_v61 = vpack.c.bf16 %v9601_v20, %v9600_v40 }
 0x89b   : > { %v9525_v38 = vpop.permute.xlu1 %9524 }
 0x89c   : > { %9610 = vst [vmem:[%s17286_s4 + $0x10] sm:$0xff] %v9606_v61  ;;  %v9553_v7 = vsel %vm9531_vm8, %v9552_v25, %v9525_v38 }
 0x89d   : > { %v9579_v60 = vadd.f32 %v9563_v46, %v9553_v7 }
 0x89f   : > { %vm9587_vm0 = vcmp.gt.f32.partialorder %v9579_v60, 0.0  ;;  %v9595_v28 = vmul.f32 0.01, %v9579_v60 }
 0x8a1   : > { %v9603_v0 = vsel %vm9587_vm0, %v9579_v60, %v9595_v28 }
 0x8a2   : > { %v9607_v19 = vpack.c.bf16 %v9603_v0, %v9602_v58 }
 0x8a4   : > { %9611 = vst [vmem:[%s17286_s4 + $0x18] sm:$0xff] %v9607_v19 }
 0x8a5   : > { %10786 = shalt.err (!%p10783_p6)
}
 0x8a6   : > { %10438 = dma.vmem_to_hbm [thread:$0]  (%p10939_p3), %s9629_s20, 512, %s9631_s21, %s9613_s24  }
 0x8a7 PF: > { %p10444_p7 = scmp.ge.s32.totalorder %s10853_s19, 2  ;;  %s9642_s28 = sand.u32 1, %s10825_s12  }
 0x8a8   : > { %s9643_s4 = scalar_lea.sflag [#allocation3], %s9642_s28 }
 0x8a9   : > { %p10441_p9 = pnand %p10444_p7, %p10948_p8 }
 0x8ab   : > { %p10442_p10 = pneg %p10441_p9 }
 0x8ad   : > { %10820 = dma.done.wait (%p10442_p10), %s9643_s4, 512  }
 0x8ae   : > { %10822 = vsyncadd (%p10442_p10), %s9643_s4, 4294966784  ;;  %s16_s19 = sadd.s32 1, %s10853_s19   ;;  %s18931_s12 = smov %s10829_s13 }
 0x8af   : > { %p13_p11 = scmp.ge.s32.totalorder %s16_s19, 10   ;;  %s18932_s13 = smov %s10833_s14 }
 0x8b0   : > { %s18933_s14 = smov %s10957_s30  ;;  %s18934_s15 = smov %s10845_s17 }
 0x8b1   : > { %s18935_s16 = smov %s10849_s18  ;;  %s18936_s17 = smov %s18939_s22 }
 0x8b2   : > { %s18937_s18 = smov %s18943_s23  ;;  %15 = sbr.rel (!%p13_p11) target bundleno = 5 (0x5), region = 164 }
 0x8b7   :  { %9649 = vsyncpa [#allocation3], 1 }
 0x8b8   :  { %9651 = vsyncpa [#allocation3 + $0x1], 1 }

</bundles_post_ra>
